<compile_context>
chip_gen: v7x
topology: tpu7x:2x2x1
jax: 0.10.0
libtpu: 0.0.40
codegen_flags: <defaults>
</compile_context>

<pallas_src>
import functools

import jax
import jax.numpy as jnp
from jax import lax
from jax.experimental import pallas as pl
from jax.experimental.pallas import tpu as pltpu


_VMEM_LIMIT = 48 * 1024 * 1024     # fits v7x (64 MiB VMEM) with headroom; fine on v5e/v6e
_ROW_TILE_TARGET = 256             # token-row tile target at real scale


def _compiler_params(dim_sem):
    return pltpu.CompilerParams(
        dimension_semantics=dim_sem,
        vmem_limit_bytes=_VMEM_LIMIT,
    )


def _tile_rows(m, target=_ROW_TILE_TARGET):
    """Largest row tile <= target that divides m and is a multiple of 8 (else whole m)."""
    if m <= target or m % 8 != 0:
        return m
    for t in range(target, 7, -8):
        if m % t == 0:
            return t
    return m


# --------------------------------------------------------------------------- #
# in-kernel math helpers (all f32)
# --------------------------------------------------------------------------- #
def _erf(x):
    # Abramowitz & Stegun 7.1.26, |err| < 1.5e-7 (mul/add/exp only -> VPU/EUP)
    a1, a2, a3, a4, a5 = 0.254829592, -0.284496736, 1.421413741, -1.453152027, 1.061405429
    p = 0.3275911
    ax = jnp.abs(x)
    t = 1.0 / (1.0 + p * ax)
    poly = ((((a5 * t + a4) * t + a3) * t + a2) * t + a1) * t
    y = 1.0 - poly * jnp.exp(-ax * ax)
    return jnp.where(x >= 0.0, y, -y)


def _gelu(x):
    # exact (erf-based) GELU, matching torch.nn.GELU() default
    return 0.5 * x * (1.0 + _erf(x * 0.7071067811865475))


def _ln(x, g, b, eps=1e-5):
    mean = jnp.mean(x, axis=-1, keepdims=True)
    var = jnp.mean(jnp.square(x - mean), axis=-1, keepdims=True)
    return (x - mean) * lax.rsqrt(var + eps) * g + b


# --------------------------------------------------------------------------- #
# fused row-wise kernels (token rows tiled, weights resident)
# --------------------------------------------------------------------------- #
def _linear_kernel(x_ref, w_ref, b_ref, o_ref):
    y = jnp.dot(x_ref[...].astype(jnp.bfloat16), w_ref[...],
                preferred_element_type=jnp.float32) + b_ref[...]
    o_ref[...] = y.astype(o_ref.dtype)


def _ln_linear_kernel(x_ref, g_ref, bln_ref, w_ref, b_ref, o_ref):
    # LayerNorm1 + QKV matmul fused
    x = x_ref[...].astype(jnp.float32)
    xn = _ln(x, g_ref[...], bln_ref[...])
    y = jnp.dot(xn.astype(jnp.bfloat16), w_ref[...],
                preferred_element_type=jnp.float32) + b_ref[...]
    o_ref[...] = y.astype(o_ref.dtype)


def _linear_res_kernel(x_ref, r_ref, w_ref, b_ref, o_ref):
    # attention output proj + bias + residual add fused
    y = jnp.dot(x_ref[...].astype(jnp.bfloat16), w_ref[...],
                preferred_element_type=jnp.float32) + b_ref[...]
    o_ref[...] = (y + r_ref[...].astype(jnp.float32)).astype(o_ref.dtype)


def _ln_mlp_res_kernel(x_ref, g_ref, bln_ref, w1_ref, b1_ref, w2_ref, b2_ref, o_ref):
    # LayerNorm2 + fc1 + GELU + fc2 + residual fused
    x = x_ref[...].astype(jnp.float32)
    xn = _ln(x, g_ref[...], bln_ref[...])
    h = jnp.dot(xn.astype(jnp.bfloat16), w1_ref[...],
                preferred_element_type=jnp.float32) + b1_ref[...]
    h = _gelu(h)
    y = jnp.dot(h.astype(jnp.bfloat16), w2_ref[...],
                preferred_element_type=jnp.float32) + b2_ref[...]
    o_ref[...] = (x + y).astype(o_ref.dtype)


def _rowwise_call(kernel, row_inputs, const_inputs, out_cols):
    """Grid over token-row tiles; weights/LN params are resident (constant block)."""
    m = row_inputs[0].shape[0]
    tm = _tile_rows(m)
    row_specs = [pl.BlockSpec((tm, r.shape[1]), lambda i: (i, 0)) for r in row_inputs]
    const_specs = [pl.BlockSpec(c.shape, lambda i: (0, 0)) for c in const_inputs]
    return pl.pallas_call(
        kernel,
        grid=(m // tm,),
        in_specs=row_specs + const_specs,
        out_specs=pl.BlockSpec((tm, out_cols), lambda i: (i, 0)),
        out_shape=jax.ShapeDtypeStruct((m, out_cols), jnp.float32),
        compiler_params=_compiler_params(("parallel",)),
    )(*row_inputs, *const_inputs)


def linear(x, w, b):
    return _rowwise_call(_linear_kernel, [x], [w, b.reshape(1, -1)], w.shape[1])


def ln_linear(x, g, bln, w, b):
    return _rowwise_call(_ln_linear_kernel, [x],
                         [g.reshape(1, -1), bln.reshape(1, -1), w, b.reshape(1, -1)],
                         w.shape[1])


def linear_residual(x, res, w, b):
    return _rowwise_call(_linear_res_kernel, [x, res], [w, b.reshape(1, -1)], w.shape[1])


def ln_mlp_residual(x, g, bln, w1, b1, w2, b2):
    return _rowwise_call(_ln_mlp_res_kernel, [x],
                         [g.reshape(1, -1), bln.reshape(1, -1),
                          w1, b1.reshape(1, -1), w2, b2.reshape(1, -1)],
                         w2.shape[1])


# --------------------------------------------------------------------------- #
# flash-style attention: grid (B, KV tiles), online softmax, in-kernel head split
# --------------------------------------------------------------------------- #
def _flash_attn_kernel(qkv_q_ref, qkv_kv_ref, o_ref, m_scr, l_scr, acc_scr,
                       *, num_heads, scale):
    kv_i = pl.program_id(1)
    d = o_ref.shape[-1]
    dh = d // num_heads

    @pl.when(kv_i == 0)
    def _init():
        m_scr[...] = jnp.full_like(m_scr, -jnp.inf)
        l_scr[...] = jnp.zeros_like(l_scr)
        acc_scr[...] = jnp.zeros_like(acc_scr)

    for h in range(num_heads):                      # static head loop; only one (Nq,tk)
        # head split via static ref slices of the QKV slab (layout: [q | k | v], head-major)
        q = qkv_q_ref[0, :, h * dh:(h + 1) * dh].astype(jnp.float32) * scale
        k = qkv_kv_ref[0, :, d + h * dh:d + (h + 1) * dh]
        v = qkv_kv_ref[0, :, 2 * d + h * dh:2 * d + (h + 1) * dh]
        s = lax.dot_general(q.astype(jnp.bfloat16), k.astype(jnp.bfloat16),
                            (((1,), (1,)), ((), ())),
                            preferred_element_type=jnp.float32)      # (Nq, tk)
        m_prev = m_scr[h]
        m_new = jnp.maximum(m_prev, jnp.max(s, axis=-1, keepdims=True))
        alpha = jnp.exp(m_prev - m_new)
        p = jnp.exp(s - m_new)
        l_scr[h] = alpha * l_scr[h] + jnp.sum(p, axis=-1, keepdims=True)
        acc_scr[h] = alpha * acc_scr[h] + jnp.dot(
            p.astype(jnp.bfloat16), v.astype(jnp.bfloat16),
            preferred_element_type=jnp.float32)
        m_scr[h] = m_new

    @pl.when(kv_i == pl.num_programs(1) - 1)
    def _finish():
        # single lane-dense (Nq, D) store covering all heads
        outs = [acc_scr[h] * pl.reciprocal(l_scr[h], approx=True)
                for h in range(num_heads)]
        o_ref[0] = jnp.concatenate(outs, axis=-1).astype(o_ref.dtype)


def flash_attention(qkv, num_heads):
    """qkv: (B, N, 3D) -> (B, N, D) attention output (heads concatenated, lane-dense)."""
    b, n, d3 = qkv.shape
    d = d3 // 3
    dh = d // num_heads
    scale = dh ** -0.5
    tk = _tile_rows(n, target=512)
    kernel = functools.partial(_flash_attn_kernel, num_heads=num_heads, scale=scale)
    return pl.pallas_call(
        kernel,
        grid=(b, n // tk),
        in_specs=[
            pl.BlockSpec((1, n, d3), lambda bi, ki: (bi, 0, 0)),   # q rows (resident per b)
            pl.BlockSpec((1, tk, d3), lambda bi, ki: (bi, ki, 0)), # streamed KV tile
        ],
        out_specs=pl.BlockSpec((1, n, d), lambda bi, ki: (bi, 0, 0)),
        out_shape=jax.ShapeDtypeStruct((b, n, d), jnp.float32),
        scratch_shapes=[
            pltpu.VMEM((num_heads, n, 1), jnp.float32),   # running max  m
            pltpu.VMEM((num_heads, n, 1), jnp.float32),   # running sum  l
            pltpu.VMEM((num_heads, n, dh), jnp.float32),  # accumulator
        ],
        compiler_params=_compiler_params(("parallel", "arbitrary")),
    )(qkv, qkv)


# --------------------------------------------------------------------------- #
# fused tail: final norm + token mean-pool + head LayerNorm + head linear
# --------------------------------------------------------------------------- #
def _tail_kernel(x_ref, ng_ref, nb_ref, hg_ref, hb_ref, hw_ref, hbias_ref, o_ref):
    x = x_ref[0].astype(jnp.float32)                      # (N, D)
    xn = _ln(x, ng_ref[...], nb_ref[...])
    pooled = jnp.mean(xn, axis=0, keepdims=True)          # (1, D)
    hn = _ln(pooled, hg_ref[...], hb_ref[...])
    y = jnp.dot(hn.astype(jnp.bfloat16), hw_ref[...],
                preferred_element_type=jnp.float32) + hbias_ref[...]
    o_ref[0] = y.astype(o_ref.dtype)


def norm_pool_head(x, ng, nb, hg, hb, hw, hbias):
    b, n, d = x.shape
    l = hw.shape[1]
    consts = [ng.reshape(1, d), nb.reshape(1, d), hg.reshape(1, d), hb.reshape(1, d),
              hw, hbias.reshape(1, l)]
    out = pl.pallas_call(
        _tail_kernel,
        grid=(b,),
        in_specs=[pl.BlockSpec((1, n, d), lambda bi: (bi, 0, 0))]
                + [pl.BlockSpec(c.shape, lambda bi: (0, 0)) for c in consts],
        out_specs=pl.BlockSpec((1, 1, l), lambda bi: (bi, 0, 0)),
        out_shape=jax.ShapeDtypeStruct((b, 1, l), jnp.float32),
        compiler_params=_compiler_params(("parallel",)),
    )(x, *consts)
    return out.reshape(b, l)


# --------------------------------------------------------------------------- #
# model glue (reshapes / residual plumbing in plain JAX, compute in kernels)
# --------------------------------------------------------------------------- #
def block_forward(bp, x, num_heads, modality=None):
    B, N, D = x.shape
    if modality is None:
        n1g, n1b, n2g, n2b = bp["norm1_g"], bp["norm1_b"], bp["norm2_g"], bp["norm2_b"]
    elif modality == "a":
        n1g, n1b, n2g, n2b = bp["norm1_a_g"], bp["norm1_a_b"], bp["norm2_a_g"], bp["norm2_a_b"]
    else:  # 'v'
        n1g, n1b, n2g, n2b = bp["norm1_v_g"], bp["norm1_v_b"], bp["norm2_v_g"], bp["norm2_v_b"]

    xf = x.reshape(B * N, D)
    qkv = ln_linear(xf, n1g, n1b, bp["qkv_w"], bp["qkv_b"])            # LN1 + QKV fused
    attn = flash_attention(qkv.reshape(B, N, 3 * D), num_heads)        # (B, N, D)
    x1 = linear_residual(attn.reshape(B * N, D), xf,
                         bp["proj_w"], bp["proj_b"])                   # proj + residual
    x2 = ln_mlp_residual(x1, n2g, n2b,
                         bp["fc1_w"], bp["fc1_b"], bp["fc2_w"], bp["fc2_b"])
    return x2.reshape(B, N, D)                                         # DropPath = identity


def patch_embed_audio(params, a, patch):
    # torch: a.unsqueeze(1).transpose(2,3) -> (B,1,F,T); Conv2d(1,D,k=p,s=p) == patchify+matmul
    B, T, F = a.shape
    img = jnp.transpose(a, (0, 2, 1))                        # (B, F, T)
    Fp, Tp = F // patch, T // patch
    x = img.reshape(B, Fp, patch, Tp, patch)
    x = jnp.transpose(x, (0, 1, 3, 2, 4)).reshape(B, Fp * Tp, patch * patch)
    tok = linear(x.reshape(B * Fp * Tp, patch * patch), params["patch_a_w"], params["patch_a_b"])
    return tok.reshape(B, Fp * Tp, -1)


def patch_embed_video(params, v, patch, t_stride):
    # torch: Conv3d(C, D, kernel=(p,p,ts), stride=(p,p,ts)) on (B, C, H, W, T)
    B, C, H, W, T = v.shape
    Hp, Wp, Tp = H // patch, W // patch, T // t_stride
    x = v.reshape(B, C, Hp, patch, Wp, patch, Tp, t_stride)
    x = jnp.transpose(x, (0, 2, 4, 6, 1, 3, 5, 7))           # (B,Hp,Wp,Tp,C,p,p,ts)
    x = x.reshape(B, Hp * Wp * Tp, C * patch * patch * t_stride)
    tok = linear(x.reshape(B * Hp * Wp * Tp, -1), params["patch_v_w"], params["patch_v_b"])
    return tok.reshape(B, Hp * Wp * Tp, -1)


def social_mae_forward(params, a, v, mode, *, patch, t_stride, num_heads):
    head_args = (params["head_ln_g"], params["head_ln_b"], params["head_w"], params["head_b"])
    if mode == "multimodal":
        ta = patch_embed_audio(params, a, patch)
        ta = ta + params["pos_embed_a"] + params["modality_a"]
        tv = patch_embed_video(params, v, patch, t_stride)
        tv = tv + params["pos_embed_v"] + params["modality_v"]
        for bp in params["blocks_a"]:
            ta = block_forward(bp, ta, num_heads)
        for bp in params["blocks_v"]:
            tv = block_forward(bp, tv, num_heads)
        x = jnp.concatenate([ta, tv], axis=1)
        for bp in params["blocks_u"]:
            x = block_forward(bp, x, num_heads)
        return norm_pool_head(x, params["norm_g"], params["norm_b"], *head_args)
    elif mode == "audioonly":
        ta = patch_embed_audio(params, a, patch)
        ta = ta + params["pos_embed_a"] + params["modality_a"]
        for bp in params["blocks_a"]:
            ta = block_forward(bp, ta, num_heads)
        for bp in params["blocks_u"]:
            ta = block_forward(bp, ta, num_heads, modality="a")
        return norm_pool_head(ta, params["norm_a_g"], params["norm_a_b"], *head_args)
    elif mode == "videoonly":
        tv = patch_embed_video(params, v, patch, t_stride)
        tv = tv + params["pos_embed_v"] + params["modality_v"]
        for bp in params["blocks_v"]:
            tv = block_forward(bp, tv, num_heads)
        for bp in params["blocks_u"]:
            tv = block_forward(bp, tv, num_heads, modality="v")
        return norm_pool_head(tv, params["norm_v_g"], params["norm_v_b"], *head_args)
    else:
        raise ValueError(mode)


# --------------------------------------------------------------------------- #
# deterministic parameter init (synthetic weights; shapes follow the module)
# matmul weights stored bf16 (MXU inputs); LN params / biases stay f32.
# --------------------------------------------------------------------------- #
def _init_block(key, dim, hidden):
    ks = jax.random.split(key, 4)
    p = {}
    for name in ["norm1", "norm1_a", "norm1_v", "norm2", "norm2_a", "norm2_v"]:
        p[name + "_g"] = jnp.ones((dim,), jnp.float32)
        p[name + "_b"] = jnp.zeros((dim,), jnp.float32)
    p["qkv_w"] = (jax.random.normal(ks[0], (dim, 3 * dim), jnp.float32) * 0.02).astype(jnp.bfloat16)
    p["qkv_b"] = jnp.zeros((3 * dim,), jnp.float32)
    p["proj_w"] = (jax.random.normal(ks[1], (dim, dim), jnp.float32) * 0.02).astype(jnp.bfloat16)
    p["proj_b"] = jnp.zeros((dim,), jnp.float32)
    p["fc1_w"] = (jax.random.normal(ks[2], (dim, hidden), jnp.float32) * 0.02).astype(jnp.bfloat16)
    p["fc1_b"] = jnp.zeros((hidden,), jnp.float32)
    p["fc2_w"] = (jax.random.normal(ks[3], (hidden, dim), jnp.float32) * 0.02).astype(jnp.bfloat16)
    p["fc2_b"] = jnp.zeros((dim,), jnp.float32)
    return p


def init_params(key, *, embed_dim, num_heads, mlp_ratio, label_dim, patch, in_chans,
                t_stride, n_patch_a, n_patch_v, msd, total_depth):
    hidden = int(embed_dim * mlp_ratio)
    ks = iter(jax.random.split(key, 64))

    def rnd(shape, scale=0.02):
        return jax.random.normal(next(ks), shape, jnp.float32) * scale

    p = {}
    # patch-embed conv weights stored pre-flattened: (C_in * kh * kw [* kt], embed_dim)
    p["patch_a_w"] = rnd((1 * patch * patch, embed_dim)).astype(jnp.bfloat16)
    p["patch_a_b"] = jnp.zeros((embed_dim,), jnp.float32)
    p["patch_v_w"] = rnd((in_chans * patch * patch * t_stride, embed_dim)).astype(jnp.bfloat16)
    p["patch_v_b"] = jnp.zeros((embed_dim,), jnp.float32)
    # TODO(synk): real model uses 2D sin-cos positional embeddings; deterministic random
    #             values here since this is init-time only, not forward semantics.
    p["pos_embed_a"] = rnd((1, n_patch_a, embed_dim))
    p["pos_embed_v"] = rnd((1, n_patch_v, embed_dim))
    p["modality_a"] = rnd((1, 1, embed_dim))
    p["modality_v"] = rnd((1, 1, embed_dim))
    p["blocks_a"] = [_init_block(next(ks), embed_dim, hidden) for _ in range(msd)]
    p["blocks_v"] = [_init_block(next(ks), embed_dim, hidden) for _ in range(msd)]
    p["blocks_u"] = [_init_block(next(ks), embed_dim, hidden) for _ in range(total_depth - msd)]
    for name in ["norm_a", "norm_v", "norm", "head_ln"]:
        p[name + "_g"] = jnp.ones((embed_dim,), jnp.float32)
        p[name + "_b"] = jnp.zeros((embed_dim,), jnp.float32)
    p["head_w"] = rnd((embed_dim, label_dim)).astype(jnp.bfloat16)
    p["head_b"] = jnp.zeros((label_dim,), jnp.float32)
    return p


# --------------------------------------------------------------------------- #
if __name__ == "__main__":
    # small config consistent with the module's structure
    B = 2
    T_AUDIO, F_MEL = 8, 8          # audio spectrogram (time, mel)
    IMG, PATCH = 8, 4              # video spatial size / patch size
    FRAMES, TSTRIDE = 4, 2         # video frames / temporal stride
    IN_CHANS = 3
    EMBED, HEADS, MLP_RATIO = 32, 4, 4.0
    LABEL = 5
    MSD, TOTAL_DEPTH = 2, 3        # 2 modality-specific + 1 unified block

    n_patch_a = (F_MEL // PATCH) * (T_AUDIO // PATCH)                       # 4
    n_patch_v = (IMG // PATCH) * (IMG // PATCH) * (FRAMES // TSTRIDE)       # 8

    key = jax.random.PRNGKey(0)
    ka, kv, kp = jax.random.split(key, 3)
    a = jax.random.normal(ka, (B, T_AUDIO, F_MEL), jnp.float32)
    v = jax.random.normal(kv, (B, IN_CHANS, IMG, IMG, FRAMES), jnp.float32)

    params = init_params(
        kp, embed_dim=EMBED, num_heads=HEADS, mlp_ratio=MLP_RATIO, label_dim=LABEL,
        patch=PATCH, in_chans=IN_CHANS, t_stride=TSTRIDE,
        n_patch_a=n_patch_a, n_patch_v=n_patch_v, msd=MSD, total_depth=TOTAL_DEPTH,
    )

    fwd = jax.jit(
        functools.partial(social_mae_forward, patch=PATCH, t_stride=TSTRIDE, num_heads=HEADS),
        static_argnames=("mode",),
    )

    out_mm = jax.block_until_ready(fwd(params, a, v, mode="multimodal"))
    assert out_mm.shape == (B, LABEL)
    out_a = jax.block_until_ready(fwd(params, a, v, mode="audioonly"))
    assert out_a.shape == (B, LABEL)
    print("KERNEL_OK")
</pallas_src>

<mosaic_0001>
module attributes {stable_mosaic.version = 11 : i64} {
  func.func @_linear_kernel(%arg0: i32, %arg1: memref<16x96xf32, #tpu.memory_space<vmem>>, %arg2: memref<96x32xbf16, #tpu.memory_space<vmem>>, %arg3: memref<1x32xf32, #tpu.memory_space<vmem>>, %arg4: memref<16x32xf32, #tpu.memory_space<vmem>>) attributes {dimension_semantics = [#tpu.dimension_semantics<parallel>], iteration_bounds = array<i64: 1>, scalar_prefetch = 0 : i64, scratch_operands = 0 : i64, tpu.core_type = #tpu.core_type<tc>, window_params = [{transform_indices = @transform_0, window_bounds = array<i64: 16, 96>}, {pipeline_mode = #tpu.pipeline_mode<synchronous>, transform_indices = @transform_1, window_bounds = array<i64: 96, 32>}, {pipeline_mode = #tpu.pipeline_mode<synchronous>, transform_indices = @transform_2, window_bounds = array<i64: 1, 32>}, {transform_indices = @transform_3, window_bounds = array<i64: 16, 32>}]} {
    %c0 = arith.constant 0 : index
    %c0_0 = arith.constant 0 : index
    %0 = vector.load %arg1[%c0, %c0_0] : memref<16x96xf32, #tpu.memory_space<vmem>>, vector<16x96xf32>
    %1 = arith.truncf %0 : vector<16x96xf32> to vector<16x96xbf16>
    %c0_1 = arith.constant 0 : index
    %c0_2 = arith.constant 0 : index
    %2 = vector.load %arg2[%c0_1, %c0_2] : memref<96x32xbf16, #tpu.memory_space<vmem>>, vector<96x32xbf16>
    %cst = arith.constant dense<0.000000e+00> : vector<16x32xf32>
    %3 = tpu.matmul %1, %2, %cst {dimension_numbers = #tpu.dot_dimension_numbers<[1], [0], [0], [1], [0, 0, 1, 1], [], []>} : vector<16x96xbf16>, vector<96x32xbf16>, vector<16x32xf32> -> vector<16x32xf32>
    %c0_3 = arith.constant 0 : index
    %c0_4 = arith.constant 0 : index
    %4 = vector.load %arg3[%c0_3, %c0_4] : memref<1x32xf32, #tpu.memory_space<vmem>>, vector<1x32xf32>
    %5 = vector.broadcast %4 : vector<1x32xf32> to vector<16x32xf32>
    %6 = arith.addf %3, %5 : vector<16x32xf32>
    %c0_5 = arith.constant 0 : index
    %c0_6 = arith.constant 0 : index
    %7 = vector.load %arg4[%c0_5, %c0_6] : memref<16x32xf32, #tpu.memory_space<vmem>>, vector<16x32xf32>
    tpu.vector_store %arg4[%c0_5, %c0_6], %6 {strides = array<i32>} : memref<16x32xf32, #tpu.memory_space<vmem>>, vector<16x32xf32>,
    return
  }
  func.func @transform_0(%arg0: i32) -> (i32, i32) {
    %c0_i32 = arith.constant 0 : i32
    %c0_i32_0 = arith.constant 0 : i32
    return %arg0, %c0_i32 : i32, i32
  }
  func.func @transform_1(%arg0: i32) -> (i32, i32) {
    %c0_i32 = arith.constant 0 : i32
    %c0_i32_0 = arith.constant 0 : i32
    %c0_i32_1 = arith.constant 0 : i32
    return %c0_i32, %c0_i32_0 : i32, i32
  }
  func.func @transform_2(%arg0: i32) -> (i32, i32) {
    %c0_i32 = arith.constant 0 : i32
    %c0_i32_0 = arith.constant 0 : i32
    %c0_i32_1 = arith.constant 0 : i32
    return %c0_i32, %c0_i32_0 : i32, i32
  }
  func.func @transform_3(%arg0: i32) -> (i32, i32) {
    %c0_i32 = arith.constant 0 : i32
    %c0_i32_0 = arith.constant 0 : i32
    return %arg0, %c0_i32 : i32, i32
  }
}

module attributes {stable_mosaic.version = 11 : i64} {
  func.func @_ln_linear_kernel(%arg0: i32, %arg1: memref<16x32xf32, #tpu.memory_space<vmem>>, %arg2: memref<1x32xf32, #tpu.memory_space<vmem>>, %arg3: memref<1x32xf32, #tpu.memory_space<vmem>>, %arg4: memref<32x96xbf16, #tpu.memory_space<vmem>>, %arg5: memref<1x96xf32, #tpu.memory_space<vmem>>, %arg6: memref<16x96xf32, #tpu.memory_space<vmem>>) attributes {dimension_semantics = [#tpu.dimension_semantics<parallel>], iteration_bounds = array<i64: 1>, scalar_prefetch = 0 : i64, scratch_operands = 0 : i64, tpu.core_type = #tpu.core_type<tc>, window_params = [{transform_indices = @transform_0, window_bounds = array<i64: 16, 32>}, {pipeline_mode = #tpu.pipeline_mode<synchronous>, transform_indices = @transform_1, window_bounds = array<i64: 1, 32>}, {pipeline_mode = #tpu.pipeline_mode<synchronous>, transform_indices = @transform_2, window_bounds = array<i64: 1, 32>}, {pipeline_mode = #tpu.pipeline_mode<synchronous>, transform_indices = @transform_3, window_bounds = array<i64: 32, 96>}, {pipeline_mode = #tpu.pipeline_mode<synchronous>, transform_indices = @transform_4, window_bounds = array<i64: 1, 96>}, {transform_indices = @transform_5, window_bounds = array<i64: 16, 96>}]} {
    %c0 = arith.constant 0 : index
    %c0_0 = arith.constant 0 : index
    %0 = vector.load %arg1[%c0, %c0_0] : memref<16x32xf32, #tpu.memory_space<vmem>>, vector<16x32xf32>
    %c0_1 = arith.constant 0 : index
    %c0_2 = arith.constant 0 : index
    %1 = vector.load %arg2[%c0_1, %c0_2] : memref<1x32xf32, #tpu.memory_space<vmem>>, vector<1x32xf32>
    %c0_3 = arith.constant 0 : index
    %c0_4 = arith.constant 0 : index
    %2 = vector.load %arg3[%c0_3, %c0_4] : memref<1x32xf32, #tpu.memory_space<vmem>>, vector<1x32xf32>
    %cst = arith.constant dense<0.000000e+00> : vector<16xf32>
    %3 = vector.multi_reduction <add>, %0, %cst [1] : vector<16x32xf32> to vector<16xf32>
    %4 = vector.shape_cast %3 : vector<16xf32> to vector<16x1xf32>
    %cst_5 = arith.constant 3.200000e+01 : f32
    %5 = vector.broadcast %cst_5 : f32 to vector<16x1xf32>
    %6 = arith.divf %4, %5 : vector<16x1xf32>
    %7 = vector.broadcast %6 : vector<16x1xf32> to vector<16x32xf32>
    %8 = arith.subf %0, %7 : vector<16x32xf32>
    %9 = arith.mulf %8, %8 : vector<16x32xf32>
    %cst_6 = arith.constant dense<0.000000e+00> : vector<16xf32>
    %10 = vector.multi_reduction <add>, %9, %cst_6 [1] : vector<16x32xf32> to vector<16xf32>
    %11 = vector.shape_cast %10 : vector<16xf32> to vector<16x1xf32>
    %cst_7 = arith.constant 3.200000e+01 : f32
    %12 = vector.broadcast %cst_7 : f32 to vector<16x1xf32>
    %13 = arith.divf %11, %12 : vector<16x1xf32>
    %14 = vector.broadcast %6 : vector<16x1xf32> to vector<16x32xf32>
    %15 = arith.subf %0, %14 : vector<16x32xf32>
    %cst_8 = arith.constant 9.99999974E-6 : f32
    %16 = vector.broadcast %cst_8 : f32 to vector<16x1xf32>
    %17 = arith.addf %13, %16 : vector<16x1xf32>
    %18 = math.rsqrt %17 : vector<16x1xf32>
    %19 = vector.broadcast %18 : vector<16x1xf32> to vector<16x32xf32>
    %20 = arith.mulf %15, %19 : vector<16x32xf32>
    %21 = vector.broadcast %1 : vector<1x32xf32> to vector<16x32xf32>
    %22 = arith.mulf %20, %21 : vector<16x32xf32>
    %23 = vector.broadcast %2 : vector<1x32xf32> to vector<16x32xf32>
    %24 = arith.addf %22, %23 : vector<16x32xf32>
    %25 = arith.truncf %24 : vector<16x32xf32> to vector<16x32xbf16>
    %c0_9 = arith.constant 0 : index
    %c0_10 = arith.constant 0 : index
    %26 = vector.load %arg4[%c0_9, %c0_10] : memref<32x96xbf16, #tpu.memory_space<vmem>>, vector<32x96xbf16>
    %cst_11 = arith.constant dense<0.000000e+00> : vector<16x96xf32>
    %27 = tpu.matmul %25, %26, %cst_11 {dimension_numbers = #tpu.dot_dimension_numbers<[1], [0], [0], [1], [0, 0, 1, 1], [], []>} : vector<16x32xbf16>, vector<32x96xbf16>, vector<16x96xf32> -> vector<16x96xf32>
    %c0_12 = arith.constant 0 : index
    %c0_13 = arith.constant 0 : index
    %28 = vector.load %arg5[%c0_12, %c0_13] : memref<1x96xf32, #tpu.memory_space<vmem>>, vector<1x96xf32>
    %29 = vector.broadcast %28 : vector<1x96xf32> to vector<16x96xf32>
    %30 = arith.addf %27, %29 : vector<16x96xf32>
    %c0_14 = arith.constant 0 : index
    %c0_15 = arith.constant 0 : index
    %31 = vector.load %arg6[%c0_14, %c0_15] : memref<16x96xf32, #tpu.memory_space<vmem>>, vector<16x96xf32>
    tpu.vector_store %arg6[%c0_14, %c0_15], %30 {strides = array<i32>} : memref<16x96xf32, #tpu.memory_space<vmem>>, vector<16x96xf32>,
    return
  }
  func.func @transform_0(%arg0: i32) -> (i32, i32) {
    %c0_i32 = arith.constant 0 : i32
    %c0_i32_0 = arith.constant 0 : i32
    return %arg0, %c0_i32 : i32, i32
  }
  func.func @transform_1(%arg0: i32) -> (i32, i32) {
    %c0_i32 = arith.constant 0 : i32
    %c0_i32_0 = arith.constant 0 : i32
    %c0_i32_1 = arith.constant 0 : i32
    return %c0_i32, %c0_i32_0 : i32, i32
  }
  func.func @transform_2(%arg0: i32) -> (i32, i32) {
    %c0_i32 = arith.constant 0 : i32
    %c0_i32_0 = arith.constant 0 : i32
    %c0_i32_1 = arith.constant 0 : i32
    return %c0_i32, %c0_i32_0 : i32, i32
  }
  func.func @transform_3(%arg0: i32) -> (i32, i32) {
    %c0_i32 = arith.constant 0 : i32
    %c0_i32_0 = arith.constant 0 : i32
    %c0_i32_1 = arith.constant 0 : i32
    return %c0_i32, %c0_i32_0 : i32, i32
  }
  func.func @transform_4(%arg0: i32) -> (i32, i32) {
    %c0_i32 = arith.constant 0 : i32
    %c0_i32_0 = arith.constant 0 : i32
    %c0_i32_1 = arith.constant 0 : i32
    return %c0_i32, %c0_i32_0 : i32, i32
  }
  func.func @transform_5(%arg0: i32) -> (i32, i32) {
    %c0_i32 = arith.constant 0 : i32
    %c0_i32_0 = arith.constant 0 : i32
    return %arg0, %c0_i32 : i32, i32
  }
}

module attributes {stable_mosaic.version = 11 : i64} {
  func.func @_linear_res_kernel(%arg0: i32, %arg1: memref<16x32xf32, #tpu.memory_space<vmem>>, %arg2: memref<16x32xf32, #tpu.memory_space<vmem>>, %arg3: memref<32x32xbf16, #tpu.memory_space<vmem>>, %arg4: memref<1x32xf32, #tpu.memory_space<vmem>>, %arg5: memref<16x32xf32, #tpu.memory_space<vmem>>) attributes {dimension_semantics = [#tpu.dimension_semantics<parallel>], iteration_bounds = array<i64: 1>, scalar_prefetch = 0 : i64, scratch_operands = 0 : i64, tpu.core_type = #tpu.core_type<tc>, window_params = [{transform_indices = @transform_0, window_bounds = array<i64: 16, 32>}, {transform_indices = @transform_1, window_bounds = array<i64: 16, 32>}, {pipeline_mode = #tpu.pipeline_mode<synchronous>, transform_indices = @transform_2, window_bounds = array<i64: 32, 32>}, {pipeline_mode = #tpu.pipeline_mode<synchronous>, transform_indices = @transform_3, window_bounds = array<i64: 1, 32>}, {transform_indices = @transform_4, window_bounds = array<i64: 16, 32>}]} {
    %c0 = arith.constant 0 : index
    %c0_0 = arith.constant 0 : index
    %0 = vector.load %arg1[%c0, %c0_0] : memref<16x32xf32, #tpu.memory_space<vmem>>, vector<16x32xf32>
    %1 = arith.truncf %0 : vector<16x32xf32> to vector<16x32xbf16>
    %c0_1 = arith.constant 0 : index
    %c0_2 = arith.constant 0 : index
    %2 = vector.load %arg3[%c0_1, %c0_2] : memref<32x32xbf16, #tpu.memory_space<vmem>>, vector<32x32xbf16>
    %cst = arith.constant dense<0.000000e+00> : vector<16x32xf32>
    %3 = tpu.matmul %1, %2, %cst {dimension_numbers = #tpu.dot_dimension_numbers<[1], [0], [0], [1], [0, 0, 1, 1], [], []>} : vector<16x32xbf16>, vector<32x32xbf16>, vector<16x32xf32> -> vector<16x32xf32>
    %c0_3 = arith.constant 0 : index
    %c0_4 = arith.constant 0 : index
    %4 = vector.load %arg4[%c0_3, %c0_4] : memref<1x32xf32, #tpu.memory_space<vmem>>, vector<1x32xf32>
    %5 = vector.broadcast %4 : vector<1x32xf32> to vector<16x32xf32>
    %6 = arith.addf %3, %5 : vector<16x32xf32>
    %c0_5 = arith.constant 0 : index
    %c0_6 = arith.constant 0 : index
    %7 = vector.load %arg2[%c0_5, %c0_6] : memref<16x32xf32, #tpu.memory_space<vmem>>, vector<16x32xf32>
    %8 = arith.addf %6, %7 : vector<16x32xf32>
    %c0_7 = arith.constant 0 : index
    %c0_8 = arith.constant 0 : index
    %9 = vector.load %arg5[%c0_7, %c0_8] : memref<16x32xf32, #tpu.memory_space<vmem>>, vector<16x32xf32>
    tpu.vector_store %arg5[%c0_7, %c0_8], %8 {strides = array<i32>} : memref<16x32xf32, #tpu.memory_space<vmem>>, vector<16x32xf32>,
    return
  }
  func.func @transform_0(%arg0: i32) -> (i32, i32) {
    %c0_i32 = arith.constant 0 : i32
    %c0_i32_0 = arith.constant 0 : i32
    return %arg0, %c0_i32 : i32, i32
  }
  func.func @transform_1(%arg0: i32) -> (i32, i32) {
    %c0_i32 = arith.constant 0 : i32
    %c0_i32_0 = arith.constant 0 : i32
    return %arg0, %c0_i32 : i32, i32
  }
  func.func @transform_2(%arg0: i32) -> (i32, i32) {
    %c0_i32 = arith.constant 0 : i32
    %c0_i32_0 = arith.constant 0 : i32
    %c0_i32_1 = arith.constant 0 : i32
    return %c0_i32, %c0_i32_0 : i32, i32
  }
  func.func @transform_3(%arg0: i32) -> (i32, i32) {
    %c0_i32 = arith.constant 0 : i32
    %c0_i32_0 = arith.constant 0 : i32
    %c0_i32_1 = arith.constant 0 : i32
    return %c0_i32, %c0_i32_0 : i32, i32
  }
  func.func @transform_4(%arg0: i32) -> (i32, i32) {
    %c0_i32 = arith.constant 0 : i32
    %c0_i32_0 = arith.constant 0 : i32
    return %arg0, %c0_i32 : i32, i32
  }
}

module attributes {stable_mosaic.version = 11 : i64} {
  func.func @_flash_attn_kernel(%arg0: i32, %arg1: i32, %arg2: memref<1x8x96xf32, #tpu.memory_space<vmem>>, %arg3: memref<1x8x96xf32, #tpu.memory_space<vmem>>, %arg4: memref<1x8x32xf32, #tpu.memory_space<vmem>>, %arg5: memref<4x8x1xf32, #tpu.memory_space<vmem>>, %arg6: memref<4x8x1xf32, #tpu.memory_space<vmem>>, %arg7: memref<4x8x8xf32, #tpu.memory_space<vmem>>) attributes {dimension_semantics = [#tpu.dimension_semantics<parallel>, #tpu.dimension_semantics<arbitrary>], iteration_bounds = array<i64: 2, 1>, scalar_prefetch = 0 : i64, scratch_operands = 3 : i64, tpu.core_type = #tpu.core_type<tc>, window_params = [{transform_indices = @transform_0, window_bounds = array<i64: 1, 8, 96>}, {transform_indices = @transform_1, window_bounds = array<i64: 1, 8, 96>}, {transform_indices = @transform_2, window_bounds = array<i64: 1, 8, 32>}]} {
    %c0_i32 = arith.constant 0 : i32
    %0 = arith.cmpi eq, %arg1, %c0_i32 : i32
    %1 = arith.extui %0 : i1 to i32
    %c0_i32_0 = arith.constant 0 : i32
    %2 = arith.cmpi ne, %1, %c0_i32_0 : i32
    scf.if %2 {
      %cst_115 = arith.constant 0xFF800000 : f32
      %182 = vector.broadcast %cst_115 : f32 to vector<4x8x1xf32>
      %c0_116 = arith.constant 0 : index
      %c0_117 = arith.constant 0 : index
      %c0_118 = arith.constant 0 : index
      %183 = vector.load %arg5[%c0_116, %c0_117, %c0_118] : memref<4x8x1xf32, #tpu.memory_space<vmem>>, vector<4x8x1xf32>
      tpu.vector_store %arg5[%c0_116, %c0_117, %c0_118], %182 {strides = array<i32>} : memref<4x8x1xf32, #tpu.memory_space<vmem>>, vector<4x8x1xf32>,
      %cst_119 = arith.constant 0.000000e+00 : f32
      %184 = vector.broadcast %cst_119 : f32 to vector<4x8x1xf32>
      %c0_120 = arith.constant 0 : index
      %c0_121 = arith.constant 0 : index
      %c0_122 = arith.constant 0 : index
      %185 = vector.load %arg6[%c0_120, %c0_121, %c0_122] : memref<4x8x1xf32, #tpu.memory_space<vmem>>, vector<4x8x1xf32>
      tpu.vector_store %arg6[%c0_120, %c0_121, %c0_122], %184 {strides = array<i32>} : memref<4x8x1xf32, #tpu.memory_space<vmem>>, vector<4x8x1xf32>,
      %cst_123 = arith.constant 0.000000e+00 : f32
      %186 = vector.broadcast %cst_123 : f32 to vector<4x8x8xf32>
      %c0_124 = arith.constant 0 : index
      %c0_125 = arith.constant 0 : index
      %c0_126 = arith.constant 0 : index
      %187 = vector.load %arg7[%c0_124, %c0_125, %c0_126] : memref<4x8x8xf32, #tpu.memory_space<vmem>>, vector<4x8x8xf32>
      tpu.vector_store %arg7[%c0_124, %c0_125, %c0_126], %186 {strides = array<i32>} : memref<4x8x8xf32, #tpu.memory_space<vmem>>, vector<4x8x8xf32>,
    } else {
    }
    %c0 = arith.constant 0 : index
    %c0_1 = arith.constant 0 : index
    %c0_2 = arith.constant 0 : index
    %3 = vector.load %arg2[%c0, %c0_1, %c0_2] : memref<1x8x96xf32, #tpu.memory_space<vmem>>, vector<1x8x8xf32>
    %4 = vector.shape_cast %3 : vector<1x8x8xf32> to vector<8x8xf32>
    %cst = arith.constant 0.353553385 : f32
    %5 = vector.broadcast %cst : f32 to vector<8x8xf32>
    %6 = arith.mulf %4, %5 : vector<8x8xf32>
    %c0_3 = arith.constant 0 : index
    %c0_4 = arith.constant 0 : index
    %c32 = arith.constant 32 : index
    %7 = vector.load %arg3[%c0_3, %c0_4, %c32] : memref<1x8x96xf32, #tpu.memory_space<vmem>>, vector<1x8x8xf32>
    %8 = vector.shape_cast %7 : vector<1x8x8xf32> to vector<8x8xf32>
    %c0_5 = arith.constant 0 : index
    %c0_6 = arith.constant 0 : index
    %c64 = arith.constant 64 : index
    %9 = vector.load %arg3[%c0_5, %c0_6, %c64] : memref<1x8x96xf32, #tpu.memory_space<vmem>>, vector<1x8x8xf32>
    %10 = vector.shape_cast %9 : vector<1x8x8xf32> to vector<8x8xf32>
    %11 = arith.truncf %6 : vector<8x8xf32> to vector<8x8xbf16>
    %12 = arith.truncf %8 : vector<8x8xf32> to vector<8x8xbf16>
    %cst_7 = arith.constant dense<0.000000e+00> : vector<8x8xf32>
    %13 = tpu.matmul %11, %12, %cst_7 {dimension_numbers = #tpu.dot_dimension_numbers<[1], [1], [0], [0], [0, 0, 1, 0], [], []>} : vector<8x8xbf16>, vector<8x8xbf16>, vector<8x8xf32> -> vector<8x8xf32>
    %c0_8 = arith.constant 0 : index
    %c0_9 = arith.constant 0 : index
    %c0_10 = arith.constant 0 : index
    %14 = vector.load %arg5[%c0_8, %c0_9, %c0_10] : memref<4x8x1xf32, #tpu.memory_space<vmem>>, vector<1x8x1xf32>
    %15 = vector.shape_cast %14 : vector<1x8x1xf32> to vector<8x1xf32>
    %cst_11 = arith.constant dense<0xFF800000> : vector<8xf32>
    %16 = vector.multi_reduction <maximumf>, %13, %cst_11 [1] : vector<8x8xf32> to vector<8xf32>
    %17 = vector.shape_cast %16 : vector<8xf32> to vector<8x1xf32>
    %18 = arith.maximumf %15, %17 : vector<8x1xf32>
    %19 = arith.subf %15, %18 : vector<8x1xf32>
    %20 = math.exp %19 : vector<8x1xf32>
    %21 = vector.broadcast %18 : vector<8x1xf32> to vector<8x8xf32>
    %22 = arith.subf %13, %21 : vector<8x8xf32>
    %23 = math.exp %22 : vector<8x8xf32>
    %c0_12 = arith.constant 0 : index
    %c0_13 = arith.constant 0 : index
    %c0_14 = arith.constant 0 : index
    %24 = vector.load %arg6[%c0_12, %c0_13, %c0_14] : memref<4x8x1xf32, #tpu.memory_space<vmem>>, vector<1x8x1xf32>
    %25 = vector.shape_cast %24 : vector<1x8x1xf32> to vector<8x1xf32>
    %26 = arith.mulf %20, %25 : vector<8x1xf32>
    %cst_15 = arith.constant dense<0.000000e+00> : vector<8xf32>
    %27 = vector.multi_reduction <add>, %23, %cst_15 [1] : vector<8x8xf32> to vector<8xf32>
    %28 = vector.shape_cast %27 : vector<8xf32> to vector<8x1xf32>
    %29 = arith.addf %26, %28 : vector<8x1xf32>
    %c0_16 = arith.constant 0 : index
    %c0_17 = arith.constant 0 : index
    %c0_18 = arith.constant 0 : index
    %30 = vector.load %arg6[%c0_16, %c0_17, %c0_18] : memref<4x8x1xf32, #tpu.memory_space<vmem>>, vector<1x8x1xf32>
    %31 = vector.shape_cast %30 : vector<1x8x1xf32> to vector<8x1xf32>
    %32 = vector.shape_cast %29 : vector<8x1xf32> to vector<1x8x1xf32>
    tpu.vector_store %arg6[%c0_16, %c0_17, %c0_18], %32 {strides = array<i32>} : memref<4x8x1xf32, #tpu.memory_space<vmem>>, vector<1x8x1xf32>,
    %c0_19 = arith.constant 0 : index
    %c0_20 = arith.constant 0 : index
    %c0_21 = arith.constant 0 : index
    %33 = vector.load %arg7[%c0_19, %c0_20, %c0_21] : memref<4x8x8xf32, #tpu.memory_space<vmem>>, vector<1x8x8xf32>
    %34 = vector.shape_cast %33 : vector<1x8x8xf32> to vector<8x8xf32>
    %35 = vector.broadcast %20 : vector<8x1xf32> to vector<8x8xf32>
    %36 = arith.mulf %35, %34 : vector<8x8xf32>
    %37 = arith.truncf %23 : vector<8x8xf32> to vector<8x8xbf16>
    %38 = arith.truncf %10 : vector<8x8xf32> to vector<8x8xbf16>
    %cst_22 = arith.constant dense<0.000000e+00> : vector<8x8xf32>
    %39 = tpu.matmul %37, %38, %cst_22 {dimension_numbers = #tpu.dot_dimension_numbers<[1], [0], [0], [1], [0, 0, 1, 1], [], []>} : vector<8x8xbf16>, vector<8x8xbf16>, vector<8x8xf32> -> vector<8x8xf32>
    %40 = arith.addf %36, %39 : vector<8x8xf32>
    %c0_23 = arith.constant 0 : index
    %c0_24 = arith.constant 0 : index
    %c0_25 = arith.constant 0 : index
    %41 = vector.load %arg7[%c0_23, %c0_24, %c0_25] : memref<4x8x8xf32, #tpu.memory_space<vmem>>, vector<1x8x8xf32>
    %42 = vector.shape_cast %41 : vector<1x8x8xf32> to vector<8x8xf32>
    %43 = vector.shape_cast %40 : vector<8x8xf32> to vector<1x8x8xf32>
    tpu.vector_store %arg7[%c0_23, %c0_24, %c0_25], %43 {strides = array<i32>} : memref<4x8x8xf32, #tpu.memory_space<vmem>>, vector<1x8x8xf32>,
    %c0_26 = arith.constant 0 : index
    %c0_27 = arith.constant 0 : index
    %c0_28 = arith.constant 0 : index
    %44 = vector.load %arg5[%c0_26, %c0_27, %c0_28] : memref<4x8x1xf32, #tpu.memory_space<vmem>>, vector<1x8x1xf32>
    %45 = vector.shape_cast %44 : vector<1x8x1xf32> to vector<8x1xf32>
    %46 = vector.shape_cast %18 : vector<8x1xf32> to vector<1x8x1xf32>
    tpu.vector_store %arg5[%c0_26, %c0_27, %c0_28], %46 {strides = array<i32>} : memref<4x8x1xf32, #tpu.memory_space<vmem>>, vector<1x8x1xf32>,
    %c0_29 = arith.constant 0 : index
    %c0_30 = arith.constant 0 : index
    %c8 = arith.constant 8 : index
    %47 = vector.load %arg2[%c0_29, %c0_30, %c8] : memref<1x8x96xf32, #tpu.memory_space<vmem>>, vector<1x8x8xf32>
    %48 = vector.shape_cast %47 : vector<1x8x8xf32> to vector<8x8xf32>
    %cst_31 = arith.constant 0.353553385 : f32
    %49 = vector.broadcast %cst_31 : f32 to vector<8x8xf32>
    %50 = arith.mulf %48, %49 : vector<8x8xf32>
    %c0_32 = arith.constant 0 : index
    %c0_33 = arith.constant 0 : index
    %c40 = arith.constant 40 : index
    %51 = vector.load %arg3[%c0_32, %c0_33, %c40] : memref<1x8x96xf32, #tpu.memory_space<vmem>>, vector<1x8x8xf32>
    %52 = vector.shape_cast %51 : vector<1x8x8xf32> to vector<8x8xf32>
    %c0_34 = arith.constant 0 : index
    %c0_35 = arith.constant 0 : index
    %c72 = arith.constant 72 : index
    %53 = vector.load %arg3[%c0_34, %c0_35, %c72] : memref<1x8x96xf32, #tpu.memory_space<vmem>>, vector<1x8x8xf32>
    %54 = vector.shape_cast %53 : vector<1x8x8xf32> to vector<8x8xf32>
    %55 = arith.truncf %50 : vector<8x8xf32> to vector<8x8xbf16>
    %56 = arith.truncf %52 : vector<8x8xf32> to vector<8x8xbf16>
    %cst_36 = arith.constant dense<0.000000e+00> : vector<8x8xf32>
    %57 = tpu.matmul %55, %56, %cst_36 {dimension_numbers = #tpu.dot_dimension_numbers<[1], [1], [0], [0], [0, 0, 1, 0], [], []>} : vector<8x8xbf16>, vector<8x8xbf16>, vector<8x8xf32> -> vector<8x8xf32>
    %c1 = arith.constant 1 : index
    %c0_37 = arith.constant 0 : index
    %c0_38 = arith.constant 0 : index
    %58 = vector.load %arg5[%c1, %c0_37, %c0_38] : memref<4x8x1xf32, #tpu.memory_space<vmem>>, vector<1x8x1xf32>
    %59 = vector.shape_cast %58 : vector<1x8x1xf32> to vector<8x1xf32>
    %cst_39 = arith.constant dense<0xFF800000> : vector<8xf32>
    %60 = vector.multi_reduction <maximumf>, %57, %cst_39 [1] : vector<8x8xf32> to vector<8xf32>
    %61 = vector.shape_cast %60 : vector<8xf32> to vector<8x1xf32>
    %62 = arith.maximumf %59, %61 : vector<8x1xf32>
    %63 = arith.subf %59, %62 : vector<8x1xf32>
    %64 = math.exp %63 : vector<8x1xf32>
    %65 = vector.broadcast %62 : vector<8x1xf32> to vector<8x8xf32>
    %66 = arith.subf %57, %65 : vector<8x8xf32>
    %67 = math.exp %66 : vector<8x8xf32>
    %c1_40 = arith.constant 1 : index
    %c0_41 = arith.constant 0 : index
    %c0_42 = arith.constant 0 : index
    %68 = vector.load %arg6[%c1_40, %c0_41, %c0_42] : memref<4x8x1xf32, #tpu.memory_space<vmem>>, vector<1x8x1xf32>
    %69 = vector.shape_cast %68 : vector<1x8x1xf32> to vector<8x1xf32>
    %70 = arith.mulf %64, %69 : vector<8x1xf32>
    %cst_43 = arith.constant dense<0.000000e+00> : vector<8xf32>
    %71 = vector.multi_reduction <add>, %67, %cst_43 [1] : vector<8x8xf32> to vector<8xf32>
    %72 = vector.shape_cast %71 : vector<8xf32> to vector<8x1xf32>
    %73 = arith.addf %70, %72 : vector<8x1xf32>
    %c1_44 = arith.constant 1 : index
    %c0_45 = arith.constant 0 : index
    %c0_46 = arith.constant 0 : index
    %74 = vector.load %arg6[%c1_44, %c0_45, %c0_46] : memref<4x8x1xf32, #tpu.memory_space<vmem>>, vector<1x8x1xf32>
    %75 = vector.shape_cast %74 : vector<1x8x1xf32> to vector<8x1xf32>
    %76 = vector.shape_cast %73 : vector<8x1xf32> to vector<1x8x1xf32>
    tpu.vector_store %arg6[%c1_44, %c0_45, %c0_46], %76 {strides = array<i32>} : memref<4x8x1xf32, #tpu.memory_space<vmem>>, vector<1x8x1xf32>,
    %c1_47 = arith.constant 1 : index
    %c0_48 = arith.constant 0 : index
    %c0_49 = arith.constant 0 : index
    %77 = vector.load %arg7[%c1_47, %c0_48, %c0_49] : memref<4x8x8xf32, #tpu.memory_space<vmem>>, vector<1x8x8xf32>
    %78 = vector.shape_cast %77 : vector<1x8x8xf32> to vector<8x8xf32>
    %79 = vector.broadcast %64 : vector<8x1xf32> to vector<8x8xf32>
    %80 = arith.mulf %79, %78 : vector<8x8xf32>
    %81 = arith.truncf %67 : vector<8x8xf32> to vector<8x8xbf16>
    %82 = arith.truncf %54 : vector<8x8xf32> to vector<8x8xbf16>
    %cst_50 = arith.constant dense<0.000000e+00> : vector<8x8xf32>
    %83 = tpu.matmul %81, %82, %cst_50 {dimension_numbers = #tpu.dot_dimension_numbers<[1], [0], [0], [1], [0, 0, 1, 1], [], []>} : vector<8x8xbf16>, vector<8x8xbf16>, vector<8x8xf32> -> vector<8x8xf32>
    %84 = arith.addf %80, %83 : vector<8x8xf32>
    %c1_51 = arith.constant 1 : index
    %c0_52 = arith.constant 0 : index
    %c0_53 = arith.constant 0 : index
    %85 = vector.load %arg7[%c1_51, %c0_52, %c0_53] : memref<4x8x8xf32, #tpu.memory_space<vmem>>, vector<1x8x8xf32>
    %86 = vector.shape_cast %85 : vector<1x8x8xf32> to vector<8x8xf32>
    %87 = vector.shape_cast %84 : vector<8x8xf32> to vector<1x8x8xf32>
    tpu.vector_store %arg7[%c1_51, %c0_52, %c0_53], %87 {strides = array<i32>} : memref<4x8x8xf32, #tpu.memory_space<vmem>>, vector<1x8x8xf32>,
    %c1_54 = arith.constant 1 : index
    %c0_55 = arith.constant 0 : index
    %c0_56 = arith.constant 0 : index
    %88 = vector.load %arg5[%c1_54, %c0_55, %c0_56] : memref<4x8x1xf32, #tpu.memory_space<vmem>>, vector<1x8x1xf32>
    %89 = vector.shape_cast %88 : vector<1x8x1xf32> to vector<8x1xf32>
    %90 = vector.shape_cast %62 : vector<8x1xf32> to vector<1x8x1xf32>
    tpu.vector_store %arg5[%c1_54, %c0_55, %c0_56], %90 {strides = array<i32>} : memref<4x8x1xf32, #tpu.memory_space<vmem>>, vector<1x8x1xf32>,
    %c0_57 = arith.constant 0 : index
    %c0_58 = arith.constant 0 : index
    %c16 = arith.constant 16 : index
    %91 = vector.load %arg2[%c0_57, %c0_58, %c16] : memref<1x8x96xf32, #tpu.memory_space<vmem>>, vector<1x8x8xf32>
    %92 = vector.shape_cast %91 : vector<1x8x8xf32> to vector<8x8xf32>
    %cst_59 = arith.constant 0.353553385 : f32
    %93 = vector.broadcast %cst_59 : f32 to vector<8x8xf32>
    %94 = arith.mulf %92, %93 : vector<8x8xf32>
    %c0_60 = arith.constant 0 : index
    %c0_61 = arith.constant 0 : index
    %c48 = arith.constant 48 : index
    %95 = vector.load %arg3[%c0_60, %c0_61, %c48] : memref<1x8x96xf32, #tpu.memory_space<vmem>>, vector<1x8x8xf32>
    %96 = vector.shape_cast %95 : vector<1x8x8xf32> to vector<8x8xf32>
    %c0_62 = arith.constant 0 : index
    %c0_63 = arith.constant 0 : index
    %c80 = arith.constant 80 : index
    %97 = vector.load %arg3[%c0_62, %c0_63, %c80] : memref<1x8x96xf32, #tpu.memory_space<vmem>>, vector<1x8x8xf32>
    %98 = vector.shape_cast %97 : vector<1x8x8xf32> to vector<8x8xf32>
    %99 = arith.truncf %94 : vector<8x8xf32> to vector<8x8xbf16>
    %100 = arith.truncf %96 : vector<8x8xf32> to vector<8x8xbf16>
    %cst_64 = arith.constant dense<0.000000e+00> : vector<8x8xf32>
    %101 = tpu.matmul %99, %100, %cst_64 {dimension_numbers = #tpu.dot_dimension_numbers<[1], [1], [0], [0], [0, 0, 1, 0], [], []>} : vector<8x8xbf16>, vector<8x8xbf16>, vector<8x8xf32> -> vector<8x8xf32>
    %c2 = arith.constant 2 : index
    %c0_65 = arith.constant 0 : index
    %c0_66 = arith.constant 0 : index
    %102 = vector.load %arg5[%c2, %c0_65, %c0_66] : memref<4x8x1xf32, #tpu.memory_space<vmem>>, vector<1x8x1xf32>
    %103 = vector.shape_cast %102 : vector<1x8x1xf32> to vector<8x1xf32>
    %cst_67 = arith.constant dense<0xFF800000> : vector<8xf32>
    %104 = vector.multi_reduction <maximumf>, %101, %cst_67 [1] : vector<8x8xf32> to vector<8xf32>
    %105 = vector.shape_cast %104 : vector<8xf32> to vector<8x1xf32>
    %106 = arith.maximumf %103, %105 : vector<8x1xf32>
    %107 = arith.subf %103, %106 : vector<8x1xf32>
    %108 = math.exp %107 : vector<8x1xf32>
    %109 = vector.broadcast %106 : vector<8x1xf32> to vector<8x8xf32>
    %110 = arith.subf %101, %109 : vector<8x8xf32>
    %111 = math.exp %110 : vector<8x8xf32>
    %c2_68 = arith.constant 2 : index
    %c0_69 = arith.constant 0 : index
    %c0_70 = arith.constant 0 : index
    %112 = vector.load %arg6[%c2_68, %c0_69, %c0_70] : memref<4x8x1xf32, #tpu.memory_space<vmem>>, vector<1x8x1xf32>
    %113 = vector.shape_cast %112 : vector<1x8x1xf32> to vector<8x1xf32>
    %114 = arith.mulf %108, %113 : vector<8x1xf32>
    %cst_71 = arith.constant dense<0.000000e+00> : vector<8xf32>
    %115 = vector.multi_reduction <add>, %111, %cst_71 [1] : vector<8x8xf32> to vector<8xf32>
    %116 = vector.shape_cast %115 : vector<8xf32> to vector<8x1xf32>
    %117 = arith.addf %114, %116 : vector<8x1xf32>
    %c2_72 = arith.constant 2 : index
    %c0_73 = arith.constant 0 : index
    %c0_74 = arith.constant 0 : index
    %118 = vector.load %arg6[%c2_72, %c0_73, %c0_74] : memref<4x8x1xf32, #tpu.memory_space<vmem>>, vector<1x8x1xf32>
    %119 = vector.shape_cast %118 : vector<1x8x1xf32> to vector<8x1xf32>
    %120 = vector.shape_cast %117 : vector<8x1xf32> to vector<1x8x1xf32>
    tpu.vector_store %arg6[%c2_72, %c0_73, %c0_74], %120 {strides = array<i32>} : memref<4x8x1xf32, #tpu.memory_space<vmem>>, vector<1x8x1xf32>,
    %c2_75 = arith.constant 2 : index
    %c0_76 = arith.constant 0 : index
    %c0_77 = arith.constant 0 : index
    %121 = vector.load %arg7[%c2_75, %c0_76, %c0_77] : memref<4x8x8xf32, #tpu.memory_space<vmem>>, vector<1x8x8xf32>
    %122 = vector.shape_cast %121 : vector<1x8x8xf32> to vector<8x8xf32>
    %123 = vector.broadcast %108 : vector<8x1xf32> to vector<8x8xf32>
    %124 = arith.mulf %123, %122 : vector<8x8xf32>
    %125 = arith.truncf %111 : vector<8x8xf32> to vector<8x8xbf16>
    %126 = arith.truncf %98 : vector<8x8xf32> to vector<8x8xbf16>
    %cst_78 = arith.constant dense<0.000000e+00> : vector<8x8xf32>
    %127 = tpu.matmul %125, %126, %cst_78 {dimension_numbers = #tpu.dot_dimension_numbers<[1], [0], [0], [1], [0, 0, 1, 1], [], []>} : vector<8x8xbf16>, vector<8x8xbf16>, vector<8x8xf32> -> vector<8x8xf32>
    %128 = arith.addf %124, %127 : vector<8x8xf32>
    %c2_79 = arith.constant 2 : index
    %c0_80 = arith.constant 0 : index
    %c0_81 = arith.constant 0 : index
    %129 = vector.load %arg7[%c2_79, %c0_80, %c0_81] : memref<4x8x8xf32, #tpu.memory_space<vmem>>, vector<1x8x8xf32>
    %130 = vector.shape_cast %129 : vector<1x8x8xf32> to vector<8x8xf32>
    %131 = vector.shape_cast %128 : vector<8x8xf32> to vector<1x8x8xf32>
    tpu.vector_store %arg7[%c2_79, %c0_80, %c0_81], %131 {strides = array<i32>} : memref<4x8x8xf32, #tpu.memory_space<vmem>>, vector<1x8x8xf32>,
    %c2_82 = arith.constant 2 : index
    %c0_83 = arith.constant 0 : index
    %c0_84 = arith.constant 0 : index
    %132 = vector.load %arg5[%c2_82, %c0_83, %c0_84] : memref<4x8x1xf32, #tpu.memory_space<vmem>>, vector<1x8x1xf32>
    %133 = vector.shape_cast %132 : vector<1x8x1xf32> to vector<8x1xf32>
    %134 = vector.shape_cast %106 : vector<8x1xf32> to vector<1x8x1xf32>
    tpu.vector_store %arg5[%c2_82, %c0_83, %c0_84], %134 {strides = array<i32>} : memref<4x8x1xf32, #tpu.memory_space<vmem>>, vector<1x8x1xf32>,
    %c0_85 = arith.constant 0 : index
    %c0_86 = arith.constant 0 : index
    %c24 = arith.constant 24 : index
    %135 = vector.load %arg2[%c0_85, %c0_86, %c24] : memref<1x8x96xf32, #tpu.memory_space<vmem>>, vector<1x8x8xf32>
    %136 = vector.shape_cast %135 : vector<1x8x8xf32> to vector<8x8xf32>
    %cst_87 = arith.constant 0.353553385 : f32
    %137 = vector.broadcast %cst_87 : f32 to vector<8x8xf32>
    %138 = arith.mulf %136, %137 : vector<8x8xf32>
    %c0_88 = arith.constant 0 : index
    %c0_89 = arith.constant 0 : index
    %c56 = arith.constant 56 : index
    %139 = vector.load %arg3[%c0_88, %c0_89, %c56] : memref<1x8x96xf32, #tpu.memory_space<vmem>>, vector<1x8x8xf32>
    %140 = vector.shape_cast %139 : vector<1x8x8xf32> to vector<8x8xf32>
    %c0_90 = arith.constant 0 : index
    %c0_91 = arith.constant 0 : index
    %c88 = arith.constant 88 : index
    %141 = vector.load %arg3[%c0_90, %c0_91, %c88] : memref<1x8x96xf32, #tpu.memory_space<vmem>>, vector<1x8x8xf32>
    %142 = vector.shape_cast %141 : vector<1x8x8xf32> to vector<8x8xf32>
    %143 = arith.truncf %138 : vector<8x8xf32> to vector<8x8xbf16>
    %144 = arith.truncf %140 : vector<8x8xf32> to vector<8x8xbf16>
    %cst_92 = arith.constant dense<0.000000e+00> : vector<8x8xf32>
    %145 = tpu.matmul %143, %144, %cst_92 {dimension_numbers = #tpu.dot_dimension_numbers<[1], [1], [0], [0], [0, 0, 1, 0], [], []>} : vector<8x8xbf16>, vector<8x8xbf16>, vector<8x8xf32> -> vector<8x8xf32>
    %c3 = arith.constant 3 : index
    %c0_93 = arith.constant 0 : index
    %c0_94 = arith.constant 0 : index
    %146 = vector.load %arg5[%c3, %c0_93, %c0_94] : memref<4x8x1xf32, #tpu.memory_space<vmem>>, vector<1x8x1xf32>
    %147 = vector.shape_cast %146 : vector<1x8x1xf32> to vector<8x1xf32>
    %cst_95 = arith.constant dense<0xFF800000> : vector<8xf32>
    %148 = vector.multi_reduction <maximumf>, %145, %cst_95 [1] : vector<8x8xf32> to vector<8xf32>
    %149 = vector.shape_cast %148 : vector<8xf32> to vector<8x1xf32>
    %150 = arith.maximumf %147, %149 : vector<8x1xf32>
    %151 = arith.subf %147, %150 : vector<8x1xf32>
    %152 = math.exp %151 : vector<8x1xf32>
    %153 = vector.broadcast %150 : vector<8x1xf32> to vector<8x8xf32>
    %154 = arith.subf %145, %153 : vector<8x8xf32>
    %155 = math.exp %154 : vector<8x8xf32>
    %c3_96 = arith.constant 3 : index
    %c0_97 = arith.constant 0 : index
    %c0_98 = arith.constant 0 : index
    %156 = vector.load %arg6[%c3_96, %c0_97, %c0_98] : memref<4x8x1xf32, #tpu.memory_space<vmem>>, vector<1x8x1xf32>
    %157 = vector.shape_cast %156 : vector<1x8x1xf32> to vector<8x1xf32>
    %158 = arith.mulf %152, %157 : vector<8x1xf32>
    %cst_99 = arith.constant dense<0.000000e+00> : vector<8xf32>
    %159 = vector.multi_reduction <add>, %155, %cst_99 [1] : vector<8x8xf32> to vector<8xf32>
    %160 = vector.shape_cast %159 : vector<8xf32> to vector<8x1xf32>
    %161 = arith.addf %158, %160 : vector<8x1xf32>
    %c3_100 = arith.constant 3 : index
    %c0_101 = arith.constant 0 : index
    %c0_102 = arith.constant 0 : index
    %162 = vector.load %arg6[%c3_100, %c0_101, %c0_102] : memref<4x8x1xf32, #tpu.memory_space<vmem>>, vector<1x8x1xf32>
    %163 = vector.shape_cast %162 : vector<1x8x1xf32> to vector<8x1xf32>
    %164 = vector.shape_cast %161 : vector<8x1xf32> to vector<1x8x1xf32>
    tpu.vector_store %arg6[%c3_100, %c0_101, %c0_102], %164 {strides = array<i32>} : memref<4x8x1xf32, #tpu.memory_space<vmem>>, vector<1x8x1xf32>,
    %c3_103 = arith.constant 3 : index
    %c0_104 = arith.constant 0 : index
    %c0_105 = arith.constant 0 : index
    %165 = vector.load %arg7[%c3_103, %c0_104, %c0_105] : memref<4x8x8xf32, #tpu.memory_space<vmem>>, vector<1x8x8xf32>
    %166 = vector.shape_cast %165 : vector<1x8x8xf32> to vector<8x8xf32>
    %167 = vector.broadcast %152 : vector<8x1xf32> to vector<8x8xf32>
    %168 = arith.mulf %167, %166 : vector<8x8xf32>
    %169 = arith.truncf %155 : vector<8x8xf32> to vector<8x8xbf16>
    %170 = arith.truncf %142 : vector<8x8xf32> to vector<8x8xbf16>
    %cst_106 = arith.constant dense<0.000000e+00> : vector<8x8xf32>
    %171 = tpu.matmul %169, %170, %cst_106 {dimension_numbers = #tpu.dot_dimension_numbers<[1], [0], [0], [1], [0, 0, 1, 1], [], []>} : vector<8x8xbf16>, vector<8x8xbf16>, vector<8x8xf32> -> vector<8x8xf32>
    %172 = arith.addf %168, %171 : vector<8x8xf32>
    %c3_107 = arith.constant 3 : index
    %c0_108 = arith.constant 0 : index
    %c0_109 = arith.constant 0 : index
    %173 = vector.load %arg7[%c3_107, %c0_108, %c0_109] : memref<4x8x8xf32, #tpu.memory_space<vmem>>, vector<1x8x8xf32>
    %174 = vector.shape_cast %173 : vector<1x8x8xf32> to vector<8x8xf32>
    %175 = vector.shape_cast %172 : vector<8x8xf32> to vector<1x8x8xf32>
    tpu.vector_store %arg7[%c3_107, %c0_108, %c0_109], %175 {strides = array<i32>} : memref<4x8x8xf32, #tpu.memory_space<vmem>>, vector<1x8x8xf32>,
    %c3_110 = arith.constant 3 : index
    %c0_111 = arith.constant 0 : index
    %c0_112 = arith.constant 0 : index
    %176 = vector.load %arg5[%c3_110, %c0_111, %c0_112] : memref<4x8x1xf32, #tpu.memory_space<vmem>>, vector<1x8x1xf32>
    %177 = vector.shape_cast %176 : vector<1x8x1xf32> to vector<8x1xf32>
    %178 = vector.shape_cast %150 : vector<8x1xf32> to vector<1x8x1xf32>
    tpu.vector_store %arg5[%c3_110, %c0_111, %c0_112], %178 {strides = array<i32>} : memref<4x8x1xf32, #tpu.memory_space<vmem>>, vector<1x8x1xf32>,
    %c0_i32_113 = arith.constant 0 : i32
    %179 = arith.cmpi eq, %arg1, %c0_i32_113 : i32
    %180 = arith.extui %179 : i1 to i32
    %c0_i32_114 = arith.constant 0 : i32
    %181 = arith.cmpi ne, %180, %c0_i32_114 : i32
    scf.if %181 {
      %c0_115 = arith.constant 0 : index
      %c0_116 = arith.constant 0 : index
      %c0_117 = arith.constant 0 : index
      %182 = vector.load %arg7[%c0_115, %c0_116, %c0_117] : memref<4x8x8xf32, #tpu.memory_space<vmem>>, vector<1x8x8xf32>
      %183 = vector.shape_cast %182 : vector<1x8x8xf32> to vector<8x8xf32>
      %c0_118 = arith.constant 0 : index
      %c0_119 = arith.constant 0 : index
      %c0_120 = arith.constant 0 : index
      %184 = vector.load %arg6[%c0_118, %c0_119, %c0_120] : memref<4x8x1xf32, #tpu.memory_space<vmem>>, vector<1x8x1xf32>
      %185 = vector.shape_cast %184 : vector<1x8x1xf32> to vector<8x1xf32>
      %186 = tpu.reciprocal %185 {approx = true} : vector<8x1xf32> -> vector<8x1xf32>
      %187 = vector.broadcast %186 : vector<8x1xf32> to vector<8x8xf32>
      %188 = arith.mulf %183, %187 : vector<8x8xf32>
      %c1_121 = arith.constant 1 : index
      %c0_122 = arith.constant 0 : index
      %c0_123 = arith.constant 0 : index
      %189 = vector.load %arg7[%c1_121, %c0_122, %c0_123] : memref<4x8x8xf32, #tpu.memory_space<vmem>>, vector<1x8x8xf32>
      %190 = vector.shape_cast %189 : vector<1x8x8xf32> to vector<8x8xf32>
      %c1_124 = arith.constant 1 : index
      %c0_125 = arith.constant 0 : index
      %c0_126 = arith.constant 0 : index
      %191 = vector.load %arg6[%c1_124, %c0_125, %c0_126] : memref<4x8x1xf32, #tpu.memory_space<vmem>>, vector<1x8x1xf32>
      %192 = vector.shape_cast %191 : vector<1x8x1xf32> to vector<8x1xf32>
      %193 = tpu.reciprocal %192 {approx = true} : vector<8x1xf32> -> vector<8x1xf32>
      %194 = vector.broadcast %193 : vector<8x1xf32> to vector<8x8xf32>
      %195 = arith.mulf %190, %194 : vector<8x8xf32>
      %c2_127 = arith.constant 2 : index
      %c0_128 = arith.constant 0 : index
      %c0_129 = arith.constant 0 : index
      %196 = vector.load %arg7[%c2_127, %c0_128, %c0_129] : memref<4x8x8xf32, #tpu.memory_space<vmem>>, vector<1x8x8xf32>
      %197 = vector.shape_cast %196 : vector<1x8x8xf32> to vector<8x8xf32>
      %c2_130 = arith.constant 2 : index
      %c0_131 = arith.constant 0 : index
      %c0_132 = arith.constant 0 : index
      %198 = vector.load %arg6[%c2_130, %c0_131, %c0_132] : memref<4x8x1xf32, #tpu.memory_space<vmem>>, vector<1x8x1xf32>
      %199 = vector.shape_cast %198 : vector<1x8x1xf32> to vector<8x1xf32>
      %200 = tpu.reciprocal %199 {approx = true} : vector<8x1xf32> -> vector<8x1xf32>
      %201 = vector.broadcast %200 : vector<8x1xf32> to vector<8x8xf32>
      %202 = arith.mulf %197, %201 : vector<8x8xf32>
      %c3_133 = arith.constant 3 : index
      %c0_134 = arith.constant 0 : index
      %c0_135 = arith.constant 0 : index
      %203 = vector.load %arg7[%c3_133, %c0_134, %c0_135] : memref<4x8x8xf32, #tpu.memory_space<vmem>>, vector<1x8x8xf32>
      %204 = vector.shape_cast %203 : vector<1x8x8xf32> to vector<8x8xf32>
      %c3_136 = arith.constant 3 : index
      %c0_137 = arith.constant 0 : index
      %c0_138 = arith.constant 0 : index
      %205 = vector.load %arg6[%c3_136, %c0_137, %c0_138] : memref<4x8x1xf32, #tpu.memory_space<vmem>>, vector<1x8x1xf32>
      %206 = vector.shape_cast %205 : vector<1x8x1xf32> to vector<8x1xf32>
      %207 = tpu.reciprocal %206 {approx = true} : vector<8x1xf32> -> vector<8x1xf32>
      %208 = vector.broadcast %207 : vector<8x1xf32> to vector<8x8xf32>
      %209 = arith.mulf %204, %208 : vector<8x8xf32>
      %210 = tpu.concatenate %188, %195, %202, %209 in 1 : vector<8x8xf32>, vector<8x8xf32>, vector<8x8xf32>, vector<8x8xf32> -> vector<8x32xf32>
      %c0_139 = arith.constant 0 : index
      %c0_140 = arith.constant 0 : index
      %c0_141 = arith.constant 0 : index
      %211 = vector.load %arg4[%c0_139, %c0_140, %c0_141] : memref<1x8x32xf32, #tpu.memory_space<vmem>>, vector<1x8x32xf32>
      %212 = vector.shape_cast %211 : vector<1x8x32xf32> to vector<8x32xf32>
      %213 = vector.shape_cast %210 : vector<8x32xf32> to vector<1x8x32xf32>
      tpu.vector_store %arg4[%c0_139, %c0_140, %c0_141], %213 {strides = array<i32>} : memref<1x8x32xf32, #tpu.memory_space<vmem>>, vector<1x8x32xf32>,
    } else {
    }
    return
  }
  func.func @transform_0(%arg0: i32, %arg1: i32) -> (i32, i32, i32) {
    %c0_i32 = arith.constant 0 : i32
    %c0_i32_0 = arith.constant 0 : i32
    %c0_i32_1 = arith.constant 0 : i32
    return %arg0, %c0_i32, %c0_i32_0 : i32, i32, i32
  }
  func.func @transform_1(%arg0: i32, %arg1: i32) -> (i32, i32, i32) {
    %c0_i32 = arith.constant 0 : i32
    %c0_i32_0 = arith.constant 0 : i32
    return %arg0, %arg1, %c0_i32 : i32, i32, i32
  }
  func.func @transform_2(%arg0: i32, %arg1: i32) -> (i32, i32, i32) {
    %c0_i32 = arith.constant 0 : i32
    %c0_i32_0 = arith.constant 0 : i32
    %c0_i32_1 = arith.constant 0 : i32
    return %arg0, %c0_i32, %c0_i32_0 : i32, i32, i32
  }
}

module attributes {stable_mosaic.version = 11 : i64} {
  func.func @_ln_mlp_res_kernel(%arg0: i32, %arg1: memref<16x32xf32, #tpu.memory_space<vmem>>, %arg2: memref<1x32xf32, #tpu.memory_space<vmem>>, %arg3: memref<1x32xf32, #tpu.memory_space<vmem>>, %arg4: memref<32x128xbf16, #tpu.memory_space<vmem>>, %arg5: memref<1x128xf32, #tpu.memory_space<vmem>>, %arg6: memref<128x32xbf16, #tpu.memory_space<vmem>>, %arg7: memref<1x32xf32, #tpu.memory_space<vmem>>, %arg8: memref<16x32xf32, #tpu.memory_space<vmem>>) attributes {dimension_semantics = [#tpu.dimension_semantics<parallel>], iteration_bounds = array<i64: 1>, scalar_prefetch = 0 : i64, scratch_operands = 0 : i64, tpu.core_type = #tpu.core_type<tc>, window_params = [{transform_indices = @transform_0, window_bounds = array<i64: 16, 32>}, {pipeline_mode = #tpu.pipeline_mode<synchronous>, transform_indices = @transform_1, window_bounds = array<i64: 1, 32>}, {pipeline_mode = #tpu.pipeline_mode<synchronous>, transform_indices = @transform_2, window_bounds = array<i64: 1, 32>}, {pipeline_mode = #tpu.pipeline_mode<synchronous>, transform_indices = @transform_3, window_bounds = array<i64: 32, 128>}, {pipeline_mode = #tpu.pipeline_mode<synchronous>, transform_indices = @transform_4, window_bounds = array<i64: 1, 128>}, {pipeline_mode = #tpu.pipeline_mode<synchronous>, transform_indices = @transform_5, window_bounds = array<i64: 128, 32>}, {pipeline_mode = #tpu.pipeline_mode<synchronous>, transform_indices = @transform_6, window_bounds = array<i64: 1, 32>}, {transform_indices = @transform_7, window_bounds = array<i64: 16, 32>}]} {
    %c0 = arith.constant 0 : index
    %c0_0 = arith.constant 0 : index
    %0 = vector.load %arg1[%c0, %c0_0] : memref<16x32xf32, #tpu.memory_space<vmem>>, vector<16x32xf32>
    %c0_1 = arith.constant 0 : index
    %c0_2 = arith.constant 0 : index
    %1 = vector.load %arg2[%c0_1, %c0_2] : memref<1x32xf32, #tpu.memory_space<vmem>>, vector<1x32xf32>
    %c0_3 = arith.constant 0 : index
    %c0_4 = arith.constant 0 : index
    %2 = vector.load %arg3[%c0_3, %c0_4] : memref<1x32xf32, #tpu.memory_space<vmem>>, vector<1x32xf32>
    %cst = arith.constant dense<0.000000e+00> : vector<16xf32>
    %3 = vector.multi_reduction <add>, %0, %cst [1] : vector<16x32xf32> to vector<16xf32>
    %4 = vector.shape_cast %3 : vector<16xf32> to vector<16x1xf32>
    %cst_5 = arith.constant 3.200000e+01 : f32
    %5 = vector.broadcast %cst_5 : f32 to vector<16x1xf32>
    %6 = arith.divf %4, %5 : vector<16x1xf32>
    %7 = vector.broadcast %6 : vector<16x1xf32> to vector<16x32xf32>
    %8 = arith.subf %0, %7 : vector<16x32xf32>
    %9 = arith.mulf %8, %8 : vector<16x32xf32>
    %cst_6 = arith.constant dense<0.000000e+00> : vector<16xf32>
    %10 = vector.multi_reduction <add>, %9, %cst_6 [1] : vector<16x32xf32> to vector<16xf32>
    %11 = vector.shape_cast %10 : vector<16xf32> to vector<16x1xf32>
    %cst_7 = arith.constant 3.200000e+01 : f32
    %12 = vector.broadcast %cst_7 : f32 to vector<16x1xf32>
    %13 = arith.divf %11, %12 : vector<16x1xf32>
    %14 = vector.broadcast %6 : vector<16x1xf32> to vector<16x32xf32>
    %15 = arith.subf %0, %14 : vector<16x32xf32>
    %cst_8 = arith.constant 9.99999974E-6 : f32
    %16 = vector.broadcast %cst_8 : f32 to vector<16x1xf32>
    %17 = arith.addf %13, %16 : vector<16x1xf32>
    %18 = math.rsqrt %17 : vector<16x1xf32>
    %19 = vector.broadcast %18 : vector<16x1xf32> to vector<16x32xf32>
    %20 = arith.mulf %15, %19 : vector<16x32xf32>
    %21 = vector.broadcast %1 : vector<1x32xf32> to vector<16x32xf32>
    %22 = arith.mulf %20, %21 : vector<16x32xf32>
    %23 = vector.broadcast %2 : vector<1x32xf32> to vector<16x32xf32>
    %24 = arith.addf %22, %23 : vector<16x32xf32>
    %25 = arith.truncf %24 : vector<16x32xf32> to vector<16x32xbf16>
    %c0_9 = arith.constant 0 : index
    %c0_10 = arith.constant 0 : index
    %26 = vector.load %arg4[%c0_9, %c0_10] : memref<32x128xbf16, #tpu.memory_space<vmem>>, vector<32x128xbf16>
    %cst_11 = arith.constant dense<0.000000e+00> : vector<16x128xf32>
    %27 = tpu.matmul %25, %26, %cst_11 {dimension_numbers = #tpu.dot_dimension_numbers<[1], [0], [0], [1], [0, 0, 1, 1], [], []>} : vector<16x32xbf16>, vector<32x128xbf16>, vector<16x128xf32> -> vector<16x128xf32>
    %c0_12 = arith.constant 0 : index
    %c0_13 = arith.constant 0 : index
    %28 = vector.load %arg5[%c0_12, %c0_13] : memref<1x128xf32, #tpu.memory_space<vmem>>, vector<1x128xf32>
    %29 = vector.broadcast %28 : vector<1x128xf32> to vector<16x128xf32>
    %30 = arith.addf %27, %29 : vector<16x128xf32>
    %cst_14 = arith.constant 5.000000e-01 : f32
    %31 = vector.broadcast %cst_14 : f32 to vector<16x128xf32>
    %32 = arith.mulf %31, %30 : vector<16x128xf32>
    %cst_15 = arith.constant 0.707106769 : f32
    %33 = vector.broadcast %cst_15 : f32 to vector<16x128xf32>
    %34 = arith.mulf %30, %33 : vector<16x128xf32>
    %35 = math.absf %34 : vector<16x128xf32>
    %cst_16 = arith.constant 0.327591091 : f32
    %36 = vector.broadcast %cst_16 : f32 to vector<16x128xf32>
    %37 = arith.mulf %36, %35 : vector<16x128xf32>
    %cst_17 = arith.constant 1.000000e+00 : f32
    %38 = vector.broadcast %cst_17 : f32 to vector<16x128xf32>
    %39 = arith.addf %38, %37 : vector<16x128xf32>
    %cst_18 = arith.constant 1.000000e+00 : f32
    %40 = vector.broadcast %cst_18 : f32 to vector<16x128xf32>
    %41 = arith.divf %40, %39 : vector<16x128xf32>
    %cst_19 = arith.constant 1.06140542 : f32
    %42 = vector.broadcast %cst_19 : f32 to vector<16x128xf32>
    %43 = arith.mulf %42, %41 : vector<16x128xf32>
    %cst_20 = arith.constant -1.45315206 : f32
    %44 = vector.broadcast %cst_20 : f32 to vector<16x128xf32>
    %45 = arith.addf %43, %44 : vector<16x128xf32>
    %46 = arith.mulf %45, %41 : vector<16x128xf32>
    %cst_21 = arith.constant 1.42141378 : f32
    %47 = vector.broadcast %cst_21 : f32 to vector<16x128xf32>
    %48 = arith.addf %46, %47 : vector<16x128xf32>
    %49 = arith.mulf %48, %41 : vector<16x128xf32>
    %cst_22 = arith.constant -0.284496725 : f32
    %50 = vector.broadcast %cst_22 : f32 to vector<16x128xf32>
    %51 = arith.addf %49, %50 : vector<16x128xf32>
    %52 = arith.mulf %51, %41 : vector<16x128xf32>
    %cst_23 = arith.constant 0.254829586 : f32
    %53 = vector.broadcast %cst_23 : f32 to vector<16x128xf32>
    %54 = arith.addf %52, %53 : vector<16x128xf32>
    %55 = arith.mulf %54, %41 : vector<16x128xf32>
    %cst_24 = arith.constant 0.000000e+00 : f32
    %56 = vector.broadcast %cst_24 : f32 to vector<16x128xf32>
    %57 = arith.subf %56, %35 : vector<16x128xf32>
    %58 = arith.mulf %57, %35 : vector<16x128xf32>
    %59 = math.exp %58 : vector<16x128xf32>
    %60 = arith.mulf %55, %59 : vector<16x128xf32>
    %cst_25 = arith.constant 1.000000e+00 : f32
    %61 = vector.broadcast %cst_25 : f32 to vector<16x128xf32>
    %62 = arith.subf %61, %60 : vector<16x128xf32>
    %cst_26 = arith.constant 0.000000e+00 : f32
    %63 = vector.broadcast %cst_26 : f32 to vector<16x128xf32>
    %64 = arith.cmpf oge, %34, %63 : vector<16x128xf32>
    %cst_27 = arith.constant 0.000000e+00 : f32
    %65 = vector.broadcast %cst_27 : f32 to vector<16x128xf32>
    %66 = arith.subf %65, %62 : vector<16x128xf32>
    %67 = arith.select %64, %62, %66 : vector<16x128xi1>, vector<16x128xf32>
    %cst_28 = arith.constant 1.000000e+00 : f32
    %68 = vector.broadcast %cst_28 : f32 to vector<16x128xf32>
    %69 = arith.addf %68, %67 : vector<16x128xf32>
    %70 = arith.mulf %32, %69 : vector<16x128xf32>
    %71 = arith.truncf %70 : vector<16x128xf32> to vector<16x128xbf16>
    %c0_29 = arith.constant 0 : index
    %c0_30 = arith.constant 0 : index
    %72 = vector.load %arg6[%c0_29, %c0_30] : memref<128x32xbf16, #tpu.memory_space<vmem>>, vector<128x32xbf16>
    %cst_31 = arith.constant dense<0.000000e+00> : vector<16x32xf32>
    %73 = tpu.matmul %71, %72, %cst_31 {dimension_numbers = #tpu.dot_dimension_numbers<[1], [0], [0], [1], [0, 0, 1, 1], [], []>} : vector<16x128xbf16>, vector<128x32xbf16>, vector<16x32xf32> -> vector<16x32xf32>
    %c0_32 = arith.constant 0 : index
    %c0_33 = arith.constant 0 : index
    %74 = vector.load %arg7[%c0_32, %c0_33] : memref<1x32xf32, #tpu.memory_space<vmem>>, vector<1x32xf32>
    %75 = vector.broadcast %74 : vector<1x32xf32> to vector<16x32xf32>
    %76 = arith.addf %73, %75 : vector<16x32xf32>
    %77 = arith.addf %0, %76 : vector<16x32xf32>
    %c0_34 = arith.constant 0 : index
    %c0_35 = arith.constant 0 : index
    %78 = vector.load %arg8[%c0_34, %c0_35] : memref<16x32xf32, #tpu.memory_space<vmem>>, vector<16x32xf32>
    tpu.vector_store %arg8[%c0_34, %c0_35], %77 {strides = array<i32>} : memref<16x32xf32, #tpu.memory_space<vmem>>, vector<16x32xf32>,
    return
  }
  func.func @transform_0(%arg0: i32) -> (i32, i32) {
    %c0_i32 = arith.constant 0 : i32
    %c0_i32_0 = arith.constant 0 : i32
    return %arg0, %c0_i32 : i32, i32
  }
  func.func @transform_1(%arg0: i32) -> (i32, i32) {
    %c0_i32 = arith.constant 0 : i32
    %c0_i32_0 = arith.constant 0 : i32
    %c0_i32_1 = arith.constant 0 : i32
    return %c0_i32, %c0_i32_0 : i32, i32
  }
  func.func @transform_2(%arg0: i32) -> (i32, i32) {
    %c0_i32 = arith.constant 0 : i32
    %c0_i32_0 = arith.constant 0 : i32
    %c0_i32_1 = arith.constant 0 : i32
    return %c0_i32, %c0_i32_0 : i32, i32
  }
  func.func @transform_3(%arg0: i32) -> (i32, i32) {
    %c0_i32 = arith.constant 0 : i32
    %c0_i32_0 = arith.constant 0 : i32
    %c0_i32_1 = arith.constant 0 : i32
    return %c0_i32, %c0_i32_0 : i32, i32
  }
  func.func @transform_4(%arg0: i32) -> (i32, i32) {
    %c0_i32 = arith.constant 0 : i32
    %c0_i32_0 = arith.constant 0 : i32
    %c0_i32_1 = arith.constant 0 : i32
    return %c0_i32, %c0_i32_0 : i32, i32
  }
  func.func @transform_5(%arg0: i32) -> (i32, i32) {
    %c0_i32 = arith.constant 0 : i32
    %c0_i32_0 = arith.constant 0 : i32
    %c0_i32_1 = arith.constant 0 : i32
    return %c0_i32, %c0_i32_0 : i32, i32
  }
  func.func @transform_6(%arg0: i32) -> (i32, i32) {
    %c0_i32 = arith.constant 0 : i32
    %c0_i32_0 = arith.constant 0 : i32
    %c0_i32_1 = arith.constant 0 : i32
    return %c0_i32, %c0_i32_0 : i32, i32
  }
  func.func @transform_7(%arg0: i32) -> (i32, i32) {
    %c0_i32 = arith.constant 0 : i32
    %c0_i32_0 = arith.constant 0 : i32
    return %arg0, %c0_i32 : i32, i32
  }
}

module attributes {stable_mosaic.version = 11 : i64} {
  func.func @_linear_kernel(%arg0: i32, %arg1: memref<8x16xf32, #tpu.memory_space<vmem>>, %arg2: memref<16x32xbf16, #tpu.memory_space<vmem>>, %arg3: memref<1x32xf32, #tpu.memory_space<vmem>>, %arg4: memref<8x32xf32, #tpu.memory_space<vmem>>) attributes {dimension_semantics = [#tpu.dimension_semantics<parallel>], iteration_bounds = array<i64: 1>, scalar_prefetch = 0 : i64, scratch_operands = 0 : i64, tpu.core_type = #tpu.core_type<tc>, window_params = [{transform_indices = @transform_0, window_bounds = array<i64: 8, 16>}, {pipeline_mode = #tpu.pipeline_mode<synchronous>, transform_indices = @transform_1, window_bounds = array<i64: 16, 32>}, {pipeline_mode = #tpu.pipeline_mode<synchronous>, transform_indices = @transform_2, window_bounds = array<i64: 1, 32>}, {transform_indices = @transform_3, window_bounds = array<i64: 8, 32>}]} {
    %c0 = arith.constant 0 : index
    %c0_0 = arith.constant 0 : index
    %0 = vector.load %arg1[%c0, %c0_0] : memref<8x16xf32, #tpu.memory_space<vmem>>, vector<8x16xf32>
    %1 = arith.truncf %0 : vector<8x16xf32> to vector<8x16xbf16>
    %c0_1 = arith.constant 0 : index
    %c0_2 = arith.constant 0 : index
    %2 = vector.load %arg2[%c0_1, %c0_2] : memref<16x32xbf16, #tpu.memory_space<vmem>>, vector<16x32xbf16>
    %cst = arith.constant dense<0.000000e+00> : vector<8x32xf32>
    %3 = tpu.matmul %1, %2, %cst {dimension_numbers = #tpu.dot_dimension_numbers<[1], [0], [0], [1], [0, 0, 1, 1], [], []>} : vector<8x16xbf16>, vector<16x32xbf16>, vector<8x32xf32> -> vector<8x32xf32>
    %c0_3 = arith.constant 0 : index
    %c0_4 = arith.constant 0 : index
    %4 = vector.load %arg3[%c0_3, %c0_4] : memref<1x32xf32, #tpu.memory_space<vmem>>, vector<1x32xf32>
    %5 = vector.broadcast %4 : vector<1x32xf32> to vector<8x32xf32>
    %6 = arith.addf %3, %5 : vector<8x32xf32>
    %c0_5 = arith.constant 0 : index
    %c0_6 = arith.constant 0 : index
    %7 = vector.load %arg4[%c0_5, %c0_6] : memref<8x32xf32, #tpu.memory_space<vmem>>, vector<8x32xf32>
    tpu.vector_store %arg4[%c0_5, %c0_6], %6 {strides = array<i32>} : memref<8x32xf32, #tpu.memory_space<vmem>>, vector<8x32xf32>,
    return
  }
  func.func @transform_0(%arg0: i32) -> (i32, i32) {
    %c0_i32 = arith.constant 0 : i32
    %c0_i32_0 = arith.constant 0 : i32
    return %arg0, %c0_i32 : i32, i32
  }
  func.func @transform_1(%arg0: i32) -> (i32, i32) {
    %c0_i32 = arith.constant 0 : i32
    %c0_i32_0 = arith.constant 0 : i32
    %c0_i32_1 = arith.constant 0 : i32
    return %c0_i32, %c0_i32_0 : i32, i32
  }
  func.func @transform_2(%arg0: i32) -> (i32, i32) {
    %c0_i32 = arith.constant 0 : i32
    %c0_i32_0 = arith.constant 0 : i32
    %c0_i32_1 = arith.constant 0 : i32
    return %c0_i32, %c0_i32_0 : i32, i32
  }
  func.func @transform_3(%arg0: i32) -> (i32, i32) {
    %c0_i32 = arith.constant 0 : i32
    %c0_i32_0 = arith.constant 0 : i32
    return %arg0, %c0_i32 : i32, i32
  }
}

module attributes {stable_mosaic.version = 11 : i64} {
  func.func @_flash_attn_kernel(%arg0: i32, %arg1: i32, %arg2: memref<1x4x96xf32, #tpu.memory_space<vmem>>, %arg3: memref<1x4x96xf32, #tpu.memory_space<vmem>>, %arg4: memref<1x4x32xf32, #tpu.memory_space<vmem>>, %arg5: memref<4x4x1xf32, #tpu.memory_space<vmem>>, %arg6: memref<4x4x1xf32, #tpu.memory_space<vmem>>, %arg7: memref<4x4x8xf32, #tpu.memory_space<vmem>>) attributes {dimension_semantics = [#tpu.dimension_semantics<parallel>, #tpu.dimension_semantics<arbitrary>], iteration_bounds = array<i64: 2, 1>, scalar_prefetch = 0 : i64, scratch_operands = 3 : i64, tpu.core_type = #tpu.core_type<tc>, window_params = [{transform_indices = @transform_0, window_bounds = array<i64: 1, 4, 96>}, {transform_indices = @transform_1, window_bounds = array<i64: 1, 4, 96>}, {transform_indices = @transform_2, window_bounds = array<i64: 1, 4, 32>}]} {
    %c0_i32 = arith.constant 0 : i32
    %0 = arith.cmpi eq, %arg1, %c0_i32 : i32
    %1 = arith.extui %0 : i1 to i32
    %c0_i32_0 = arith.constant 0 : i32
    %2 = arith.cmpi ne, %1, %c0_i32_0 : i32
    scf.if %2 {
      %cst_115 = arith.constant 0xFF800000 : f32
      %182 = vector.broadcast %cst_115 : f32 to vector<4x4x1xf32>
      %c0_116 = arith.constant 0 : index
      %c0_117 = arith.constant 0 : index
      %c0_118 = arith.constant 0 : index
      %183 = vector.load %arg5[%c0_116, %c0_117, %c0_118] : memref<4x4x1xf32, #tpu.memory_space<vmem>>, vector<4x4x1xf32>
      tpu.vector_store %arg5[%c0_116, %c0_117, %c0_118], %182 {strides = array<i32>} : memref<4x4x1xf32, #tpu.memory_space<vmem>>, vector<4x4x1xf32>,
      %cst_119 = arith.constant 0.000000e+00 : f32
      %184 = vector.broadcast %cst_119 : f32 to vector<4x4x1xf32>
      %c0_120 = arith.constant 0 : index
      %c0_121 = arith.constant 0 : index
      %c0_122 = arith.constant 0 : index
      %185 = vector.load %arg6[%c0_120, %c0_121, %c0_122] : memref<4x4x1xf32, #tpu.memory_space<vmem>>, vector<4x4x1xf32>
      tpu.vector_store %arg6[%c0_120, %c0_121, %c0_122], %184 {strides = array<i32>} : memref<4x4x1xf32, #tpu.memory_space<vmem>>, vector<4x4x1xf32>,
      %cst_123 = arith.constant 0.000000e+00 : f32
      %186 = vector.broadcast %cst_123 : f32 to vector<4x4x8xf32>
      %c0_124 = arith.constant 0 : index
      %c0_125 = arith.constant 0 : index
      %c0_126 = arith.constant 0 : index
      %187 = vector.load %arg7[%c0_124, %c0_125, %c0_126] : memref<4x4x8xf32, #tpu.memory_space<vmem>>, vector<4x4x8xf32>
      tpu.vector_store %arg7[%c0_124, %c0_125, %c0_126], %186 {strides = array<i32>} : memref<4x4x8xf32, #tpu.memory_space<vmem>>, vector<4x4x8xf32>,
    } else {
    }
    %c0 = arith.constant 0 : index
    %c0_1 = arith.constant 0 : index
    %c0_2 = arith.constant 0 : index
    %3 = vector.load %arg2[%c0, %c0_1, %c0_2] : memref<1x4x96xf32, #tpu.memory_space<vmem>>, vector<1x4x8xf32>
    %4 = vector.shape_cast %3 : vector<1x4x8xf32> to vector<4x8xf32>
    %cst = arith.constant 0.353553385 : f32
    %5 = vector.broadcast %cst : f32 to vector<4x8xf32>
    %6 = arith.mulf %4, %5 : vector<4x8xf32>
    %c0_3 = arith.constant 0 : index
    %c0_4 = arith.constant 0 : index
    %c32 = arith.constant 32 : index
    %7 = vector.load %arg3[%c0_3, %c0_4, %c32] : memref<1x4x96xf32, #tpu.memory_space<vmem>>, vector<1x4x8xf32>
    %8 = vector.shape_cast %7 : vector<1x4x8xf32> to vector<4x8xf32>
    %c0_5 = arith.constant 0 : index
    %c0_6 = arith.constant 0 : index
    %c64 = arith.constant 64 : index
    %9 = vector.load %arg3[%c0_5, %c0_6, %c64] : memref<1x4x96xf32, #tpu.memory_space<vmem>>, vector<1x4x8xf32>
    %10 = vector.shape_cast %9 : vector<1x4x8xf32> to vector<4x8xf32>
    %11 = arith.truncf %6 : vector<4x8xf32> to vector<4x8xbf16>
    %12 = arith.truncf %8 : vector<4x8xf32> to vector<4x8xbf16>
    %cst_7 = arith.constant dense<0.000000e+00> : vector<4x4xf32>
    %13 = tpu.matmul %11, %12, %cst_7 {dimension_numbers = #tpu.dot_dimension_numbers<[1], [1], [0], [0], [0, 0, 1, 0], [], []>} : vector<4x8xbf16>, vector<4x8xbf16>, vector<4x4xf32> -> vector<4x4xf32>
    %c0_8 = arith.constant 0 : index
    %c0_9 = arith.constant 0 : index
    %c0_10 = arith.constant 0 : index
    %14 = vector.load %arg5[%c0_8, %c0_9, %c0_10] : memref<4x4x1xf32, #tpu.memory_space<vmem>>, vector<1x4x1xf32>
    %15 = vector.shape_cast %14 : vector<1x4x1xf32> to vector<4x1xf32>
    %cst_11 = arith.constant dense<0xFF800000> : vector<4xf32>
    %16 = vector.multi_reduction <maximumf>, %13, %cst_11 [1] : vector<4x4xf32> to vector<4xf32>
    %17 = vector.shape_cast %16 : vector<4xf32> to vector<4x1xf32>
    %18 = arith.maximumf %15, %17 : vector<4x1xf32>
    %19 = arith.subf %15, %18 : vector<4x1xf32>
    %20 = math.exp %19 : vector<4x1xf32>
    %21 = vector.broadcast %18 : vector<4x1xf32> to vector<4x4xf32>
    %22 = arith.subf %13, %21 : vector<4x4xf32>
    %23 = math.exp %22 : vector<4x4xf32>
    %c0_12 = arith.constant 0 : index
    %c0_13 = arith.constant 0 : index
    %c0_14 = arith.constant 0 : index
    %24 = vector.load %arg6[%c0_12, %c0_13, %c0_14] : memref<4x4x1xf32, #tpu.memory_space<vmem>>, vector<1x4x1xf32>
    %25 = vector.shape_cast %24 : vector<1x4x1xf32> to vector<4x1xf32>
    %26 = arith.mulf %20, %25 : vector<4x1xf32>
    %cst_15 = arith.constant dense<0.000000e+00> : vector<4xf32>
    %27 = vector.multi_reduction <add>, %23, %cst_15 [1] : vector<4x4xf32> to vector<4xf32>
    %28 = vector.shape_cast %27 : vector<4xf32> to vector<4x1xf32>
    %29 = arith.addf %26, %28 : vector<4x1xf32>
    %c0_16 = arith.constant 0 : index
    %c0_17 = arith.constant 0 : index
    %c0_18 = arith.constant 0 : index
    %30 = vector.load %arg6[%c0_16, %c0_17, %c0_18] : memref<4x4x1xf32, #tpu.memory_space<vmem>>, vector<1x4x1xf32>
    %31 = vector.shape_cast %30 : vector<1x4x1xf32> to vector<4x1xf32>
    %32 = vector.shape_cast %29 : vector<4x1xf32> to vector<1x4x1xf32>
    tpu.vector_store %arg6[%c0_16, %c0_17, %c0_18], %32 {strides = array<i32>} : memref<4x4x1xf32, #tpu.memory_space<vmem>>, vector<1x4x1xf32>,
    %c0_19 = arith.constant 0 : index
    %c0_20 = arith.constant 0 : index
    %c0_21 = arith.constant 0 : index
    %33 = vector.load %arg7[%c0_19, %c0_20, %c0_21] : memref<4x4x8xf32, #tpu.memory_space<vmem>>, vector<1x4x8xf32>
    %34 = vector.shape_cast %33 : vector<1x4x8xf32> to vector<4x8xf32>
    %35 = vector.broadcast %20 : vector<4x1xf32> to vector<4x8xf32>
    %36 = arith.mulf %35, %34 : vector<4x8xf32>
    %37 = arith.truncf %23 : vector<4x4xf32> to vector<4x4xbf16>
    %38 = arith.truncf %10 : vector<4x8xf32> to vector<4x8xbf16>
    %cst_22 = arith.constant dense<0.000000e+00> : vector<4x8xf32>
    %39 = tpu.matmul %37, %38, %cst_22 {dimension_numbers = #tpu.dot_dimension_numbers<[1], [0], [0], [1], [0, 0, 1, 1], [], []>} : vector<4x4xbf16>, vector<4x8xbf16>, vector<4x8xf32> -> vector<4x8xf32>
    %40 = arith.addf %36, %39 : vector<4x8xf32>
    %c0_23 = arith.constant 0 : index
    %c0_24 = arith.constant 0 : index
    %c0_25 = arith.constant 0 : index
    %41 = vector.load %arg7[%c0_23, %c0_24, %c0_25] : memref<4x4x8xf32, #tpu.memory_space<vmem>>, vector<1x4x8xf32>
    %42 = vector.shape_cast %41 : vector<1x4x8xf32> to vector<4x8xf32>
    %43 = vector.shape_cast %40 : vector<4x8xf32> to vector<1x4x8xf32>
    tpu.vector_store %arg7[%c0_23, %c0_24, %c0_25], %43 {strides = array<i32>} : memref<4x4x8xf32, #tpu.memory_space<vmem>>, vector<1x4x8xf32>,
    %c0_26 = arith.constant 0 : index
    %c0_27 = arith.constant 0 : index
    %c0_28 = arith.constant 0 : index
    %44 = vector.load %arg5[%c0_26, %c0_27, %c0_28] : memref<4x4x1xf32, #tpu.memory_space<vmem>>, vector<1x4x1xf32>
    %45 = vector.shape_cast %44 : vector<1x4x1xf32> to vector<4x1xf32>
    %46 = vector.shape_cast %18 : vector<4x1xf32> to vector<1x4x1xf32>
    tpu.vector_store %arg5[%c0_26, %c0_27, %c0_28], %46 {strides = array<i32>} : memref<4x4x1xf32, #tpu.memory_space<vmem>>, vector<1x4x1xf32>,
    %c0_29 = arith.constant 0 : index
    %c0_30 = arith.constant 0 : index
    %c8 = arith.constant 8 : index
    %47 = vector.load %arg2[%c0_29, %c0_30, %c8] : memref<1x4x96xf32, #tpu.memory_space<vmem>>, vector<1x4x8xf32>
    %48 = vector.shape_cast %47 : vector<1x4x8xf32> to vector<4x8xf32>
    %cst_31 = arith.constant 0.353553385 : f32
    %49 = vector.broadcast %cst_31 : f32 to vector<4x8xf32>
    %50 = arith.mulf %48, %49 : vector<4x8xf32>
    %c0_32 = arith.constant 0 : index
    %c0_33 = arith.constant 0 : index
    %c40 = arith.constant 40 : index
    %51 = vector.load %arg3[%c0_32, %c0_33, %c40] : memref<1x4x96xf32, #tpu.memory_space<vmem>>, vector<1x4x8xf32>
    %52 = vector.shape_cast %51 : vector<1x4x8xf32> to vector<4x8xf32>
    %c0_34 = arith.constant 0 : index
    %c0_35 = arith.constant 0 : index
    %c72 = arith.constant 72 : index
    %53 = vector.load %arg3[%c0_34, %c0_35, %c72] : memref<1x4x96xf32, #tpu.memory_space<vmem>>, vector<1x4x8xf32>
    %54 = vector.shape_cast %53 : vector<1x4x8xf32> to vector<4x8xf32>
    %55 = arith.truncf %50 : vector<4x8xf32> to vector<4x8xbf16>
    %56 = arith.truncf %52 : vector<4x8xf32> to vector<4x8xbf16>
    %cst_36 = arith.constant dense<0.000000e+00> : vector<4x4xf32>
    %57 = tpu.matmul %55, %56, %cst_36 {dimension_numbers = #tpu.dot_dimension_numbers<[1], [1], [0], [0], [0, 0, 1, 0], [], []>} : vector<4x8xbf16>, vector<4x8xbf16>, vector<4x4xf32> -> vector<4x4xf32>
    %c1 = arith.constant 1 : index
    %c0_37 = arith.constant 0 : index
    %c0_38 = arith.constant 0 : index
    %58 = vector.load %arg5[%c1, %c0_37, %c0_38] : memref<4x4x1xf32, #tpu.memory_space<vmem>>, vector<1x4x1xf32>
    %59 = vector.shape_cast %58 : vector<1x4x1xf32> to vector<4x1xf32>
    %cst_39 = arith.constant dense<0xFF800000> : vector<4xf32>
    %60 = vector.multi_reduction <maximumf>, %57, %cst_39 [1] : vector<4x4xf32> to vector<4xf32>
    %61 = vector.shape_cast %60 : vector<4xf32> to vector<4x1xf32>
    %62 = arith.maximumf %59, %61 : vector<4x1xf32>
    %63 = arith.subf %59, %62 : vector<4x1xf32>
    %64 = math.exp %63 : vector<4x1xf32>
    %65 = vector.broadcast %62 : vector<4x1xf32> to vector<4x4xf32>
    %66 = arith.subf %57, %65 : vector<4x4xf32>
    %67 = math.exp %66 : vector<4x4xf32>
    %c1_40 = arith.constant 1 : index
    %c0_41 = arith.constant 0 : index
    %c0_42 = arith.constant 0 : index
    %68 = vector.load %arg6[%c1_40, %c0_41, %c0_42] : memref<4x4x1xf32, #tpu.memory_space<vmem>>, vector<1x4x1xf32>
    %69 = vector.shape_cast %68 : vector<1x4x1xf32> to vector<4x1xf32>
    %70 = arith.mulf %64, %69 : vector<4x1xf32>
    %cst_43 = arith.constant dense<0.000000e+00> : vector<4xf32>
    %71 = vector.multi_reduction <add>, %67, %cst_43 [1] : vector<4x4xf32> to vector<4xf32>
    %72 = vector.shape_cast %71 : vector<4xf32> to vector<4x1xf32>
    %73 = arith.addf %70, %72 : vector<4x1xf32>
    %c1_44 = arith.constant 1 : index
    %c0_45 = arith.constant 0 : index
    %c0_46 = arith.constant 0 : index
    %74 = vector.load %arg6[%c1_44, %c0_45, %c0_46] : memref<4x4x1xf32, #tpu.memory_space<vmem>>, vector<1x4x1xf32>
    %75 = vector.shape_cast %74 : vector<1x4x1xf32> to vector<4x1xf32>
    %76 = vector.shape_cast %73 : vector<4x1xf32> to vector<1x4x1xf32>
    tpu.vector_store %arg6[%c1_44, %c0_45, %c0_46], %76 {strides = array<i32>} : memref<4x4x1xf32, #tpu.memory_space<vmem>>, vector<1x4x1xf32>,
    %c1_47 = arith.constant 1 : index
    %c0_48 = arith.constant 0 : index
    %c0_49 = arith.constant 0 : index
    %77 = vector.load %arg7[%c1_47, %c0_48, %c0_49] : memref<4x4x8xf32, #tpu.memory_space<vmem>>, vector<1x4x8xf32>
    %78 = vector.shape_cast %77 : vector<1x4x8xf32> to vector<4x8xf32>
    %79 = vector.broadcast %64 : vector<4x1xf32> to vector<4x8xf32>
    %80 = arith.mulf %79, %78 : vector<4x8xf32>
    %81 = arith.truncf %67 : vector<4x4xf32> to vector<4x4xbf16>
    %82 = arith.truncf %54 : vector<4x8xf32> to vector<4x8xbf16>
    %cst_50 = arith.constant dense<0.000000e+00> : vector<4x8xf32>
    %83 = tpu.matmul %81, %82, %cst_50 {dimension_numbers = #tpu.dot_dimension_numbers<[1], [0], [0], [1], [0, 0, 1, 1], [], []>} : vector<4x4xbf16>, vector<4x8xbf16>, vector<4x8xf32> -> vector<4x8xf32>
    %84 = arith.addf %80, %83 : vector<4x8xf32>
    %c1_51 = arith.constant 1 : index
    %c0_52 = arith.constant 0 : index
    %c0_53 = arith.constant 0 : index
    %85 = vector.load %arg7[%c1_51, %c0_52, %c0_53] : memref<4x4x8xf32, #tpu.memory_space<vmem>>, vector<1x4x8xf32>
    %86 = vector.shape_cast %85 : vector<1x4x8xf32> to vector<4x8xf32>
    %87 = vector.shape_cast %84 : vector<4x8xf32> to vector<1x4x8xf32>
    tpu.vector_store %arg7[%c1_51, %c0_52, %c0_53], %87 {strides = array<i32>} : memref<4x4x8xf32, #tpu.memory_space<vmem>>, vector<1x4x8xf32>,
    %c1_54 = arith.constant 1 : index
    %c0_55 = arith.constant 0 : index
    %c0_56 = arith.constant 0 : index
    %88 = vector.load %arg5[%c1_54, %c0_55, %c0_56] : memref<4x4x1xf32, #tpu.memory_space<vmem>>, vector<1x4x1xf32>
    %89 = vector.shape_cast %88 : vector<1x4x1xf32> to vector<4x1xf32>
    %90 = vector.shape_cast %62 : vector<4x1xf32> to vector<1x4x1xf32>
    tpu.vector_store %arg5[%c1_54, %c0_55, %c0_56], %90 {strides = array<i32>} : memref<4x4x1xf32, #tpu.memory_space<vmem>>, vector<1x4x1xf32>,
    %c0_57 = arith.constant 0 : index
    %c0_58 = arith.constant 0 : index
    %c16 = arith.constant 16 : index
    %91 = vector.load %arg2[%c0_57, %c0_58, %c16] : memref<1x4x96xf32, #tpu.memory_space<vmem>>, vector<1x4x8xf32>
    %92 = vector.shape_cast %91 : vector<1x4x8xf32> to vector<4x8xf32>
    %cst_59 = arith.constant 0.353553385 : f32
    %93 = vector.broadcast %cst_59 : f32 to vector<4x8xf32>
    %94 = arith.mulf %92, %93 : vector<4x8xf32>
    %c0_60 = arith.constant 0 : index
    %c0_61 = arith.constant 0 : index
    %c48 = arith.constant 48 : index
    %95 = vector.load %arg3[%c0_60, %c0_61, %c48] : memref<1x4x96xf32, #tpu.memory_space<vmem>>, vector<1x4x8xf32>
    %96 = vector.shape_cast %95 : vector<1x4x8xf32> to vector<4x8xf32>
    %c0_62 = arith.constant 0 : index
    %c0_63 = arith.constant 0 : index
    %c80 = arith.constant 80 : index
    %97 = vector.load %arg3[%c0_62, %c0_63, %c80] : memref<1x4x96xf32, #tpu.memory_space<vmem>>, vector<1x4x8xf32>
    %98 = vector.shape_cast %97 : vector<1x4x8xf32> to vector<4x8xf32>
    %99 = arith.truncf %94 : vector<4x8xf32> to vector<4x8xbf16>
    %100 = arith.truncf %96 : vector<4x8xf32> to vector<4x8xbf16>
    %cst_64 = arith.constant dense<0.000000e+00> : vector<4x4xf32>
    %101 = tpu.matmul %99, %100, %cst_64 {dimension_numbers = #tpu.dot_dimension_numbers<[1], [1], [0], [0], [0, 0, 1, 0], [], []>} : vector<4x8xbf16>, vector<4x8xbf16>, vector<4x4xf32> -> vector<4x4xf32>
    %c2 = arith.constant 2 : index
    %c0_65 = arith.constant 0 : index
    %c0_66 = arith.constant 0 : index
    %102 = vector.load %arg5[%c2, %c0_65, %c0_66] : memref<4x4x1xf32, #tpu.memory_space<vmem>>, vector<1x4x1xf32>
    %103 = vector.shape_cast %102 : vector<1x4x1xf32> to vector<4x1xf32>
    %cst_67 = arith.constant dense<0xFF800000> : vector<4xf32>
    %104 = vector.multi_reduction <maximumf>, %101, %cst_67 [1] : vector<4x4xf32> to vector<4xf32>
    %105 = vector.shape_cast %104 : vector<4xf32> to vector<4x1xf32>
    %106 = arith.maximumf %103, %105 : vector<4x1xf32>
    %107 = arith.subf %103, %106 : vector<4x1xf32>
    %108 = math.exp %107 : vector<4x1xf32>
    %109 = vector.broadcast %106 : vector<4x1xf32> to vector<4x4xf32>
    %110 = arith.subf %101, %109 : vector<4x4xf32>
    %111 = math.exp %110 : vector<4x4xf32>
    %c2_68 = arith.constant 2 : index
    %c0_69 = arith.constant 0 : index
    %c0_70 = arith.constant 0 : index
    %112 = vector.load %arg6[%c2_68, %c0_69, %c0_70] : memref<4x4x1xf32, #tpu.memory_space<vmem>>, vector<1x4x1xf32>
    %113 = vector.shape_cast %112 : vector<1x4x1xf32> to vector<4x1xf32>
    %114 = arith.mulf %108, %113 : vector<4x1xf32>
    %cst_71 = arith.constant dense<0.000000e+00> : vector<4xf32>
    %115 = vector.multi_reduction <add>, %111, %cst_71 [1] : vector<4x4xf32> to vector<4xf32>
    %116 = vector.shape_cast %115 : vector<4xf32> to vector<4x1xf32>
    %117 = arith.addf %114, %116 : vector<4x1xf32>
    %c2_72 = arith.constant 2 : index
    %c0_73 = arith.constant 0 : index
    %c0_74 = arith.constant 0 : index
    %118 = vector.load %arg6[%c2_72, %c0_73, %c0_74] : memref<4x4x1xf32, #tpu.memory_space<vmem>>, vector<1x4x1xf32>
    %119 = vector.shape_cast %118 : vector<1x4x1xf32> to vector<4x1xf32>
    %120 = vector.shape_cast %117 : vector<4x1xf32> to vector<1x4x1xf32>
    tpu.vector_store %arg6[%c2_72, %c0_73, %c0_74], %120 {strides = array<i32>} : memref<4x4x1xf32, #tpu.memory_space<vmem>>, vector<1x4x1xf32>,
    %c2_75 = arith.constant 2 : index
    %c0_76 = arith.constant 0 : index
    %c0_77 = arith.constant 0 : index
    %121 = vector.load %arg7[%c2_75, %c0_76, %c0_77] : memref<4x4x8xf32, #tpu.memory_space<vmem>>, vector<1x4x8xf32>
    %122 = vector.shape_cast %121 : vector<1x4x8xf32> to vector<4x8xf32>
    %123 = vector.broadcast %108 : vector<4x1xf32> to vector<4x8xf32>
    %124 = arith.mulf %123, %122 : vector<4x8xf32>
    %125 = arith.truncf %111 : vector<4x4xf32> to vector<4x4xbf16>
    %126 = arith.truncf %98 : vector<4x8xf32> to vector<4x8xbf16>
    %cst_78 = arith.constant dense<0.000000e+00> : vector<4x8xf32>
    %127 = tpu.matmul %125, %126, %cst_78 {dimension_numbers = #tpu.dot_dimension_numbers<[1], [0], [0], [1], [0, 0, 1, 1], [], []>} : vector<4x4xbf16>, vector<4x8xbf16>, vector<4x8xf32> -> vector<4x8xf32>
    %128 = arith.addf %124, %127 : vector<4x8xf32>
    %c2_79 = arith.constant 2 : index
    %c0_80 = arith.constant 0 : index
    %c0_81 = arith.constant 0 : index
    %129 = vector.load %arg7[%c2_79, %c0_80, %c0_81] : memref<4x4x8xf32, #tpu.memory_space<vmem>>, vector<1x4x8xf32>
    %130 = vector.shape_cast %129 : vector<1x4x8xf32> to vector<4x8xf32>
    %131 = vector.shape_cast %128 : vector<4x8xf32> to vector<1x4x8xf32>
    tpu.vector_store %arg7[%c2_79, %c0_80, %c0_81], %131 {strides = array<i32>} : memref<4x4x8xf32, #tpu.memory_space<vmem>>, vector<1x4x8xf32>,
    %c2_82 = arith.constant 2 : index
    %c0_83 = arith.constant 0 : index
    %c0_84 = arith.constant 0 : index
    %132 = vector.load %arg5[%c2_82, %c0_83, %c0_84] : memref<4x4x1xf32, #tpu.memory_space<vmem>>, vector<1x4x1xf32>
    %133 = vector.shape_cast %132 : vector<1x4x1xf32> to vector<4x1xf32>
    %134 = vector.shape_cast %106 : vector<4x1xf32> to vector<1x4x1xf32>
    tpu.vector_store %arg5[%c2_82, %c0_83, %c0_84], %134 {strides = array<i32>} : memref<4x4x1xf32, #tpu.memory_space<vmem>>, vector<1x4x1xf32>,
    %c0_85 = arith.constant 0 : index
    %c0_86 = arith.constant 0 : index
    %c24 = arith.constant 24 : index
    %135 = vector.load %arg2[%c0_85, %c0_86, %c24] : memref<1x4x96xf32, #tpu.memory_space<vmem>>, vector<1x4x8xf32>
    %136 = vector.shape_cast %135 : vector<1x4x8xf32> to vector<4x8xf32>
    %cst_87 = arith.constant 0.353553385 : f32
    %137 = vector.broadcast %cst_87 : f32 to vector<4x8xf32>
    %138 = arith.mulf %136, %137 : vector<4x8xf32>
    %c0_88 = arith.constant 0 : index
    %c0_89 = arith.constant 0 : index
    %c56 = arith.constant 56 : index
    %139 = vector.load %arg3[%c0_88, %c0_89, %c56] : memref<1x4x96xf32, #tpu.memory_space<vmem>>, vector<1x4x8xf32>
    %140 = vector.shape_cast %139 : vector<1x4x8xf32> to vector<4x8xf32>
    %c0_90 = arith.constant 0 : index
    %c0_91 = arith.constant 0 : index
    %c88 = arith.constant 88 : index
    %141 = vector.load %arg3[%c0_90, %c0_91, %c88] : memref<1x4x96xf32, #tpu.memory_space<vmem>>, vector<1x4x8xf32>
    %142 = vector.shape_cast %141 : vector<1x4x8xf32> to vector<4x8xf32>
    %143 = arith.truncf %138 : vector<4x8xf32> to vector<4x8xbf16>
    %144 = arith.truncf %140 : vector<4x8xf32> to vector<4x8xbf16>
    %cst_92 = arith.constant dense<0.000000e+00> : vector<4x4xf32>
    %145 = tpu.matmul %143, %144, %cst_92 {dimension_numbers = #tpu.dot_dimension_numbers<[1], [1], [0], [0], [0, 0, 1, 0], [], []>} : vector<4x8xbf16>, vector<4x8xbf16>, vector<4x4xf32> -> vector<4x4xf32>
    %c3 = arith.constant 3 : index
    %c0_93 = arith.constant 0 : index
    %c0_94 = arith.constant 0 : index
    %146 = vector.load %arg5[%c3, %c0_93, %c0_94] : memref<4x4x1xf32, #tpu.memory_space<vmem>>, vector<1x4x1xf32>
    %147 = vector.shape_cast %146 : vector<1x4x1xf32> to vector<4x1xf32>
    %cst_95 = arith.constant dense<0xFF800000> : vector<4xf32>
    %148 = vector.multi_reduction <maximumf>, %145, %cst_95 [1] : vector<4x4xf32> to vector<4xf32>
    %149 = vector.shape_cast %148 : vector<4xf32> to vector<4x1xf32>
    %150 = arith.maximumf %147, %149 : vector<4x1xf32>
    %151 = arith.subf %147, %150 : vector<4x1xf32>
    %152 = math.exp %151 : vector<4x1xf32>
    %153 = vector.broadcast %150 : vector<4x1xf32> to vector<4x4xf32>
    %154 = arith.subf %145, %153 : vector<4x4xf32>
    %155 = math.exp %154 : vector<4x4xf32>
    %c3_96 = arith.constant 3 : index
    %c0_97 = arith.constant 0 : index
    %c0_98 = arith.constant 0 : index
    %156 = vector.load %arg6[%c3_96, %c0_97, %c0_98] : memref<4x4x1xf32, #tpu.memory_space<vmem>>, vector<1x4x1xf32>
    %157 = vector.shape_cast %156 : vector<1x4x1xf32> to vector<4x1xf32>
    %158 = arith.mulf %152, %157 : vector<4x1xf32>
    %cst_99 = arith.constant dense<0.000000e+00> : vector<4xf32>
    %159 = vector.multi_reduction <add>, %155, %cst_99 [1] : vector<4x4xf32> to vector<4xf32>
    %160 = vector.shape_cast %159 : vector<4xf32> to vector<4x1xf32>
    %161 = arith.addf %158, %160 : vector<4x1xf32>
    %c3_100 = arith.constant 3 : index
    %c0_101 = arith.constant 0 : index
    %c0_102 = arith.constant 0 : index
    %162 = vector.load %arg6[%c3_100, %c0_101, %c0_102] : memref<4x4x1xf32, #tpu.memory_space<vmem>>, vector<1x4x1xf32>
    %163 = vector.shape_cast %162 : vector<1x4x1xf32> to vector<4x1xf32>
    %164 = vector.shape_cast %161 : vector<4x1xf32> to vector<1x4x1xf32>
    tpu.vector_store %arg6[%c3_100, %c0_101, %c0_102], %164 {strides = array<i32>} : memref<4x4x1xf32, #tpu.memory_space<vmem>>, vector<1x4x1xf32>,
    %c3_103 = arith.constant 3 : index
    %c0_104 = arith.constant 0 : index
    %c0_105 = arith.constant 0 : index
    %165 = vector.load %arg7[%c3_103, %c0_104, %c0_105] : memref<4x4x8xf32, #tpu.memory_space<vmem>>, vector<1x4x8xf32>
    %166 = vector.shape_cast %165 : vector<1x4x8xf32> to vector<4x8xf32>
    %167 = vector.broadcast %152 : vector<4x1xf32> to vector<4x8xf32>
    %168 = arith.mulf %167, %166 : vector<4x8xf32>
    %169 = arith.truncf %155 : vector<4x4xf32> to vector<4x4xbf16>
    %170 = arith.truncf %142 : vector<4x8xf32> to vector<4x8xbf16>
    %cst_106 = arith.constant dense<0.000000e+00> : vector<4x8xf32>
    %171 = tpu.matmul %169, %170, %cst_106 {dimension_numbers = #tpu.dot_dimension_numbers<[1], [0], [0], [1], [0, 0, 1, 1], [], []>} : vector<4x4xbf16>, vector<4x8xbf16>, vector<4x8xf32> -> vector<4x8xf32>
    %172 = arith.addf %168, %171 : vector<4x8xf32>
    %c3_107 = arith.constant 3 : index
    %c0_108 = arith.constant 0 : index
    %c0_109 = arith.constant 0 : index
    %173 = vector.load %arg7[%c3_107, %c0_108, %c0_109] : memref<4x4x8xf32, #tpu.memory_space<vmem>>, vector<1x4x8xf32>
    %174 = vector.shape_cast %173 : vector<1x4x8xf32> to vector<4x8xf32>
    %175 = vector.shape_cast %172 : vector<4x8xf32> to vector<1x4x8xf32>
    tpu.vector_store %arg7[%c3_107, %c0_108, %c0_109], %175 {strides = array<i32>} : memref<4x4x8xf32, #tpu.memory_space<vmem>>, vector<1x4x8xf32>,
    %c3_110 = arith.constant 3 : index
    %c0_111 = arith.constant 0 : index
    %c0_112 = arith.constant 0 : index
    %176 = vector.load %arg5[%c3_110, %c0_111, %c0_112] : memref<4x4x1xf32, #tpu.memory_space<vmem>>, vector<1x4x1xf32>
    %177 = vector.shape_cast %176 : vector<1x4x1xf32> to vector<4x1xf32>
    %178 = vector.shape_cast %150 : vector<4x1xf32> to vector<1x4x1xf32>
    tpu.vector_store %arg5[%c3_110, %c0_111, %c0_112], %178 {strides = array<i32>} : memref<4x4x1xf32, #tpu.memory_space<vmem>>, vector<1x4x1xf32>,
    %c0_i32_113 = arith.constant 0 : i32
    %179 = arith.cmpi eq, %arg1, %c0_i32_113 : i32
    %180 = arith.extui %179 : i1 to i32
    %c0_i32_114 = arith.constant 0 : i32
    %181 = arith.cmpi ne, %180, %c0_i32_114 : i32
    scf.if %181 {
      %c0_115 = arith.constant 0 : index
      %c0_116 = arith.constant 0 : index
      %c0_117 = arith.constant 0 : index
      %182 = vector.load %arg7[%c0_115, %c0_116, %c0_117] : memref<4x4x8xf32, #tpu.memory_space<vmem>>, vector<1x4x8xf32>
      %183 = vector.shape_cast %182 : vector<1x4x8xf32> to vector<4x8xf32>
      %c0_118 = arith.constant 0 : index
      %c0_119 = arith.constant 0 : index
      %c0_120 = arith.constant 0 : index
      %184 = vector.load %arg6[%c0_118, %c0_119, %c0_120] : memref<4x4x1xf32, #tpu.memory_space<vmem>>, vector<1x4x1xf32>
      %185 = vector.shape_cast %184 : vector<1x4x1xf32> to vector<4x1xf32>
      %186 = tpu.reciprocal %185 {approx = true} : vector<4x1xf32> -> vector<4x1xf32>
      %187 = vector.broadcast %186 : vector<4x1xf32> to vector<4x8xf32>
      %188 = arith.mulf %183, %187 : vector<4x8xf32>
      %c1_121 = arith.constant 1 : index
      %c0_122 = arith.constant 0 : index
      %c0_123 = arith.constant 0 : index
      %189 = vector.load %arg7[%c1_121, %c0_122, %c0_123] : memref<4x4x8xf32, #tpu.memory_space<vmem>>, vector<1x4x8xf32>
      %190 = vector.shape_cast %189 : vector<1x4x8xf32> to vector<4x8xf32>
      %c1_124 = arith.constant 1 : index
      %c0_125 = arith.constant 0 : index
      %c0_126 = arith.constant 0 : index
      %191 = vector.load %arg6[%c1_124, %c0_125, %c0_126] : memref<4x4x1xf32, #tpu.memory_space<vmem>>, vector<1x4x1xf32>
      %192 = vector.shape_cast %191 : vector<1x4x1xf32> to vector<4x1xf32>
      %193 = tpu.reciprocal %192 {approx = true} : vector<4x1xf32> -> vector<4x1xf32>
      %194 = vector.broadcast %193 : vector<4x1xf32> to vector<4x8xf32>
      %195 = arith.mulf %190, %194 : vector<4x8xf32>
      %c2_127 = arith.constant 2 : index
      %c0_128 = arith.constant 0 : index
      %c0_129 = arith.constant 0 : index
      %196 = vector.load %arg7[%c2_127, %c0_128, %c0_129] : memref<4x4x8xf32, #tpu.memory_space<vmem>>, vector<1x4x8xf32>
      %197 = vector.shape_cast %196 : vector<1x4x8xf32> to vector<4x8xf32>
      %c2_130 = arith.constant 2 : index
      %c0_131 = arith.constant 0 : index
      %c0_132 = arith.constant 0 : index
      %198 = vector.load %arg6[%c2_130, %c0_131, %c0_132] : memref<4x4x1xf32, #tpu.memory_space<vmem>>, vector<1x4x1xf32>
      %199 = vector.shape_cast %198 : vector<1x4x1xf32> to vector<4x1xf32>
      %200 = tpu.reciprocal %199 {approx = true} : vector<4x1xf32> -> vector<4x1xf32>
      %201 = vector.broadcast %200 : vector<4x1xf32> to vector<4x8xf32>
      %202 = arith.mulf %197, %201 : vector<4x8xf32>
      %c3_133 = arith.constant 3 : index
      %c0_134 = arith.constant 0 : index
      %c0_135 = arith.constant 0 : index
      %203 = vector.load %arg7[%c3_133, %c0_134, %c0_135] : memref<4x4x8xf32, #tpu.memory_space<vmem>>, vector<1x4x8xf32>
      %204 = vector.shape_cast %203 : vector<1x4x8xf32> to vector<4x8xf32>
      %c3_136 = arith.constant 3 : index
      %c0_137 = arith.constant 0 : index
      %c0_138 = arith.constant 0 : index
      %205 = vector.load %arg6[%c3_136, %c0_137, %c0_138] : memref<4x4x1xf32, #tpu.memory_space<vmem>>, vector<1x4x1xf32>
      %206 = vector.shape_cast %205 : vector<1x4x1xf32> to vector<4x1xf32>
      %207 = tpu.reciprocal %206 {approx = true} : vector<4x1xf32> -> vector<4x1xf32>
      %208 = vector.broadcast %207 : vector<4x1xf32> to vector<4x8xf32>
      %209 = arith.mulf %204, %208 : vector<4x8xf32>
      %210 = tpu.concatenate %188, %195, %202, %209 in 1 : vector<4x8xf32>, vector<4x8xf32>, vector<4x8xf32>, vector<4x8xf32> -> vector<4x32xf32>
      %c0_139 = arith.constant 0 : index
      %c0_140 = arith.constant 0 : index
      %c0_141 = arith.constant 0 : index
      %211 = vector.load %arg4[%c0_139, %c0_140, %c0_141] : memref<1x4x32xf32, #tpu.memory_space<vmem>>, vector<1x4x32xf32>
      %212 = vector.shape_cast %211 : vector<1x4x32xf32> to vector<4x32xf32>
      %213 = vector.shape_cast %210 : vector<4x32xf32> to vector<1x4x32xf32>
      tpu.vector_store %arg4[%c0_139, %c0_140, %c0_141], %213 {strides = array<i32>} : memref<1x4x32xf32, #tpu.memory_space<vmem>>, vector<1x4x32xf32>,
    } else {
    }
    return
  }
  func.func @transform_0(%arg0: i32, %arg1: i32) -> (i32, i32, i32) {
    %c0_i32 = arith.constant 0 : i32
    %c0_i32_0 = arith.constant 0 : i32
    %c0_i32_1 = arith.constant 0 : i32
    return %arg0, %c0_i32, %c0_i32_0 : i32, i32, i32
  }
  func.func @transform_1(%arg0: i32, %arg1: i32) -> (i32, i32, i32) {
    %c0_i32 = arith.constant 0 : i32
    %c0_i32_0 = arith.constant 0 : i32
    return %arg0, %arg1, %c0_i32 : i32, i32, i32
  }
  func.func @transform_2(%arg0: i32, %arg1: i32) -> (i32, i32, i32) {
    %c0_i32 = arith.constant 0 : i32
    %c0_i32_0 = arith.constant 0 : i32
    %c0_i32_1 = arith.constant 0 : i32
    return %arg0, %c0_i32, %c0_i32_0 : i32, i32, i32
  }
}

module attributes {stable_mosaic.version = 11 : i64} {
  func.func @_linear_res_kernel(%arg0: i32, %arg1: memref<8x32xf32, #tpu.memory_space<vmem>>, %arg2: memref<8x32xf32, #tpu.memory_space<vmem>>, %arg3: memref<32x32xbf16, #tpu.memory_space<vmem>>, %arg4: memref<1x32xf32, #tpu.memory_space<vmem>>, %arg5: memref<8x32xf32, #tpu.memory_space<vmem>>) attributes {dimension_semantics = [#tpu.dimension_semantics<parallel>], iteration_bounds = array<i64: 1>, scalar_prefetch = 0 : i64, scratch_operands = 0 : i64, tpu.core_type = #tpu.core_type<tc>, window_params = [{transform_indices = @transform_0, window_bounds = array<i64: 8, 32>}, {transform_indices = @transform_1, window_bounds = array<i64: 8, 32>}, {pipeline_mode = #tpu.pipeline_mode<synchronous>, transform_indices = @transform_2, window_bounds = array<i64: 32, 32>}, {pipeline_mode = #tpu.pipeline_mode<synchronous>, transform_indices = @transform_3, window_bounds = array<i64: 1, 32>}, {transform_indices = @transform_4, window_bounds = array<i64: 8, 32>}]} {
    %c0 = arith.constant 0 : index
    %c0_0 = arith.constant 0 : index
    %0 = vector.load %arg1[%c0, %c0_0] : memref<8x32xf32, #tpu.memory_space<vmem>>, vector<8x32xf32>
    %1 = arith.truncf %0 : vector<8x32xf32> to vector<8x32xbf16>
    %c0_1 = arith.constant 0 : index
    %c0_2 = arith.constant 0 : index
    %2 = vector.load %arg3[%c0_1, %c0_2] : memref<32x32xbf16, #tpu.memory_space<vmem>>, vector<32x32xbf16>
    %cst = arith.constant dense<0.000000e+00> : vector<8x32xf32>
    %3 = tpu.matmul %1, %2, %cst {dimension_numbers = #tpu.dot_dimension_numbers<[1], [0], [0], [1], [0, 0, 1, 1], [], []>} : vector<8x32xbf16>, vector<32x32xbf16>, vector<8x32xf32> -> vector<8x32xf32>
    %c0_3 = arith.constant 0 : index
    %c0_4 = arith.constant 0 : index
    %4 = vector.load %arg4[%c0_3, %c0_4] : memref<1x32xf32, #tpu.memory_space<vmem>>, vector<1x32xf32>
    %5 = vector.broadcast %4 : vector<1x32xf32> to vector<8x32xf32>
    %6 = arith.addf %3, %5 : vector<8x32xf32>
    %c0_5 = arith.constant 0 : index
    %c0_6 = arith.constant 0 : index
    %7 = vector.load %arg2[%c0_5, %c0_6] : memref<8x32xf32, #tpu.memory_space<vmem>>, vector<8x32xf32>
    %8 = arith.addf %6, %7 : vector<8x32xf32>
    %c0_7 = arith.constant 0 : index
    %c0_8 = arith.constant 0 : index
    %9 = vector.load %arg5[%c0_7, %c0_8] : memref<8x32xf32, #tpu.memory_space<vmem>>, vector<8x32xf32>
    tpu.vector_store %arg5[%c0_7, %c0_8], %8 {strides = array<i32>} : memref<8x32xf32, #tpu.memory_space<vmem>>, vector<8x32xf32>,
    return
  }
  func.func @transform_0(%arg0: i32) -> (i32, i32) {
    %c0_i32 = arith.constant 0 : i32
    %c0_i32_0 = arith.constant 0 : i32
    return %arg0, %c0_i32 : i32, i32
  }
  func.func @transform_1(%arg0: i32) -> (i32, i32) {
    %c0_i32 = arith.constant 0 : i32
    %c0_i32_0 = arith.constant 0 : i32
    return %arg0, %c0_i32 : i32, i32
  }
  func.func @transform_2(%arg0: i32) -> (i32, i32) {
    %c0_i32 = arith.constant 0 : i32
    %c0_i32_0 = arith.constant 0 : i32
    %c0_i32_1 = arith.constant 0 : i32
    return %c0_i32, %c0_i32_0 : i32, i32
  }
  func.func @transform_3(%arg0: i32) -> (i32, i32) {
    %c0_i32 = arith.constant 0 : i32
    %c0_i32_0 = arith.constant 0 : i32
    %c0_i32_1 = arith.constant 0 : i32
    return %c0_i32, %c0_i32_0 : i32, i32
  }
  func.func @transform_4(%arg0: i32) -> (i32, i32) {
    %c0_i32 = arith.constant 0 : i32
    %c0_i32_0 = arith.constant 0 : i32
    return %arg0, %c0_i32 : i32, i32
  }
}

module attributes {stable_mosaic.version = 11 : i64} {
  func.func @_ln_linear_kernel(%arg0: i32, %arg1: memref<8x32xf32, #tpu.memory_space<vmem>>, %arg2: memref<1x32xf32, #tpu.memory_space<vmem>>, %arg3: memref<1x32xf32, #tpu.memory_space<vmem>>, %arg4: memref<32x96xbf16, #tpu.memory_space<vmem>>, %arg5: memref<1x96xf32, #tpu.memory_space<vmem>>, %arg6: memref<8x96xf32, #tpu.memory_space<vmem>>) attributes {dimension_semantics = [#tpu.dimension_semantics<parallel>], iteration_bounds = array<i64: 1>, scalar_prefetch = 0 : i64, scratch_operands = 0 : i64, tpu.core_type = #tpu.core_type<tc>, window_params = [{transform_indices = @transform_0, window_bounds = array<i64: 8, 32>}, {pipeline_mode = #tpu.pipeline_mode<synchronous>, transform_indices = @transform_1, window_bounds = array<i64: 1, 32>}, {pipeline_mode = #tpu.pipeline_mode<synchronous>, transform_indices = @transform_2, window_bounds = array<i64: 1, 32>}, {pipeline_mode = #tpu.pipeline_mode<synchronous>, transform_indices = @transform_3, window_bounds = array<i64: 32, 96>}, {pipeline_mode = #tpu.pipeline_mode<synchronous>, transform_indices = @transform_4, window_bounds = array<i64: 1, 96>}, {transform_indices = @transform_5, window_bounds = array<i64: 8, 96>}]} {
    %c0 = arith.constant 0 : index
    %c0_0 = arith.constant 0 : index
    %0 = vector.load %arg1[%c0, %c0_0] : memref<8x32xf32, #tpu.memory_space<vmem>>, vector<8x32xf32>
    %c0_1 = arith.constant 0 : index
    %c0_2 = arith.constant 0 : index
    %1 = vector.load %arg2[%c0_1, %c0_2] : memref<1x32xf32, #tpu.memory_space<vmem>>, vector<1x32xf32>
    %c0_3 = arith.constant 0 : index
    %c0_4 = arith.constant 0 : index
    %2 = vector.load %arg3[%c0_3, %c0_4] : memref<1x32xf32, #tpu.memory_space<vmem>>, vector<1x32xf32>
    %cst = arith.constant dense<0.000000e+00> : vector<8xf32>
    %3 = vector.multi_reduction <add>, %0, %cst [1] : vector<8x32xf32> to vector<8xf32>
    %4 = vector.shape_cast %3 : vector<8xf32> to vector<8x1xf32>
    %cst_5 = arith.constant 3.200000e+01 : f32
    %5 = vector.broadcast %cst_5 : f32 to vector<8x1xf32>
    %6 = arith.divf %4, %5 : vector<8x1xf32>
    %7 = vector.broadcast %6 : vector<8x1xf32> to vector<8x32xf32>
    %8 = arith.subf %0, %7 : vector<8x32xf32>
    %9 = arith.mulf %8, %8 : vector<8x32xf32>
    %cst_6 = arith.constant dense<0.000000e+00> : vector<8xf32>
    %10 = vector.multi_reduction <add>, %9, %cst_6 [1] : vector<8x32xf32> to vector<8xf32>
    %11 = vector.shape_cast %10 : vector<8xf32> to vector<8x1xf32>
    %cst_7 = arith.constant 3.200000e+01 : f32
    %12 = vector.broadcast %cst_7 : f32 to vector<8x1xf32>
    %13 = arith.divf %11, %12 : vector<8x1xf32>
    %14 = vector.broadcast %6 : vector<8x1xf32> to vector<8x32xf32>
    %15 = arith.subf %0, %14 : vector<8x32xf32>
    %cst_8 = arith.constant 9.99999974E-6 : f32
    %16 = vector.broadcast %cst_8 : f32 to vector<8x1xf32>
    %17 = arith.addf %13, %16 : vector<8x1xf32>
    %18 = math.rsqrt %17 : vector<8x1xf32>
    %19 = vector.broadcast %18 : vector<8x1xf32> to vector<8x32xf32>
    %20 = arith.mulf %15, %19 : vector<8x32xf32>
    %21 = vector.broadcast %1 : vector<1x32xf32> to vector<8x32xf32>
    %22 = arith.mulf %20, %21 : vector<8x32xf32>
    %23 = vector.broadcast %2 : vector<1x32xf32> to vector<8x32xf32>
    %24 = arith.addf %22, %23 : vector<8x32xf32>
    %25 = arith.truncf %24 : vector<8x32xf32> to vector<8x32xbf16>
    %c0_9 = arith.constant 0 : index
    %c0_10 = arith.constant 0 : index
    %26 = vector.load %arg4[%c0_9, %c0_10] : memref<32x96xbf16, #tpu.memory_space<vmem>>, vector<32x96xbf16>
    %cst_11 = arith.constant dense<0.000000e+00> : vector<8x96xf32>
    %27 = tpu.matmul %25, %26, %cst_11 {dimension_numbers = #tpu.dot_dimension_numbers<[1], [0], [0], [1], [0, 0, 1, 1], [], []>} : vector<8x32xbf16>, vector<32x96xbf16>, vector<8x96xf32> -> vector<8x96xf32>
    %c0_12 = arith.constant 0 : index
    %c0_13 = arith.constant 0 : index
    %28 = vector.load %arg5[%c0_12, %c0_13] : memref<1x96xf32, #tpu.memory_space<vmem>>, vector<1x96xf32>
    %29 = vector.broadcast %28 : vector<1x96xf32> to vector<8x96xf32>
    %30 = arith.addf %27, %29 : vector<8x96xf32>
    %c0_14 = arith.constant 0 : index
    %c0_15 = arith.constant 0 : index
    %31 = vector.load %arg6[%c0_14, %c0_15] : memref<8x96xf32, #tpu.memory_space<vmem>>, vector<8x96xf32>
    tpu.vector_store %arg6[%c0_14, %c0_15], %30 {strides = array<i32>} : memref<8x96xf32, #tpu.memory_space<vmem>>, vector<8x96xf32>,
    return
  }
  func.func @transform_0(%arg0: i32) -> (i32, i32) {
    %c0_i32 = arith.constant 0 : i32
    %c0_i32_0 = arith.constant 0 : i32
    return %arg0, %c0_i32 : i32, i32
  }
  func.func @transform_1(%arg0: i32) -> (i32, i32) {
    %c0_i32 = arith.constant 0 : i32
    %c0_i32_0 = arith.constant 0 : i32
    %c0_i32_1 = arith.constant 0 : i32
    return %c0_i32, %c0_i32_0 : i32, i32
  }
  func.func @transform_2(%arg0: i32) -> (i32, i32) {
    %c0_i32 = arith.constant 0 : i32
    %c0_i32_0 = arith.constant 0 : i32
    %c0_i32_1 = arith.constant 0 : i32
    return %c0_i32, %c0_i32_0 : i32, i32
  }
  func.func @transform_3(%arg0: i32) -> (i32, i32) {
    %c0_i32 = arith.constant 0 : i32
    %c0_i32_0 = arith.constant 0 : i32
    %c0_i32_1 = arith.constant 0 : i32
    return %c0_i32, %c0_i32_0 : i32, i32
  }
  func.func @transform_4(%arg0: i32) -> (i32, i32) {
    %c0_i32 = arith.constant 0 : i32
    %c0_i32_0 = arith.constant 0 : i32
    %c0_i32_1 = arith.constant 0 : i32
    return %c0_i32, %c0_i32_0 : i32, i32
  }
  func.func @transform_5(%arg0: i32) -> (i32, i32) {
    %c0_i32 = arith.constant 0 : i32
    %c0_i32_0 = arith.constant 0 : i32
    return %arg0, %c0_i32 : i32, i32
  }
}

module attributes {stable_mosaic.version = 11 : i64} {
  func.func @_ln_mlp_res_kernel(%arg0: i32, %arg1: memref<8x32xf32, #tpu.memory_space<vmem>>, %arg2: memref<1x32xf32, #tpu.memory_space<vmem>>, %arg3: memref<1x32xf32, #tpu.memory_space<vmem>>, %arg4: memref<32x128xbf16, #tpu.memory_space<vmem>>, %arg5: memref<1x128xf32, #tpu.memory_space<vmem>>, %arg6: memref<128x32xbf16, #tpu.memory_space<vmem>>, %arg7: memref<1x32xf32, #tpu.memory_space<vmem>>, %arg8: memref<8x32xf32, #tpu.memory_space<vmem>>) attributes {dimension_semantics = [#tpu.dimension_semantics<parallel>], iteration_bounds = array<i64: 1>, scalar_prefetch = 0 : i64, scratch_operands = 0 : i64, tpu.core_type = #tpu.core_type<tc>, window_params = [{transform_indices = @transform_0, window_bounds = array<i64: 8, 32>}, {pipeline_mode = #tpu.pipeline_mode<synchronous>, transform_indices = @transform_1, window_bounds = array<i64: 1, 32>}, {pipeline_mode = #tpu.pipeline_mode<synchronous>, transform_indices = @transform_2, window_bounds = array<i64: 1, 32>}, {pipeline_mode = #tpu.pipeline_mode<synchronous>, transform_indices = @transform_3, window_bounds = array<i64: 32, 128>}, {pipeline_mode = #tpu.pipeline_mode<synchronous>, transform_indices = @transform_4, window_bounds = array<i64: 1, 128>}, {pipeline_mode = #tpu.pipeline_mode<synchronous>, transform_indices = @transform_5, window_bounds = array<i64: 128, 32>}, {pipeline_mode = #tpu.pipeline_mode<synchronous>, transform_indices = @transform_6, window_bounds = array<i64: 1, 32>}, {transform_indices = @transform_7, window_bounds = array<i64: 8, 32>}]} {
    %c0 = arith.constant 0 : index
    %c0_0 = arith.constant 0 : index
    %0 = vector.load %arg1[%c0, %c0_0] : memref<8x32xf32, #tpu.memory_space<vmem>>, vector<8x32xf32>
    %c0_1 = arith.constant 0 : index
    %c0_2 = arith.constant 0 : index
    %1 = vector.load %arg2[%c0_1, %c0_2] : memref<1x32xf32, #tpu.memory_space<vmem>>, vector<1x32xf32>
    %c0_3 = arith.constant 0 : index
    %c0_4 = arith.constant 0 : index
    %2 = vector.load %arg3[%c0_3, %c0_4] : memref<1x32xf32, #tpu.memory_space<vmem>>, vector<1x32xf32>
    %cst = arith.constant dense<0.000000e+00> : vector<8xf32>
    %3 = vector.multi_reduction <add>, %0, %cst [1] : vector<8x32xf32> to vector<8xf32>
    %4 = vector.shape_cast %3 : vector<8xf32> to vector<8x1xf32>
    %cst_5 = arith.constant 3.200000e+01 : f32
    %5 = vector.broadcast %cst_5 : f32 to vector<8x1xf32>
    %6 = arith.divf %4, %5 : vector<8x1xf32>
    %7 = vector.broadcast %6 : vector<8x1xf32> to vector<8x32xf32>
    %8 = arith.subf %0, %7 : vector<8x32xf32>
    %9 = arith.mulf %8, %8 : vector<8x32xf32>
    %cst_6 = arith.constant dense<0.000000e+00> : vector<8xf32>
    %10 = vector.multi_reduction <add>, %9, %cst_6 [1] : vector<8x32xf32> to vector<8xf32>
    %11 = vector.shape_cast %10 : vector<8xf32> to vector<8x1xf32>
    %cst_7 = arith.constant 3.200000e+01 : f32
    %12 = vector.broadcast %cst_7 : f32 to vector<8x1xf32>
    %13 = arith.divf %11, %12 : vector<8x1xf32>
    %14 = vector.broadcast %6 : vector<8x1xf32> to vector<8x32xf32>
    %15 = arith.subf %0, %14 : vector<8x32xf32>
    %cst_8 = arith.constant 9.99999974E-6 : f32
    %16 = vector.broadcast %cst_8 : f32 to vector<8x1xf32>
    %17 = arith.addf %13, %16 : vector<8x1xf32>
    %18 = math.rsqrt %17 : vector<8x1xf32>
    %19 = vector.broadcast %18 : vector<8x1xf32> to vector<8x32xf32>
    %20 = arith.mulf %15, %19 : vector<8x32xf32>
    %21 = vector.broadcast %1 : vector<1x32xf32> to vector<8x32xf32>
    %22 = arith.mulf %20, %21 : vector<8x32xf32>
    %23 = vector.broadcast %2 : vector<1x32xf32> to vector<8x32xf32>
    %24 = arith.addf %22, %23 : vector<8x32xf32>
    %25 = arith.truncf %24 : vector<8x32xf32> to vector<8x32xbf16>
    %c0_9 = arith.constant 0 : index
    %c0_10 = arith.constant 0 : index
    %26 = vector.load %arg4[%c0_9, %c0_10] : memref<32x128xbf16, #tpu.memory_space<vmem>>, vector<32x128xbf16>
    %cst_11 = arith.constant dense<0.000000e+00> : vector<8x128xf32>
    %27 = tpu.matmul %25, %26, %cst_11 {dimension_numbers = #tpu.dot_dimension_numbers<[1], [0], [0], [1], [0, 0, 1, 1], [], []>} : vector<8x32xbf16>, vector<32x128xbf16>, vector<8x128xf32> -> vector<8x128xf32>
    %c0_12 = arith.constant 0 : index
    %c0_13 = arith.constant 0 : index
    %28 = vector.load %arg5[%c0_12, %c0_13] : memref<1x128xf32, #tpu.memory_space<vmem>>, vector<1x128xf32>
    %29 = vector.broadcast %28 : vector<1x128xf32> to vector<8x128xf32>
    %30 = arith.addf %27, %29 : vector<8x128xf32>
    %cst_14 = arith.constant 5.000000e-01 : f32
    %31 = vector.broadcast %cst_14 : f32 to vector<8x128xf32>
    %32 = arith.mulf %31, %30 : vector<8x128xf32>
    %cst_15 = arith.constant 0.707106769 : f32
    %33 = vector.broadcast %cst_15 : f32 to vector<8x128xf32>
    %34 = arith.mulf %30, %33 : vector<8x128xf32>
    %35 = math.absf %34 : vector<8x128xf32>
    %cst_16 = arith.constant 0.327591091 : f32
    %36 = vector.broadcast %cst_16 : f32 to vector<8x128xf32>
    %37 = arith.mulf %36, %35 : vector<8x128xf32>
    %cst_17 = arith.constant 1.000000e+00 : f32
    %38 = vector.broadcast %cst_17 : f32 to vector<8x128xf32>
    %39 = arith.addf %38, %37 : vector<8x128xf32>
    %cst_18 = arith.constant 1.000000e+00 : f32
    %40 = vector.broadcast %cst_18 : f32 to vector<8x128xf32>
    %41 = arith.divf %40, %39 : vector<8x128xf32>
    %cst_19 = arith.constant 1.06140542 : f32
    %42 = vector.broadcast %cst_19 : f32 to vector<8x128xf32>
    %43 = arith.mulf %42, %41 : vector<8x128xf32>
    %cst_20 = arith.constant -1.45315206 : f32
    %44 = vector.broadcast %cst_20 : f32 to vector<8x128xf32>
    %45 = arith.addf %43, %44 : vector<8x128xf32>
    %46 = arith.mulf %45, %41 : vector<8x128xf32>
    %cst_21 = arith.constant 1.42141378 : f32
    %47 = vector.broadcast %cst_21 : f32 to vector<8x128xf32>
    %48 = arith.addf %46, %47 : vector<8x128xf32>
    %49 = arith.mulf %48, %41 : vector<8x128xf32>
    %cst_22 = arith.constant -0.284496725 : f32
    %50 = vector.broadcast %cst_22 : f32 to vector<8x128xf32>
    %51 = arith.addf %49, %50 : vector<8x128xf32>
    %52 = arith.mulf %51, %41 : vector<8x128xf32>
    %cst_23 = arith.constant 0.254829586 : f32
    %53 = vector.broadcast %cst_23 : f32 to vector<8x128xf32>
    %54 = arith.addf %52, %53 : vector<8x128xf32>
    %55 = arith.mulf %54, %41 : vector<8x128xf32>
    %cst_24 = arith.constant 0.000000e+00 : f32
    %56 = vector.broadcast %cst_24 : f32 to vector<8x128xf32>
    %57 = arith.subf %56, %35 : vector<8x128xf32>
    %58 = arith.mulf %57, %35 : vector<8x128xf32>
    %59 = math.exp %58 : vector<8x128xf32>
    %60 = arith.mulf %55, %59 : vector<8x128xf32>
    %cst_25 = arith.constant 1.000000e+00 : f32
    %61 = vector.broadcast %cst_25 : f32 to vector<8x128xf32>
    %62 = arith.subf %61, %60 : vector<8x128xf32>
    %cst_26 = arith.constant 0.000000e+00 : f32
    %63 = vector.broadcast %cst_26 : f32 to vector<8x128xf32>
    %64 = arith.cmpf oge, %34, %63 : vector<8x128xf32>
    %cst_27 = arith.constant 0.000000e+00 : f32
    %65 = vector.broadcast %cst_27 : f32 to vector<8x128xf32>
    %66 = arith.subf %65, %62 : vector<8x128xf32>
    %67 = arith.select %64, %62, %66 : vector<8x128xi1>, vector<8x128xf32>
    %cst_28 = arith.constant 1.000000e+00 : f32
    %68 = vector.broadcast %cst_28 : f32 to vector<8x128xf32>
    %69 = arith.addf %68, %67 : vector<8x128xf32>
    %70 = arith.mulf %32, %69 : vector<8x128xf32>
    %71 = arith.truncf %70 : vector<8x128xf32> to vector<8x128xbf16>
    %c0_29 = arith.constant 0 : index
    %c0_30 = arith.constant 0 : index
    %72 = vector.load %arg6[%c0_29, %c0_30] : memref<128x32xbf16, #tpu.memory_space<vmem>>, vector<128x32xbf16>
    %cst_31 = arith.constant dense<0.000000e+00> : vector<8x32xf32>
    %73 = tpu.matmul %71, %72, %cst_31 {dimension_numbers = #tpu.dot_dimension_numbers<[1], [0], [0], [1], [0, 0, 1, 1], [], []>} : vector<8x128xbf16>, vector<128x32xbf16>, vector<8x32xf32> -> vector<8x32xf32>
    %c0_32 = arith.constant 0 : index
    %c0_33 = arith.constant 0 : index
    %74 = vector.load %arg7[%c0_32, %c0_33] : memref<1x32xf32, #tpu.memory_space<vmem>>, vector<1x32xf32>
    %75 = vector.broadcast %74 : vector<1x32xf32> to vector<8x32xf32>
    %76 = arith.addf %73, %75 : vector<8x32xf32>
    %77 = arith.addf %0, %76 : vector<8x32xf32>
    %c0_34 = arith.constant 0 : index
    %c0_35 = arith.constant 0 : index
    %78 = vector.load %arg8[%c0_34, %c0_35] : memref<8x32xf32, #tpu.memory_space<vmem>>, vector<8x32xf32>
    tpu.vector_store %arg8[%c0_34, %c0_35], %77 {strides = array<i32>} : memref<8x32xf32, #tpu.memory_space<vmem>>, vector<8x32xf32>,
    return
  }
  func.func @transform_0(%arg0: i32) -> (i32, i32) {
    %c0_i32 = arith.constant 0 : i32
    %c0_i32_0 = arith.constant 0 : i32
    return %arg0, %c0_i32 : i32, i32
  }
  func.func @transform_1(%arg0: i32) -> (i32, i32) {
    %c0_i32 = arith.constant 0 : i32
    %c0_i32_0 = arith.constant 0 : i32
    %c0_i32_1 = arith.constant 0 : i32
    return %c0_i32, %c0_i32_0 : i32, i32
  }
  func.func @transform_2(%arg0: i32) -> (i32, i32) {
    %c0_i32 = arith.constant 0 : i32
    %c0_i32_0 = arith.constant 0 : i32
    %c0_i32_1 = arith.constant 0 : i32
    return %c0_i32, %c0_i32_0 : i32, i32
  }
  func.func @transform_3(%arg0: i32) -> (i32, i32) {
    %c0_i32 = arith.constant 0 : i32
    %c0_i32_0 = arith.constant 0 : i32
    %c0_i32_1 = arith.constant 0 : i32
    return %c0_i32, %c0_i32_0 : i32, i32
  }
  func.func @transform_4(%arg0: i32) -> (i32, i32) {
    %c0_i32 = arith.constant 0 : i32
    %c0_i32_0 = arith.constant 0 : i32
    %c0_i32_1 = arith.constant 0 : i32
    return %c0_i32, %c0_i32_0 : i32, i32
  }
  func.func @transform_5(%arg0: i32) -> (i32, i32) {
    %c0_i32 = arith.constant 0 : i32
    %c0_i32_0 = arith.constant 0 : i32
    %c0_i32_1 = arith.constant 0 : i32
    return %c0_i32, %c0_i32_0 : i32, i32
  }
  func.func @transform_6(%arg0: i32) -> (i32, i32) {
    %c0_i32 = arith.constant 0 : i32
    %c0_i32_0 = arith.constant 0 : i32
    %c0_i32_1 = arith.constant 0 : i32
    return %c0_i32, %c0_i32_0 : i32, i32
  }
  func.func @transform_7(%arg0: i32) -> (i32, i32) {
    %c0_i32 = arith.constant 0 : i32
    %c0_i32_0 = arith.constant 0 : i32
    return %arg0, %c0_i32 : i32, i32
  }
}

module attributes {stable_mosaic.version = 11 : i64} {
  func.func @_ln_linear_kernel(%arg0: i32, %arg1: memref<24x32xf32, #tpu.memory_space<vmem>>, %arg2: memref<1x32xf32, #tpu.memory_space<vmem>>, %arg3: memref<1x32xf32, #tpu.memory_space<vmem>>, %arg4: memref<32x96xbf16, #tpu.memory_space<vmem>>, %arg5: memref<1x96xf32, #tpu.memory_space<vmem>>, %arg6: memref<24x96xf32, #tpu.memory_space<vmem>>) attributes {dimension_semantics = [#tpu.dimension_semantics<parallel>], iteration_bounds = array<i64: 1>, scalar_prefetch = 0 : i64, scratch_operands = 0 : i64, tpu.core_type = #tpu.core_type<tc>, window_params = [{transform_indices = @transform_0, window_bounds = array<i64: 24, 32>}, {pipeline_mode = #tpu.pipeline_mode<synchronous>, transform_indices = @transform_1, window_bounds = array<i64: 1, 32>}, {pipeline_mode = #tpu.pipeline_mode<synchronous>, transform_indices = @transform_2, window_bounds = array<i64: 1, 32>}, {pipeline_mode = #tpu.pipeline_mode<synchronous>, transform_indices = @transform_3, window_bounds = array<i64: 32, 96>}, {pipeline_mode = #tpu.pipeline_mode<synchronous>, transform_indices = @transform_4, window_bounds = array<i64: 1, 96>}, {transform_indices = @transform_5, window_bounds = array<i64: 24, 96>}]} {
    %c0 = arith.constant 0 : index
    %c0_0 = arith.constant 0 : index
    %0 = vector.load %arg1[%c0, %c0_0] : memref<24x32xf32, #tpu.memory_space<vmem>>, vector<24x32xf32>
    %c0_1 = arith.constant 0 : index
    %c0_2 = arith.constant 0 : index
    %1 = vector.load %arg2[%c0_1, %c0_2] : memref<1x32xf32, #tpu.memory_space<vmem>>, vector<1x32xf32>
    %c0_3 = arith.constant 0 : index
    %c0_4 = arith.constant 0 : index
    %2 = vector.load %arg3[%c0_3, %c0_4] : memref<1x32xf32, #tpu.memory_space<vmem>>, vector<1x32xf32>
    %cst = arith.constant dense<0.000000e+00> : vector<24xf32>
    %3 = vector.multi_reduction <add>, %0, %cst [1] : vector<24x32xf32> to vector<24xf32>
    %4 = vector.shape_cast %3 : vector<24xf32> to vector<24x1xf32>
    %cst_5 = arith.constant 3.200000e+01 : f32
    %5 = vector.broadcast %cst_5 : f32 to vector<24x1xf32>
    %6 = arith.divf %4, %5 : vector<24x1xf32>
    %7 = vector.broadcast %6 : vector<24x1xf32> to vector<24x32xf32>
    %8 = arith.subf %0, %7 : vector<24x32xf32>
    %9 = arith.mulf %8, %8 : vector<24x32xf32>
    %cst_6 = arith.constant dense<0.000000e+00> : vector<24xf32>
    %10 = vector.multi_reduction <add>, %9, %cst_6 [1] : vector<24x32xf32> to vector<24xf32>
    %11 = vector.shape_cast %10 : vector<24xf32> to vector<24x1xf32>
    %cst_7 = arith.constant 3.200000e+01 : f32
    %12 = vector.broadcast %cst_7 : f32 to vector<24x1xf32>
    %13 = arith.divf %11, %12 : vector<24x1xf32>
    %14 = vector.broadcast %6 : vector<24x1xf32> to vector<24x32xf32>
    %15 = arith.subf %0, %14 : vector<24x32xf32>
    %cst_8 = arith.constant 9.99999974E-6 : f32
    %16 = vector.broadcast %cst_8 : f32 to vector<24x1xf32>
    %17 = arith.addf %13, %16 : vector<24x1xf32>
    %18 = math.rsqrt %17 : vector<24x1xf32>
    %19 = vector.broadcast %18 : vector<24x1xf32> to vector<24x32xf32>
    %20 = arith.mulf %15, %19 : vector<24x32xf32>
    %21 = vector.broadcast %1 : vector<1x32xf32> to vector<24x32xf32>
    %22 = arith.mulf %20, %21 : vector<24x32xf32>
    %23 = vector.broadcast %2 : vector<1x32xf32> to vector<24x32xf32>
    %24 = arith.addf %22, %23 : vector<24x32xf32>
    %25 = arith.truncf %24 : vector<24x32xf32> to vector<24x32xbf16>
    %c0_9 = arith.constant 0 : index
    %c0_10 = arith.constant 0 : index
    %26 = vector.load %arg4[%c0_9, %c0_10] : memref<32x96xbf16, #tpu.memory_space<vmem>>, vector<32x96xbf16>
    %cst_11 = arith.constant dense<0.000000e+00> : vector<24x96xf32>
    %27 = tpu.matmul %25, %26, %cst_11 {dimension_numbers = #tpu.dot_dimension_numbers<[1], [0], [0], [1], [0, 0, 1, 1], [], []>} : vector<24x32xbf16>, vector<32x96xbf16>, vector<24x96xf32> -> vector<24x96xf32>
    %c0_12 = arith.constant 0 : index
    %c0_13 = arith.constant 0 : index
    %28 = vector.load %arg5[%c0_12, %c0_13] : memref<1x96xf32, #tpu.memory_space<vmem>>, vector<1x96xf32>
    %29 = vector.broadcast %28 : vector<1x96xf32> to vector<24x96xf32>
    %30 = arith.addf %27, %29 : vector<24x96xf32>
    %c0_14 = arith.constant 0 : index
    %c0_15 = arith.constant 0 : index
    %31 = vector.load %arg6[%c0_14, %c0_15] : memref<24x96xf32, #tpu.memory_space<vmem>>, vector<24x96xf32>
    tpu.vector_store %arg6[%c0_14, %c0_15], %30 {strides = array<i32>} : memref<24x96xf32, #tpu.memory_space<vmem>>, vector<24x96xf32>,
    return
  }
  func.func @transform_0(%arg0: i32) -> (i32, i32) {
    %c0_i32 = arith.constant 0 : i32
    %c0_i32_0 = arith.constant 0 : i32
    return %arg0, %c0_i32 : i32, i32
  }
  func.func @transform_1(%arg0: i32) -> (i32, i32) {
    %c0_i32 = arith.constant 0 : i32
    %c0_i32_0 = arith.constant 0 : i32
    %c0_i32_1 = arith.constant 0 : i32
    return %c0_i32, %c0_i32_0 : i32, i32
  }
  func.func @transform_2(%arg0: i32) -> (i32, i32) {
    %c0_i32 = arith.constant 0 : i32
    %c0_i32_0 = arith.constant 0 : i32
    %c0_i32_1 = arith.constant 0 : i32
    return %c0_i32, %c0_i32_0 : i32, i32
  }
  func.func @transform_3(%arg0: i32) -> (i32, i32) {
    %c0_i32 = arith.constant 0 : i32
    %c0_i32_0 = arith.constant 0 : i32
    %c0_i32_1 = arith.constant 0 : i32
    return %c0_i32, %c0_i32_0 : i32, i32
  }
  func.func @transform_4(%arg0: i32) -> (i32, i32) {
    %c0_i32 = arith.constant 0 : i32
    %c0_i32_0 = arith.constant 0 : i32
    %c0_i32_1 = arith.constant 0 : i32
    return %c0_i32, %c0_i32_0 : i32, i32
  }
  func.func @transform_5(%arg0: i32) -> (i32, i32) {
    %c0_i32 = arith.constant 0 : i32
    %c0_i32_0 = arith.constant 0 : i32
    return %arg0, %c0_i32 : i32, i32
  }
}

module attributes {stable_mosaic.version = 11 : i64} {
  func.func @_flash_attn_kernel(%arg0: i32, %arg1: i32, %arg2: memref<1x12x96xf32, #tpu.memory_space<vmem>>, %arg3: memref<1x12x96xf32, #tpu.memory_space<vmem>>, %arg4: memref<1x12x32xf32, #tpu.memory_space<vmem>>, %arg5: memref<4x12x1xf32, #tpu.memory_space<vmem>>, %arg6: memref<4x12x1xf32, #tpu.memory_space<vmem>>, %arg7: memref<4x12x8xf32, #tpu.memory_space<vmem>>) attributes {dimension_semantics = [#tpu.dimension_semantics<parallel>, #tpu.dimension_semantics<arbitrary>], iteration_bounds = array<i64: 2, 1>, scalar_prefetch = 0 : i64, scratch_operands = 3 : i64, tpu.core_type = #tpu.core_type<tc>, window_params = [{transform_indices = @transform_0, window_bounds = array<i64: 1, 12, 96>}, {transform_indices = @transform_1, window_bounds = array<i64: 1, 12, 96>}, {transform_indices = @transform_2, window_bounds = array<i64: 1, 12, 32>}]} {
    %c0_i32 = arith.constant 0 : i32
    %0 = arith.cmpi eq, %arg1, %c0_i32 : i32
    %1 = arith.extui %0 : i1 to i32
    %c0_i32_0 = arith.constant 0 : i32
    %2 = arith.cmpi ne, %1, %c0_i32_0 : i32
    scf.if %2 {
      %cst_115 = arith.constant 0xFF800000 : f32
      %182 = vector.broadcast %cst_115 : f32 to vector<4x12x1xf32>
      %c0_116 = arith.constant 0 : index
      %c0_117 = arith.constant 0 : index
      %c0_118 = arith.constant 0 : index
      %183 = vector.load %arg5[%c0_116, %c0_117, %c0_118] : memref<4x12x1xf32, #tpu.memory_space<vmem>>, vector<4x12x1xf32>
      tpu.vector_store %arg5[%c0_116, %c0_117, %c0_118], %182 {strides = array<i32>} : memref<4x12x1xf32, #tpu.memory_space<vmem>>, vector<4x12x1xf32>,
      %cst_119 = arith.constant 0.000000e+00 : f32
      %184 = vector.broadcast %cst_119 : f32 to vector<4x12x1xf32>
      %c0_120 = arith.constant 0 : index
      %c0_121 = arith.constant 0 : index
      %c0_122 = arith.constant 0 : index
      %185 = vector.load %arg6[%c0_120, %c0_121, %c0_122] : memref<4x12x1xf32, #tpu.memory_space<vmem>>, vector<4x12x1xf32>
      tpu.vector_store %arg6[%c0_120, %c0_121, %c0_122], %184 {strides = array<i32>} : memref<4x12x1xf32, #tpu.memory_space<vmem>>, vector<4x12x1xf32>,
      %cst_123 = arith.constant 0.000000e+00 : f32
      %186 = vector.broadcast %cst_123 : f32 to vector<4x12x8xf32>
      %c0_124 = arith.constant 0 : index
      %c0_125 = arith.constant 0 : index
      %c0_126 = arith.constant 0 : index
      %187 = vector.load %arg7[%c0_124, %c0_125, %c0_126] : memref<4x12x8xf32, #tpu.memory_space<vmem>>, vector<4x12x8xf32>
      tpu.vector_store %arg7[%c0_124, %c0_125, %c0_126], %186 {strides = array<i32>} : memref<4x12x8xf32, #tpu.memory_space<vmem>>, vector<4x12x8xf32>,
    } else {
    }
    %c0 = arith.constant 0 : index
    %c0_1 = arith.constant 0 : index
    %c0_2 = arith.constant 0 : index
    %3 = vector.load %arg2[%c0, %c0_1, %c0_2] : memref<1x12x96xf32, #tpu.memory_space<vmem>>, vector<1x12x8xf32>
    %4 = vector.shape_cast %3 : vector<1x12x8xf32> to vector<12x8xf32>
    %cst = arith.constant 0.353553385 : f32
    %5 = vector.broadcast %cst : f32 to vector<12x8xf32>
    %6 = arith.mulf %4, %5 : vector<12x8xf32>
    %c0_3 = arith.constant 0 : index
    %c0_4 = arith.constant 0 : index
    %c32 = arith.constant 32 : index
    %7 = vector.load %arg3[%c0_3, %c0_4, %c32] : memref<1x12x96xf32, #tpu.memory_space<vmem>>, vector<1x12x8xf32>
    %8 = vector.shape_cast %7 : vector<1x12x8xf32> to vector<12x8xf32>
    %c0_5 = arith.constant 0 : index
    %c0_6 = arith.constant 0 : index
    %c64 = arith.constant 64 : index
    %9 = vector.load %arg3[%c0_5, %c0_6, %c64] : memref<1x12x96xf32, #tpu.memory_space<vmem>>, vector<1x12x8xf32>
    %10 = vector.shape_cast %9 : vector<1x12x8xf32> to vector<12x8xf32>
    %11 = arith.truncf %6 : vector<12x8xf32> to vector<12x8xbf16>
    %12 = arith.truncf %8 : vector<12x8xf32> to vector<12x8xbf16>
    %cst_7 = arith.constant dense<0.000000e+00> : vector<12x12xf32>
    %13 = tpu.matmul %11, %12, %cst_7 {dimension_numbers = #tpu.dot_dimension_numbers<[1], [1], [0], [0], [0, 0, 1, 0], [], []>} : vector<12x8xbf16>, vector<12x8xbf16>, vector<12x12xf32> -> vector<12x12xf32>
    %c0_8 = arith.constant 0 : index
    %c0_9 = arith.constant 0 : index
    %c0_10 = arith.constant 0 : index
    %14 = vector.load %arg5[%c0_8, %c0_9, %c0_10] : memref<4x12x1xf32, #tpu.memory_space<vmem>>, vector<1x12x1xf32>
    %15 = vector.shape_cast %14 : vector<1x12x1xf32> to vector<12x1xf32>
    %cst_11 = arith.constant dense<0xFF800000> : vector<12xf32>
    %16 = vector.multi_reduction <maximumf>, %13, %cst_11 [1] : vector<12x12xf32> to vector<12xf32>
    %17 = vector.shape_cast %16 : vector<12xf32> to vector<12x1xf32>
    %18 = arith.maximumf %15, %17 : vector<12x1xf32>
    %19 = arith.subf %15, %18 : vector<12x1xf32>
    %20 = math.exp %19 : vector<12x1xf32>
    %21 = vector.broadcast %18 : vector<12x1xf32> to vector<12x12xf32>
    %22 = arith.subf %13, %21 : vector<12x12xf32>
    %23 = math.exp %22 : vector<12x12xf32>
    %c0_12 = arith.constant 0 : index
    %c0_13 = arith.constant 0 : index
    %c0_14 = arith.constant 0 : index
    %24 = vector.load %arg6[%c0_12, %c0_13, %c0_14] : memref<4x12x1xf32, #tpu.memory_space<vmem>>, vector<1x12x1xf32>
    %25 = vector.shape_cast %24 : vector<1x12x1xf32> to vector<12x1xf32>
    %26 = arith.mulf %20, %25 : vector<12x1xf32>
    %cst_15 = arith.constant dense<0.000000e+00> : vector<12xf32>
    %27 = vector.multi_reduction <add>, %23, %cst_15 [1] : vector<12x12xf32> to vector<12xf32>
    %28 = vector.shape_cast %27 : vector<12xf32> to vector<12x1xf32>
    %29 = arith.addf %26, %28 : vector<12x1xf32>
    %c0_16 = arith.constant 0 : index
    %c0_17 = arith.constant 0 : index
    %c0_18 = arith.constant 0 : index
    %30 = vector.load %arg6[%c0_16, %c0_17, %c0_18] : memref<4x12x1xf32, #tpu.memory_space<vmem>>, vector<1x12x1xf32>
    %31 = vector.shape_cast %30 : vector<1x12x1xf32> to vector<12x1xf32>
    %32 = vector.shape_cast %29 : vector<12x1xf32> to vector<1x12x1xf32>
    tpu.vector_store %arg6[%c0_16, %c0_17, %c0_18], %32 {strides = array<i32>} : memref<4x12x1xf32, #tpu.memory_space<vmem>>, vector<1x12x1xf32>,
    %c0_19 = arith.constant 0 : index
    %c0_20 = arith.constant 0 : index
    %c0_21 = arith.constant 0 : index
    %33 = vector.load %arg7[%c0_19, %c0_20, %c0_21] : memref<4x12x8xf32, #tpu.memory_space<vmem>>, vector<1x12x8xf32>
    %34 = vector.shape_cast %33 : vector<1x12x8xf32> to vector<12x8xf32>
    %35 = vector.broadcast %20 : vector<12x1xf32> to vector<12x8xf32>
    %36 = arith.mulf %35, %34 : vector<12x8xf32>
    %37 = arith.truncf %23 : vector<12x12xf32> to vector<12x12xbf16>
    %38 = arith.truncf %10 : vector<12x8xf32> to vector<12x8xbf16>
    %cst_22 = arith.constant dense<0.000000e+00> : vector<12x8xf32>
    %39 = tpu.matmul %37, %38, %cst_22 {dimension_numbers = #tpu.dot_dimension_numbers<[1], [0], [0], [1], [0, 0, 1, 1], [], []>} : vector<12x12xbf16>, vector<12x8xbf16>, vector<12x8xf32> -> vector<12x8xf32>
    %40 = arith.addf %36, %39 : vector<12x8xf32>
    %c0_23 = arith.constant 0 : index
    %c0_24 = arith.constant 0 : index
    %c0_25 = arith.constant 0 : index
    %41 = vector.load %arg7[%c0_23, %c0_24, %c0_25] : memref<4x12x8xf32, #tpu.memory_space<vmem>>, vector<1x12x8xf32>
    %42 = vector.shape_cast %41 : vector<1x12x8xf32> to vector<12x8xf32>
    %43 = vector.shape_cast %40 : vector<12x8xf32> to vector<1x12x8xf32>
    tpu.vector_store %arg7[%c0_23, %c0_24, %c0_25], %43 {strides = array<i32>} : memref<4x12x8xf32, #tpu.memory_space<vmem>>, vector<1x12x8xf32>,
    %c0_26 = arith.constant 0 : index
    %c0_27 = arith.constant 0 : index
    %c0_28 = arith.constant 0 : index
    %44 = vector.load %arg5[%c0_26, %c0_27, %c0_28] : memref<4x12x1xf32, #tpu.memory_space<vmem>>, vector<1x12x1xf32>
    %45 = vector.shape_cast %44 : vector<1x12x1xf32> to vector<12x1xf32>
    %46 = vector.shape_cast %18 : vector<12x1xf32> to vector<1x12x1xf32>
    tpu.vector_store %arg5[%c0_26, %c0_27, %c0_28], %46 {strides = array<i32>} : memref<4x12x1xf32, #tpu.memory_space<vmem>>, vector<1x12x1xf32>,
    %c0_29 = arith.constant 0 : index
    %c0_30 = arith.constant 0 : index
    %c8 = arith.constant 8 : index
    %47 = vector.load %arg2[%c0_29, %c0_30, %c8] : memref<1x12x96xf32, #tpu.memory_space<vmem>>, vector<1x12x8xf32>
    %48 = vector.shape_cast %47 : vector<1x12x8xf32> to vector<12x8xf32>
    %cst_31 = arith.constant 0.353553385 : f32
    %49 = vector.broadcast %cst_31 : f32 to vector<12x8xf32>
    %50 = arith.mulf %48, %49 : vector<12x8xf32>
    %c0_32 = arith.constant 0 : index
    %c0_33 = arith.constant 0 : index
    %c40 = arith.constant 40 : index
    %51 = vector.load %arg3[%c0_32, %c0_33, %c40] : memref<1x12x96xf32, #tpu.memory_space<vmem>>, vector<1x12x8xf32>
    %52 = vector.shape_cast %51 : vector<1x12x8xf32> to vector<12x8xf32>
    %c0_34 = arith.constant 0 : index
    %c0_35 = arith.constant 0 : index
    %c72 = arith.constant 72 : index
    %53 = vector.load %arg3[%c0_34, %c0_35, %c72] : memref<1x12x96xf32, #tpu.memory_space<vmem>>, vector<1x12x8xf32>
    %54 = vector.shape_cast %53 : vector<1x12x8xf32> to vector<12x8xf32>
    %55 = arith.truncf %50 : vector<12x8xf32> to vector<12x8xbf16>
    %56 = arith.truncf %52 : vector<12x8xf32> to vector<12x8xbf16>
    %cst_36 = arith.constant dense<0.000000e+00> : vector<12x12xf32>
    %57 = tpu.matmul %55, %56, %cst_36 {dimension_numbers = #tpu.dot_dimension_numbers<[1], [1], [0], [0], [0, 0, 1, 0], [], []>} : vector<12x8xbf16>, vector<12x8xbf16>, vector<12x12xf32> -> vector<12x12xf32>
    %c1 = arith.constant 1 : index
    %c0_37 = arith.constant 0 : index
    %c0_38 = arith.constant 0 : index
    %58 = vector.load %arg5[%c1, %c0_37, %c0_38] : memref<4x12x1xf32, #tpu.memory_space<vmem>>, vector<1x12x1xf32>
    %59 = vector.shape_cast %58 : vector<1x12x1xf32> to vector<12x1xf32>
    %cst_39 = arith.constant dense<0xFF800000> : vector<12xf32>
    %60 = vector.multi_reduction <maximumf>, %57, %cst_39 [1] : vector<12x12xf32> to vector<12xf32>
    %61 = vector.shape_cast %60 : vector<12xf32> to vector<12x1xf32>
    %62 = arith.maximumf %59, %61 : vector<12x1xf32>
    %63 = arith.subf %59, %62 : vector<12x1xf32>
    %64 = math.exp %63 : vector<12x1xf32>
    %65 = vector.broadcast %62 : vector<12x1xf32> to vector<12x12xf32>
    %66 = arith.subf %57, %65 : vector<12x12xf32>
    %67 = math.exp %66 : vector<12x12xf32>
    %c1_40 = arith.constant 1 : index
    %c0_41 = arith.constant 0 : index
    %c0_42 = arith.constant 0 : index
    %68 = vector.load %arg6[%c1_40, %c0_41, %c0_42] : memref<4x12x1xf32, #tpu.memory_space<vmem>>, vector<1x12x1xf32>
    %69 = vector.shape_cast %68 : vector<1x12x1xf32> to vector<12x1xf32>
    %70 = arith.mulf %64, %69 : vector<12x1xf32>
    %cst_43 = arith.constant dense<0.000000e+00> : vector<12xf32>
    %71 = vector.multi_reduction <add>, %67, %cst_43 [1] : vector<12x12xf32> to vector<12xf32>
    %72 = vector.shape_cast %71 : vector<12xf32> to vector<12x1xf32>
    %73 = arith.addf %70, %72 : vector<12x1xf32>
    %c1_44 = arith.constant 1 : index
    %c0_45 = arith.constant 0 : index
    %c0_46 = arith.constant 0 : index
    %74 = vector.load %arg6[%c1_44, %c0_45, %c0_46] : memref<4x12x1xf32, #tpu.memory_space<vmem>>, vector<1x12x1xf32>
    %75 = vector.shape_cast %74 : vector<1x12x1xf32> to vector<12x1xf32>
    %76 = vector.shape_cast %73 : vector<12x1xf32> to vector<1x12x1xf32>
    tpu.vector_store %arg6[%c1_44, %c0_45, %c0_46], %76 {strides = array<i32>} : memref<4x12x1xf32, #tpu.memory_space<vmem>>, vector<1x12x1xf32>,
    %c1_47 = arith.constant 1 : index
    %c0_48 = arith.constant 0 : index
    %c0_49 = arith.constant 0 : index
    %77 = vector.load %arg7[%c1_47, %c0_48, %c0_49] : memref<4x12x8xf32, #tpu.memory_space<vmem>>, vector<1x12x8xf32>
    %78 = vector.shape_cast %77 : vector<1x12x8xf32> to vector<12x8xf32>
    %79 = vector.broadcast %64 : vector<12x1xf32> to vector<12x8xf32>
    %80 = arith.mulf %79, %78 : vector<12x8xf32>
    %81 = arith.truncf %67 : vector<12x12xf32> to vector<12x12xbf16>
    %82 = arith.truncf %54 : vector<12x8xf32> to vector<12x8xbf16>
    %cst_50 = arith.constant dense<0.000000e+00> : vector<12x8xf32>
    %83 = tpu.matmul %81, %82, %cst_50 {dimension_numbers = #tpu.dot_dimension_numbers<[1], [0], [0], [1], [0, 0, 1, 1], [], []>} : vector<12x12xbf16>, vector<12x8xbf16>, vector<12x8xf32> -> vector<12x8xf32>
    %84 = arith.addf %80, %83 : vector<12x8xf32>
    %c1_51 = arith.constant 1 : index
    %c0_52 = arith.constant 0 : index
    %c0_53 = arith.constant 0 : index
    %85 = vector.load %arg7[%c1_51, %c0_52, %c0_53] : memref<4x12x8xf32, #tpu.memory_space<vmem>>, vector<1x12x8xf32>
    %86 = vector.shape_cast %85 : vector<1x12x8xf32> to vector<12x8xf32>
    %87 = vector.shape_cast %84 : vector<12x8xf32> to vector<1x12x8xf32>
    tpu.vector_store %arg7[%c1_51, %c0_52, %c0_53], %87 {strides = array<i32>} : memref<4x12x8xf32, #tpu.memory_space<vmem>>, vector<1x12x8xf32>,
    %c1_54 = arith.constant 1 : index
    %c0_55 = arith.constant 0 : index
    %c0_56 = arith.constant 0 : index
    %88 = vector.load %arg5[%c1_54, %c0_55, %c0_56] : memref<4x12x1xf32, #tpu.memory_space<vmem>>, vector<1x12x1xf32>
    %89 = vector.shape_cast %88 : vector<1x12x1xf32> to vector<12x1xf32>
    %90 = vector.shape_cast %62 : vector<12x1xf32> to vector<1x12x1xf32>
    tpu.vector_store %arg5[%c1_54, %c0_55, %c0_56], %90 {strides = array<i32>} : memref<4x12x1xf32, #tpu.memory_space<vmem>>, vector<1x12x1xf32>,
    %c0_57 = arith.constant 0 : index
    %c0_58 = arith.constant 0 : index
    %c16 = arith.constant 16 : index
    %91 = vector.load %arg2[%c0_57, %c0_58, %c16] : memref<1x12x96xf32, #tpu.memory_space<vmem>>, vector<1x12x8xf32>
    %92 = vector.shape_cast %91 : vector<1x12x8xf32> to vector<12x8xf32>
    %cst_59 = arith.constant 0.353553385 : f32
    %93 = vector.broadcast %cst_59 : f32 to vector<12x8xf32>
    %94 = arith.mulf %92, %93 : vector<12x8xf32>
    %c0_60 = arith.constant 0 : index
    %c0_61 = arith.constant 0 : index
    %c48 = arith.constant 48 : index
    %95 = vector.load %arg3[%c0_60, %c0_61, %c48] : memref<1x12x96xf32, #tpu.memory_space<vmem>>, vector<1x12x8xf32>
    %96 = vector.shape_cast %95 : vector<1x12x8xf32> to vector<12x8xf32>
    %c0_62 = arith.constant 0 : index
    %c0_63 = arith.constant 0 : index
    %c80 = arith.constant 80 : index
    %97 = vector.load %arg3[%c0_62, %c0_63, %c80] : memref<1x12x96xf32, #tpu.memory_space<vmem>>, vector<1x12x8xf32>
    %98 = vector.shape_cast %97 : vector<1x12x8xf32> to vector<12x8xf32>
    %99 = arith.truncf %94 : vector<12x8xf32> to vector<12x8xbf16>
    %100 = arith.truncf %96 : vector<12x8xf32> to vector<12x8xbf16>
    %cst_64 = arith.constant dense<0.000000e+00> : vector<12x12xf32>
    %101 = tpu.matmul %99, %100, %cst_64 {dimension_numbers = #tpu.dot_dimension_numbers<[1], [1], [0], [0], [0, 0, 1, 0], [], []>} : vector<12x8xbf16>, vector<12x8xbf16>, vector<12x12xf32> -> vector<12x12xf32>
    %c2 = arith.constant 2 : index
    %c0_65 = arith.constant 0 : index
    %c0_66 = arith.constant 0 : index
    %102 = vector.load %arg5[%c2, %c0_65, %c0_66] : memref<4x12x1xf32, #tpu.memory_space<vmem>>, vector<1x12x1xf32>
    %103 = vector.shape_cast %102 : vector<1x12x1xf32> to vector<12x1xf32>
    %cst_67 = arith.constant dense<0xFF800000> : vector<12xf32>
    %104 = vector.multi_reduction <maximumf>, %101, %cst_67 [1] : vector<12x12xf32> to vector<12xf32>
    %105 = vector.shape_cast %104 : vector<12xf32> to vector<12x1xf32>
    %106 = arith.maximumf %103, %105 : vector<12x1xf32>
    %107 = arith.subf %103, %106 : vector<12x1xf32>
    %108 = math.exp %107 : vector<12x1xf32>
    %109 = vector.broadcast %106 : vector<12x1xf32> to vector<12x12xf32>
    %110 = arith.subf %101, %109 : vector<12x12xf32>
    %111 = math.exp %110 : vector<12x12xf32>
    %c2_68 = arith.constant 2 : index
    %c0_69 = arith.constant 0 : index
    %c0_70 = arith.constant 0 : index
    %112 = vector.load %arg6[%c2_68, %c0_69, %c0_70] : memref<4x12x1xf32, #tpu.memory_space<vmem>>, vector<1x12x1xf32>
    %113 = vector.shape_cast %112 : vector<1x12x1xf32> to vector<12x1xf32>
    %114 = arith.mulf %108, %113 : vector<12x1xf32>
    %cst_71 = arith.constant dense<0.000000e+00> : vector<12xf32>
    %115 = vector.multi_reduction <add>, %111, %cst_71 [1] : vector<12x12xf32> to vector<12xf32>
    %116 = vector.shape_cast %115 : vector<12xf32> to vector<12x1xf32>
    %117 = arith.addf %114, %116 : vector<12x1xf32>
    %c2_72 = arith.constant 2 : index
    %c0_73 = arith.constant 0 : index
    %c0_74 = arith.constant 0 : index
    %118 = vector.load %arg6[%c2_72, %c0_73, %c0_74] : memref<4x12x1xf32, #tpu.memory_space<vmem>>, vector<1x12x1xf32>
    %119 = vector.shape_cast %118 : vector<1x12x1xf32> to vector<12x1xf32>
    %120 = vector.shape_cast %117 : vector<12x1xf32> to vector<1x12x1xf32>
    tpu.vector_store %arg6[%c2_72, %c0_73, %c0_74], %120 {strides = array<i32>} : memref<4x12x1xf32, #tpu.memory_space<vmem>>, vector<1x12x1xf32>,
    %c2_75 = arith.constant 2 : index
    %c0_76 = arith.constant 0 : index
    %c0_77 = arith.constant 0 : index
    %121 = vector.load %arg7[%c2_75, %c0_76, %c0_77] : memref<4x12x8xf32, #tpu.memory_space<vmem>>, vector<1x12x8xf32>
    %122 = vector.shape_cast %121 : vector<1x12x8xf32> to vector<12x8xf32>
    %123 = vector.broadcast %108 : vector<12x1xf32> to vector<12x8xf32>
    %124 = arith.mulf %123, %122 : vector<12x8xf32>
    %125 = arith.truncf %111 : vector<12x12xf32> to vector<12x12xbf16>
    %126 = arith.truncf %98 : vector<12x8xf32> to vector<12x8xbf16>
    %cst_78 = arith.constant dense<0.000000e+00> : vector<12x8xf32>
    %127 = tpu.matmul %125, %126, %cst_78 {dimension_numbers = #tpu.dot_dimension_numbers<[1], [0], [0], [1], [0, 0, 1, 1], [], []>} : vector<12x12xbf16>, vector<12x8xbf16>, vector<12x8xf32> -> vector<12x8xf32>
    %128 = arith.addf %124, %127 : vector<12x8xf32>
    %c2_79 = arith.constant 2 : index
    %c0_80 = arith.constant 0 : index
    %c0_81 = arith.constant 0 : index
    %129 = vector.load %arg7[%c2_79, %c0_80, %c0_81] : memref<4x12x8xf32, #tpu.memory_space<vmem>>, vector<1x12x8xf32>
    %130 = vector.shape_cast %129 : vector<1x12x8xf32> to vector<12x8xf32>
    %131 = vector.shape_cast %128 : vector<12x8xf32> to vector<1x12x8xf32>
    tpu.vector_store %arg7[%c2_79, %c0_80, %c0_81], %131 {strides = array<i32>} : memref<4x12x8xf32, #tpu.memory_space<vmem>>, vector<1x12x8xf32>,
    %c2_82 = arith.constant 2 : index
    %c0_83 = arith.constant 0 : index
    %c0_84 = arith.constant 0 : index
    %132 = vector.load %arg5[%c2_82, %c0_83, %c0_84] : memref<4x12x1xf32, #tpu.memory_space<vmem>>, vector<1x12x1xf32>
    %133 = vector.shape_cast %132 : vector<1x12x1xf32> to vector<12x1xf32>
    %134 = vector.shape_cast %106 : vector<12x1xf32> to vector<1x12x1xf32>
    tpu.vector_store %arg5[%c2_82, %c0_83, %c0_84], %134 {strides = array<i32>} : memref<4x12x1xf32, #tpu.memory_space<vmem>>, vector<1x12x1xf32>,
    %c0_85 = arith.constant 0 : index
    %c0_86 = arith.constant 0 : index
    %c24 = arith.constant 24 : index
    %135 = vector.load %arg2[%c0_85, %c0_86, %c24] : memref<1x12x96xf32, #tpu.memory_space<vmem>>, vector<1x12x8xf32>
    %136 = vector.shape_cast %135 : vector<1x12x8xf32> to vector<12x8xf32>
    %cst_87 = arith.constant 0.353553385 : f32
    %137 = vector.broadcast %cst_87 : f32 to vector<12x8xf32>
    %138 = arith.mulf %136, %137 : vector<12x8xf32>
    %c0_88 = arith.constant 0 : index
    %c0_89 = arith.constant 0 : index
    %c56 = arith.constant 56 : index
    %139 = vector.load %arg3[%c0_88, %c0_89, %c56] : memref<1x12x96xf32, #tpu.memory_space<vmem>>, vector<1x12x8xf32>
    %140 = vector.shape_cast %139 : vector<1x12x8xf32> to vector<12x8xf32>
    %c0_90 = arith.constant 0 : index
    %c0_91 = arith.constant 0 : index
    %c88 = arith.constant 88 : index
    %141 = vector.load %arg3[%c0_90, %c0_91, %c88] : memref<1x12x96xf32, #tpu.memory_space<vmem>>, vector<1x12x8xf32>
    %142 = vector.shape_cast %141 : vector<1x12x8xf32> to vector<12x8xf32>
    %143 = arith.truncf %138 : vector<12x8xf32> to vector<12x8xbf16>
    %144 = arith.truncf %140 : vector<12x8xf32> to vector<12x8xbf16>
    %cst_92 = arith.constant dense<0.000000e+00> : vector<12x12xf32>
    %145 = tpu.matmul %143, %144, %cst_92 {dimension_numbers = #tpu.dot_dimension_numbers<[1], [1], [0], [0], [0, 0, 1, 0], [], []>} : vector<12x8xbf16>, vector<12x8xbf16>, vector<12x12xf32> -> vector<12x12xf32>
    %c3 = arith.constant 3 : index
    %c0_93 = arith.constant 0 : index
    %c0_94 = arith.constant 0 : index
    %146 = vector.load %arg5[%c3, %c0_93, %c0_94] : memref<4x12x1xf32, #tpu.memory_space<vmem>>, vector<1x12x1xf32>
    %147 = vector.shape_cast %146 : vector<1x12x1xf32> to vector<12x1xf32>
    %cst_95 = arith.constant dense<0xFF800000> : vector<12xf32>
    %148 = vector.multi_reduction <maximumf>, %145, %cst_95 [1] : vector<12x12xf32> to vector<12xf32>
    %149 = vector.shape_cast %148 : vector<12xf32> to vector<12x1xf32>
    %150 = arith.maximumf %147, %149 : vector<12x1xf32>
    %151 = arith.subf %147, %150 : vector<12x1xf32>
    %152 = math.exp %151 : vector<12x1xf32>
    %153 = vector.broadcast %150 : vector<12x1xf32> to vector<12x12xf32>
    %154 = arith.subf %145, %153 : vector<12x12xf32>
    %155 = math.exp %154 : vector<12x12xf32>
    %c3_96 = arith.constant 3 : index
    %c0_97 = arith.constant 0 : index
    %c0_98 = arith.constant 0 : index
    %156 = vector.load %arg6[%c3_96, %c0_97, %c0_98] : memref<4x12x1xf32, #tpu.memory_space<vmem>>, vector<1x12x1xf32>
    %157 = vector.shape_cast %156 : vector<1x12x1xf32> to vector<12x1xf32>
    %158 = arith.mulf %152, %157 : vector<12x1xf32>
    %cst_99 = arith.constant dense<0.000000e+00> : vector<12xf32>
    %159 = vector.multi_reduction <add>, %155, %cst_99 [1] : vector<12x12xf32> to vector<12xf32>
    %160 = vector.shape_cast %159 : vector<12xf32> to vector<12x1xf32>
    %161 = arith.addf %158, %160 : vector<12x1xf32>
    %c3_100 = arith.constant 3 : index
    %c0_101 = arith.constant 0 : index
    %c0_102 = arith.constant 0 : index
    %162 = vector.load %arg6[%c3_100, %c0_101, %c0_102] : memref<4x12x1xf32, #tpu.memory_space<vmem>>, vector<1x12x1xf32>
    %163 = vector.shape_cast %162 : vector<1x12x1xf32> to vector<12x1xf32>
    %164 = vector.shape_cast %161 : vector<12x1xf32> to vector<1x12x1xf32>
    tpu.vector_store %arg6[%c3_100, %c0_101, %c0_102], %164 {strides = array<i32>} : memref<4x12x1xf32, #tpu.memory_space<vmem>>, vector<1x12x1xf32>,
    %c3_103 = arith.constant 3 : index
    %c0_104 = arith.constant 0 : index
    %c0_105 = arith.constant 0 : index
    %165 = vector.load %arg7[%c3_103, %c0_104, %c0_105] : memref<4x12x8xf32, #tpu.memory_space<vmem>>, vector<1x12x8xf32>
    %166 = vector.shape_cast %165 : vector<1x12x8xf32> to vector<12x8xf32>
    %167 = vector.broadcast %152 : vector<12x1xf32> to vector<12x8xf32>
    %168 = arith.mulf %167, %166 : vector<12x8xf32>
    %169 = arith.truncf %155 : vector<12x12xf32> to vector<12x12xbf16>
    %170 = arith.truncf %142 : vector<12x8xf32> to vector<12x8xbf16>
    %cst_106 = arith.constant dense<0.000000e+00> : vector<12x8xf32>
    %171 = tpu.matmul %169, %170, %cst_106 {dimension_numbers = #tpu.dot_dimension_numbers<[1], [0], [0], [1], [0, 0, 1, 1], [], []>} : vector<12x12xbf16>, vector<12x8xbf16>, vector<12x8xf32> -> vector<12x8xf32>
    %172 = arith.addf %168, %171 : vector<12x8xf32>
    %c3_107 = arith.constant 3 : index
    %c0_108 = arith.constant 0 : index
    %c0_109 = arith.constant 0 : index
    %173 = vector.load %arg7[%c3_107, %c0_108, %c0_109] : memref<4x12x8xf32, #tpu.memory_space<vmem>>, vector<1x12x8xf32>
    %174 = vector.shape_cast %173 : vector<1x12x8xf32> to vector<12x8xf32>
    %175 = vector.shape_cast %172 : vector<12x8xf32> to vector<1x12x8xf32>
    tpu.vector_store %arg7[%c3_107, %c0_108, %c0_109], %175 {strides = array<i32>} : memref<4x12x8xf32, #tpu.memory_space<vmem>>, vector<1x12x8xf32>,
    %c3_110 = arith.constant 3 : index
    %c0_111 = arith.constant 0 : index
    %c0_112 = arith.constant 0 : index
    %176 = vector.load %arg5[%c3_110, %c0_111, %c0_112] : memref<4x12x1xf32, #tpu.memory_space<vmem>>, vector<1x12x1xf32>
    %177 = vector.shape_cast %176 : vector<1x12x1xf32> to vector<12x1xf32>
    %178 = vector.shape_cast %150 : vector<12x1xf32> to vector<1x12x1xf32>
    tpu.vector_store %arg5[%c3_110, %c0_111, %c0_112], %178 {strides = array<i32>} : memref<4x12x1xf32, #tpu.memory_space<vmem>>, vector<1x12x1xf32>,
    %c0_i32_113 = arith.constant 0 : i32
    %179 = arith.cmpi eq, %arg1, %c0_i32_113 : i32
    %180 = arith.extui %179 : i1 to i32
    %c0_i32_114 = arith.constant 0 : i32
    %181 = arith.cmpi ne, %180, %c0_i32_114 : i32
    scf.if %181 {
      %c0_115 = arith.constant 0 : index
      %c0_116 = arith.constant 0 : index
      %c0_117 = arith.constant 0 : index
      %182 = vector.load %arg7[%c0_115, %c0_116, %c0_117] : memref<4x12x8xf32, #tpu.memory_space<vmem>>, vector<1x12x8xf32>
      %183 = vector.shape_cast %182 : vector<1x12x8xf32> to vector<12x8xf32>
      %c0_118 = arith.constant 0 : index
      %c0_119 = arith.constant 0 : index
      %c0_120 = arith.constant 0 : index
      %184 = vector.load %arg6[%c0_118, %c0_119, %c0_120] : memref<4x12x1xf32, #tpu.memory_space<vmem>>, vector<1x12x1xf32>
      %185 = vector.shape_cast %184 : vector<1x12x1xf32> to vector<12x1xf32>
      %186 = tpu.reciprocal %185 {approx = true} : vector<12x1xf32> -> vector<12x1xf32>
      %187 = vector.broadcast %186 : vector<12x1xf32> to vector<12x8xf32>
      %188 = arith.mulf %183, %187 : vector<12x8xf32>
      %c1_121 = arith.constant 1 : index
      %c0_122 = arith.constant 0 : index
      %c0_123 = arith.constant 0 : index
      %189 = vector.load %arg7[%c1_121, %c0_122, %c0_123] : memref<4x12x8xf32, #tpu.memory_space<vmem>>, vector<1x12x8xf32>
      %190 = vector.shape_cast %189 : vector<1x12x8xf32> to vector<12x8xf32>
      %c1_124 = arith.constant 1 : index
      %c0_125 = arith.constant 0 : index
      %c0_126 = arith.constant 0 : index
      %191 = vector.load %arg6[%c1_124, %c0_125, %c0_126] : memref<4x12x1xf32, #tpu.memory_space<vmem>>, vector<1x12x1xf32>
      %192 = vector.shape_cast %191 : vector<1x12x1xf32> to vector<12x1xf32>
      %193 = tpu.reciprocal %192 {approx = true} : vector<12x1xf32> -> vector<12x1xf32>
      %194 = vector.broadcast %193 : vector<12x1xf32> to vector<12x8xf32>
      %195 = arith.mulf %190, %194 : vector<12x8xf32>
      %c2_127 = arith.constant 2 : index
      %c0_128 = arith.constant 0 : index
      %c0_129 = arith.constant 0 : index
      %196 = vector.load %arg7[%c2_127, %c0_128, %c0_129] : memref<4x12x8xf32, #tpu.memory_space<vmem>>, vector<1x12x8xf32>
      %197 = vector.shape_cast %196 : vector<1x12x8xf32> to vector<12x8xf32>
      %c2_130 = arith.constant 2 : index
      %c0_131 = arith.constant 0 : index
      %c0_132 = arith.constant 0 : index
      %198 = vector.load %arg6[%c2_130, %c0_131, %c0_132] : memref<4x12x1xf32, #tpu.memory_space<vmem>>, vector<1x12x1xf32>
      %199 = vector.shape_cast %198 : vector<1x12x1xf32> to vector<12x1xf32>
      %200 = tpu.reciprocal %199 {approx = true} : vector<12x1xf32> -> vector<12x1xf32>
      %201 = vector.broadcast %200 : vector<12x1xf32> to vector<12x8xf32>
      %202 = arith.mulf %197, %201 : vector<12x8xf32>
      %c3_133 = arith.constant 3 : index
      %c0_134 = arith.constant 0 : index
      %c0_135 = arith.constant 0 : index
      %203 = vector.load %arg7[%c3_133, %c0_134, %c0_135] : memref<4x12x8xf32, #tpu.memory_space<vmem>>, vector<1x12x8xf32>
      %204 = vector.shape_cast %203 : vector<1x12x8xf32> to vector<12x8xf32>
      %c3_136 = arith.constant 3 : index
      %c0_137 = arith.constant 0 : index
      %c0_138 = arith.constant 0 : index
      %205 = vector.load %arg6[%c3_136, %c0_137, %c0_138] : memref<4x12x1xf32, #tpu.memory_space<vmem>>, vector<1x12x1xf32>
      %206 = vector.shape_cast %205 : vector<1x12x1xf32> to vector<12x1xf32>
      %207 = tpu.reciprocal %206 {approx = true} : vector<12x1xf32> -> vector<12x1xf32>
      %208 = vector.broadcast %207 : vector<12x1xf32> to vector<12x8xf32>
      %209 = arith.mulf %204, %208 : vector<12x8xf32>
      %210 = tpu.concatenate %188, %195, %202, %209 in 1 : vector<12x8xf32>, vector<12x8xf32>, vector<12x8xf32>, vector<12x8xf32> -> vector<12x32xf32>
      %c0_139 = arith.constant 0 : index
      %c0_140 = arith.constant 0 : index
      %c0_141 = arith.constant 0 : index
      %211 = vector.load %arg4[%c0_139, %c0_140, %c0_141] : memref<1x12x32xf32, #tpu.memory_space<vmem>>, vector<1x12x32xf32>
      %212 = vector.shape_cast %211 : vector<1x12x32xf32> to vector<12x32xf32>
      %213 = vector.shape_cast %210 : vector<12x32xf32> to vector<1x12x32xf32>
      tpu.vector_store %arg4[%c0_139, %c0_140, %c0_141], %213 {strides = array<i32>} : memref<1x12x32xf32, #tpu.memory_space<vmem>>, vector<1x12x32xf32>,
    } else {
    }
    return
  }
  func.func @transform_0(%arg0: i32, %arg1: i32) -> (i32, i32, i32) {
    %c0_i32 = arith.constant 0 : i32
    %c0_i32_0 = arith.constant 0 : i32
    %c0_i32_1 = arith.constant 0 : i32
    return %arg0, %c0_i32, %c0_i32_0 : i32, i32, i32
  }
  func.func @transform_1(%arg0: i32, %arg1: i32) -> (i32, i32, i32) {
    %c0_i32 = arith.constant 0 : i32
    %c0_i32_0 = arith.constant 0 : i32
    return %arg0, %arg1, %c0_i32 : i32, i32, i32
  }
  func.func @transform_2(%arg0: i32, %arg1: i32) -> (i32, i32, i32) {
    %c0_i32 = arith.constant 0 : i32
    %c0_i32_0 = arith.constant 0 : i32
    %c0_i32_1 = arith.constant 0 : i32
    return %arg0, %c0_i32, %c0_i32_0 : i32, i32, i32
  }
}

module attributes {stable_mosaic.version = 11 : i64} {
  func.func @_linear_res_kernel(%arg0: i32, %arg1: memref<24x32xf32, #tpu.memory_space<vmem>>, %arg2: memref<24x32xf32, #tpu.memory_space<vmem>>, %arg3: memref<32x32xbf16, #tpu.memory_space<vmem>>, %arg4: memref<1x32xf32, #tpu.memory_space<vmem>>, %arg5: memref<24x32xf32, #tpu.memory_space<vmem>>) attributes {dimension_semantics = [#tpu.dimension_semantics<parallel>], iteration_bounds = array<i64: 1>, scalar_prefetch = 0 : i64, scratch_operands = 0 : i64, tpu.core_type = #tpu.core_type<tc>, window_params = [{transform_indices = @transform_0, window_bounds = array<i64: 24, 32>}, {transform_indices = @transform_1, window_bounds = array<i64: 24, 32>}, {pipeline_mode = #tpu.pipeline_mode<synchronous>, transform_indices = @transform_2, window_bounds = array<i64: 32, 32>}, {pipeline_mode = #tpu.pipeline_mode<synchronous>, transform_indices = @transform_3, window_bounds = array<i64: 1, 32>}, {transform_indices = @transform_4, window_bounds = array<i64: 24, 32>}]} {
    %c0 = arith.constant 0 : index
    %c0_0 = arith.constant 0 : index
    %0 = vector.load %arg1[%c0, %c0_0] : memref<24x32xf32, #tpu.memory_space<vmem>>, vector<24x32xf32>
    %1 = arith.truncf %0 : vector<24x32xf32> to vector<24x32xbf16>
    %c0_1 = arith.constant 0 : index
    %c0_2 = arith.constant 0 : index
    %2 = vector.load %arg3[%c0_1, %c0_2] : memref<32x32xbf16, #tpu.memory_space<vmem>>, vector<32x32xbf16>
    %cst = arith.constant dense<0.000000e+00> : vector<24x32xf32>
    %3 = tpu.matmul %1, %2, %cst {dimension_numbers = #tpu.dot_dimension_numbers<[1], [0], [0], [1], [0, 0, 1, 1], [], []>} : vector<24x32xbf16>, vector<32x32xbf16>, vector<24x32xf32> -> vector<24x32xf32>
    %c0_3 = arith.constant 0 : index
    %c0_4 = arith.constant 0 : index
    %4 = vector.load %arg4[%c0_3, %c0_4] : memref<1x32xf32, #tpu.memory_space<vmem>>, vector<1x32xf32>
    %5 = vector.broadcast %4 : vector<1x32xf32> to vector<24x32xf32>
    %6 = arith.addf %3, %5 : vector<24x32xf32>
    %c0_5 = arith.constant 0 : index
    %c0_6 = arith.constant 0 : index
    %7 = vector.load %arg2[%c0_5, %c0_6] : memref<24x32xf32, #tpu.memory_space<vmem>>, vector<24x32xf32>
    %8 = arith.addf %6, %7 : vector<24x32xf32>
    %c0_7 = arith.constant 0 : index
    %c0_8 = arith.constant 0 : index
    %9 = vector.load %arg5[%c0_7, %c0_8] : memref<24x32xf32, #tpu.memory_space<vmem>>, vector<24x32xf32>
    tpu.vector_store %arg5[%c0_7, %c0_8], %8 {strides = array<i32>} : memref<24x32xf32, #tpu.memory_space<vmem>>, vector<24x32xf32>,
    return
  }
  func.func @transform_0(%arg0: i32) -> (i32, i32) {
    %c0_i32 = arith.constant 0 : i32
    %c0_i32_0 = arith.constant 0 : i32
    return %arg0, %c0_i32 : i32, i32
  }
  func.func @transform_1(%arg0: i32) -> (i32, i32) {
    %c0_i32 = arith.constant 0 : i32
    %c0_i32_0 = arith.constant 0 : i32
    return %arg0, %c0_i32 : i32, i32
  }
  func.func @transform_2(%arg0: i32) -> (i32, i32) {
    %c0_i32 = arith.constant 0 : i32
    %c0_i32_0 = arith.constant 0 : i32
    %c0_i32_1 = arith.constant 0 : i32
    return %c0_i32, %c0_i32_0 : i32, i32
  }
  func.func @transform_3(%arg0: i32) -> (i32, i32) {
    %c0_i32 = arith.constant 0 : i32
    %c0_i32_0 = arith.constant 0 : i32
    %c0_i32_1 = arith.constant 0 : i32
    return %c0_i32, %c0_i32_0 : i32, i32
  }
  func.func @transform_4(%arg0: i32) -> (i32, i32) {
    %c0_i32 = arith.constant 0 : i32
    %c0_i32_0 = arith.constant 0 : i32
    return %arg0, %c0_i32 : i32, i32
  }
}

module attributes {stable_mosaic.version = 11 : i64} {
  func.func @_ln_mlp_res_kernel(%arg0: i32, %arg1: memref<24x32xf32, #tpu.memory_space<vmem>>, %arg2: memref<1x32xf32, #tpu.memory_space<vmem>>, %arg3: memref<1x32xf32, #tpu.memory_space<vmem>>, %arg4: memref<32x128xbf16, #tpu.memory_space<vmem>>, %arg5: memref<1x128xf32, #tpu.memory_space<vmem>>, %arg6: memref<128x32xbf16, #tpu.memory_space<vmem>>, %arg7: memref<1x32xf32, #tpu.memory_space<vmem>>, %arg8: memref<24x32xf32, #tpu.memory_space<vmem>>) attributes {dimension_semantics = [#tpu.dimension_semantics<parallel>], iteration_bounds = array<i64: 1>, scalar_prefetch = 0 : i64, scratch_operands = 0 : i64, tpu.core_type = #tpu.core_type<tc>, window_params = [{transform_indices = @transform_0, window_bounds = array<i64: 24, 32>}, {pipeline_mode = #tpu.pipeline_mode<synchronous>, transform_indices = @transform_1, window_bounds = array<i64: 1, 32>}, {pipeline_mode = #tpu.pipeline_mode<synchronous>, transform_indices = @transform_2, window_bounds = array<i64: 1, 32>}, {pipeline_mode = #tpu.pipeline_mode<synchronous>, transform_indices = @transform_3, window_bounds = array<i64: 32, 128>}, {pipeline_mode = #tpu.pipeline_mode<synchronous>, transform_indices = @transform_4, window_bounds = array<i64: 1, 128>}, {pipeline_mode = #tpu.pipeline_mode<synchronous>, transform_indices = @transform_5, window_bounds = array<i64: 128, 32>}, {pipeline_mode = #tpu.pipeline_mode<synchronous>, transform_indices = @transform_6, window_bounds = array<i64: 1, 32>}, {transform_indices = @transform_7, window_bounds = array<i64: 24, 32>}]} {
    %c0 = arith.constant 0 : index
    %c0_0 = arith.constant 0 : index
    %0 = vector.load %arg1[%c0, %c0_0] : memref<24x32xf32, #tpu.memory_space<vmem>>, vector<24x32xf32>
    %c0_1 = arith.constant 0 : index
    %c0_2 = arith.constant 0 : index
    %1 = vector.load %arg2[%c0_1, %c0_2] : memref<1x32xf32, #tpu.memory_space<vmem>>, vector<1x32xf32>
    %c0_3 = arith.constant 0 : index
    %c0_4 = arith.constant 0 : index
    %2 = vector.load %arg3[%c0_3, %c0_4] : memref<1x32xf32, #tpu.memory_space<vmem>>, vector<1x32xf32>
    %cst = arith.constant dense<0.000000e+00> : vector<24xf32>
    %3 = vector.multi_reduction <add>, %0, %cst [1] : vector<24x32xf32> to vector<24xf32>
    %4 = vector.shape_cast %3 : vector<24xf32> to vector<24x1xf32>
    %cst_5 = arith.constant 3.200000e+01 : f32
    %5 = vector.broadcast %cst_5 : f32 to vector<24x1xf32>
    %6 = arith.divf %4, %5 : vector<24x1xf32>
    %7 = vector.broadcast %6 : vector<24x1xf32> to vector<24x32xf32>
    %8 = arith.subf %0, %7 : vector<24x32xf32>
    %9 = arith.mulf %8, %8 : vector<24x32xf32>
    %cst_6 = arith.constant dense<0.000000e+00> : vector<24xf32>
    %10 = vector.multi_reduction <add>, %9, %cst_6 [1] : vector<24x32xf32> to vector<24xf32>
    %11 = vector.shape_cast %10 : vector<24xf32> to vector<24x1xf32>
    %cst_7 = arith.constant 3.200000e+01 : f32
    %12 = vector.broadcast %cst_7 : f32 to vector<24x1xf32>
    %13 = arith.divf %11, %12 : vector<24x1xf32>
    %14 = vector.broadcast %6 : vector<24x1xf32> to vector<24x32xf32>
    %15 = arith.subf %0, %14 : vector<24x32xf32>
    %cst_8 = arith.constant 9.99999974E-6 : f32
    %16 = vector.broadcast %cst_8 : f32 to vector<24x1xf32>
    %17 = arith.addf %13, %16 : vector<24x1xf32>
    %18 = math.rsqrt %17 : vector<24x1xf32>
    %19 = vector.broadcast %18 : vector<24x1xf32> to vector<24x32xf32>
    %20 = arith.mulf %15, %19 : vector<24x32xf32>
    %21 = vector.broadcast %1 : vector<1x32xf32> to vector<24x32xf32>
    %22 = arith.mulf %20, %21 : vector<24x32xf32>
    %23 = vector.broadcast %2 : vector<1x32xf32> to vector<24x32xf32>
    %24 = arith.addf %22, %23 : vector<24x32xf32>
    %25 = arith.truncf %24 : vector<24x32xf32> to vector<24x32xbf16>
    %c0_9 = arith.constant 0 : index
    %c0_10 = arith.constant 0 : index
    %26 = vector.load %arg4[%c0_9, %c0_10] : memref<32x128xbf16, #tpu.memory_space<vmem>>, vector<32x128xbf16>
    %cst_11 = arith.constant dense<0.000000e+00> : vector<24x128xf32>
    %27 = tpu.matmul %25, %26, %cst_11 {dimension_numbers = #tpu.dot_dimension_numbers<[1], [0], [0], [1], [0, 0, 1, 1], [], []>} : vector<24x32xbf16>, vector<32x128xbf16>, vector<24x128xf32> -> vector<24x128xf32>
    %c0_12 = arith.constant 0 : index
    %c0_13 = arith.constant 0 : index
    %28 = vector.load %arg5[%c0_12, %c0_13] : memref<1x128xf32, #tpu.memory_space<vmem>>, vector<1x128xf32>
    %29 = vector.broadcast %28 : vector<1x128xf32> to vector<24x128xf32>
    %30 = arith.addf %27, %29 : vector<24x128xf32>
    %cst_14 = arith.constant 5.000000e-01 : f32
    %31 = vector.broadcast %cst_14 : f32 to vector<24x128xf32>
    %32 = arith.mulf %31, %30 : vector<24x128xf32>
    %cst_15 = arith.constant 0.707106769 : f32
    %33 = vector.broadcast %cst_15 : f32 to vector<24x128xf32>
    %34 = arith.mulf %30, %33 : vector<24x128xf32>
    %35 = math.absf %34 : vector<24x128xf32>
    %cst_16 = arith.constant 0.327591091 : f32
    %36 = vector.broadcast %cst_16 : f32 to vector<24x128xf32>
    %37 = arith.mulf %36, %35 : vector<24x128xf32>
    %cst_17 = arith.constant 1.000000e+00 : f32
    %38 = vector.broadcast %cst_17 : f32 to vector<24x128xf32>
    %39 = arith.addf %38, %37 : vector<24x128xf32>
    %cst_18 = arith.constant 1.000000e+00 : f32
    %40 = vector.broadcast %cst_18 : f32 to vector<24x128xf32>
    %41 = arith.divf %40, %39 : vector<24x128xf32>
    %cst_19 = arith.constant 1.06140542 : f32
    %42 = vector.broadcast %cst_19 : f32 to vector<24x128xf32>
    %43 = arith.mulf %42, %41 : vector<24x128xf32>
    %cst_20 = arith.constant -1.45315206 : f32
    %44 = vector.broadcast %cst_20 : f32 to vector<24x128xf32>
    %45 = arith.addf %43, %44 : vector<24x128xf32>
    %46 = arith.mulf %45, %41 : vector<24x128xf32>
    %cst_21 = arith.constant 1.42141378 : f32
    %47 = vector.broadcast %cst_21 : f32 to vector<24x128xf32>
    %48 = arith.addf %46, %47 : vector<24x128xf32>
    %49 = arith.mulf %48, %41 : vector<24x128xf32>
    %cst_22 = arith.constant -0.284496725 : f32
    %50 = vector.broadcast %cst_22 : f32 to vector<24x128xf32>
    %51 = arith.addf %49, %50 : vector<24x128xf32>
    %52 = arith.mulf %51, %41 : vector<24x128xf32>
    %cst_23 = arith.constant 0.254829586 : f32
    %53 = vector.broadcast %cst_23 : f32 to vector<24x128xf32>
    %54 = arith.addf %52, %53 : vector<24x128xf32>
    %55 = arith.mulf %54, %41 : vector<24x128xf32>
    %cst_24 = arith.constant 0.000000e+00 : f32
    %56 = vector.broadcast %cst_24 : f32 to vector<24x128xf32>
    %57 = arith.subf %56, %35 : vector<24x128xf32>
    %58 = arith.mulf %57, %35 : vector<24x128xf32>
    %59 = math.exp %58 : vector<24x128xf32>
    %60 = arith.mulf %55, %59 : vector<24x128xf32>
    %cst_25 = arith.constant 1.000000e+00 : f32
    %61 = vector.broadcast %cst_25 : f32 to vector<24x128xf32>
    %62 = arith.subf %61, %60 : vector<24x128xf32>
    %cst_26 = arith.constant 0.000000e+00 : f32
    %63 = vector.broadcast %cst_26 : f32 to vector<24x128xf32>
    %64 = arith.cmpf oge, %34, %63 : vector<24x128xf32>
    %cst_27 = arith.constant 0.000000e+00 : f32
    %65 = vector.broadcast %cst_27 : f32 to vector<24x128xf32>
    %66 = arith.subf %65, %62 : vector<24x128xf32>
    %67 = arith.select %64, %62, %66 : vector<24x128xi1>, vector<24x128xf32>
    %cst_28 = arith.constant 1.000000e+00 : f32
    %68 = vector.broadcast %cst_28 : f32 to vector<24x128xf32>
    %69 = arith.addf %68, %67 : vector<24x128xf32>
    %70 = arith.mulf %32, %69 : vector<24x128xf32>
    %71 = arith.truncf %70 : vector<24x128xf32> to vector<24x128xbf16>
    %c0_29 = arith.constant 0 : index
    %c0_30 = arith.constant 0 : index
    %72 = vector.load %arg6[%c0_29, %c0_30] : memref<128x32xbf16, #tpu.memory_space<vmem>>, vector<128x32xbf16>
    %cst_31 = arith.constant dense<0.000000e+00> : vector<24x32xf32>
    %73 = tpu.matmul %71, %72, %cst_31 {dimension_numbers = #tpu.dot_dimension_numbers<[1], [0], [0], [1], [0, 0, 1, 1], [], []>} : vector<24x128xbf16>, vector<128x32xbf16>, vector<24x32xf32> -> vector<24x32xf32>
    %c0_32 = arith.constant 0 : index
    %c0_33 = arith.constant 0 : index
    %74 = vector.load %arg7[%c0_32, %c0_33] : memref<1x32xf32, #tpu.memory_space<vmem>>, vector<1x32xf32>
    %75 = vector.broadcast %74 : vector<1x32xf32> to vector<24x32xf32>
    %76 = arith.addf %73, %75 : vector<24x32xf32>
    %77 = arith.addf %0, %76 : vector<24x32xf32>
    %c0_34 = arith.constant 0 : index
    %c0_35 = arith.constant 0 : index
    %78 = vector.load %arg8[%c0_34, %c0_35] : memref<24x32xf32, #tpu.memory_space<vmem>>, vector<24x32xf32>
    tpu.vector_store %arg8[%c0_34, %c0_35], %77 {strides = array<i32>} : memref<24x32xf32, #tpu.memory_space<vmem>>, vector<24x32xf32>,
    return
  }
  func.func @transform_0(%arg0: i32) -> (i32, i32) {
    %c0_i32 = arith.constant 0 : i32
    %c0_i32_0 = arith.constant 0 : i32
    return %arg0, %c0_i32 : i32, i32
  }
  func.func @transform_1(%arg0: i32) -> (i32, i32) {
    %c0_i32 = arith.constant 0 : i32
    %c0_i32_0 = arith.constant 0 : i32
    %c0_i32_1 = arith.constant 0 : i32
    return %c0_i32, %c0_i32_0 : i32, i32
  }
  func.func @transform_2(%arg0: i32) -> (i32, i32) {
    %c0_i32 = arith.constant 0 : i32
    %c0_i32_0 = arith.constant 0 : i32
    %c0_i32_1 = arith.constant 0 : i32
    return %c0_i32, %c0_i32_0 : i32, i32
  }
  func.func @transform_3(%arg0: i32) -> (i32, i32) {
    %c0_i32 = arith.constant 0 : i32
    %c0_i32_0 = arith.constant 0 : i32
    %c0_i32_1 = arith.constant 0 : i32
    return %c0_i32, %c0_i32_0 : i32, i32
  }
  func.func @transform_4(%arg0: i32) -> (i32, i32) {
    %c0_i32 = arith.constant 0 : i32
    %c0_i32_0 = arith.constant 0 : i32
    %c0_i32_1 = arith.constant 0 : i32
    return %c0_i32, %c0_i32_0 : i32, i32
  }
  func.func @transform_5(%arg0: i32) -> (i32, i32) {
    %c0_i32 = arith.constant 0 : i32
    %c0_i32_0 = arith.constant 0 : i32
    %c0_i32_1 = arith.constant 0 : i32
    return %c0_i32, %c0_i32_0 : i32, i32
  }
  func.func @transform_6(%arg0: i32) -> (i32, i32) {
    %c0_i32 = arith.constant 0 : i32
    %c0_i32_0 = arith.constant 0 : i32
    %c0_i32_1 = arith.constant 0 : i32
    return %c0_i32, %c0_i32_0 : i32, i32
  }
  func.func @transform_7(%arg0: i32) -> (i32, i32) {
    %c0_i32 = arith.constant 0 : i32
    %c0_i32_0 = arith.constant 0 : i32
    return %arg0, %c0_i32 : i32, i32
  }
}

module attributes {stable_mosaic.version = 11 : i64} {
  func.func @_tail_kernel(%arg0: i32, %arg1: memref<1x12x32xf32, #tpu.memory_space<vmem>>, %arg2: memref<1x32xf32, #tpu.memory_space<vmem>>, %arg3: memref<1x32xf32, #tpu.memory_space<vmem>>, %arg4: memref<1x32xf32, #tpu.memory_space<vmem>>, %arg5: memref<1x32xf32, #tpu.memory_space<vmem>>, %arg6: memref<32x5xbf16, #tpu.memory_space<vmem>>, %arg7: memref<1x5xf32, #tpu.memory_space<vmem>>, %arg8: memref<1x1x5xf32, #tpu.memory_space<vmem>>) attributes {dimension_semantics = [#tpu.dimension_semantics<parallel>], iteration_bounds = array<i64: 2>, scalar_prefetch = 0 : i64, scratch_operands = 0 : i64, tpu.core_type = #tpu.core_type<tc>, window_params = [{transform_indices = @transform_0, window_bounds = array<i64: 1, 12, 32>}, {pipeline_mode = #tpu.pipeline_mode<synchronous>, transform_indices = @transform_1, window_bounds = array<i64: 1, 32>}, {pipeline_mode = #tpu.pipeline_mode<synchronous>, transform_indices = @transform_2, window_bounds = array<i64: 1, 32>}, {pipeline_mode = #tpu.pipeline_mode<synchronous>, transform_indices = @transform_3, window_bounds = array<i64: 1, 32>}, {pipeline_mode = #tpu.pipeline_mode<synchronous>, transform_indices = @transform_4, window_bounds = array<i64: 1, 32>}, {pipeline_mode = #tpu.pipeline_mode<synchronous>, transform_indices = @transform_5, window_bounds = array<i64: 32, 5>}, {pipeline_mode = #tpu.pipeline_mode<synchronous>, transform_indices = @transform_6, window_bounds = array<i64: 1, 5>}, {transform_indices = @transform_7, window_bounds = array<i64: 1, 1, 5>}]} {
    %c0 = arith.constant 0 : index
    %c0_0 = arith.constant 0 : index
    %c0_1 = arith.constant 0 : index
    %0 = vector.load %arg1[%c0, %c0_0, %c0_1] : memref<1x12x32xf32, #tpu.memory_space<vmem>>, vector<1x12x32xf32>
    %1 = vector.shape_cast %0 : vector<1x12x32xf32> to vector<12x32xf32>
    %c0_2 = arith.constant 0 : index
    %c0_3 = arith.constant 0 : index
    %2 = vector.load %arg2[%c0_2, %c0_3] : memref<1x32xf32, #tpu.memory_space<vmem>>, vector<1x32xf32>
    %c0_4 = arith.constant 0 : index
    %c0_5 = arith.constant 0 : index
    %3 = vector.load %arg3[%c0_4, %c0_5] : memref<1x32xf32, #tpu.memory_space<vmem>>, vector<1x32xf32>
    %cst = arith.constant dense<0.000000e+00> : vector<12xf32>
    %4 = vector.multi_reduction <add>, %1, %cst [1] : vector<12x32xf32> to vector<12xf32>
    %5 = vector.shape_cast %4 : vector<12xf32> to vector<12x1xf32>
    %cst_6 = arith.constant 3.200000e+01 : f32
    %6 = vector.broadcast %cst_6 : f32 to vector<12x1xf32>
    %7 = arith.divf %5, %6 : vector<12x1xf32>
    %8 = vector.broadcast %7 : vector<12x1xf32> to vector<12x32xf32>
    %9 = arith.subf %1, %8 : vector<12x32xf32>
    %10 = arith.mulf %9, %9 : vector<12x32xf32>
    %cst_7 = arith.constant dense<0.000000e+00> : vector<12xf32>
    %11 = vector.multi_reduction <add>, %10, %cst_7 [1] : vector<12x32xf32> to vector<12xf32>
    %12 = vector.shape_cast %11 : vector<12xf32> to vector<12x1xf32>
    %cst_8 = arith.constant 3.200000e+01 : f32
    %13 = vector.broadcast %cst_8 : f32 to vector<12x1xf32>
    %14 = arith.divf %12, %13 : vector<12x1xf32>
    %15 = vector.broadcast %7 : vector<12x1xf32> to vector<12x32xf32>
    %16 = arith.subf %1, %15 : vector<12x32xf32>
    %cst_9 = arith.constant 9.99999974E-6 : f32
    %17 = vector.broadcast %cst_9 : f32 to vector<12x1xf32>
    %18 = arith.addf %14, %17 : vector<12x1xf32>
    %19 = math.rsqrt %18 : vector<12x1xf32>
    %20 = vector.broadcast %19 : vector<12x1xf32> to vector<12x32xf32>
    %21 = arith.mulf %16, %20 : vector<12x32xf32>
    %22 = vector.broadcast %2 : vector<1x32xf32> to vector<12x32xf32>
    %23 = arith.mulf %21, %22 : vector<12x32xf32>
    %24 = vector.broadcast %3 : vector<1x32xf32> to vector<12x32xf32>
    %25 = arith.addf %23, %24 : vector<12x32xf32>
    %cst_10 = arith.constant dense<0.000000e+00> : vector<32xf32>
    %26 = vector.multi_reduction <add>, %25, %cst_10 [0] : vector<12x32xf32> to vector<32xf32>
    %27 = vector.shape_cast %26 : vector<32xf32> to vector<1x32xf32>
    %cst_11 = arith.constant 1.200000e+01 : f32
    %28 = vector.broadcast %cst_11 : f32 to vector<1x32xf32>
    %29 = arith.divf %27, %28 : vector<1x32xf32>
    %c0_12 = arith.constant 0 : index
    %c0_13 = arith.constant 0 : index
    %30 = vector.load %arg4[%c0_12, %c0_13] : memref<1x32xf32, #tpu.memory_space<vmem>>, vector<1x32xf32>
    %c0_14 = arith.constant 0 : index
    %c0_15 = arith.constant 0 : index
    %31 = vector.load %arg5[%c0_14, %c0_15] : memref<1x32xf32, #tpu.memory_space<vmem>>, vector<1x32xf32>
    %cst_16 = arith.constant dense<0.000000e+00> : vector<1xf32>
    %32 = vector.multi_reduction <add>, %29, %cst_16 [1] : vector<1x32xf32> to vector<1xf32>
    %33 = vector.shape_cast %32 : vector<1xf32> to vector<1x1xf32>
    %cst_17 = arith.constant 3.200000e+01 : f32
    %34 = vector.broadcast %cst_17 : f32 to vector<1x1xf32>
    %35 = arith.divf %33, %34 : vector<1x1xf32>
    %36 = vector.broadcast %35 : vector<1x1xf32> to vector<1x32xf32>
    %37 = arith.subf %29, %36 : vector<1x32xf32>
    %38 = arith.mulf %37, %37 : vector<1x32xf32>
    %cst_18 = arith.constant dense<0.000000e+00> : vector<1xf32>
    %39 = vector.multi_reduction <add>, %38, %cst_18 [1] : vector<1x32xf32> to vector<1xf32>
    %40 = vector.shape_cast %39 : vector<1xf32> to vector<1x1xf32>
    %cst_19 = arith.constant 3.200000e+01 : f32
    %41 = vector.broadcast %cst_19 : f32 to vector<1x1xf32>
    %42 = arith.divf %40, %41 : vector<1x1xf32>
    %43 = vector.broadcast %35 : vector<1x1xf32> to vector<1x32xf32>
    %44 = arith.subf %29, %43 : vector<1x32xf32>
    %cst_20 = arith.constant 9.99999974E-6 : f32
    %45 = vector.broadcast %cst_20 : f32 to vector<1x1xf32>
    %46 = arith.addf %42, %45 : vector<1x1xf32>
    %47 = math.rsqrt %46 : vector<1x1xf32>
    %48 = vector.broadcast %47 : vector<1x1xf32> to vector<1x32xf32>
    %49 = arith.mulf %44, %48 : vector<1x32xf32>
    %50 = arith.mulf %49, %30 : vector<1x32xf32>
    %51 = arith.addf %50, %31 : vector<1x32xf32>
    %52 = arith.truncf %51 : vector<1x32xf32> to vector<1x32xbf16>
    %c0_21 = arith.constant 0 : index
    %c0_22 = arith.constant 0 : index
    %53 = vector.load %arg6[%c0_21, %c0_22] : memref<32x5xbf16, #tpu.memory_space<vmem>>, vector<32x5xbf16>
    %cst_23 = arith.constant dense<0.000000e+00> : vector<1x5xf32>
    %54 = tpu.matmul %52, %53, %cst_23 {dimension_numbers = #tpu.dot_dimension_numbers<[1], [0], [0], [1], [0, 0, 1, 1], [], []>} : vector<1x32xbf16>, vector<32x5xbf16>, vector<1x5xf32> -> vector<1x5xf32>
    %c0_24 = arith.constant 0 : index
    %c0_25 = arith.constant 0 : index
    %55 = vector.load %arg7[%c0_24, %c0_25] : memref<1x5xf32, #tpu.memory_space<vmem>>, vector<1x5xf32>
    %56 = arith.addf %54, %55 : vector<1x5xf32>
    %c0_26 = arith.constant 0 : index
    %c0_27 = arith.constant 0 : index
    %c0_28 = arith.constant 0 : index
    %57 = vector.load %arg8[%c0_26, %c0_27, %c0_28] : memref<1x1x5xf32, #tpu.memory_space<vmem>>, vector<1x1x5xf32>
    %58 = vector.shape_cast %57 : vector<1x1x5xf32> to vector<1x5xf32>
    %59 = vector.shape_cast %56 : vector<1x5xf32> to vector<1x1x5xf32>
    tpu.vector_store %arg8[%c0_26, %c0_27, %c0_28], %59 {strides = array<i32>} : memref<1x1x5xf32, #tpu.memory_space<vmem>>, vector<1x1x5xf32>,
    return
  }
  func.func @transform_0(%arg0: i32) -> (i32, i32, i32) {
    %c0_i32 = arith.constant 0 : i32
    %c0_i32_0 = arith.constant 0 : i32
    %c0_i32_1 = arith.constant 0 : i32
    return %arg0, %c0_i32, %c0_i32_0 : i32, i32, i32
  }
  func.func @transform_1(%arg0: i32) -> (i32, i32) {
    %c0_i32 = arith.constant 0 : i32
    %c0_i32_0 = arith.constant 0 : i32
    %c0_i32_1 = arith.constant 0 : i32
    return %c0_i32, %c0_i32_0 : i32, i32
  }
  func.func @transform_2(%arg0: i32) -> (i32, i32) {
    %c0_i32 = arith.constant 0 : i32
    %c0_i32_0 = arith.constant 0 : i32
    %c0_i32_1 = arith.constant 0 : i32
    return %c0_i32, %c0_i32_0 : i32, i32
  }
  func.func @transform_3(%arg0: i32) -> (i32, i32) {
    %c0_i32 = arith.constant 0 : i32
    %c0_i32_0 = arith.constant 0 : i32
    %c0_i32_1 = arith.constant 0 : i32
    return %c0_i32, %c0_i32_0 : i32, i32
  }
  func.func @transform_4(%arg0: i32) -> (i32, i32) {
    %c0_i32 = arith.constant 0 : i32
    %c0_i32_0 = arith.constant 0 : i32
    %c0_i32_1 = arith.constant 0 : i32
    return %c0_i32, %c0_i32_0 : i32, i32
  }
  func.func @transform_5(%arg0: i32) -> (i32, i32) {
    %c0_i32 = arith.constant 0 : i32
    %c0_i32_0 = arith.constant 0 : i32
    %c0_i32_1 = arith.constant 0 : i32
    return %c0_i32, %c0_i32_0 : i32, i32
  }
  func.func @transform_6(%arg0: i32) -> (i32, i32) {
    %c0_i32 = arith.constant 0 : i32
    %c0_i32_0 = arith.constant 0 : i32
    %c0_i32_1 = arith.constant 0 : i32
    return %c0_i32, %c0_i32_0 : i32, i32
  }
  func.func @transform_7(%arg0: i32) -> (i32, i32, i32) {
    %c0_i32 = arith.constant 0 : i32
    %c0_i32_0 = arith.constant 0 : i32
    %c0_i32_1 = arith.constant 0 : i32
    return %arg0, %c0_i32, %c0_i32_0 : i32, i32, i32
  }
}

</mosaic_0001>

<bundles_post_ra>
// kernel: social_mae_forward.24
= control target key start
LH: loop header
LB: loop body
LE: loop exit
PB: predicated region body
PF: predicated region fallthrough
CT: control target
= control target key end

     0   :  { %v164_v0 = vmov 0.0   ;;  %vm165_vm0 = vmmov 0   ;;  %vm73_vm1 = vcmask 785408   ;;  %vm118_vm2 = vcmask 261120   ;;  %s219_s1 = inlined_call_operand.vmem [shape: bf16[96,32], index: 1, kind: input, shape index: {}]   ;;  %s220_s0 = inlined_call_operand.vmem [shape: f32[16,96], index: 0, kind: input, shape index: {}]   ;;  %s221_s2 = inlined_call_operand.vmem [shape: f32[1,32], index: 2, kind: input, shape index: {}]   ;;  %s222_s3 = inlined_call_operand.vmem [shape: f32[16,32], index: 3, kind: output, shape index: {}]  }
   0x1   :  { %140 = vmatprep.subr.bf16.mxu0 %v164_v0  ;;  %v158_v1 = vld [vmem:[%s219_s1] sm:$0xff]   ;;  %152 = vmatprep.mubr.msk.bf16.mxu0 %vm165_vm0, %v164_v0  ;;  %v159_v2 = vld [vmem:[%s219_s1 + $0x8] sm:$0xff]   ;;  %v160_v3 = vld [vmem:[%s219_s1 + $0x10] sm:$0xff]  }
   0x2   :  { %141 = vmatpush3.bf16.msra.mxu0 %v158_v1  ;;  %v161_v4 = vld [vmem:[%s219_s1 + $0x18] sm:$0xff]   ;;  %v162_v5 = vld [vmem:[%s219_s1 + $0x20] sm:$0xff]   ;;  %v163_v6 = vld [vmem:[%s219_s1 + $0x28] sm:$0xff]  }
   0x3   :  { %142 = vmatprep.subr.bf16.mxu0 %v164_v0  ;;  %v15_v7 = vld [vmem:[%s220_s0] sm:$0xff]  ;;  %v16_v8 = vld [vmem:[%s220_s0 + $0x8] sm:$0xff] }
   0x4   :  { %v17_v9 = vpack.c.bf16 %v16_v8, %v15_v7  ;;  %v125_v10 = vld [vmem:[%s221_s2] ss:$0 sm:$0xff] }
   0x6   :  { %143 = vmatpush3.bf16.msra.mxu0 %v159_v2 }
   0x7   :  { %144 = vmatprep.subr.bf16.mxu0 %v164_v0 }
   0xa   :  { %145 = vmatpush3.bf16.msra.mxu0 %v160_v3 }
   0xb   :  { %146 = vmatprep.subr.bf16.mxu0 %v164_v0 }
   0xe   :  { %147 = vmatpush3.bf16.msra.mxu0 %v161_v4 }
   0xf   :  { %148 = vmatprep.subr.bf16.mxu0 %v164_v0 }
  0x12   :  { %149 = vmatpush3.bf16.msra.mxu0 %v162_v5 }
  0x13   :  { %150 = vmatprep.subr.bf16.mxu0 %v164_v0 }
  0x16   :  { %151 = vmatpush3.bf16.msra.mxu0 %v163_v6 }
  0x19   :  { %153 = vmatmul.mubr.msk.bf16.vlgmr.msra.gmra.mrb[0].mxu0 %vm73_vm1, %v17_v9 }
  0xec   :  { %v111_v11 = vpop.f32.mrb[0].mxu0 }
  0xed   :  { %v112_v12 = vadd.f32 %v125_v10, %v111_v11  ;;  %v154_v13 = vpop.f32.mrb[1].mxu0 }
  0xee   :  { %v114_v14 = vpop.f32.mrb[2].mxu0 }
  0xef   :  { %119 = vst.msk [vmem:[%s222_s3] sm:$0xff] %vm118_vm2, %v112_v12  ;;  %v115_v15 = vadd.f32 %v125_v10, %v114_v14  ;;  %v155_v16 = vpop.f32.mrb[3].mxu0 }
  0xf1   :  { %120 = vst.msk [vmem:[%s222_s3 + $0x8] sm:$0xff] %vm118_vm2, %v115_v15 }

// kernel: social_mae_forward.33
= control target key start
LH: loop header
LB: loop body
LE: loop exit
PB: predicated region body
PF: predicated region fallthrough
CT: control target
= control target key end

     0   :  { %vm25_vm0 = vcmask 261120   ;;  %v169_v15 = vmov 0.0   ;;  %vm170_vm1 = vmmov 0   ;;  %vm137_vm2 = vcmask 785408   ;;  %s233_s0 = inlined_call_operand.vmem [shape: f32[16,32], index: 0, kind: input, shape index: {}]   ;;  %s234_s3 = inlined_call_operand.vmem [shape: bf16[32,96], index: 3, kind: input, shape index: {}]   ;;  %s235_s1 = inlined_call_operand.vmem [shape: f32[1,32], index: 1, kind: input, shape index: {}]   ;;  %s236_s2 = inlined_call_operand.vmem [shape: f32[1,32], index: 2, kind: input, shape index: {}]   ;;  %s237_s4 = inlined_call_operand.vmem [shape: f32[1,96], index: 4, kind: input, shape index: {}]   ;;  %s238_s5 = inlined_call_operand.vmem [shape: f32[16,96], index: 5, kind: output, shape index: {}]  }
   0x1   :  { %v21_v0 = vld [vmem:[%s233_s0] sm:$0xff]  ;;  %v22_v1 = vld [vmem:[%s233_s0 + $0x8] sm:$0xff]  ;;  %153 = vmatprep.subr.bf16.mxu0 %v169_v15  ;;  %157 = vmatprep.mubr.msk.bf16.mxu0 %vm170_vm1, %v169_v15 }
   0x2   :  { %v26_v2 = vsel %vm25_vm0, %v21_v0, 0.0  ;;  %v29_v3 = vsel %vm25_vm0, %v22_v1, 0.0  ;;  %v163_v14 = vld [vmem:[%s234_s3] sm:$0xff]   ;;  %v164_v16 = vld [vmem:[%s234_s3 + $0x8] sm:$0xff]  }
   0x3   :  { %27 = vadd.xlane.f32.xlu0 %v26_v2  ;;  %154 = vmatpush3.bf16.msra.mxu0 %v163_v14  ;;  %v144_v25 = vld [vmem:[%s235_s1] ss:$0 sm:$0xff] }
   0x4   :  { %155 = vmatprep.subr.bf16.mxu0 %v169_v15  ;;  %v145_v29 = vld [vmem:[%s236_s2] ss:$0 sm:$0xff] }
   0x5   :  { %v146_v34 = vld [vmem:[%s237_s4] ss:$0 sm:$0xff] }
   0x7   :  { %30 = vadd.xlane.f32.xlu0 %v29_v3  ;;  %156 = vmatpush3.bf16.msra.mxu0 %v164_v16 }
  0x90   :  { %v28_v4 = vpop.xlane.xlu0 %27 }
  0x91   :  { %v33_v5 = vmul.f32 0.03125, %v28_v4 }
  0x93   :  { %v35_v6 = vsub.f32 %v21_v0, %v33_v5 }
  0x94   :  { %v31_v7 = vpop.xlane.xlu0 %30 }
  0x95   :  { %v34_v8 = vmul.f32 0.03125, %v31_v7  ;;  %v37_v9 = vmul.f32 %v35_v6, %v35_v6 }
  0x97   :  { %v36_v10 = vsub.f32 %v22_v1, %v34_v8  ;;  %v39_v11 = vsel %vm25_vm0, %v37_v9, 0.0 }
  0x98   :  { %40 = vadd.xlane.f32.xlu1 %v39_v11 }
  0x99   :  { %v38_v12 = vmul.f32 %v36_v10, %v36_v10 }
  0x9b   :  { %v42_v13 = vsel %vm25_vm0, %v38_v12, 0.0 }
  0x9c   :  { %43 = vadd.xlane.f32.xlu1 %v42_v13 }
 0x125   :  { %v41_v17 = vpop.xlane.xlu1 %40 }
 0x126   :  { %v45_v18 = vmul.f32 0.03125, %v41_v17 }
 0x128   :  { %v47_v19 = vadd.f32 1e-05, %v45_v18 }
 0x129   :  { %v44_v20 = vpop.xlane.xlu1 %43 }
 0x12a   :  { %165 = vrsqrt.f32 %v47_v19  ;;  %v46_v21 = vmul.f32 0.03125, %v44_v20 }
 0x12c   :  { %v48_v22 = vadd.f32 1e-05, %v46_v21 }
 0x12e   :  { %167 = vrsqrt.f32 %v48_v22 }
 0x134   :  { %v166_v23 = vpop.eup %165 }
 0x135   :  { %v51_v24 = vmul.f32 %v166_v23, %v35_v6 }
 0x137   :  { %v59_v28 = vmul.f32 %v144_v25, %v51_v24 }
 0x138   :  { %v168_v26 = vpop.eup %167 }
 0x139   :  { %v52_v27 = vmul.f32 %v168_v26, %v36_v10  ;;  %v67_v31 = vadd.f32 %v145_v29, %v59_v28 }
 0x13b   :  { %v60_v30 = vmul.f32 %v144_v25, %v52_v27 }
 0x13d   :  { %v68_v32 = vadd.f32 %v145_v29, %v60_v30 }
 0x13f   :  { %v69_v33 = vpack.c.bf16 %v68_v32, %v67_v31 }
 0x141   :  { %158 = vmatmul.mubr.msk.bf16.vlgmr.msra.gmra.mrb[0].mxu0 %vm25_vm0, %v69_v33 }
 0x214   :  { %v130_v35 = vpop.f32.mrb[0].mxu0 }
 0x215   :  { %v131_v36 = vadd.f32 %v146_v34, %v130_v35  ;;  %v159_v37 = vpop.f32.mrb[1].mxu0 }
 0x216   :  { %v133_v38 = vpop.f32.mrb[2].mxu0 }
 0x217   :  { %138 = vst.msk [vmem:[%s238_s5] sm:$0xff] %vm137_vm2, %v131_v36  ;;  %v134_v39 = vadd.f32 %v146_v34, %v133_v38  ;;  %v160_v40 = vpop.f32.mrb[3].mxu0 }
 0x219   :  { %139 = vst.msk [vmem:[%s238_s5 + $0x8] sm:$0xff] %vm137_vm2, %v134_v39 }

// kernel: social_mae_forward.35
= control target key start
LH: loop header
LB: loop body
LE: loop exit
PB: predicated region body
PF: predicated region fallthrough
CT: control target
= control target key end

     0   :  { %v118_v0 = vmov 0.0   ;;  %vm119_vm0 = vmmov 0   ;;  %vm44_vm1 = vcmask 261120   ;;  %s175_s2 = inlined_call_operand.vmem [shape: bf16[32,32], index: 2, kind: input, shape index: {}]   ;;  %s176_s0 = inlined_call_operand.vmem [shape: f32[16,32], index: 0, kind: input, shape index: {}]   ;;  %s177_s3 = inlined_call_operand.vmem [shape: f32[1,32], index: 3, kind: input, shape index: {}]   ;;  %s178_s1 = inlined_call_operand.vmem [shape: f32[16,32], index: 1, kind: input, shape index: {}]   ;;  %s179_s4 = inlined_call_operand.vmem [shape: f32[16,32], index: 4, kind: output, shape index: {}]  }
   0x1   :  { %106 = vmatprep.subr.bf16.mxu0 %v118_v0  ;;  %v116_v1 = vld [vmem:[%s175_s2] sm:$0xff]   ;;  %110 = vmatprep.mubr.msk.bf16.mxu0 %vm119_vm0, %v118_v0  ;;  %v117_v2 = vld [vmem:[%s175_s2 + $0x8] sm:$0xff]  }
   0x2   :  { %107 = vmatpush3.bf16.msra.mxu0 %v116_v1  ;;  %v18_v3 = vld [vmem:[%s176_s0] sm:$0xff]  ;;  %v19_v4 = vld [vmem:[%s176_s0 + $0x8] sm:$0xff] }
   0x3   :  { %108 = vmatprep.subr.bf16.mxu0 %v118_v0  ;;  %v20_v5 = vpack.c.bf16 %v19_v4, %v18_v3  ;;  %v99_v6 = vld [vmem:[%s177_s3] ss:$0 sm:$0xff]  ;;  %v90_v12 = vld [vmem:[%s178_s1 + $0x8] sm:$0xff] }
   0x4   :  { %v89_v8 = vld [vmem:[%s178_s1] sm:$0xff] }
   0x6   :  { %109 = vmatpush3.bf16.msra.mxu0 %v117_v2 }
   0x9   :  { %111 = vmatmul.mubr.msk.bf16.vlgmr.msra.gmra.mrb[0].mxu0 %vm44_vm1, %v20_v5 }
  0xdc   :  { %v82_v7 = vpop.f32.mrb[0].mxu0 }
  0xdd   :  { %v83_v9 = vadd.f32 %v99_v6, %v82_v7  ;;  %v112_v10 = vpop.f32.mrb[1].mxu0 }
  0xde   :  { %v85_v11 = vpop.f32.mrb[2].mxu0 }
  0xdf   :  { %v91_v13 = vadd.f32 %v89_v8, %v83_v9  ;;  %v86_v14 = vadd.f32 %v99_v6, %v85_v11  ;;  %v113_v15 = vpop.f32.mrb[3].mxu0 }
  0xe1   :  { %93 = vst.msk [vmem:[%s179_s4] sm:$0xff] %vm44_vm1, %v91_v13  ;;  %v92_v16 = vadd.f32 %v90_v12, %v86_v14 }
  0xe3   :  { %94 = vst.msk [vmem:[%s179_s4 + $0x8] sm:$0xff] %vm44_vm1, %v92_v16 }

// kernel: social_mae_forward.34
= control target key start
LH: loop header
LB: loop body
LE: loop exit
PB: predicated region body
PF: predicated region fallthrough
CT: control target
= control target key end

     0   :  { %s1104_s9 = smov 0   ;;  %s1106_s10 = smov 0   ;;  %s1265_s0 = inlined_call_operand.vmem [shape: f32[2,8,96], index: 0, kind: input, shape index: {}, may-alias: {0,1}]   ;;  %s1266_s1 = inlined_call_operand.vmem [shape: f32[2,8,96], index: 1, kind: input, shape index: {}, may-alias: {0,1}]   ;;  %s1267_s2 = inlined_call_operand.vmem [shape: f32[2,8,32], index: 2, kind: output, shape index: {}]  }
   0x1   :  { %s1108_s11 = smov 0  }
   0x2 LB: > { %s24_s12 = sadd.s32 1, %s1065_s10  ;;  %p901_p0 = scmp.ge.s32.totalorder %s1069_s11, 1  ;;  %s1069_s11 = sphi %s1108_s11, %s12_s11   ;;  %s1065_s10 = sphi %s1106_s10, %s1269_s10   ;;  %s1061_s9 = sphi %s1104_s9, %s1268_s9  }
   0x3   : > { %p26_p1 = scmp.ge.s32.totalorder %s24_s12, 2  ;;  %p137_p2 = scmp.lt.s32.totalorder %s1069_s11, 3 }
   0x5   : > { %s1271_s12 = smov (%p26_p1, %s24_s12), 0  ;;  %p138_p3 = pnand %p901_p0, %p137_p2 }
   0x6   : > { %p164_p4 = scmp.lt.s32.totalorder (!%p138_p3), %s1061_s9, 1  ;;  %vm193_vm0 = vcmask (!%p138_p3), 64512   ;;  %v1071_v0 = vmov (!%p138_p3), 0.0   ;;  %vm1072_vm1 = vmmov (!%p138_p3), 0   ;;  %s1073_s17 = smov (!%p138_p3), 96   ;;  %vm184_vm2 = vcmask (!%p138_p3), 7168  }
   0x7   : > { %141 = sbr.rel (%p138_p3) target bundleno = 1580 (0x62c), region = 28  ;;  %931 = vmatprep.subr.bf16.mxu0 (!%p138_p3), %v1071_v0  ;;  %194 = vst.msk [vmem:[#allocation4] sm:$0xff] (!%p138_p3), %vm193_vm0, %v1071_v0  ;;  %195 = vst.msk [vmem:[#allocation4 + $0x8] sm:$0xff] (!%p138_p3), %vm193_vm0, %v1071_v0  ;;  %933 = vmatprep.mubr.msk.bf16.mxu0 (!%p138_p3), %vm1072_vm1, %v1071_v0  ;;  %v1074_v8 = vmov (!%p138_p3), -inf   ;;  %v1075_v14 = vmov (!%p138_p3), 0   ;;  %s1076_s21 = smov (!%p138_p3), 64  }
   0x8   : > { %196 = vst.msk [vmem:[#allocation4 + $0x10] sm:$0xff] (!%p138_p3), %vm193_vm0, %v1071_v0  ;;  %197 = vst.msk [vmem:[#allocation4 + $0x18] sm:$0xff] (!%p138_p3), %vm193_vm0, %v1071_v0  ;;  %937 = vmatprep.subr.bf16.mxu1 (!%p138_p3), %v1071_v0  ;;  %939 = vmatprep.mubr.msk.bf16.mxu1 (!%p138_p3), %vm1072_vm1, %v1071_v0  ;;  %s1077_s22 = smov (!%p138_p3), 88   ;;  %s1078_s23 = smov (!%p138_p3), 120   ;;  %vm290_vm3 = vcmask (!%p138_p3), 1043456   ;;  %vm815_vm4 = vcmask (!%p138_p3), 130048  }
   0x9   : > { %185 = vst.msk [vmem:[#allocation2] sm:$0xff] (!%p138_p3), %vm184_vm2, %v1074_v8  ;;  %186 = vst.msk [vmem:[#allocation2 + $0x8] sm:$0xff] (!%p138_p3), %vm184_vm2, %v1074_v8  ;;  %1021 = vset.pattern.permute.xlu1 (!%p138_p3), %v1075_v14  ;;  %1022 = vset.pattern.permute.xlu0 (!%p138_p3), %v1075_v14  ;;  %s1079_s24 = smov (!%p138_p3), 80   ;;  %s1080_s25 = smov (!%p138_p3), 112   ;;  %vm817_vm5 = vcmask (!%p138_p3), 195584   ;;  %vm819_vm6 = vcmask (!%p138_p3), 261120  }
   0xa   : > { %187 = vst.msk [vmem:[#allocation2 + $0x10] sm:$0xff] (!%p138_p3), %vm184_vm2, %v1074_v8  ;;  %188 = vst.msk [vmem:[#allocation2 + $0x18] sm:$0xff] (!%p138_p3), %vm184_vm2, %v1074_v8  ;;  %s1081_s26 = smov (!%p138_p3), 72   ;;  %s1082_s27 = smov (!%p138_p3), 104  }
   0xb   : > { %189 = vst.msk [vmem:[#allocation3] sm:$0xff] (!%p138_p3), %vm184_vm2, %v1071_v0  ;;  %190 = vst.msk [vmem:[#allocation3 + $0x8] sm:$0xff] (!%p138_p3), %vm184_vm2, %v1071_v0  ;;  %s1083_s28 = smov (!%p138_p3), 56   ;;  %s1084_s29 = smov (!%p138_p3), 40  }
   0xc   : > { %191 = vst.msk [vmem:[#allocation3 + $0x10] sm:$0xff] (!%p138_p3), %vm184_vm2, %v1071_v0  ;;  %192 = vst.msk [vmem:[#allocation3 + $0x18] sm:$0xff] (!%p138_p3), %vm184_vm2, %v1071_v0  ;;  %s1085_s30 = smov (!%p138_p3), 48   ;;  %s1086_s3 = smov (!%p138_p3), 8  }
   0xd   : > { %s1087_s4 = smov (!%p138_p3), 16   ;;  %s1088_s5 = smov (!%p138_p3), 24  }
   0xe   : > { %s1273_s9 = smov (!%p164_p4, %s1061_s9), 1 }
   0xf   : > { %s1136_s13 = sshll.u32 %s1273_s9, 3 }
  0x10   : > { %s174_s16 = scalar_lea.vmem %s1266_s1, %s1136_s13  ;;  %s167_s20 = scalar_lea.vmem %s1265_s0, %s1136_s13  ;;  %v1167_v15 = vld [vmem:[#allocation2] sm:$0xff]  ;;  %v395_v54 = vld [vmem:[#allocation2 + $0x8] sm:$0xff] }
  0x11   : > { %v200_v1 = vld [vmem:[%s174_s16] sm:$0xff]  ;;  %v1208_v58 = vld [vmem:[#allocation2 + $0x10] sm:$0xff]  ;;  %v679_v62 = vld [vmem:[#allocation2 + $0x18] sm:$0xff]  ;;  %s178_s8 = scalar_lea.vmem %s1267_s2, %s1136_s13 }
  0x12   : > { %v1142_v2 = vpack.c.bf16 %v200_v1, %v200_v1  ;;  %v198_v3 = vld [vmem:[%s167_s20] sm:$0xff] }
  0x13   : > { %v199_v6 = vmul.f32 0.35355338, %v198_v3 }
  0x14   : > { %204 = vrot.lane.b32.xlu0 %v1142_v2, %s1073_s17 }
  0x15   : > { %v201_v7 = vpack.c.bf16 %v199_v6, %v199_v6 }
  0x86   : > { %v205_v4 = vpop.permute.xlu0 %204 }
  0x87   : > { %v211_v5 = vsel %vm193_vm0, %v205_v4, 0 }
  0x88   : > { %932 = vmatpush3.bf16.xpose.msra.mxu0 %v211_v5 }
  0x89   : > { %949 = vmatprep.subr.bf16.mxu0 %v1071_v0 }
  0x8f   : > { %934 = vmatmul.mubr.msk.bf16.vlgmr.msra.gmra.mrb[0].mxu0 %vm193_vm0, %v201_v7 }
  0x90   : > { %951 = vmatprep.mubr.msk.bf16.mxu0 %vm1072_vm1, %v1071_v0 }
 0x162   : > { %v247_v9 = vpop.f32.mrb[0].mxu0 }
 0x163   : > { %v935_v10 = vpop.f32.mrb[1].mxu0  ;;  %v254_v11 = vsel %vm193_vm0, %v247_v9, -inf }
 0x164   : > { %255 = vmax.xlane.f32.xlu0 %v254_v11  ;;  %v250_v12 = vpop.f32.mrb[2].mxu0 }
 0x165   : > { %v936_v13 = vpop.f32.mrb[3].mxu0 }
 0x1f1   : > { %v256_v16 = vpop.xlane.xlu0 %255 }
 0x1f2   : > { %v1170_v17 = vmax.f32 %v1167_v15, %v256_v16 }
 0x1f4   : > { %v258_v18 = vsub.f32 %v1167_v15, %v1170_v17  ;;  %336 = vst.msk [vmem:[#allocation2] sm:$0xff] %vm184_vm2, %v1170_v17  ;;  %263 = vperm.xlu1 %1021, %v1170_v17   ;;  %v412_v17 = vld [vmem:[#allocation3 + $0x8] sm:$0xff] }
 0x1f8   : > { %285 = vrot.lane.b32.xlu1 %v1142_v2, %s1076_s21 }
 0x1fc   : > { %346 = vrot.lane.b32.xlu1 %v1142_v2, %s1077_s22 }
 0x200   : > { %343 = vrot.lane.b32.xlu1 %v201_v7, %s1078_s23 }
 0x204   : > { %488 = vrot.lane.b32.xlu1 %v1142_v2, %s1079_s24 }
 0x208   : > { %485 = vrot.lane.b32.xlu1 %v201_v7, %s1080_s25 }
 0x20c   : > { %630 = vrot.lane.b32.xlu1 %v1142_v2, %s1081_s26 }
 0x210   : > { %627 = vrot.lane.b32.xlu1 %v201_v7, %s1082_s27 }
 0x273   : > { %v264_v19 = vpop.permute.xlu1 %263 }
 0x274   : > { %v266_v20 = vsub.f32 %v247_v9, %v264_v19 }
 0x276   : > { %v267_v21 = vmul.f32 1.442695, %v266_v20 }
 0x277   : > { %v286_v22 = vpop.permute.xlu1 %285 }
 0x278   : > { %1023 = vpow2.f32 %v267_v21  ;;  %v292_v23 = vsel %vm290_vm3, %v286_v22, 0 }
 0x279   : > { %938 = vmatpush3.bf16.msra.mxu1 %v292_v23 }
 0x27a   : > { %943 = vmatprep.subr.bf16.mxu1 %v1071_v0 }
 0x27b   : > { %v347_v24 = vpop.permute.xlu1 %346 }
 0x27c   : > { %v352_v27 = vsel %vm193_vm0, %v347_v24, 0 }
 0x27f   : > { %v344_v25 = vpop.permute.xlu1 %343 }
 0x282   : > { %v1183_v26 = vpop.eup %1023 }
 0x283   : > { %v284_v28 = vpack.c.bf16 %v1183_v26, %v1183_v26  ;;  %v489_v29 = vpop.permute.xlu1 %488  ;;  %v271_v4 = vsel %vm193_vm0, %v1183_v26, 0.0 }
 0x284   : > { %v494_v31 = vsel %vm193_vm0, %v489_v29, 0 }
 0x285   : > { %940 = vmatmul.mubr.msk.bf16.vlgmr.msra.gmra.mrb[0].mxu1 %vm193_vm0, %v284_v28 }
 0x286   : > { %944 = vmatpush3.bf16.xpose.msra.mxu1 %v352_v27  ;;  %945 = vmatprep.mubr.msk.bf16.mxu1 %vm1072_vm1, %v1071_v0 }
 0x287   : > { %955 = vmatprep.subr.bf16.mxu1 %v1071_v0  ;;  %v486_v30 = vpop.permute.xlu1 %485 }
 0x28b   : > { %v631_v32 = vpop.permute.xlu1 %630 }
 0x28c   : > { %v636_v33 = vsel %vm193_vm0, %v631_v32, 0 }
 0x28d   : > { %946 = vmatmul.mubr.msk.bf16.vlgmr.msra.gmra.mrb[4].mxu1 %vm193_vm0, %v344_v25 }
 0x28e   : > { %956 = vmatpush3.bf16.xpose.msra.mxu1 %v494_v31  ;;  %957 = vmatprep.mubr.msk.bf16.mxu1 %vm1072_vm1, %v1071_v0 }
 0x28f   : > { %967 = vmatprep.subr.bf16.mxu1 %v1071_v0  ;;  %v628_v34 = vpop.permute.xlu1 %627 }
 0x295   : > { %958 = vmatmul.mubr.msk.bf16.vlgmr.msra.gmra.mrb[8].mxu1 %vm193_vm0, %v486_v30 }
 0x296   : > { %968 = vmatpush3.bf16.xpose.msra.mxu1 %v636_v33  ;;  %969 = vmatprep.mubr.msk.bf16.mxu1 %vm1072_vm1, %v1071_v0  ;;  %v259_v33 = vmul.f32 1.442695, %v258_v18 }
 0x29d   : > { %970 = vmatmul.mubr.msk.bf16.vlgmr.msra.gmra.mrb[12].mxu1 %vm193_vm0, %v628_v34 }
 0x358   : > { %v1202_v35 = vpop.f32.mrb[0].mxu1 }
 0x359   : > { %v941_v36 = vpop.f32.mrb[1].mxu1 }
 0x35a   : > { %v331_v37 = vpop.f32.mrb[2].mxu1 }
 0x35b   : > { %v942_v38 = vpop.f32.mrb[3].mxu1 }
 0x360   : > { %v388_v39 = vpop.f32.mrb[4].mxu1 }
 0x361   : > { %v947_v40 = vpop.f32.mrb[5].mxu1  ;;  %v396_v41 = vsel %vm193_vm0, %v388_v39, -inf }
 0x362   : > { %397 = vmax.xlane.f32.xlu1 %v396_v41  ;;  %v391_v42 = vpop.f32.mrb[6].mxu1 }
 0x363   : > { %v948_v43 = vpop.f32.mrb[7].mxu1 }
 0x368   : > { %v530_v44 = vpop.f32.mrb[8].mxu1 }
 0x369   : > { %v959_v45 = vpop.f32.mrb[9].mxu1  ;;  %v538_v46 = vsel %vm193_vm0, %v530_v44, -inf }
 0x36a   : > { %539 = vmax.xlane.f32.xlu0 %v538_v46  ;;  %v533_v47 = vpop.f32.mrb[10].mxu1  ;;  %v554_v46 = vld [vmem:[#allocation3 + $0x10] sm:$0xff] }
 0x36b   : > { %v960_v48 = vpop.f32.mrb[11].mxu1 }
 0x370   : > { %v672_v49 = vpop.f32.mrb[12].mxu1 }
 0x371   : > { %v971_v50 = vpop.f32.mrb[13].mxu1  ;;  %v680_v51 = vsel %vm193_vm0, %v672_v49, -inf }
 0x372   : > { %681 = vmax.xlane.f32.xlu0 %v680_v51  ;;  %v675_v52 = vpop.f32.mrb[14].mxu1  ;;  %v696_v51 = vld [vmem:[#allocation3 + $0x18] sm:$0xff] }
 0x373   : > { %v972_v53 = vpop.f32.mrb[15].mxu1 }
 0x3ef   : > { %v398_v55 = vpop.xlane.xlu1 %397 }
 0x3f0   : > { %v399_v56 = vmax.f32 %v395_v54, %v398_v55 }
 0x3f2   : > { %v400_v57 = vsub.f32 %v395_v54, %v399_v56  ;;  %478 = vst.msk [vmem:[#allocation2 + $0x8] sm:$0xff] %vm184_vm2, %v399_v56  ;;  %405 = vperm.xlu0 %1022, %v399_v56  }
 0x3f4   : > { %v401_v28 = vmul.f32 1.442695, %v400_v57  ;;  %v277_v57 = vld [vmem:[#allocation4] sm:$0xff] }
 0x3f6   : > { %428 = vrot.lane.b32.xlu0 %v1142_v2, %s1083_s28 }
 0x3f7   : > { %v540_v59 = vpop.xlane.xlu0 %539 }
 0x3f8   : > { %v1212_v60 = vmax.f32 %v1208_v58, %v540_v59 }
 0x3fa   : > { %v542_v61 = vsub.f32 %v1208_v58, %v1212_v60  ;;  %620 = vst.msk [vmem:[#allocation2 + $0x10] sm:$0xff] %vm184_vm2, %v1212_v60  ;;  %547 = vperm.xlu1 %1021, %v1212_v60   ;;  %712 = vrot.lane.b32.xlu0 %v1142_v2, %s1084_s29 }
 0x3fc   : > { %v543_v36 = vmul.f32 1.442695, %v542_v61 }
 0x3ff   : > { %v682_v63 = vpop.xlane.xlu0 %681 }
 0x400   : > { %v683_v1 = vmax.f32 %v679_v62, %v682_v63 }
 0x402   : > { %v684_v3 = vsub.f32 %v679_v62, %v683_v1  ;;  %762 = vst.msk [vmem:[#allocation2 + $0x18] sm:$0xff] %vm184_vm2, %v683_v1  ;;  %689 = vperm.xlu1 %1021, %v683_v1   ;;  %v420_v1 = vld [vmem:[#allocation4 + $0x8] sm:$0xff] }
 0x404   : > { %v685_v30 = vmul.f32 1.442695, %v684_v3 }
 0x406   : > { %570 = vrot.lane.b32.xlu1 %v1142_v2, %s1085_s30 }
 0x42a   : > { %272 = vadd.xlane.f32.xlu1 %v271_v4 }
 0x471   : > { %v406_v5 = vpop.permute.xlu0 %405 }
 0x472   : > { %v408_v6 = vsub.f32 %v388_v39, %v406_v5  ;;  %v269_v39 = vld [vmem:[#allocation3] sm:$0xff] }
 0x474   : > { %v409_v7 = vmul.f32 1.442695, %v408_v6 }
 0x475   : > { %v429_v8 = vpop.permute.xlu0 %428 }
 0x476   : > { %1025 = vpow2.f32 %v409_v7  ;;  %v434_v9 = vsel %vm290_vm3, %v429_v8, 0 }
 0x477   : > { %950 = vmatpush3.bf16.msra.mxu0 %v434_v9 }
 0x478   : > { %961 = vmatprep.subr.bf16.mxu0 %v1071_v0 }
 0x479   : > { %v548_v10 = vpop.permute.xlu1 %547  ;;  %v713_v23 = vpop.permute.xlu0 %712 }
 0x47a   : > { %v550_v11 = vsub.f32 %v530_v44, %v548_v10  ;;  %v718_v27 = vsel %vm290_vm3, %v713_v23, 0  ;;  %v562_v10 = vld [vmem:[#allocation4 + $0x10] sm:$0xff] }
 0x47c   : > { %v551_v12 = vmul.f32 1.442695, %v550_v11 }
 0x47e   : > { %1027 = vpow2.f32 %v551_v12 }
 0x480   : > { %v1026_v13 = vpop.eup %1025 }
 0x481   : > { %v690_v2 = vpop.permute.xlu1 %689  ;;  %v414_v14 = vsel %vm193_vm0, %v1026_v13, 0.0  ;;  %v427_v16 = vpack.c.bf16 %v1026_v13, %v1026_v13 }
 0x482   : > { %v692_v19 = vsub.f32 %v672_v49, %v690_v2  ;;  %415 = vadd.xlane.f32.xlu0 %v414_v14 }
 0x483   : > { %952 = vmatmul.mubr.msk.bf16.vlgmr.msra.gmra.mrb[4].mxu0 %vm193_vm0, %v427_v16 }
 0x484   : > { %v693_v20 = vmul.f32 1.442695, %v692_v19  ;;  %963 = vmatprep.mubr.msk.bf16.mxu0 %vm1072_vm1, %v1071_v0  ;;  %v704_v19 = vld [vmem:[#allocation4 + $0x18] sm:$0xff] }
 0x485   : > { %v571_v21 = vpop.permute.xlu1 %570 }
 0x486   : > { %1029 = vpow2.f32 %v693_v20  ;;  %v576_v22 = vsel %vm290_vm3, %v571_v21, 0 }
 0x487   : > { %962 = vmatpush3.bf16.msra.mxu0 %v576_v22  ;;  %1031 = vpow2.f32 %v401_v28 }
 0x488   : > { %v1028_v24 = vpop.eup %1027  ;;  %973 = vmatprep.subr.bf16.mxu0 %v1071_v0  ;;  %1033 = vpow2.f32 %v685_v30 }
 0x489   : > { %v556_v25 = vsel %vm193_vm0, %v1028_v24, 0.0  ;;  %v569_v26 = vpack.c.bf16 %v1028_v24, %v1028_v24  ;;  %1035 = vpow2.f32 %v259_v33 }
 0x48a   : > { %557 = vadd.xlane.f32.xlu1 %v556_v25  ;;  %1037 = vpow2.f32 %v543_v36 }
 0x48b   : > { %964 = vmatmul.mubr.msk.bf16.vlgmr.msra.gmra.mrb[8].mxu0 %vm193_vm0, %v569_v26 }
 0x48c   : > { %974 = vmatpush3.bf16.msra.mxu0 %v718_v27  ;;  %975 = vmatprep.mubr.msk.bf16.mxu0 %vm1072_vm1, %v1071_v0 }
 0x490   : > { %v1030_v29 = vpop.eup %1029 }
 0x491   : > { %v698_v31 = vsel %vm193_vm0, %v1030_v29, 0.0  ;;  %v711_v32 = vpack.c.bf16 %v1030_v29, %v1030_v29  ;;  %v1032_v34 = vpop.eup %1031 }
 0x492   : > { %699 = vadd.xlane.f32.xlu0 %v698_v31  ;;  %v1034_v37 = vpop.eup %1033  ;;  %v413_v18 = vmul.f32 %v1032_v34, %v412_v17 }
 0x493   : > { %976 = vmatmul.mubr.msk.bf16.vlgmr.msra.gmra.mrb[12].mxu0 %vm193_vm0, %v711_v32  ;;  %v1036_v0 = vpop.eup %1035  ;;  %v697_v52 = vmul.f32 %v1034_v37, %v696_v51 }
 0x494   : > { %v1038_v38 = vpop.eup %1037  ;;  %v270_v40 = vmul.f32 %v1036_v0, %v269_v39 }
 0x495   : > { %v555_v47 = vmul.f32 %v1038_v38, %v554_v46 }
 0x49b   : > { %423 = vperm.xlu1 %1021, %v1032_v34  }
 0x49f   : > { %707 = vperm.xlu1 %1021, %v1034_v37  }
 0x4a8   : > { %280 = vperm.xlu0 %1022, %v1036_v0  }
 0x4ac   : > { %565 = vperm.xlu0 %1022, %v1038_v38  }
 0x4b7   : > { %v273_v41 = vpop.xlane.xlu1 %272 }
 0x4b8   : > { %v274_v42 = vadd.f32 %v273_v41, %v270_v40 }
 0x4ba   : > { %276 = vst.msk [vmem:[#allocation3] sm:$0xff] %vm184_vm2, %v274_v42 }
 0x4c1   : > { %v767_v43 = vld [vmem:[#allocation3] sm:$0xff] }
 0x4c2   : > { %1039 = vrcp.f32 %v767_v43 }
 0x4cc   : > { %v1040_v15 = vpop.eup %1039 }
 0x4cd   : > { %771 = vperm.xlu1 %1021, %v1040_v15  }
 0x50f   : > { %v416_v44 = vpop.xlane.xlu0 %415 }
 0x510   : > { %v417_v45 = vadd.f32 %v416_v44, %v413_v18 }
 0x512   : > { %418 = vst.msk [vmem:[#allocation3 + $0x8] sm:$0xff] %vm184_vm2, %v417_v45 }
 0x517   : > { %v558_v48 = vpop.xlane.xlu1 %557 }
 0x518   : > { %v559_v49 = vadd.f32 %v558_v48, %v555_v47 }
 0x519   : > { %v776_v50 = vld [vmem:[#allocation3 + $0x8] sm:$0xff] }
 0x51a   : > { %560 = vst.msk [vmem:[#allocation3 + $0x10] sm:$0xff] %vm184_vm2, %v559_v49  ;;  %1041 = vrcp.f32 %v776_v50 }
 0x51b   : > { %v424_v3 = vpop.permute.xlu1 %423 }
 0x51c   : > { %v426_v4 = vmul.f32 %v424_v3, %v420_v1 }
 0x51f   : > { %v700_v53 = vpop.xlane.xlu0 %699  ;;  %v708_v20 = vpop.permute.xlu1 %707 }
 0x520   : > { %v701_v54 = vadd.f32 %v700_v53, %v697_v52  ;;  %v710_v21 = vmul.f32 %v708_v20, %v704_v19 }
 0x521   : > { %v785_v55 = vld [vmem:[#allocation3 + $0x10] sm:$0xff] }
 0x522   : > { %702 = vst.msk [vmem:[#allocation3 + $0x18] sm:$0xff] %vm184_vm2, %v701_v54  ;;  %1043 = vrcp.f32 %v785_v55 }
 0x524   : > { %v1042_v56 = vpop.eup %1041 }
 0x525   : > { %780 = vperm.xlu0 %1022, %v1042_v56  }
 0x527   : > { %v281_v58 = vpop.permute.xlu0 %280 }
 0x528   : > { %v283_v59 = vmul.f32 %v281_v58, %v277_v57 }
 0x529   : > { %v794_v60 = vld [vmem:[#allocation3 + $0x18] sm:$0xff] }
 0x52a   : > { %v334_v61 = vadd.f32 %v1202_v35, %v283_v59  ;;  %1045 = vrcp.f32 %v794_v60 }
 0x52b   : > { %v566_v11 = vpop.permute.xlu0 %565 }
 0x52c   : > { %v1044_v62 = vpop.eup %1043  ;;  %335 = vst.msk [vmem:[#allocation4] sm:$0xff] %vm193_vm0, %v334_v61  ;;  %v568_v35 = vmul.f32 %v566_v11, %v562_v10 }
 0x52d   : > { %789 = vperm.xlu1 %1021, %v1044_v62  }
 0x533   : > { %v766_v0 = vld [vmem:[#allocation4] sm:$0xff] }
 0x534   : > { %v1046_v63 = vpop.eup %1045 }
 0x535   : > { %798 = vperm.xlu0 %1022, %v1046_v63  }
 0x54c   : > { %v772_v30 = vpop.permute.xlu1 %771 }
 0x54d   : > { %v774_v39 = vmul.f32 %v772_v30, %v766_v0 }
 0x556   : > { %v470_v5 = vpop.f32.mrb[4].mxu0 }
 0x557   : > { %v476_v6 = vadd.f32 %v470_v5, %v426_v4  ;;  %v953_v7 = vpop.f32.mrb[5].mxu0 }
 0x558   : > { %v473_v8 = vpop.f32.mrb[6].mxu0 }
 0x559   : > { %477 = vst.msk [vmem:[#allocation4 + $0x8] sm:$0xff] %vm193_vm0, %v476_v6  ;;  %v954_v9 = vpop.f32.mrb[7].mxu0 }
 0x55e   : > { %v612_v12 = vpop.f32.mrb[8].mxu0 }
 0x55f   : > { %v618_v13 = vadd.f32 %v612_v12, %v568_v35  ;;  %v965_v2 = vpop.f32.mrb[9].mxu0 }
 0x560   : > { %v615_v14 = vpop.f32.mrb[10].mxu0  ;;  %v775_v28 = vld [vmem:[#allocation4 + $0x8] sm:$0xff] }
 0x561   : > { %619 = vst.msk [vmem:[#allocation4 + $0x10] sm:$0xff] %vm193_vm0, %v618_v13  ;;  %v966_v16 = vpop.f32.mrb[11].mxu0 }
 0x566   : > { %v754_v22 = vpop.f32.mrb[12].mxu0 }
 0x567   : > { %v760_v23 = vadd.f32 %v754_v22, %v710_v21  ;;  %v977_v24 = vpop.f32.mrb[13].mxu0 }
 0x568   : > { %v757_v25 = vpop.f32.mrb[14].mxu0  ;;  %v784_v32 = vld [vmem:[#allocation4 + $0x10] sm:$0xff] }
 0x569   : > { %761 = vst.msk [vmem:[#allocation4 + $0x18] sm:$0xff] %vm193_vm0, %v760_v23  ;;  %v978_v26 = vpop.f32.mrb[15].mxu0 }
 0x570   : > { %v793_v36 = vld [vmem:[#allocation4 + $0x18] sm:$0xff] }
 0x5a4   : > { %v781_v27 = vpop.permute.xlu0 %780 }
 0x5a5   : > { %v783_v29 = vmul.f32 %v781_v27, %v775_v28 }
 0x5a7   : > { %803 = vrot.lane.b32.xlu1 %v783_v29, %s1086_s3 }
 0x5ac   : > { %v790_v31 = vpop.permute.xlu1 %789 }
 0x5ad   : > { %v792_v33 = vmul.f32 %v790_v31, %v784_v32 }
 0x5af   : > { %807 = vrot.lane.b32.xlu0 %v792_v33, %s1087_s4 }
 0x5b4   : > { %v799_v34 = vpop.permute.xlu0 %798 }
 0x5b5   : > { %v801_v37 = vmul.f32 %v799_v34, %v793_v36 }
 0x5b7   : > { %811 = vrot.lane.b32.xlu1 %v801_v37, %s1088_s5 }
 0x619   : > { %v804_v38 = vpop.permute.xlu1 %803 }
 0x61a   : > { %v814_v41 = vsel %vm193_vm0, %v774_v39, %v804_v38 }
 0x621   : > { %v808_v40 = vpop.permute.xlu0 %807 }
 0x622   : > { %v816_v42 = vsel %vm815_vm4, %v814_v41, %v808_v40 }
 0x629   : > { %v812_v43 = vpop.permute.xlu1 %811 }
 0x62a   : > { %v818_v15 = vsel %vm817_vm5, %v816_v42, %v812_v43 }
 0x62b   : > { %820 = vst.msk [vmem:[%s178_s8] sm:$0xff] %vm819_vm6, %v818_v15 }
 0x62c PF: > { %s12_s11 = sadd.s32 1, %s1069_s11   ;;  %s1268_s9 = smov %s1065_s10 }
 0x62d   : > { %p9_p5 = scmp.ge.s32.totalorder %s12_s11, 4   ;;  %s1269_s10 = smov %s1271_s12 }
 0x62f   :  { %11 = sbr.rel (!%p9_p5) target bundleno = 2 (0x2), region = 78 }

// kernel: social_mae_forward.36
= control target key start
LH: loop header
LB: loop body
LE: loop exit
PB: predicated region body
PF: predicated region fallthrough
CT: control target
= control target key end

     0   :  { %vm31_vm0 = vcmask 261120   ;;  %v397_v15 = vmov 0.0   ;;  %vm398_vm1 = vmmov 0   ;;  %s510_s0 = inlined_call_operand.vmem [shape: f32[16,32], index: 0, kind: input, shape index: {}]   ;;  %s511_s3 = inlined_call_operand.vmem [shape: bf16[32,128], index: 3, kind: input, shape index: {}]   ;;  %s512_s1 = inlined_call_operand.vmem [shape: f32[1,32], index: 1, kind: input, shape index: {}]   ;;  %s513_s2 = inlined_call_operand.vmem [shape: f32[1,32], index: 2, kind: input, shape index: {}]   ;;  %s514_s5 = inlined_call_operand.vmem [shape: bf16[128,32], index: 5, kind: input, shape index: {}]   ;;  %s515_s4 = inlined_call_operand.vmem [shape: f32[1,128], index: 4, kind: input, shape index: {}]   ;;  %s516_s6 = inlined_call_operand.vmem [shape: f32[1,32], index: 6, kind: input, shape index: {}]   ;;  %s517_s7 = inlined_call_operand.vmem [shape: f32[16,32], index: 7, kind: output, shape index: {}]  }
   0x1   :  { %v442_v0 = vld [vmem:[%s510_s0] sm:$0xff]  ;;  %v447_v1 = vld [vmem:[%s510_s0 + $0x8] sm:$0xff]  ;;  %345 = vmatprep.subr.bf16.mxu0 %v397_v15  ;;  %353 = vmatprep.subr.bf16.mxu1 %v397_v15  ;;  %v379_v36 = vld [vmem:[%s514_s5 + $0x10] sm:$0xff]  }
   0x2   :  { %v32_v2 = vsel %vm31_vm0, %v442_v0, 0.0  ;;  %v35_v3 = vsel %vm31_vm0, %v447_v1, 0.0  ;;  %v375_v14 = vld [vmem:[%s511_s3] sm:$0xff]   ;;  %v376_v16 = vld [vmem:[%s511_s3 + $0x8] sm:$0xff]   ;;  %349 = vmatprep.mubr.msk.bf16.mxu0 %vm398_vm1, %v397_v15  ;;  %369 = vmatprep.mubr.msk.bf16.mxu1 %vm398_vm1, %v397_v15  ;;  %v380_v37 = vld [vmem:[%s514_s5 + $0x18] sm:$0xff]  }
   0x3   :  { %33 = vadd.xlane.f32.xlu0 %v32_v2  ;;  %346 = vmatpush3.bf16.msra.mxu0 %v375_v14  ;;  %v318_v25 = vld [vmem:[%s512_s1] ss:$0 sm:$0xff]  ;;  %v378_v35 = vld [vmem:[%s514_s5 + $0x8] sm:$0xff]   ;;  %v383_v40 = vld [vmem:[%s514_s5 + $0x30] sm:$0xff]  }
   0x4   :  { %347 = vmatprep.subr.bf16.mxu0 %v397_v15  ;;  %v319_v29 = vld [vmem:[%s513_s2] ss:$0 sm:$0xff]  ;;  %v382_v39 = vld [vmem:[%s514_s5 + $0x28] sm:$0xff]   ;;  %v384_v41 = vld [vmem:[%s514_s5 + $0x38] sm:$0xff]  }
   0x5   :  { %v377_v34 = vld [vmem:[%s514_s5] sm:$0xff]  }
   0x6   :  { %354 = vmatpush3.bf16.msra.mxu1 %v377_v34  ;;  %v381_v38 = vld [vmem:[%s514_s5 + $0x20] sm:$0xff]  }
   0x7   :  { %36 = vadd.xlane.f32.xlu0 %v35_v3  ;;  %348 = vmatpush3.bf16.msra.mxu0 %v376_v16  ;;  %v320_v42 = vld [vmem:[%s515_s4] ss:$0 sm:$0xff] }
   0x8   :  { %355 = vmatprep.subr.bf16.mxu1 %v397_v15 }
   0xa   :  { %356 = vmatpush3.bf16.msra.mxu1 %v378_v35 }
   0xb   :  { %357 = vmatprep.subr.bf16.mxu1 %v397_v15 }
   0xe   :  { %358 = vmatpush3.bf16.msra.mxu1 %v379_v36 }
   0xf   :  { %359 = vmatprep.subr.bf16.mxu1 %v397_v15 }
  0x12   :  { %360 = vmatpush3.bf16.msra.mxu1 %v380_v37 }
  0x13   :  { %361 = vmatprep.subr.bf16.mxu1 %v397_v15 }
  0x16   :  { %362 = vmatpush3.bf16.msra.mxu1 %v381_v38  ;;  %v324_v38 = vld [vmem:[%s516_s6] ss:$0 sm:$0xff] }
  0x17   :  { %363 = vmatprep.subr.bf16.mxu1 %v397_v15 }
  0x1a   :  { %364 = vmatpush3.bf16.msra.mxu1 %v382_v39 }
  0x1b   :  { %365 = vmatprep.subr.bf16.mxu1 %v397_v15 }
  0x1e   :  { %366 = vmatpush3.bf16.msra.mxu1 %v383_v40 }
  0x1f   :  { %367 = vmatprep.subr.bf16.mxu1 %v397_v15 }
  0x22   :  { %368 = vmatpush3.bf16.msra.mxu1 %v384_v41 }
  0x90   :  { %v34_v4 = vpop.xlane.xlu0 %33 }
  0x91   :  { %v39_v5 = vmul.f32 0.03125, %v34_v4 }
  0x93   :  { %v41_v6 = vsub.f32 %v442_v0, %v39_v5 }
  0x94   :  { %v37_v7 = vpop.xlane.xlu0 %36 }
  0x95   :  { %v40_v8 = vmul.f32 0.03125, %v37_v7  ;;  %v43_v9 = vmul.f32 %v41_v6, %v41_v6 }
  0x97   :  { %v42_v10 = vsub.f32 %v447_v1, %v40_v8  ;;  %v45_v11 = vsel %vm31_vm0, %v43_v9, 0.0 }
  0x98   :  { %46 = vadd.xlane.f32.xlu1 %v45_v11 }
  0x99   :  { %v44_v12 = vmul.f32 %v42_v10, %v42_v10 }
  0x9b   :  { %v48_v13 = vsel %vm31_vm0, %v44_v12, 0.0 }
  0x9c   :  { %49 = vadd.xlane.f32.xlu1 %v48_v13 }
 0x125   :  { %v47_v17 = vpop.xlane.xlu1 %46 }
 0x126   :  { %v51_v18 = vmul.f32 0.03125, %v47_v17 }
 0x128   :  { %v53_v19 = vadd.f32 1e-05, %v51_v18 }
 0x129   :  { %v50_v20 = vpop.xlane.xlu1 %49 }
 0x12a   :  { %385 = vrsqrt.f32 %v53_v19  ;;  %v52_v21 = vmul.f32 0.03125, %v50_v20 }
 0x12c   :  { %v54_v22 = vadd.f32 1e-05, %v52_v21 }
 0x12e   :  { %387 = vrsqrt.f32 %v54_v22 }
 0x134   :  { %v386_v23 = vpop.eup %385 }
 0x135   :  { %v57_v24 = vmul.f32 %v386_v23, %v41_v6 }
 0x137   :  { %v65_v28 = vmul.f32 %v318_v25, %v57_v24 }
 0x138   :  { %v388_v26 = vpop.eup %387 }
 0x139   :  { %v58_v27 = vmul.f32 %v388_v26, %v42_v10  ;;  %v73_v31 = vadd.f32 %v319_v29, %v65_v28 }
 0x13b   :  { %v66_v30 = vmul.f32 %v318_v25, %v58_v27 }
 0x13d   :  { %v74_v32 = vadd.f32 %v319_v29, %v66_v30 }
 0x13f   :  { %v75_v33 = vpack.c.bf16 %v74_v32, %v73_v31 }
 0x141   :  { %350 = vmatmul.mubr.msk.bf16.vlgmr.msra.gmra.mrb[0].mxu0 %vm31_vm0, %v75_v33 }
 0x214   :  { %v136_v43 = vpop.f32.mrb[0].mxu0 }
 0x215   :  { %v137_v44 = vadd.f32 %v320_v42, %v136_v43  ;;  %v351_v45 = vpop.f32.mrb[1].mxu0 }
 0x216   :  { %v139_v46 = vpop.f32.mrb[2].mxu0 }
 0x217   :  { %v145_v47 = vmul.f32 0.70710677, %v137_v44  ;;  %v140_v48 = vadd.f32 %v320_v42, %v139_v46  ;;  %v352_v49 = vpop.f32.mrb[3].mxu0  ;;  %v143_v32 = vmul.f32 0.5, %v137_v44 }
 0x219   :  { %v147_v50 = vand.u32 2147483647, %v145_v47  ;;  %v146_v51 = vmul.f32 0.70710677, %v140_v48  ;;  %vm187_vm2 = vcmp.ge.f32.partialorder %v145_v47, 0.0  ;;  %v144_v33 = vmul.f32 0.5, %v140_v48 }
 0x21b   :  { %v149_v52 = vmul.f32 0.3275911, %v147_v50  ;;  %v148_v53 = vand.u32 2147483647, %v146_v51  ;;  %v175_v57 = vsub.f32 0.0, %v147_v50  ;;  %vm188_vm3 = vcmp.ge.f32.partialorder %v146_v51, 0.0 }
 0x21d   :  { %v151_v54 = vadd.f32 1.0, %v149_v52  ;;  %v150_v55 = vmul.f32 0.3275911, %v148_v53  ;;  %v176_v58 = vsub.f32 0.0, %v148_v53  ;;  %v177_v60 = vmul.f32 %v175_v57, %v147_v50 }
 0x21f   :  { %389 = vrcp.f32 %v151_v54  ;;  %v152_v56 = vadd.f32 1.0, %v150_v55  ;;  %v178_v2 = vmul.f32 %v176_v58, %v148_v53  ;;  %v179_v3 = vmul.f32 1.442695, %v177_v60 }
 0x221   :  { %391 = vrcp.f32 %v152_v56  ;;  %v181_v8 = vmul.f32 1.442695, %v178_v2 }
 0x222   :  { %393 = vpow2.f32 %v179_v3 }
 0x223   :  { %395 = vpow2.f32 %v181_v8 }
 0x229   :  { %v390_v59 = vpop.eup %389 }
 0x22a   :  { %v157_v61 = vmul.f32 1.0614054, %v390_v59 }
 0x22b   :  { %v392_v62 = vpop.eup %391 }
 0x22c   :  { %v159_v63 = vadd.f32 -1.4531521, %v157_v61  ;;  %v158_v4 = vmul.f32 1.0614054, %v392_v62  ;;  %v394_v19 = vpop.eup %393 }
 0x22d   :  { %v396_v23 = vpop.eup %395 }
 0x22e   :  { %v161_v5 = vmul.f32 %v390_v59, %v159_v63  ;;  %v160_v6 = vadd.f32 -1.4531521, %v158_v4 }
 0x230   :  { %v163_v7 = vadd.f32 1.4214138, %v161_v5  ;;  %v162_v9 = vmul.f32 %v392_v62, %v160_v6 }
 0x232   :  { %v165_v10 = vmul.f32 %v390_v59, %v163_v7  ;;  %v164_v11 = vadd.f32 1.4214138, %v162_v9 }
 0x234   :  { %v167_v12 = vadd.f32 -0.28449672, %v165_v10  ;;  %v166_v13 = vmul.f32 %v392_v62, %v164_v11 }
 0x236   :  { %v169_v14 = vmul.f32 %v390_v59, %v167_v12  ;;  %v168_v15 = vadd.f32 -0.28449672, %v166_v13 }
 0x238   :  { %v171_v16 = vadd.f32 0.2548296, %v169_v14  ;;  %v170_v17 = vmul.f32 %v392_v62, %v168_v15 }
 0x23a   :  { %v173_v18 = vmul.f32 %v390_v59, %v171_v16  ;;  %v172_v20 = vadd.f32 0.2548296, %v170_v17 }
 0x23c   :  { %v183_v21 = vmul.f32 %v394_v19, %v173_v18  ;;  %v174_v22 = vmul.f32 %v392_v62, %v172_v20 }
 0x23e   :  { %v185_v24 = vsub.f32 1.0, %v183_v21  ;;  %v184_v25 = vmul.f32 %v396_v23, %v174_v22 }
 0x240   :  { %v189_v26 = vsub.f32 0.0, %v185_v24  ;;  %v186_v27 = vsub.f32 1.0, %v184_v25 }
 0x242   :  { %v191_v28 = vsel %vm187_vm2, %v185_v24, %v189_v26  ;;  %v190_v29 = vsub.f32 0.0, %v186_v27 }
 0x243   :  { %v193_v30 = vadd.f32 1.0, %v191_v28 }
 0x244   :  { %v192_v31 = vsel %vm188_vm3, %v186_v27, %v190_v29 }
 0x245   :  { %v194_v34 = vadd.f32 1.0, %v192_v31  ;;  %v195_v35 = vmul.f32 %v193_v30, %v143_v32 }
 0x247   :  { %v196_v36 = vmul.f32 %v194_v34, %v144_v33 }
 0x249   :  { %v197_v37 = vpack.c.bf16 %v196_v36, %v195_v35 }
 0x24b   :  { %370 = vmatmul.mubr.bf16.vlgmr.msra.gmra.mrb[0].mxu1 %v197_v37 }
 0x31e   :  { %v303_v39 = vpop.f32.mrb[0].mxu1 }
 0x31f   :  { %v304_v40 = vadd.f32 %v324_v38, %v303_v39  ;;  %v371_v41 = vpop.f32.mrb[1].mxu1 }
 0x320   :  { %v306_v42 = vpop.f32.mrb[2].mxu1 }
 0x321   :  { %v310_v43 = vadd.f32 %v304_v40, %v442_v0  ;;  %v307_v45 = vadd.f32 %v324_v38, %v306_v42  ;;  %v372_v46 = vpop.f32.mrb[3].mxu1 }
 0x323   :  { %312 = vst.msk [vmem:[%s517_s7] sm:$0xff] %vm31_vm0, %v310_v43  ;;  %v311_v44 = vadd.f32 %v307_v45, %v447_v1 }
 0x325   :  { %313 = vst.msk [vmem:[%s517_s7 + $0x8] sm:$0xff] %vm31_vm0, %v311_v44 }

// kernel: social_mae_forward.23
= control target key start
LH: loop header
LB: loop body
LE: loop exit
PB: predicated region body
PF: predicated region fallthrough
CT: control target
= control target key end

     0   :  { %v96_v0 = vmov 0.0   ;;  %vm97_vm0 = vmmov 0   ;;  %vm32_vm1 = vcmask 130048   ;;  %vm76_vm2 = vcmask 261120   ;;  %s130_s1 = inlined_call_operand.vmem [shape: bf16[16,32], index: 1, kind: input, shape index: {}]   ;;  %s131_s0 = inlined_call_operand.vmem [shape: f32[8,16], index: 0, kind: input, shape index: {}]   ;;  %s132_s2 = inlined_call_operand.vmem [shape: f32[1,32], index: 2, kind: input, shape index: {}]   ;;  %s133_s3 = inlined_call_operand.vmem [shape: f32[8,32], index: 3, kind: output, shape index: {}]  }
   0x1   :  { %87 = vmatprep.subr.bf16.mxu0 %v96_v0  ;;  %v95_v1 = vld [vmem:[%s130_s1] sm:$0xff]   ;;  %89 = vmatprep.mubr.msk.bf16.mxu0 %vm97_vm0, %v96_v0 }
   0x2   :  { %v15_v2 = vld [vmem:[%s131_s0] sm:$0xff]  ;;  %88 = vmatpush3.bf16.msra.mxu0 %v95_v1 }
   0x3   :  { %v16_v3 = vpack.c.bf16 %v15_v2, %v15_v2  ;;  %v82_v4 = vld [vmem:[%s132_s2] ss:$0 sm:$0xff] }
   0x5   :  { %90 = vmatmul.mubr.msk.bf16.vlgmr.msra.gmra.mrb[0].mxu0 %vm32_vm1, %v16_v3 }
  0xd8   :  { %v70_v5 = vpop.f32.mrb[0].mxu0 }
  0xd9   :  { %v71_v6 = vadd.f32 %v82_v4, %v70_v5  ;;  %v91_v7 = vpop.f32.mrb[1].mxu0 }
  0xda   :  { %v73_v8 = vpop.f32.mrb[2].mxu0 }
  0xdb   :  { %77 = vst.msk [vmem:[%s133_s3] sm:$0xff] %vm76_vm2, %v71_v6  ;;  %v92_v9 = vpop.f32.mrb[3].mxu0 }

// kernel: social_mae_forward.27
= control target key start
LH: loop header
LB: loop body
LE: loop exit
PB: predicated region body
PF: predicated region fallthrough
CT: control target
= control target key end

     0   :  { %v113_v0 = vmov 0.0   ;;  %vm114_vm0 = vmmov 0   ;;  %vm43_vm1 = vcmask 261120   ;;  %s158_s2 = inlined_call_operand.vmem [shape: bf16[32,32], index: 2, kind: input, shape index: {}]   ;;  %s159_s0 = inlined_call_operand.vmem [shape: f32[8,32], index: 0, kind: input, shape index: {}]   ;;  %s160_s3 = inlined_call_operand.vmem [shape: f32[1,32], index: 3, kind: input, shape index: {}]   ;;  %s161_s1 = inlined_call_operand.vmem [shape: f32[8,32], index: 1, kind: input, shape index: {}]   ;;  %s162_s4 = inlined_call_operand.vmem [shape: f32[8,32], index: 4, kind: output, shape index: {}]  }
   0x1   :  { %101 = vmatprep.subr.bf16.mxu0 %v113_v0  ;;  %v111_v1 = vld [vmem:[%s158_s2] sm:$0xff]   ;;  %105 = vmatprep.mubr.msk.bf16.mxu0 %vm114_vm0, %v113_v0  ;;  %v112_v2 = vld [vmem:[%s158_s2 + $0x8] sm:$0xff]  }
   0x2   :  { %102 = vmatpush3.bf16.msra.mxu0 %v111_v1  ;;  %v18_v3 = vld [vmem:[%s159_s0] sm:$0xff] }
   0x3   :  { %103 = vmatprep.subr.bf16.mxu0 %v113_v0  ;;  %v19_v4 = vpack.c.bf16 %v18_v3, %v18_v3  ;;  %v94_v5 = vld [vmem:[%s160_s3] ss:$0 sm:$0xff] }
   0x4   :  { %v87_v7 = vld [vmem:[%s161_s1] sm:$0xff] }
   0x6   :  { %104 = vmatpush3.bf16.msra.mxu0 %v112_v2 }
   0x9   :  { %106 = vmatmul.mubr.msk.bf16.vlgmr.msra.gmra.mrb[0].mxu0 %vm43_vm1, %v19_v4 }
  0xdc   :  { %v81_v6 = vpop.f32.mrb[0].mxu0 }
  0xdd   :  { %v82_v8 = vadd.f32 %v94_v5, %v81_v6  ;;  %v107_v9 = vpop.f32.mrb[1].mxu0 }
  0xde   :  { %v84_v10 = vpop.f32.mrb[2].mxu0 }
  0xdf   :  { %v88_v11 = vadd.f32 %v87_v7, %v82_v8  ;;  %v108_v12 = vpop.f32.mrb[3].mxu0 }
  0xe1   :  { %89 = vst.msk [vmem:[%s162_s4] sm:$0xff] %vm43_vm1, %v88_v11 }

// kernel: social_mae_forward.25
= control target key start
LH: loop header
LB: loop body
LE: loop exit
PB: predicated region body
PF: predicated region fallthrough
CT: control target
= control target key end

     0   :  { %vm24_vm0 = vcmask 261120   ;;  %v149_v8 = vmov 0.0   ;;  %vm150_vm1 = vmmov 0   ;;  %vm120_vm2 = vcmask 785408   ;;  %s205_s0 = inlined_call_operand.vmem [shape: f32[8,32], index: 0, kind: input, shape index: {}]   ;;  %s206_s3 = inlined_call_operand.vmem [shape: bf16[32,96], index: 3, kind: input, shape index: {}]   ;;  %s207_s1 = inlined_call_operand.vmem [shape: f32[1,32], index: 1, kind: input, shape index: {}]   ;;  %s208_s2 = inlined_call_operand.vmem [shape: f32[1,32], index: 2, kind: input, shape index: {}]   ;;  %s209_s4 = inlined_call_operand.vmem [shape: f32[1,96], index: 4, kind: input, shape index: {}]   ;;  %s210_s5 = inlined_call_operand.vmem [shape: f32[8,96], index: 5, kind: output, shape index: {}]  }
   0x1   :  { %v21_v0 = vld [vmem:[%s205_s0] sm:$0xff]  ;;  %135 = vmatprep.subr.bf16.mxu0 %v149_v8  ;;  %v146_v9 = vld [vmem:[%s206_s3 + $0x8] sm:$0xff]   ;;  %139 = vmatprep.mubr.msk.bf16.mxu0 %vm150_vm1, %v149_v8 }
   0x2   :  { %v25_v1 = vsel %vm24_vm0, %v21_v0, 0.0  ;;  %v145_v7 = vld [vmem:[%s206_s3] sm:$0xff]  }
   0x3   :  { %26 = vadd.xlane.f32.xlu0 %v25_v1  ;;  %136 = vmatpush3.bf16.msra.mxu0 %v145_v7  ;;  %v126_v14 = vld [vmem:[%s207_s1] ss:$0 sm:$0xff] }
   0x4   :  { %137 = vmatprep.subr.bf16.mxu0 %v149_v8  ;;  %v127_v16 = vld [vmem:[%s208_s2] ss:$0 sm:$0xff] }
   0x5   :  { %v128_v20 = vld [vmem:[%s209_s4] ss:$0 sm:$0xff] }
   0x7   :  { %138 = vmatpush3.bf16.msra.mxu0 %v146_v9 }
  0x90   :  { %v27_v2 = vpop.xlane.xlu0 %26 }
  0x91   :  { %v29_v3 = vmul.f32 0.03125, %v27_v2 }
  0x93   :  { %v30_v4 = vsub.f32 %v21_v0, %v29_v3 }
  0x95   :  { %v31_v5 = vmul.f32 %v30_v4, %v30_v4 }
  0x97   :  { %v32_v6 = vsel %vm24_vm0, %v31_v5, 0.0 }
  0x98   :  { %33 = vadd.xlane.f32.xlu0 %v32_v6 }
 0x125   :  { %v34_v10 = vpop.xlane.xlu0 %33 }
 0x126   :  { %v35_v11 = vmul.f32 0.03125, %v34_v10 }
 0x128   :  { %v36_v12 = vadd.f32 1e-05, %v35_v11 }
 0x12a   :  { %147 = vrsqrt.f32 %v36_v12 }
 0x134   :  { %v148_v13 = vpop.eup %147 }
 0x135   :  { %v38_v15 = vmul.f32 %v148_v13, %v30_v4 }
 0x137   :  { %v45_v17 = vmul.f32 %v126_v14, %v38_v15 }
 0x139   :  { %v52_v18 = vadd.f32 %v127_v16, %v45_v17 }
 0x13b   :  { %v53_v19 = vpack.c.bf16 %v52_v18, %v52_v18 }
 0x13d   :  { %140 = vmatmul.mubr.msk.bf16.vlgmr.msra.gmra.mrb[0].mxu0 %vm24_vm0, %v53_v19 }
 0x210   :  { %v114_v21 = vpop.f32.mrb[0].mxu0 }
 0x211   :  { %v115_v22 = vadd.f32 %v128_v20, %v114_v21  ;;  %v141_v23 = vpop.f32.mrb[1].mxu0 }
 0x212   :  { %v117_v24 = vpop.f32.mrb[2].mxu0 }
 0x213   :  { %121 = vst.msk [vmem:[%s210_s5] sm:$0xff] %vm120_vm2, %v115_v22  ;;  %v142_v25 = vpop.f32.mrb[3].mxu0 }

// kernel: social_mae_forward.28
= control target key start
LH: loop header
LB: loop body
LE: loop exit
PB: predicated region body
PF: predicated region fallthrough
CT: control target
= control target key end

     0   :  { %vm30_vm0 = vcmask 261120   ;;  %v344_v8 = vmov 0.0   ;;  %vm345_vm1 = vmmov 0   ;;  %s443_s0 = inlined_call_operand.vmem [shape: f32[8,32], index: 0, kind: input, shape index: {}]   ;;  %s444_s3 = inlined_call_operand.vmem [shape: bf16[32,128], index: 3, kind: input, shape index: {}]   ;;  %s445_s1 = inlined_call_operand.vmem [shape: f32[1,32], index: 1, kind: input, shape index: {}]   ;;  %s446_s2 = inlined_call_operand.vmem [shape: f32[1,32], index: 2, kind: input, shape index: {}]   ;;  %s447_s5 = inlined_call_operand.vmem [shape: bf16[128,32], index: 5, kind: input, shape index: {}]   ;;  %s448_s4 = inlined_call_operand.vmem [shape: f32[1,128], index: 4, kind: input, shape index: {}]   ;;  %s449_s6 = inlined_call_operand.vmem [shape: f32[1,32], index: 6, kind: input, shape index: {}]   ;;  %s450_s7 = inlined_call_operand.vmem [shape: f32[8,32], index: 7, kind: output, shape index: {}]  }
   0x1   :  { %v389_v0 = vld [vmem:[%s443_s0] sm:$0xff]  ;;  %298 = vmatprep.subr.bf16.mxu0 %v344_v8  ;;  %306 = vmatprep.subr.bf16.mxu1 %v344_v8  ;;  %v329_v9 = vld [vmem:[%s444_s3 + $0x8] sm:$0xff]   ;;  %v332_v22 = vld [vmem:[%s447_s5 + $0x10] sm:$0xff]  }
   0x2   :  { %v31_v1 = vsel %vm30_vm0, %v389_v0, 0.0  ;;  %v328_v7 = vld [vmem:[%s444_s3] sm:$0xff]   ;;  %302 = vmatprep.mubr.msk.bf16.mxu0 %vm345_vm1, %v344_v8  ;;  %322 = vmatprep.mubr.msk.bf16.mxu1 %vm345_vm1, %v344_v8  ;;  %v331_v21 = vld [vmem:[%s447_s5 + $0x8] sm:$0xff]   ;;  %v333_v23 = vld [vmem:[%s447_s5 + $0x18] sm:$0xff]  }
   0x3   :  { %32 = vadd.xlane.f32.xlu0 %v31_v1  ;;  %299 = vmatpush3.bf16.msra.mxu0 %v328_v7  ;;  %v271_v14 = vld [vmem:[%s445_s1] ss:$0 sm:$0xff]  ;;  %v335_v25 = vld [vmem:[%s447_s5 + $0x28] sm:$0xff]   ;;  %v336_v26 = vld [vmem:[%s447_s5 + $0x30] sm:$0xff]  }
   0x4   :  { %300 = vmatprep.subr.bf16.mxu0 %v344_v8  ;;  %v272_v16 = vld [vmem:[%s446_s2] ss:$0 sm:$0xff]  ;;  %v337_v27 = vld [vmem:[%s447_s5 + $0x38] sm:$0xff]  }
   0x5   :  { %v330_v20 = vld [vmem:[%s447_s5] sm:$0xff]  }
   0x6   :  { %307 = vmatpush3.bf16.msra.mxu1 %v330_v20  ;;  %v334_v24 = vld [vmem:[%s447_s5 + $0x20] sm:$0xff]  }
   0x7   :  { %301 = vmatpush3.bf16.msra.mxu0 %v329_v9  ;;  %308 = vmatprep.subr.bf16.mxu1 %v344_v8  ;;  %v273_v28 = vld [vmem:[%s448_s4] ss:$0 sm:$0xff] }
   0x8   :  { %v277_v60 = vld [vmem:[%s449_s6] ss:$0 sm:$0xff] }
   0xa   :  { %309 = vmatpush3.bf16.msra.mxu1 %v331_v21 }
   0xb   :  { %310 = vmatprep.subr.bf16.mxu1 %v344_v8 }
   0xe   :  { %311 = vmatpush3.bf16.msra.mxu1 %v332_v22 }
   0xf   :  { %312 = vmatprep.subr.bf16.mxu1 %v344_v8 }
  0x12   :  { %313 = vmatpush3.bf16.msra.mxu1 %v333_v23 }
  0x13   :  { %314 = vmatprep.subr.bf16.mxu1 %v344_v8 }
  0x16   :  { %315 = vmatpush3.bf16.msra.mxu1 %v334_v24 }
  0x17   :  { %316 = vmatprep.subr.bf16.mxu1 %v344_v8 }
  0x1a   :  { %317 = vmatpush3.bf16.msra.mxu1 %v335_v25 }
  0x1b   :  { %318 = vmatprep.subr.bf16.mxu1 %v344_v8 }
  0x1e   :  { %319 = vmatpush3.bf16.msra.mxu1 %v336_v26 }
  0x1f   :  { %320 = vmatprep.subr.bf16.mxu1 %v344_v8 }
  0x22   :  { %321 = vmatpush3.bf16.msra.mxu1 %v337_v27 }
  0x90   :  { %v33_v2 = vpop.xlane.xlu0 %32 }
  0x91   :  { %v35_v3 = vmul.f32 0.03125, %v33_v2 }
  0x93   :  { %v36_v4 = vsub.f32 %v389_v0, %v35_v3 }
  0x95   :  { %v37_v5 = vmul.f32 %v36_v4, %v36_v4 }
  0x97   :  { %v38_v6 = vsel %vm30_vm0, %v37_v5, 0.0 }
  0x98   :  { %39 = vadd.xlane.f32.xlu0 %v38_v6 }
 0x125   :  { %v40_v10 = vpop.xlane.xlu0 %39 }
 0x126   :  { %v41_v11 = vmul.f32 0.03125, %v40_v10 }
 0x128   :  { %v42_v12 = vadd.f32 1e-05, %v41_v11 }
 0x12a   :  { %338 = vrsqrt.f32 %v42_v12 }
 0x134   :  { %v339_v13 = vpop.eup %338 }
 0x135   :  { %v44_v15 = vmul.f32 %v339_v13, %v36_v4 }
 0x137   :  { %v51_v17 = vmul.f32 %v271_v14, %v44_v15 }
 0x139   :  { %v58_v18 = vadd.f32 %v272_v16, %v51_v17 }
 0x13b   :  { %v59_v19 = vpack.c.bf16 %v58_v18, %v58_v18 }
 0x13d   :  { %303 = vmatmul.mubr.msk.bf16.vlgmr.msra.gmra.mrb[0].mxu0 %vm30_vm0, %v59_v19 }
 0x210   :  { %v120_v29 = vpop.f32.mrb[0].mxu0 }
 0x211   :  { %v121_v30 = vadd.f32 %v273_v28, %v120_v29  ;;  %v304_v31 = vpop.f32.mrb[1].mxu0 }
 0x212   :  { %v123_v32 = vpop.f32.mrb[2].mxu0 }
 0x213   :  { %v127_v33 = vmul.f32 0.70710677, %v121_v30  ;;  %v305_v34 = vpop.f32.mrb[3].mxu0  ;;  %v126_v56 = vmul.f32 0.5, %v121_v30 }
 0x215   :  { %v128_v35 = vand.u32 2147483647, %v127_v33  ;;  %vm148_vm2 = vcmp.ge.f32.partialorder %v127_v33, 0.0 }
 0x217   :  { %v129_v36 = vmul.f32 0.3275911, %v128_v35  ;;  %v142_v38 = vsub.f32 0.0, %v128_v35 }
 0x219   :  { %v130_v37 = vadd.f32 1.0, %v129_v36  ;;  %v143_v40 = vmul.f32 %v142_v38, %v128_v35 }
 0x21b   :  { %340 = vrcp.f32 %v130_v37  ;;  %v144_v43 = vmul.f32 1.442695, %v143_v40 }
 0x21d   :  { %342 = vpow2.f32 %v144_v43 }
 0x225   :  { %v341_v39 = vpop.eup %340 }
 0x226   :  { %v133_v41 = vmul.f32 1.0614054, %v341_v39 }
 0x227   :  { %v343_v51 = vpop.eup %342 }
 0x228   :  { %v134_v42 = vadd.f32 -1.4531521, %v133_v41 }
 0x22a   :  { %v135_v44 = vmul.f32 %v341_v39, %v134_v42 }
 0x22c   :  { %v136_v45 = vadd.f32 1.4214138, %v135_v44 }
 0x22e   :  { %v137_v46 = vmul.f32 %v341_v39, %v136_v45 }
 0x230   :  { %v138_v47 = vadd.f32 -0.28449672, %v137_v46 }
 0x232   :  { %v139_v48 = vmul.f32 %v341_v39, %v138_v47 }
 0x234   :  { %v140_v49 = vadd.f32 0.2548296, %v139_v48 }
 0x236   :  { %v141_v50 = vmul.f32 %v341_v39, %v140_v49 }
 0x238   :  { %v146_v52 = vmul.f32 %v343_v51, %v141_v50 }
 0x23a   :  { %v147_v53 = vsub.f32 1.0, %v146_v52 }
 0x23c   :  { %v149_v54 = vsub.f32 0.0, %v147_v53 }
 0x23e   :  { %v150_v55 = vsel %vm148_vm2, %v147_v53, %v149_v54 }
 0x23f   :  { %v151_v57 = vadd.f32 1.0, %v150_v55 }
 0x241   :  { %v152_v58 = vmul.f32 %v151_v57, %v126_v56 }
 0x243   :  { %v153_v59 = vpack.c.bf16 %v152_v58, %v152_v58 }
 0x245   :  { %323 = vmatmul.mubr.bf16.vlgmr.msra.gmra.mrb[0].mxu1 %v153_v59 }
 0x318   :  { %v259_v61 = vpop.f32.mrb[0].mxu1 }
 0x319   :  { %v260_v62 = vadd.f32 %v277_v60, %v259_v61  ;;  %v324_v63 = vpop.f32.mrb[1].mxu1 }
 0x31a   :  { %v262_v1 = vpop.f32.mrb[2].mxu1 }
 0x31b   :  { %v265_v2 = vadd.f32 %v260_v62, %v389_v0  ;;  %v325_v3 = vpop.f32.mrb[3].mxu1 }
 0x31d   :  { %266 = vst.msk [vmem:[%s450_s7] sm:$0xff] %vm30_vm0, %v265_v2 }

// kernel: social_mae_forward.26
= control target key start
LH: loop header
LB: loop body
LE: loop exit
PB: predicated region body
PF: predicated region fallthrough
CT: control target
= control target key end

     0   :  { %s1107_s9 = smov 0   ;;  %s1109_s10 = smov 0   ;;  %s1285_s0 = inlined_call_operand.vmem [shape: f32[2,4,96], index: 0, kind: input, shape index: {}, may-alias: {0,1}]   ;;  %s1286_s1 = inlined_call_operand.vmem [shape: f32[2,4,96], index: 1, kind: input, shape index: {}, may-alias: {0,1}]   ;;  %s1287_s2 = inlined_call_operand.vmem [shape: f32[2,4,32], index: 2, kind: output, shape index: {}]  }
   0x1   :  { %s1111_s11 = smov 0  }
   0x2 LB: > { %s24_s12 = sadd.s32 1, %s1068_s10  ;;  %p904_p0 = scmp.ge.s32.totalorder %s1072_s11, 1  ;;  %s1072_s11 = sphi %s1111_s11, %s12_s11   ;;  %s1068_s10 = sphi %s1109_s10, %s1289_s10   ;;  %s1064_s9 = sphi %s1107_s9, %s1288_s9  }
   0x3   : > { %p26_p1 = scmp.ge.s32.totalorder %s24_s12, 2  ;;  %p137_p2 = scmp.lt.s32.totalorder %s1072_s11, 3 }
   0x5   : > { %s1291_s12 = smov (%p26_p1, %s24_s12), 0  ;;  %p138_p3 = pnand %p904_p0, %p137_p2 }
   0x6   : > { %p164_p4 = scmp.lt.s32.totalorder (!%p138_p3), %s1064_s9, 1  ;;  %v1074_v0 = vmov (!%p138_p3), 0.0   ;;  %vm1075_vm0 = vmmov (!%p138_p3), 0   ;;  %s1076_s17 = smov (!%p138_p3), 96   ;;  %vm206_vm1 = vcmask (!%p138_p3), 64512   ;;  %vm184_vm2 = vcmask (!%p138_p3), 3072  }
   0x7   : > { %141 = sbr.rel (%p138_p3) target bundleno = 1580 (0x62c), region = 28  ;;  %934 = vmatprep.subr.bf16.mxu0 (!%p138_p3), %v1074_v0  ;;  %936 = vmatprep.mubr.msk.bf16.mxu0 (!%p138_p3), %vm1075_vm0, %v1074_v0  ;;  %v1077_v8 = vmov (!%p138_p3), -inf   ;;  %189 = vst.msk [vmem:[#allocation3] sm:$0xf] (!%p138_p3), %vm184_vm2, %v1074_v0  ;;  %190 = vst.msk [vmem:[#allocation3 + $0x4] sm:$0xf] (!%p138_p3), %vm184_vm2, %v1074_v0 }
   0x8   : > { %940 = vmatprep.subr.bf16.mxu1 (!%p138_p3), %v1074_v0  ;;  %942 = vmatprep.mubr.msk.bf16.mxu1 (!%p138_p3), %vm1075_vm0, %v1074_v0  ;;  %185 = vst.msk [vmem:[#allocation2] sm:$0xf] (!%p138_p3), %vm184_vm2, %v1077_v8  ;;  %186 = vst.msk [vmem:[#allocation2 + $0x4] sm:$0xf] (!%p138_p3), %vm184_vm2, %v1077_v8  ;;  %vm254_vm3 = vcmask (!%p138_p3), 27648   ;;  %v1078_v14 = vmov (!%p138_p3), 0  }
   0x9   : > { %187 = vst.msk [vmem:[#allocation2 + $0x8] sm:$0xf] (!%p138_p3), %vm184_vm2, %v1077_v8  ;;  %188 = vst.msk [vmem:[#allocation2 + $0xc] sm:$0xf] (!%p138_p3), %vm184_vm2, %v1077_v8  ;;  %1024 = vset.pattern.permute.xlu1 (!%p138_p3), %v1078_v14  ;;  %1025 = vset.pattern.permute.xlu0 (!%p138_p3), %v1078_v14  ;;  %s1079_s21 = smov (!%p138_p3), 64   ;;  %s1080_s22 = smov (!%p138_p3), 88  }
   0xa   : > { %191 = vst.msk [vmem:[#allocation3 + $0x8] sm:$0xf] (!%p138_p3), %vm184_vm2, %v1074_v0  ;;  %192 = vst.msk [vmem:[#allocation3 + $0xc] sm:$0xf] (!%p138_p3), %vm184_vm2, %v1074_v0  ;;  %s1081_s23 = smov (!%p138_p3), 120   ;;  %s1082_s24 = smov (!%p138_p3), 80  }
   0xb   : > { %s1083_s25 = smov (!%p138_p3), 112   ;;  %s1084_s26 = smov (!%p138_p3), 72   ;;  %vm292_vm4 = vcmask (!%p138_p3), 1041408   ;;  %vm288_vm5 = vcmask (!%p138_p3), 31744   ;;  %vm193_vm6 = vcmask (!%p138_p3), 60416   ;;  %vm818_vm7 = vcmask (!%p138_p3), 130048  }
   0xc   : > { %s1085_s27 = smov (!%p138_p3), 104   ;;  %s1086_s28 = smov (!%p138_p3), 56   ;;  %195 = vst.msk [vmem:[#allocation4 + $0x4] sm:$0xf] (!%p138_p3), %vm193_vm6, %v1074_v0  ;;  %194 = vst.msk [vmem:[#allocation4] sm:$0xf] (!%p138_p3), %vm193_vm6, %v1074_v0 }
   0xd   : > { %s1087_s29 = smov (!%p138_p3), 40   ;;  %s1088_s30 = smov (!%p138_p3), 48   ;;  %196 = vst.msk [vmem:[#allocation4 + $0x8] sm:$0xf] (!%p138_p3), %vm193_vm6, %v1074_v0  ;;  %197 = vst.msk [vmem:[#allocation4 + $0xc] sm:$0xf] (!%p138_p3), %vm193_vm6, %v1074_v0 }
   0xe   : > { %s1293_s9 = smov (!%p164_p4, %s1064_s9), 1  ;;  %s1089_s3 = smov 8   ;;  %vm820_vm8 = vcmask 195584   ;;  %vm822_vm9 = vcmask 257024  }
   0xf   : > { %s1131_s13 = sshll.u32 %s1293_s9, 2  ;;  %v1165_v15 = vld [vmem:[#allocation2] sm:$0xf]  ;;  %s1090_s4 = smov 16  }
  0x10   : > { %s1137_s16 = scalar_lea.vmem %s1286_s1, %s1131_s13  ;;  %s1144_s20 = scalar_lea.vmem %s1285_s0, %s1131_s13  ;;  %v682_v14 = vld [vmem:[#allocation2 + $0xc] sm:$0xf] }
  0x11   : > { %v200_v1 = vld [vmem:[%s1137_s16] sm:$0xf]  ;;  %s1091_s5 = smov 24   ;;  %s178_s8 = scalar_lea.vmem %s1287_s2, %s1131_s13 }
  0x12   : > { %v202_v2 = vpack.c.bf16 %v200_v1, %v200_v1  ;;  %v198_v3 = vld [vmem:[%s1144_s20] sm:$0xf] }
  0x13   : > { %v199_v6 = vmul.f32 0.35355338, %v198_v3  ;;  %v342_v19 = vld [vmem:[%s1137_s16] sm:$0xf] }
  0x14   : > { %204 = vrot.lane.b32.xlu0 %v202_v2, %s1076_s17  ;;  %v340_v20 = vld [vmem:[%s1144_s20] sm:$0xf]  ;;  %v1177_v21 = vpack.c.bf16 %v342_v19, %v342_v19 }
  0x15   : > { %v201_v7 = vpack.c.bf16 %v199_v6, %v199_v6  ;;  %v341_v22 = vmul.f32 0.35355338, %v340_v20  ;;  %v484_v24 = vld [vmem:[%s1137_s16] sm:$0xf]  ;;  %v398_v6 = vld [vmem:[#allocation2 + $0x4] sm:$0xf] }
  0x16   : > { %v482_v25 = vld [vmem:[%s1144_s20] sm:$0xf]  ;;  %v1182_v26 = vpack.c.bf16 %v484_v24, %v484_v24 }
  0x17   : > { %v343_v23 = vpack.c.bf16 %v341_v22, %v341_v22  ;;  %v483_v27 = vmul.f32 0.35355338, %v482_v25  ;;  %v626_v29 = vld [vmem:[%s1137_s16] sm:$0xf] }
  0x18   : > { %v624_v30 = vld [vmem:[%s1144_s20] sm:$0xf]  ;;  %v1187_v31 = vpack.c.bf16 %v626_v29, %v626_v29 }
  0x19   : > { %v485_v28 = vpack.c.bf16 %v483_v27, %v483_v27  ;;  %v625_v32 = vmul.f32 0.35355338, %v624_v30 }
  0x1b   : > { %v627_v33 = vpack.c.bf16 %v625_v32, %v625_v32 }
  0x86   : > { %v205_v4 = vpop.permute.xlu0 %204 }
  0x87   : > { %v211_v5 = vsel %vm206_vm1, %v205_v4, 0 }
  0x88   : > { %935 = vmatpush3.bf16.xpose.msra.mxu0 %v211_v5 }
  0x89   : > { %952 = vmatprep.subr.bf16.mxu0 %v1074_v0 }
  0x8f   : > { %937 = vmatmul.mubr.msk.bf16.vlgmr.msra.gmra.mrb[0].mxu0 %vm206_vm1, %v201_v7 }
  0x90   : > { %954 = vmatprep.mubr.msk.bf16.mxu0 %vm1075_vm0, %v1074_v0 }
 0x162   : > { %v247_v9 = vpop.f32.mrb[0].mxu0 }
 0x163   : > { %v938_v10 = vpop.f32.mrb[1].mxu0  ;;  %v255_v11 = vsel %vm254_vm3, %v247_v9, -inf }
 0x164   : > { %256 = vmax.xlane.f32.xlu0 %v255_v11  ;;  %v250_v12 = vpop.f32.mrb[2].mxu0  ;;  %v1217_v10 = vld [vmem:[#allocation2 + $0x8] sm:$0xf] }
 0x165   : > { %v939_v13 = vpop.f32.mrb[3].mxu0 }
 0x1f1   : > { %v257_v16 = vpop.xlane.xlu0 %256 }
 0x1f2   : > { %v1168_v17 = vmax.f32 %v1165_v15, %v257_v16 }
 0x1f4   : > { %v259_v18 = vsub.f32 %v1165_v15, %v1168_v17  ;;  %339 = vst.msk [vmem:[#allocation2] sm:$0xf] %vm184_vm2, %v1168_v17  ;;  %264 = vperm.xlu1 %1024, %v1168_v17  }
 0x1f8   : > { %286 = vrot.lane.b32.xlu1 %v202_v2, %s1079_s21 }
 0x1fc   : > { %349 = vrot.lane.b32.xlu1 %v1177_v21, %s1080_s22 }
 0x200   : > { %346 = vrot.lane.b32.xlu1 %v343_v23, %s1081_s23 }
 0x204   : > { %491 = vrot.lane.b32.xlu1 %v1182_v26, %s1082_s24 }
 0x208   : > { %488 = vrot.lane.b32.xlu1 %v485_v28, %s1083_s25 }
 0x20c   : > { %633 = vrot.lane.b32.xlu1 %v1187_v31, %s1084_s26 }
 0x210   : > { %630 = vrot.lane.b32.xlu1 %v627_v33, %s1085_s27 }
 0x273   : > { %v265_v34 = vpop.permute.xlu1 %264 }
 0x274   : > { %v267_v35 = vsub.f32 %v247_v9, %v265_v34 }
 0x276   : > { %v268_v36 = vmul.f32 1.442695, %v267_v35 }
 0x277   : > { %v287_v37 = vpop.permute.xlu1 %286 }
 0x278   : > { %1026 = vpow2.f32 %v268_v36  ;;  %v294_v38 = vsel %vm292_vm4, %v287_v37, 0 }
 0x279   : > { %941 = vmatpush3.bf16.msra.mxu1 %v294_v38 }
 0x27a   : > { %946 = vmatprep.subr.bf16.mxu1 %v1074_v0 }
 0x27b   : > { %v350_v39 = vpop.permute.xlu1 %349 }
 0x27c   : > { %v355_v42 = vsel %vm206_vm1, %v350_v39, 0 }
 0x27f   : > { %v347_v40 = vpop.permute.xlu1 %346 }
 0x282   : > { %v1192_v41 = vpop.eup %1026 }
 0x283   : > { %v285_v43 = vpack.c.bf16 %v1192_v41, %v1192_v41  ;;  %v492_v44 = vpop.permute.xlu1 %491 }
 0x284   : > { %v497_v46 = vsel %vm206_vm1, %v492_v44, 0 }
 0x285   : > { %943 = vmatmul.mubr.msk.bf16.vlgmr.msra.gmra.mrb[0].mxu1 %vm288_vm5, %v285_v43 }
 0x286   : > { %947 = vmatpush3.bf16.xpose.msra.mxu1 %v355_v42  ;;  %948 = vmatprep.mubr.msk.bf16.mxu1 %vm1075_vm0, %v1074_v0 }
 0x287   : > { %958 = vmatprep.subr.bf16.mxu1 %v1074_v0  ;;  %v489_v45 = vpop.permute.xlu1 %488 }
 0x28b   : > { %v634_v47 = vpop.permute.xlu1 %633 }
 0x28c   : > { %v639_v48 = vsel %vm206_vm1, %v634_v47, 0 }
 0x28d   : > { %949 = vmatmul.mubr.msk.bf16.vlgmr.msra.gmra.mrb[4].mxu1 %vm206_vm1, %v347_v40 }
 0x28e   : > { %959 = vmatpush3.bf16.xpose.msra.mxu1 %v497_v46  ;;  %960 = vmatprep.mubr.msk.bf16.mxu1 %vm1075_vm0, %v1074_v0 }
 0x28f   : > { %970 = vmatprep.subr.bf16.mxu1 %v1074_v0  ;;  %v631_v49 = vpop.permute.xlu1 %630 }
 0x295   : > { %961 = vmatmul.mubr.msk.bf16.vlgmr.msra.gmra.mrb[8].mxu1 %vm206_vm1, %v489_v45 }
 0x296   : > { %971 = vmatpush3.bf16.xpose.msra.mxu1 %v639_v48  ;;  %972 = vmatprep.mubr.msk.bf16.mxu1 %vm1075_vm0, %v1074_v0  ;;  %v260_v48 = vmul.f32 1.442695, %v259_v18  ;;  %v415_v18 = vld [vmem:[#allocation3 + $0x4] sm:$0xf] }
 0x29d   : > { %973 = vmatmul.mubr.msk.bf16.vlgmr.msra.gmra.mrb[12].mxu1 %vm206_vm1, %v631_v49 }
 0x358   : > { %v1211_v50 = vpop.f32.mrb[0].mxu1 }
 0x359   : > { %v944_v51 = vpop.f32.mrb[1].mxu1 }
 0x35a   : > { %v333_v52 = vpop.f32.mrb[2].mxu1 }
 0x35b   : > { %v945_v53 = vpop.f32.mrb[3].mxu1 }
 0x360   : > { %v391_v54 = vpop.f32.mrb[4].mxu1 }
 0x361   : > { %v950_v55 = vpop.f32.mrb[5].mxu1  ;;  %v399_v56 = vsel %vm254_vm3, %v391_v54, -inf }
 0x362   : > { %400 = vmax.xlane.f32.xlu1 %v399_v56  ;;  %v394_v57 = vpop.f32.mrb[6].mxu1  ;;  %v270_v55 = vld [vmem:[#allocation3] sm:$0xf] }
 0x363   : > { %v951_v58 = vpop.f32.mrb[7].mxu1 }
 0x368   : > { %v533_v59 = vpop.f32.mrb[8].mxu1 }
 0x369   : > { %v962_v60 = vpop.f32.mrb[9].mxu1  ;;  %v541_v61 = vsel %vm254_vm3, %v533_v59, -inf }
 0x36a   : > { %542 = vmax.xlane.f32.xlu0 %v541_v61  ;;  %v536_v62 = vpop.f32.mrb[10].mxu1  ;;  %v557_v61 = vld [vmem:[#allocation3 + $0x8] sm:$0xf] }
 0x36b   : > { %v963_v63 = vpop.f32.mrb[11].mxu1 }
 0x370   : > { %v675_v1 = vpop.f32.mrb[12].mxu1 }
 0x371   : > { %v974_v2 = vpop.f32.mrb[13].mxu1  ;;  %v683_v3 = vsel %vm254_vm3, %v675_v1, -inf }
 0x372   : > { %684 = vmax.xlane.f32.xlu0 %v683_v3  ;;  %v678_v4 = vpop.f32.mrb[14].mxu1  ;;  %v699_v3 = vld [vmem:[#allocation3 + $0xc] sm:$0xf] }
 0x373   : > { %v975_v5 = vpop.f32.mrb[15].mxu1 }
 0x3ef   : > { %v401_v7 = vpop.xlane.xlu1 %400 }
 0x3f0   : > { %v402_v8 = vmax.f32 %v398_v6, %v401_v7 }
 0x3f2   : > { %v403_v9 = vsub.f32 %v398_v6, %v402_v8  ;;  %481 = vst.msk [vmem:[#allocation2 + $0x4] sm:$0xf] %vm184_vm2, %v402_v8  ;;  %408 = vperm.xlu0 %1025, %v402_v8  }
 0x3f4   : > { %v404_v43 = vmul.f32 1.442695, %v403_v9  ;;  %v278_v9 = vld [vmem:[#allocation4] sm:$0xf] }
 0x3f6   : > { %431 = vrot.lane.b32.xlu0 %v1177_v21, %s1086_s28  ;;  %v272_v21 = vsel %vm254_vm3, %v1192_v41, 0.0 }
 0x3f7   : > { %v543_v11 = vpop.xlane.xlu0 %542 }
 0x3f8   : > { %v1221_v12 = vmax.f32 %v1217_v10, %v543_v11 }
 0x3fa   : > { %v545_v13 = vsub.f32 %v1217_v10, %v1221_v12  ;;  %623 = vst.msk [vmem:[#allocation2 + $0x8] sm:$0xf] %vm184_vm2, %v1221_v12  ;;  %550 = vperm.xlu1 %1024, %v1221_v12   ;;  %715 = vrot.lane.b32.xlu0 %v1187_v31, %s1087_s29 }
 0x3fc   : > { %v546_v51 = vmul.f32 1.442695, %v545_v13 }
 0x3ff   : > { %v685_v16 = vpop.xlane.xlu0 %684 }
 0x400   : > { %v686_v19 = vmax.f32 %v682_v14, %v685_v16 }
 0x402   : > { %v687_v20 = vsub.f32 %v682_v14, %v686_v19  ;;  %765 = vst.msk [vmem:[#allocation2 + $0xc] sm:$0xf] %vm184_vm2, %v686_v19  ;;  %692 = vperm.xlu1 %1024, %v686_v19   ;;  %v423_v19 = vld [vmem:[#allocation4 + $0x4] sm:$0xf] }
 0x404   : > { %v688_v45 = vmul.f32 1.442695, %v687_v20 }
 0x406   : > { %573 = vrot.lane.b32.xlu1 %v1182_v26, %s1088_s30 }
 0x42a   : > { %273 = vadd.xlane.f32.xlu1 %v272_v21 }
 0x471   : > { %v409_v22 = vpop.permute.xlu0 %408 }
 0x472   : > { %v411_v23 = vsub.f32 %v391_v54, %v409_v22 }
 0x474   : > { %v412_v24 = vmul.f32 1.442695, %v411_v23 }
 0x475   : > { %v432_v25 = vpop.permute.xlu0 %431 }
 0x476   : > { %1028 = vpow2.f32 %v412_v24  ;;  %v437_v27 = vsel %vm292_vm4, %v432_v25, 0 }
 0x477   : > { %953 = vmatpush3.bf16.msra.mxu0 %v437_v27 }
 0x478   : > { %964 = vmatprep.subr.bf16.mxu0 %v1074_v0 }
 0x479   : > { %v551_v28 = vpop.permute.xlu1 %550  ;;  %v716_v38 = vpop.permute.xlu0 %715 }
 0x47a   : > { %v553_v29 = vsub.f32 %v533_v59, %v551_v28  ;;  %v721_v42 = vsel %vm292_vm4, %v716_v38, 0  ;;  %v565_v28 = vld [vmem:[#allocation4 + $0x8] sm:$0xf] }
 0x47c   : > { %v554_v30 = vmul.f32 1.442695, %v553_v29 }
 0x47e   : > { %1030 = vpow2.f32 %v554_v30 }
 0x480   : > { %v1029_v31 = vpop.eup %1028 }
 0x481   : > { %v693_v26 = vpop.permute.xlu1 %692  ;;  %v417_v32 = vsel %vm254_vm3, %v1029_v31, 0.0  ;;  %v430_v33 = vpack.c.bf16 %v1029_v31, %v1029_v31 }
 0x482   : > { %v695_v34 = vsub.f32 %v675_v1, %v693_v26  ;;  %418 = vadd.xlane.f32.xlu0 %v417_v32 }
 0x483   : > { %955 = vmatmul.mubr.msk.bf16.vlgmr.msra.gmra.mrb[4].mxu0 %vm288_vm5, %v430_v33 }
 0x484   : > { %v696_v35 = vmul.f32 1.442695, %v695_v34  ;;  %966 = vmatprep.mubr.msk.bf16.mxu0 %vm1075_vm0, %v1074_v0  ;;  %v707_v34 = vld [vmem:[#allocation4 + $0xc] sm:$0xf] }
 0x485   : > { %v574_v36 = vpop.permute.xlu1 %573 }
 0x486   : > { %1032 = vpow2.f32 %v696_v35  ;;  %v579_v37 = vsel %vm292_vm4, %v574_v36, 0 }
 0x487   : > { %965 = vmatpush3.bf16.msra.mxu0 %v579_v37  ;;  %1034 = vpow2.f32 %v404_v43 }
 0x488   : > { %v1031_v39 = vpop.eup %1030  ;;  %976 = vmatprep.subr.bf16.mxu0 %v1074_v0  ;;  %1036 = vpow2.f32 %v688_v45 }
 0x489   : > { %v559_v40 = vsel %vm254_vm3, %v1031_v39, 0.0  ;;  %v572_v41 = vpack.c.bf16 %v1031_v39, %v1031_v39  ;;  %1038 = vpow2.f32 %v260_v48 }
 0x48a   : > { %560 = vadd.xlane.f32.xlu1 %v559_v40  ;;  %1040 = vpow2.f32 %v546_v51 }
 0x48b   : > { %967 = vmatmul.mubr.msk.bf16.vlgmr.msra.gmra.mrb[8].mxu0 %vm288_vm5, %v572_v41 }
 0x48c   : > { %977 = vmatpush3.bf16.msra.mxu0 %v721_v42  ;;  %978 = vmatprep.mubr.msk.bf16.mxu0 %vm1075_vm0, %v1074_v0 }
 0x490   : > { %v1033_v44 = vpop.eup %1032 }
 0x491   : > { %v701_v46 = vsel %vm254_vm3, %v1033_v44, 0.0  ;;  %v714_v47 = vpack.c.bf16 %v1033_v44, %v1033_v44  ;;  %v1035_v49 = vpop.eup %1034 }
 0x492   : > { %702 = vadd.xlane.f32.xlu0 %v701_v46  ;;  %v1037_v52 = vpop.eup %1036  ;;  %v416_v58 = vmul.f32 %v1035_v49, %v415_v18 }
 0x493   : > { %979 = vmatmul.mubr.msk.bf16.vlgmr.msra.gmra.mrb[12].mxu0 %vm288_vm5, %v714_v47  ;;  %v1039_v53 = vpop.eup %1038  ;;  %v700_v4 = vmul.f32 %v1037_v52, %v699_v3 }
 0x494   : > { %v1041_v54 = vpop.eup %1040  ;;  %v271_v0 = vmul.f32 %v1039_v53, %v270_v55 }
 0x495   : > { %v558_v62 = vmul.f32 %v1041_v54, %v557_v61 }
 0x49b   : > { %426 = vperm.xlu1 %1024, %v1035_v49  }
 0x49f   : > { %710 = vperm.xlu1 %1024, %v1037_v52  }
 0x4a8   : > { %281 = vperm.xlu0 %1025, %v1039_v53  }
 0x4ac   : > { %568 = vperm.xlu0 %1025, %v1041_v54  }
 0x4b7   : > { %v274_v56 = vpop.xlane.xlu1 %273 }
 0x4b8   : > { %v275_v57 = vadd.f32 %v274_v56, %v271_v0 }
 0x4ba   : > { %277 = vst.msk [vmem:[#allocation3] sm:$0xf] %vm184_vm2, %v275_v57 }
 0x4c1   : > { %v770_v15 = vld [vmem:[#allocation3] sm:$0xf] }
 0x4c2   : > { %1042 = vrcp.f32 %v770_v15 }
 0x4cc   : > { %v1043_v17 = vpop.eup %1042 }
 0x4cd   : > { %774 = vperm.xlu1 %1024, %v1043_v17  }
 0x50f   : > { %v419_v59 = vpop.xlane.xlu0 %418 }
 0x510   : > { %v420_v60 = vadd.f32 %v419_v59, %v416_v58 }
 0x512   : > { %421 = vst.msk [vmem:[#allocation3 + $0x4] sm:$0xf] %vm184_vm2, %v420_v60 }
 0x517   : > { %v561_v63 = vpop.xlane.xlu1 %560 }
 0x518   : > { %v562_v1 = vadd.f32 %v561_v63, %v558_v62 }
 0x519   : > { %v779_v2 = vld [vmem:[#allocation3 + $0x4] sm:$0xf] }
 0x51a   : > { %563 = vst.msk [vmem:[#allocation3 + $0x8] sm:$0xf] %vm184_vm2, %v562_v1  ;;  %1044 = vrcp.f32 %v779_v2 }
 0x51b   : > { %v427_v20 = vpop.permute.xlu1 %426 }
 0x51c   : > { %v429_v21 = vmul.f32 %v427_v20, %v423_v19 }
 0x51f   : > { %v703_v5 = vpop.xlane.xlu0 %702  ;;  %v711_v35 = vpop.permute.xlu1 %710 }
 0x520   : > { %v704_v6 = vadd.f32 %v703_v5, %v700_v4  ;;  %v713_v36 = vmul.f32 %v711_v35, %v707_v34 }
 0x521   : > { %v788_v7 = vld [vmem:[#allocation3 + $0x8] sm:$0xf] }
 0x522   : > { %705 = vst.msk [vmem:[#allocation3 + $0xc] sm:$0xf] %vm184_vm2, %v704_v6  ;;  %1046 = vrcp.f32 %v788_v7 }
 0x524   : > { %v1045_v8 = vpop.eup %1044 }
 0x525   : > { %783 = vperm.xlu0 %1025, %v1045_v8  }
 0x527   : > { %v282_v10 = vpop.permute.xlu0 %281 }
 0x528   : > { %v284_v11 = vmul.f32 %v282_v10, %v278_v9 }
 0x529   : > { %v797_v12 = vld [vmem:[#allocation3 + $0xc] sm:$0xf] }
 0x52a   : > { %v336_v13 = vadd.f32 %v1211_v50, %v284_v11  ;;  %1048 = vrcp.f32 %v797_v12 }
 0x52b   : > { %v569_v29 = vpop.permute.xlu0 %568 }
 0x52c   : > { %v1047_v14 = vpop.eup %1046  ;;  %338 = vst.msk [vmem:[#allocation4] sm:$0xf] %vm193_vm6, %v336_v13  ;;  %v571_v50 = vmul.f32 %v569_v29, %v565_v28 }
 0x52d   : > { %792 = vperm.xlu1 %1024, %v1047_v14  }
 0x533   : > { %v769_v53 = vld [vmem:[#allocation4] sm:$0xf] }
 0x534   : > { %v1049_v16 = vpop.eup %1048 }
 0x535   : > { %801 = vperm.xlu0 %1025, %v1049_v16  }
 0x54c   : > { %v775_v45 = vpop.permute.xlu1 %774 }
 0x54d   : > { %v777_v55 = vmul.f32 %v775_v45, %v769_v53 }
 0x556   : > { %v473_v22 = vpop.f32.mrb[4].mxu0 }
 0x557   : > { %v479_v23 = vadd.f32 %v473_v22, %v429_v21  ;;  %v956_v24 = vpop.f32.mrb[5].mxu0 }
 0x558   : > { %v476_v25 = vpop.f32.mrb[6].mxu0 }
 0x559   : > { %480 = vst.msk [vmem:[#allocation4 + $0x4] sm:$0xf] %vm193_vm6, %v479_v23  ;;  %v957_v27 = vpop.f32.mrb[7].mxu0 }
 0x55e   : > { %v615_v30 = vpop.f32.mrb[8].mxu0 }
 0x55f   : > { %v621_v31 = vadd.f32 %v615_v30, %v571_v50  ;;  %v968_v26 = vpop.f32.mrb[9].mxu0 }
 0x560   : > { %v618_v32 = vpop.f32.mrb[10].mxu0  ;;  %v778_v43 = vld [vmem:[#allocation4 + $0x4] sm:$0xf] }
 0x561   : > { %622 = vst.msk [vmem:[#allocation4 + $0x8] sm:$0xf] %vm193_vm6, %v621_v31  ;;  %v969_v33 = vpop.f32.mrb[11].mxu0 }
 0x566   : > { %v757_v37 = vpop.f32.mrb[12].mxu0 }
 0x567   : > { %v763_v38 = vadd.f32 %v757_v37, %v713_v36  ;;  %v980_v39 = vpop.f32.mrb[13].mxu0 }
 0x568   : > { %v760_v40 = vpop.f32.mrb[14].mxu0  ;;  %v787_v47 = vld [vmem:[#allocation4 + $0x8] sm:$0xf] }
 0x569   : > { %764 = vst.msk [vmem:[#allocation4 + $0xc] sm:$0xf] %vm193_vm6, %v763_v38  ;;  %v981_v41 = vpop.f32.mrb[15].mxu0 }
 0x570   : > { %v796_v51 = vld [vmem:[#allocation4 + $0xc] sm:$0xf] }
 0x5a4   : > { %v784_v42 = vpop.permute.xlu0 %783 }
 0x5a5   : > { %v786_v44 = vmul.f32 %v784_v42, %v778_v43 }
 0x5a7   : > { %806 = vrot.lane.b32.xlu1 %v786_v44, %s1089_s3 }
 0x5ac   : > { %v793_v46 = vpop.permute.xlu1 %792 }
 0x5ad   : > { %v795_v48 = vmul.f32 %v793_v46, %v787_v47 }
 0x5af   : > { %810 = vrot.lane.b32.xlu0 %v795_v48, %s1090_s4 }
 0x5b4   : > { %v802_v49 = vpop.permute.xlu0 %801 }
 0x5b5   : > { %v804_v52 = vmul.f32 %v802_v49, %v796_v51 }
 0x5b7   : > { %814 = vrot.lane.b32.xlu1 %v804_v52, %s1091_s5 }
 0x619   : > { %v807_v54 = vpop.permute.xlu1 %806 }
 0x61a   : > { %v817_v56 = vsel %vm206_vm1, %v777_v55, %v807_v54 }
 0x621   : > { %v811_v0 = vpop.permute.xlu0 %810 }
 0x622   : > { %v819_v57 = vsel %vm818_vm7, %v817_v56, %v811_v0 }
 0x629   : > { %v815_v15 = vpop.permute.xlu1 %814 }
 0x62a   : > { %v821_v17 = vsel %vm820_vm8, %v819_v57, %v815_v15 }
 0x62b   : > { %823 = vst.msk [vmem:[%s178_s8] sm:$0xf] %vm822_vm9, %v821_v17 }
 0x62c PF: > { %s12_s11 = sadd.s32 1, %s1072_s11   ;;  %s1288_s9 = smov %s1068_s10 }
 0x62d   : > { %p9_p5 = scmp.ge.s32.totalorder %s12_s11, 4   ;;  %s1289_s10 = smov %s1291_s12 }
 0x62f   :  { %11 = sbr.rel (!%p9_p5) target bundleno = 2 (0x2), region = 78 }

// kernel: social_mae_forward.41
= control target key start
LH: loop header
LB: loop body
LE: loop exit
PB: predicated region body
PF: predicated region fallthrough
CT: control target
= control target key end

     0   :  { %vm26_vm0 = vcmask 261120   ;;  %vm164_vm1 = vcmask 785408   ;;  %s270_s0 = inlined_call_operand.vmem [shape: f32[24,32], index: 0, kind: input, shape index: {}]   ;;  %s271_s3 = inlined_call_operand.vmem [shape: bf16[32,96], index: 3, kind: input, shape index: {}]   ;;  %s272_s1 = inlined_call_operand.vmem [shape: f32[1,32], index: 1, kind: input, shape index: {}]   ;;  %s273_s2 = inlined_call_operand.vmem [shape: f32[1,32], index: 2, kind: input, shape index: {}]   ;;  %s274_s4 = inlined_call_operand.vmem [shape: f32[1,96], index: 4, kind: input, shape index: {}]   ;;  %s275_s5 = inlined_call_operand.vmem [shape: f32[24,96], index: 5, kind: output, shape index: {}]  }
   0x1   :  { %v21_v0 = vld [vmem:[%s270_s0] sm:$0xff]  ;;  %v23_v1 = vld [vmem:[%s270_s0 + $0x10] sm:$0xff]  ;;  %v22_v2 = vld [vmem:[%s270_s0 + $0x8] sm:$0xff] }
   0x2   :  { %v27_v3 = vsel %vm26_vm0, %v21_v0, 0.0  ;;  %v33_v4 = vsel %vm26_vm0, %v23_v1, 0.0  ;;  %v30_v5 = vsel %vm26_vm0, %v22_v2, 0.0  ;;  %v191_v21 = vld [vmem:[%s271_s3] sm:$0xff]   ;;  %v192_v22 = vld [vmem:[%s271_s3 + $0x8] sm:$0xff]  }
   0x3   :  { %28 = vadd.xlane.f32.xlu0 %v27_v3  ;;  %34 = vadd.xlane.f32.xlu1 %v33_v4  ;;  %v172_v34 = vld [vmem:[%s272_s1] ss:$0 sm:$0xff] }
   0x4   :  { %183 = vmatprep.subr.bf16.mxu0 %v191_v21  ;;  %v173_v40 = vld [vmem:[%s273_s2] ss:$0 sm:$0xff] }
   0x5   :  { %184 = vmatpush3.bf16.msra.mxu0 %v191_v21  ;;  %v174_v48 = vld [vmem:[%s274_s4] ss:$0 sm:$0xff] }
   0x6   :  { %185 = vmatprep.subr.bf16.mxu0 %v192_v22 }
   0x7   :  { %31 = vadd.xlane.f32.xlu0 %v30_v5 }
   0x9   :  { %186 = vmatpush3.bf16.msra.mxu0 %v192_v22 }
  0x90   :  { %v29_v6 = vpop.xlane.xlu0 %28  ;;  %v35_v7 = vpop.xlane.xlu1 %34 }
  0x91   :  { %v37_v8 = vmul.f32 0.03125, %v29_v6  ;;  %v39_v9 = vmul.f32 0.03125, %v35_v7 }
  0x93   :  { %v40_v10 = vsub.f32 %v21_v0, %v37_v8  ;;  %v42_v11 = vsub.f32 %v23_v1, %v39_v9 }
  0x94   :  { %v32_v12 = vpop.xlane.xlu0 %31 }
  0x95   :  { %v38_v13 = vmul.f32 0.03125, %v32_v12  ;;  %v43_v14 = vmul.f32 %v40_v10, %v40_v10  ;;  %v45_v15 = vmul.f32 %v42_v11, %v42_v11 }
  0x97   :  { %v41_v16 = vsub.f32 %v22_v2, %v38_v13  ;;  %v46_v17 = vsel %vm26_vm0, %v43_v14, 0.0  ;;  %v52_v18 = vsel %vm26_vm0, %v45_v15, 0.0 }
  0x98   :  { %47 = vadd.xlane.f32.xlu1 %v46_v17 }
  0x99   :  { %v44_v19 = vmul.f32 %v41_v16, %v41_v16 }
  0x9b   :  { %v49_v20 = vsel %vm26_vm0, %v44_v19, 0.0 }
  0x9c   :  { %53 = vadd.xlane.f32.xlu1 %v52_v18  ;;  %50 = vadd.xlane.f32.xlu0 %v49_v20 }
 0x125   :  { %v48_v23 = vpop.xlane.xlu1 %47 }
 0x126   :  { %v55_v24 = vmul.f32 0.03125, %v48_v23 }
 0x128   :  { %v58_v25 = vadd.f32 1e-05, %v55_v24 }
 0x129   :  { %v54_v26 = vpop.xlane.xlu1 %53  ;;  %v51_v27 = vpop.xlane.xlu0 %50 }
 0x12a   :  { %193 = vrsqrt.f32 %v58_v25  ;;  %v57_v28 = vmul.f32 0.03125, %v54_v26  ;;  %v56_v29 = vmul.f32 0.03125, %v51_v27 }
 0x12c   :  { %v60_v30 = vadd.f32 1e-05, %v57_v28  ;;  %v59_v31 = vadd.f32 1e-05, %v56_v29 }
 0x12e   :  { %195 = vrsqrt.f32 %v60_v30 }
 0x12f   :  { %197 = vrsqrt.f32 %v59_v31 }
 0x134   :  { %v194_v32 = vpop.eup %193 }
 0x135   :  { %v64_v33 = vmul.f32 %v194_v32, %v40_v10 }
 0x137   :  { %v73_v39 = vmul.f32 %v172_v34, %v64_v33 }
 0x138   :  { %v196_v35 = vpop.eup %195 }
 0x139   :  { %v198_v36 = vpop.eup %197  ;;  %v66_v37 = vmul.f32 %v196_v35, %v42_v11  ;;  %v82_v44 = vadd.f32 %v173_v40, %v73_v39 }
 0x13a   :  { %v65_v38 = vmul.f32 %v198_v36, %v41_v16 }
 0x13b   :  { %v75_v41 = vmul.f32 %v172_v34, %v66_v37 }
 0x13c   :  { %v74_v42 = vmul.f32 %v172_v34, %v65_v38 }
 0x13d   :  { %v84_v43 = vadd.f32 %v173_v40, %v75_v41 }
 0x13e   :  { %v83_v45 = vadd.f32 %v173_v40, %v74_v42 }
 0x13f   :  { %v86_v46 = vpack.c.bf16 %v84_v43, %v84_v43 }
 0x140   :  { %v85_v47 = vpack.c.bf16 %v83_v45, %v82_v44 }
 0x142   :  { %187 = vmatprep.mubr.msk.bf16.mxu0 %vm26_vm0, %v85_v47 }
 0x143   :  { %188 = vmatmul.mubr.msk.bf16.vlgmr.msra.gmra.mrb[0].mxu0 %vm26_vm0, %v86_v46 }
 0x216   :  { %v189_v49 = vpop.f32.mrb[0].mxu0 }
 0x217   :  { %v159_v50 = vadd.f32 %v189_v49, %v174_v48  ;;  %v150_v51 = vpop.f32.mrb[1].mxu0 }
 0x218   :  { %v151_v52 = vadd.f32 %v174_v48, %v150_v51  ;;  %v190_v53 = vpop.f32.mrb[2].mxu0 }
 0x219   :  { %167 = vst.msk [vmem:[%s275_s5 + $0x10] sm:$0xff] %vm164_vm1, %v159_v50  ;;  %v153_v54 = vpop.f32.mrb[3].mxu0 }
 0x21a   :  { %165 = vst.msk [vmem:[%s275_s5] sm:$0xff] %vm164_vm1, %v151_v52  ;;  %v154_v55 = vadd.f32 %v174_v48, %v153_v54 }
 0x21c   :  { %166 = vst.msk [vmem:[%s275_s5 + $0x8] sm:$0xff] %vm164_vm1, %v154_v55 }

// kernel: social_mae_forward.43
= control target key start
LH: loop header
LB: loop body
LE: loop exit
PB: predicated region body
PF: predicated region fallthrough
CT: control target
= control target key end

     0   :  { %vm46_vm0 = vcmask 261120   ;;  %s199_s2 = inlined_call_operand.vmem [shape: bf16[32,32], index: 2, kind: input, shape index: {}]   ;;  %s200_s0 = inlined_call_operand.vmem [shape: f32[24,32], index: 0, kind: input, shape index: {}]   ;;  %s201_s3 = inlined_call_operand.vmem [shape: f32[1,32], index: 3, kind: input, shape index: {}]   ;;  %s202_s1 = inlined_call_operand.vmem [shape: f32[24,32], index: 1, kind: input, shape index: {}]   ;;  %s203_s4 = inlined_call_operand.vmem [shape: f32[24,32], index: 4, kind: output, shape index: {}]  }
   0x1   :  { %v131_v0 = vld [vmem:[%s199_s2] sm:$0xff]   ;;  %v132_v1 = vld [vmem:[%s199_s2 + $0x8] sm:$0xff]   ;;  %v20_v4 = vld [vmem:[%s200_s0 + $0x10] sm:$0xff] }
   0x2   :  { %123 = vmatprep.subr.bf16.mxu0 %v131_v0  ;;  %v18_v2 = vld [vmem:[%s200_s0] sm:$0xff]  ;;  %v19_v3 = vld [vmem:[%s200_s0 + $0x8] sm:$0xff]  ;;  %v22_v6 = vpack.c.bf16 %v20_v4, %v20_v4  ;;  %v103_v9 = vld [vmem:[%s202_s1 + $0x10] sm:$0xff] }
   0x3   :  { %124 = vmatpush3.bf16.msra.mxu0 %v131_v0  ;;  %v21_v5 = vpack.c.bf16 %v19_v3, %v18_v2  ;;  %v114_v7 = vld [vmem:[%s201_s3] ss:$0 sm:$0xff]  ;;  %v102_v17 = vld [vmem:[%s202_s1 + $0x8] sm:$0xff] }
   0x4   :  { %125 = vmatprep.subr.bf16.mxu0 %v132_v1  ;;  %v101_v12 = vld [vmem:[%s202_s1] sm:$0xff] }
   0x5   :  { %127 = vmatprep.mubr.msk.bf16.mxu0 %vm46_vm0, %v21_v5 }
   0x7   :  { %126 = vmatpush3.bf16.msra.mxu0 %v132_v1 }
   0xa   :  { %128 = vmatmul.mubr.msk.bf16.vlgmr.msra.gmra.mrb[0].mxu0 %vm46_vm0, %v22_v6 }
  0xdd   :  { %v129_v8 = vpop.f32.mrb[0].mxu0 }
  0xde   :  { %v96_v10 = vadd.f32 %v129_v8, %v114_v7  ;;  %v87_v11 = vpop.f32.mrb[1].mxu0 }
  0xdf   :  { %v88_v13 = vadd.f32 %v114_v7, %v87_v11  ;;  %v130_v14 = vpop.f32.mrb[2].mxu0 }
  0xe0   :  { %v106_v15 = vadd.f32 %v103_v9, %v96_v10  ;;  %v90_v16 = vpop.f32.mrb[3].mxu0 }
  0xe1   :  { %v104_v18 = vadd.f32 %v101_v12, %v88_v13  ;;  %v91_v19 = vadd.f32 %v114_v7, %v90_v16 }
  0xe2   :  { %109 = vst.msk [vmem:[%s203_s4 + $0x10] sm:$0xff] %vm46_vm0, %v106_v15 }
  0xe3   :  { %107 = vst.msk [vmem:[%s203_s4] sm:$0xff] %vm46_vm0, %v104_v18  ;;  %v105_v20 = vadd.f32 %v102_v17, %v91_v19 }
  0xe5   :  { %108 = vst.msk [vmem:[%s203_s4 + $0x8] sm:$0xff] %vm46_vm0, %v105_v20 }

// kernel: social_mae_forward.42
= control target key start
LH: loop header
LB: loop body
LE: loop exit
PB: predicated region body
PF: predicated region fallthrough
CT: control target
= control target key end

     0   :  { %s1375_s9 = smov 0   ;;  %s1377_s10 = smov 0   ;;  %s1722_s0 = inlined_call_operand.vmem [shape: f32[2,12,96], index: 0, kind: input, shape index: {}, may-alias: {0,1}]   ;;  %s1723_s1 = inlined_call_operand.vmem [shape: f32[2,12,96], index: 1, kind: input, shape index: {}, may-alias: {0,1}]   ;;  %s1724_s2 = inlined_call_operand.vmem [shape: f32[2,12,32], index: 2, kind: output, shape index: {}]  }
   0x1   :  { %s1379_s11 = smov 0  }
   0x2 LB: > { %s24_s12 = sadd.s32 1, %s1336_s10  ;;  %p1142_p0 = scmp.ge.s32.totalorder %s1340_s11, 1  ;;  %s1340_s11 = sphi %s1379_s11, %s12_s11   ;;  %s1336_s10 = sphi %s1377_s10, %s1726_s10   ;;  %s1332_s9 = sphi %s1375_s9, %s1725_s9  }
   0x3   : > { %p26_p1 = scmp.ge.s32.totalorder %s24_s12, 2  ;;  %p141_p2 = scmp.lt.s32.totalorder %s1340_s11, 3 }
   0x5   : > { %s1728_s12 = smov (%p26_p1, %s24_s12), 0  ;;  %p142_p3 = pnand %p1142_p0, %p141_p2 }
   0x6   : > { %p172_p4 = scmp.lt.s32.totalorder (!%p142_p3), %s1332_s9, 1  ;;  %vm215_vm0 = vcmask (!%p142_p3), 64512   ;;  %v1342_v0 = vmov (!%p142_p3), 0.0   ;;  %vm1343_vm1 = vmmov (!%p142_p3), 0   ;;  %s1344_s17 = smov (!%p142_p3), 96   ;;  %vm197_vm2 = vcmask (!%p142_p3), 7168  }
   0x7   : > { %145 = sbr.rel (%p142_p3) target bundleno = 1588 (0x634), region = 28  ;;  %1178 = vmatprep.subr.bf16.mxu0 (!%p142_p3), %v1342_v0  ;;  %216 = vst.msk [vmem:[#allocation4] sm:$0xff] (!%p142_p3), %vm215_vm0, %v1342_v0  ;;  %219 = vst.msk [vmem:[#allocation4 + $0x10] sm:$0xff] (!%p142_p3), %vm215_vm0, %v1342_v0  ;;  %1180 = vmatprep.mubr.msk.bf16.mxu0 (!%p142_p3), %vm1343_vm1, %v1342_v0  ;;  %v1345_v11 = vmov (!%p142_p3), -inf   ;;  %vm286_vm3 = vcmask (!%p142_p3), 97280   ;;  %vm290_vm4 = vcmask (!%p142_p3), 93184  }
   0x8   : > { %221 = vst.msk [vmem:[#allocation4 + $0x20] sm:$0xff] (!%p142_p3), %vm215_vm0, %v1342_v0  ;;  %223 = vst.msk [vmem:[#allocation4 + $0x30] sm:$0xff] (!%p142_p3), %vm215_vm0, %v1342_v0  ;;  %1184 = vmatprep.subr.bf16.mxu1 (!%p142_p3), %v1342_v0  ;;  %1186 = vmatprep.mubr.msk.bf16.mxu1 (!%p142_p3), %vm1343_vm1, %v1342_v0  ;;  %vm199_vm5 = vcmask (!%p142_p3), 3072   ;;  %v1346_v18 = vmov (!%p142_p3), 0   ;;  %s1347_s21 = smov (!%p142_p3), 80   ;;  %s1348_s22 = smov (!%p142_p3), 64  }
   0x9   : > { %198 = vst.msk [vmem:[#allocation2] sm:$0xff] (!%p142_p3), %vm197_vm2, %v1345_v11  ;;  %201 = vst.msk [vmem:[#allocation2 + $0x10] sm:$0xff] (!%p142_p3), %vm197_vm2, %v1345_v11  ;;  %1268 = vset.pattern.permute.xlu1 (!%p142_p3), %v1346_v18  ;;  %1269 = vset.pattern.permute.xlu0 (!%p142_p3), %v1346_v18  ;;  %s1349_s23 = smov (!%p142_p3), 88   ;;  %s1350_s24 = smov (!%p142_p3), 120   ;;  %vm354_vm6 = vcmask (!%p142_p3), 1045504   ;;  %vm217_vm7 = vcmask (!%p142_p3), 60416  }
   0xa   : > { %203 = vst.msk [vmem:[#allocation2 + $0x20] sm:$0xff] (!%p142_p3), %vm197_vm2, %v1345_v11  ;;  %205 = vst.msk [vmem:[#allocation2 + $0x30] sm:$0xff] (!%p142_p3), %vm197_vm2, %v1345_v11  ;;  %s1351_s25 = smov (!%p142_p3), 112   ;;  %s1352_s26 = smov (!%p142_p3), 72   ;;  %vm1047_vm8 = vcmask (!%p142_p3), 130048   ;;  %vm1050_vm9 = vcmask (!%p142_p3), 195584  }
   0xb   : > { %207 = vst.msk [vmem:[#allocation3] sm:$0xff] (!%p142_p3), %vm197_vm2, %v1342_v0  ;;  %209 = vst.msk [vmem:[#allocation3 + $0x10] sm:$0xff] (!%p142_p3), %vm197_vm2, %v1342_v0  ;;  %s1353_s27 = smov (!%p142_p3), 104   ;;  %s1354_s28 = smov (!%p142_p3), 56   ;;  %vm1053_vm10 = vcmask (!%p142_p3), 261120   ;;  %vm1055_vm11 = vcmask (!%p142_p3), 257024  }
   0xc   : > { %211 = vst.msk [vmem:[#allocation3 + $0x20] sm:$0xff] (!%p142_p3), %vm197_vm2, %v1342_v0  ;;  %213 = vst.msk [vmem:[#allocation3 + $0x30] sm:$0xff] (!%p142_p3), %vm197_vm2, %v1342_v0  ;;  %s1355_s29 = smov (!%p142_p3), 48   ;;  %s1356_s30 = smov (!%p142_p3), 40  }
   0xd   : > { %200 = vst.msk [vmem:[#allocation2 + $0x8] sm:$0xf] (!%p142_p3), %vm199_vm5, %v1345_v11  ;;  %202 = vst.msk [vmem:[#allocation2 + $0x18] sm:$0xf] (!%p142_p3), %vm199_vm5, %v1345_v11  ;;  %s1357_s3 = smov (!%p142_p3), 8   ;;  %s1358_s4 = smov (!%p142_p3), 16  }
   0xe   : > { %s1730_s9 = smov (!%p172_p4, %s1332_s9), 1  ;;  %204 = vst.msk [vmem:[#allocation2 + $0x28] sm:$0xf] %vm199_vm5, %v1345_v11  ;;  %206 = vst.msk [vmem:[#allocation2 + $0x38] sm:$0xf] %vm199_vm5, %v1345_v11  ;;  %s1359_s5 = smov 24  }
   0xf   : > { %s1407_s13 = sshll.u32 %s1730_s9, 4  ;;  %208 = vst.msk [vmem:[#allocation3 + $0x8] sm:$0xf] %vm199_vm5, %v1342_v0  ;;  %210 = vst.msk [vmem:[#allocation3 + $0x18] sm:$0xf] %vm199_vm5, %v1342_v0 }
  0x10   : > { %s1413_s16 = scalar_lea.vmem %s1723_s1, %s1407_s13  ;;  %s1427_s20 = scalar_lea.vmem %s1722_s0, %s1407_s13  ;;  %212 = vst.msk [vmem:[#allocation3 + $0x28] sm:$0xf] %vm199_vm5, %v1342_v0  ;;  %214 = vst.msk [vmem:[#allocation3 + $0x38] sm:$0xf] %vm199_vm5, %v1342_v0  ;;  %v1476_v21 = vld [vmem:[#allocation2] sm:$0xff] }
  0x11   : > { %v1416_v1 = vld [vmem:[%s1413_s16] sm:$0xff]  ;;  %v230_v2 = vld [vmem:[%s1413_s16 + $0x8] sm:$0xf]  ;;  %222 = vst.msk [vmem:[#allocation4 + $0x28] sm:$0xf] %vm217_vm7, %v1342_v0  ;;  %s191_s8 = scalar_lea.vmem %s1724_s2, %s1407_s13 }
  0x12   : > { %v1420_v3 = vpack.c.bf16 %v230_v2, %v1416_v1  ;;  %v225_v4 = vld [vmem:[%s1427_s20] sm:$0xff]  ;;  %v226_v5 = vld [vmem:[%s1427_s20 + $0x8] sm:$0xf]  ;;  %218 = vst.msk [vmem:[#allocation4 + $0x8] sm:$0xf] %vm217_vm7, %v1342_v0 }
  0x13   : > { %v1432_v8 = vmul.f32 0.35355338, %v225_v4  ;;  %v228_v9 = vmul.f32 0.35355338, %v226_v5  ;;  %v591_v19 = vld [vmem:[%s1413_s16 + $0x8] sm:$0xf] }
  0x14   : > { %234 = vrot.lane.b32.xlu0 %v1420_v3, %s1344_s17  ;;  %v1473_v20 = vpack.c.bf16 %v591_v19, %v1416_v1  ;;  %v1478_v23 = vld [vmem:[#allocation2 + $0x8] sm:$0xf]  ;;  %220 = vst.msk [vmem:[#allocation4 + $0x18] sm:$0xf] %vm217_vm7, %v1342_v0  ;;  %224 = vst.msk [vmem:[#allocation4 + $0x38] sm:$0xf] %vm217_vm7, %v1342_v0 }
  0x15   : > { %v231_v10 = vpack.c.bf16 %v228_v9, %v1432_v8  ;;  %v411_v29 = vld [vmem:[%s1413_s16 + $0x8] sm:$0xf] }
  0x16   : > { %v407_v30 = vld [vmem:[%s1427_s20 + $0x8] sm:$0xf]  ;;  %v1500_v31 = vpack.c.bf16 %v411_v29, %v1416_v1 }
  0x17   : > { %v409_v32 = vmul.f32 0.35355338, %v407_v30  ;;  %v587_v33 = vld [vmem:[%s1427_s20 + $0x8] sm:$0xf]  ;;  %v1568_v30 = vld [vmem:[#allocation2 + $0x18] sm:$0xf] }
  0x18   : > { %v589_v35 = vmul.f32 0.35355338, %v587_v33  ;;  %v771_v37 = vld [vmem:[%s1413_s16 + $0x8] sm:$0xf] }
  0x19   : > { %v412_v34 = vpack.c.bf16 %v409_v32, %v1432_v8  ;;  %v767_v38 = vld [vmem:[%s1427_s20 + $0x8] sm:$0xf]  ;;  %v1509_v39 = vpack.c.bf16 %v771_v37, %v1416_v1  ;;  %v1586_v37 = vld [vmem:[#allocation2 + $0x20] sm:$0xff] }
  0x1a   : > { %v592_v36 = vpack.c.bf16 %v589_v35, %v1432_v8  ;;  %v769_v40 = vmul.f32 0.35355338, %v767_v38 }
  0x1c   : > { %v772_v41 = vpack.c.bf16 %v769_v40, %v1432_v8  ;;  %v1588_v40 = vld [vmem:[#allocation2 + $0x28] sm:$0xf] }
  0x86   : > { %v235_v6 = vpop.permute.xlu0 %234 }
  0x87   : > { %v241_v7 = vsel %vm215_vm0, %v235_v6, 0 }
  0x88   : > { %1179 = vmatpush3.bf16.xpose.msra.mxu0 %v241_v7 }
  0x89   : > { %1196 = vmatprep.subr.bf16.mxu0 %v1342_v0 }
  0x8f   : > { %1181 = vmatmul.mubr.msk.bf16.vlgmr.msra.gmra.mrb[0].mxu0 %vm215_vm0, %v231_v10 }
  0x90   : > { %1198 = vmatprep.mubr.msk.bf16.mxu0 %vm1343_vm1, %v1342_v0 }
 0x162   : > { %v1451_v12 = vpop.f32.mrb[0].mxu0 }
 0x163   : > { %v1182_v13 = vpop.f32.mrb[1].mxu0  ;;  %v287_v14 = vsel %vm286_vm3, %v1451_v12, -inf }
 0x164   : > { %288 = vmax.xlane.f32.xlu0 %v287_v14  ;;  %v1455_v15 = vpop.f32.mrb[2].mxu0 }
 0x165   : > { %v1183_v16 = vpop.f32.mrb[3].mxu0  ;;  %v291_v17 = vsel %vm290_vm4, %v1455_v15, -inf }
 0x166   : > { %292 = vmax.xlane.f32.xlu1 %v291_v17 }
 0x17a   : > { %598 = vrot.lane.b32.xlu0 %v1473_v20, %s1347_s21 }
 0x1f1   : > { %v289_v22 = vpop.xlane.xlu0 %288 }
 0x1f2   : > { %v1481_v24 = vmax.f32 %v1476_v21, %v289_v22 }
 0x1f3   : > { %v293_v25 = vpop.xlane.xlu1 %292 }
 0x1f4   : > { %v296_v26 = vsub.f32 %v1476_v21, %v1481_v24  ;;  %404 = vst.msk [vmem:[#allocation2] sm:$0xff] %vm197_vm2, %v1481_v24  ;;  %v1488_v27 = vmax.f32 %v1478_v23, %v293_v25  ;;  %304 = vperm.xlu1 %1268, %v1481_v24   ;;  %v1566_v25 = vld [vmem:[#allocation2 + $0x10] sm:$0xff] }
 0x1f5   : > { %v599_v56 = vpop.permute.xlu0 %598 }
 0x1f6   : > { %v297_v28 = vsub.f32 %v1478_v23, %v1488_v27  ;;  %405 = vst.msk [vmem:[#allocation2 + $0x8] sm:$0xf] %vm199_vm5, %v1488_v27  ;;  %v604_v58 = vsel %vm215_vm0, %v599_v56, 0 }
 0x1f8   : > { %309 = vperm.xlu1 %1268, %v1488_v27  }
 0x1fc   : > { %349 = vrot.lane.b32.xlu1 %v1420_v3, %s1348_s22 }
 0x200   : > { %418 = vrot.lane.b32.xlu1 %v1500_v31, %s1349_s23 }
 0x204   : > { %415 = vrot.lane.b32.xlu1 %v412_v34, %s1350_s24 }
 0x208   : > { %595 = vrot.lane.b32.xlu1 %v592_v36, %s1351_s25 }
 0x20c   : > { %778 = vrot.lane.b32.xlu1 %v1509_v39, %s1352_s26 }
 0x210   : > { %775 = vrot.lane.b32.xlu1 %v772_v41, %s1353_s27 }
 0x273   : > { %v305_v42 = vpop.permute.xlu1 %304 }
 0x274   : > { %v312_v43 = vsub.f32 %v1451_v12, %v305_v42 }
 0x276   : > { %v314_v44 = vmul.f32 1.442695, %v312_v43 }
 0x277   : > { %v310_v45 = vpop.permute.xlu1 %309 }
 0x278   : > { %v313_v46 = vsub.f32 %v1455_v15, %v310_v45  ;;  %1270 = vpow2.f32 %v314_v44 }
 0x27a   : > { %v316_v47 = vmul.f32 1.442695, %v313_v46  ;;  %v1605_v46 = vld [vmem:[#allocation2 + $0x30] sm:$0xff] }
 0x27b   : > { %v350_v48 = vpop.permute.xlu1 %349 }
 0x27c   : > { %1272 = vpow2.f32 %v316_v47  ;;  %v356_v49 = vsel %vm354_vm6, %v350_v48, 0  ;;  %v1608_v48 = vld [vmem:[#allocation2 + $0x38] sm:$0xf] }
 0x27d   : > { %1185 = vmatpush3.bf16.msra.mxu1 %v356_v49 }
 0x27e   : > { %1190 = vmatprep.subr.bf16.mxu1 %v1342_v0 }
 0x27f   : > { %v419_v50 = vpop.permute.xlu1 %418 }
 0x280   : > { %v424_v53 = vsel %vm215_vm0, %v419_v50, 0 }
 0x282   : > { %v1517_v51 = vpop.eup %1270 }
 0x283   : > { %v416_v55 = vpop.permute.xlu1 %415 }
 0x286   : > { %v1519_v52 = vpop.eup %1272 }
 0x287   : > { %v348_v54 = vpack.c.bf16 %v1519_v52, %v1517_v51  ;;  %v596_v57 = vpop.permute.xlu1 %595  ;;  %v325_v56 = vsel %vm290_vm4, %v1519_v52, 0.0 }
 0x289   : > { %1187 = vmatmul.mubr.msk.bf16.vlgmr.msra.gmra.mrb[0].mxu1 %vm286_vm3, %v348_v54 }
 0x28a   : > { %1191 = vmatpush3.bf16.xpose.msra.mxu1 %v424_v53  ;;  %1192 = vmatprep.mubr.msk.bf16.mxu1 %vm1343_vm1, %v1342_v0 }
 0x28b   : > { %1202 = vmatprep.subr.bf16.mxu1 %v1342_v0  ;;  %v779_v59 = vpop.permute.xlu1 %778 }
 0x28c   : > { %v784_v60 = vsel %vm215_vm0, %v779_v59, 0 }
 0x28f   : > { %v776_v61 = vpop.permute.xlu1 %775 }
 0x291   : > { %1193 = vmatmul.mubr.msk.bf16.vlgmr.msra.gmra.mrb[4].mxu1 %vm215_vm0, %v416_v55 }
 0x292   : > { %1203 = vmatpush3.bf16.xpose.msra.mxu1 %v604_v58  ;;  %1204 = vmatprep.mubr.msk.bf16.mxu1 %vm1343_vm1, %v1342_v0 }
 0x293   : > { %1214 = vmatprep.subr.bf16.mxu1 %v1342_v0 }
 0x299   : > { %1205 = vmatmul.mubr.msk.bf16.vlgmr.msra.gmra.mrb[8].mxu1 %vm215_vm0, %v596_v57  ;;  %v322_v57 = vsel %vm286_vm3, %v1517_v51, 0.0 }
 0x29a   : > { %1215 = vmatpush3.bf16.xpose.msra.mxu1 %v784_v60  ;;  %1216 = vmatprep.mubr.msk.bf16.mxu1 %vm1343_vm1, %v1342_v0 }
 0x2a1   : > { %1217 = vmatmul.mubr.msk.bf16.vlgmr.msra.gmra.mrb[12].mxu1 %vm215_vm0, %v776_v61 }
 0x35c   : > { %v1538_v62 = vpop.f32.mrb[0].mxu1 }
 0x35d   : > { %v1188_v63 = vpop.f32.mrb[1].mxu1 }
 0x35e   : > { %v1540_v1 = vpop.f32.mrb[2].mxu1 }
 0x35f   : > { %v1189_v2 = vpop.f32.mrb[3].mxu1 }
 0x364   : > { %v1542_v3 = vpop.f32.mrb[4].mxu1 }
 0x365   : > { %v1194_v4 = vpop.f32.mrb[5].mxu1  ;;  %v470_v5 = vsel %vm286_vm3, %v1542_v3, -inf }
 0x366   : > { %471 = vmax.xlane.f32.xlu1 %v470_v5  ;;  %v1546_v6 = vpop.f32.mrb[6].mxu1 }
 0x367   : > { %v1195_v7 = vpop.f32.mrb[7].mxu1  ;;  %v473_v8 = vsel %vm290_vm4, %v1546_v6, -inf }
 0x368   : > { %474 = vmax.xlane.f32.xlu0 %v473_v8 }
 0x36c   : > { %v1550_v9 = vpop.f32.mrb[8].mxu1 }
 0x36d   : > { %v1206_v10 = vpop.f32.mrb[9].mxu1  ;;  %v650_v11 = vsel %vm286_vm3, %v1550_v9, -inf }
 0x36e   : > { %651 = vmax.xlane.f32.xlu1 %v650_v11  ;;  %v1554_v12 = vpop.f32.mrb[10].mxu1 }
 0x36f   : > { %v1207_v13 = vpop.f32.mrb[11].mxu1  ;;  %v653_v14 = vsel %vm290_vm4, %v1554_v12, -inf }
 0x370   : > { %654 = vmax.xlane.f32.xlu0 %v653_v14 }
 0x374   : > { %v1558_v15 = vpop.f32.mrb[12].mxu1 }
 0x375   : > { %v1218_v16 = vpop.f32.mrb[13].mxu1  ;;  %v830_v17 = vsel %vm286_vm3, %v1558_v15, -inf }
 0x376   : > { %831 = vmax.xlane.f32.xlu1 %v830_v17  ;;  %v1562_v18 = vpop.f32.mrb[14].mxu1 }
 0x377   : > { %v1219_v19 = vpop.f32.mrb[15].mxu1  ;;  %v833_v22 = vsel %vm290_vm4, %v1562_v18, -inf }
 0x378   : > { %834 = vmax.xlane.f32.xlu0 %v833_v22 }
 0x3f3   : > { %v472_v29 = vpop.xlane.xlu1 %471 }
 0x3f4   : > { %v1571_v32 = vmax.f32 %v1566_v25, %v472_v29 }
 0x3f5   : > { %v475_v33 = vpop.xlane.xlu0 %474 }
 0x3f6   : > { %v478_v34 = vsub.f32 %v1566_v25, %v1571_v32  ;;  %584 = vst.msk [vmem:[#allocation2 + $0x10] sm:$0xff] %vm197_vm2, %v1571_v32  ;;  %v1578_v35 = vmax.f32 %v1568_v30, %v475_v33  ;;  %486 = vperm.xlu1 %1268, %v1571_v32  }
 0x3f8   : > { %v479_v36 = vsub.f32 %v1568_v30, %v1578_v35  ;;  %585 = vst.msk [vmem:[#allocation2 + $0x18] sm:$0xf] %vm199_vm5, %v1578_v35  ;;  %491 = vperm.xlu0 %1269, %v1578_v35   ;;  %v480_v21 = vmul.f32 1.442695, %v478_v34 }
 0x3fb   : > { %v652_v38 = vpop.xlane.xlu1 %651 }
 0x3fc   : > { %v1591_v41 = vmax.f32 %v1586_v37, %v652_v38 }
 0x3fd   : > { %v655_v42 = vpop.xlane.xlu0 %654 }
 0x3fe   : > { %v658_v43 = vsub.f32 %v1586_v37, %v1591_v41  ;;  %764 = vst.msk [vmem:[#allocation2 + $0x20] sm:$0xff] %vm197_vm2, %v1591_v41  ;;  %v1598_v44 = vmax.f32 %v1588_v40, %v655_v42  ;;  %666 = vperm.xlu1 %1268, %v1591_v41   ;;  %v300_v42 = vmul.f32 1.442695, %v297_v28 }
 0x400   : > { %v659_v45 = vsub.f32 %v1588_v40, %v1598_v44  ;;  %765 = vst.msk [vmem:[#allocation2 + $0x28] sm:$0xf] %vm199_vm5, %v1598_v44  ;;  %v660_v27 = vmul.f32 1.442695, %v658_v43 }
 0x402   : > { %671 = vperm.xlu1 %1268, %v1598_v44  }
 0x403   : > { %v832_v47 = vpop.xlane.xlu1 %831 }
 0x404   : > { %v1611_v49 = vmax.f32 %v1605_v46, %v832_v47 }
 0x405   : > { %v835_v50 = vpop.xlane.xlu0 %834 }
 0x406   : > { %v838_v53 = vsub.f32 %v1605_v46, %v1611_v49  ;;  %944 = vst.msk [vmem:[#allocation2 + $0x30] sm:$0xff] %vm197_vm2, %v1611_v49  ;;  %v1618_v54 = vmax.f32 %v1608_v48, %v835_v50  ;;  %846 = vperm.xlu1 %1268, %v1611_v49   ;;  %v662_v50 = vmul.f32 1.442695, %v659_v45 }
 0x408   : > { %v839_v55 = vsub.f32 %v1608_v48, %v1618_v54  ;;  %945 = vst.msk [vmem:[#allocation2 + $0x38] sm:$0xf] %vm199_vm5, %v1618_v54  ;;  %v840_v41 = vmul.f32 1.442695, %v838_v53 }
 0x40a   : > { %851 = vperm.xlu1 %1268, %v1618_v54   ;;  %v842_v30 = vmul.f32 1.442695, %v839_v55  ;;  %v318_v54 = vld [vmem:[#allocation3] sm:$0xff] }
 0x40e   : > { %531 = vrot.lane.b32.xlu1 %v1500_v31, %s1354_s28 }
 0x412   : > { %711 = vrot.lane.b32.xlu1 %v1473_v20, %s1355_s29 }
 0x416   : > { %891 = vrot.lane.b32.xlu1 %v1509_v39, %s1356_s30 }
 0x417   : > { %326 = vadd.xlane.f32.xlu0 %v325_v56  ;;  %v482_v56 = vmul.f32 1.442695, %v479_v36 }
 0x43a   : > { %323 = vadd.xlane.f32.xlu1 %v322_v57  ;;  %v319_v57 = vld [vmem:[#allocation3 + $0x8] sm:$0xf] }
 0x475   : > { %v487_v58 = vpop.permute.xlu1 %486 }
 0x476   : > { %v494_v59 = vsub.f32 %v1542_v3, %v487_v58 }
 0x477   : > { %v492_v60 = vpop.permute.xlu0 %491 }
 0x478   : > { %v496_v61 = vmul.f32 1.442695, %v494_v59  ;;  %v495_v31 = vsub.f32 %v1546_v6, %v492_v60 }
 0x47a   : > { %1274 = vpow2.f32 %v496_v61  ;;  %v498_v20 = vmul.f32 1.442695, %v495_v31 }
 0x47c   : > { %1276 = vpow2.f32 %v498_v20  ;;  %v501_v20 = vld [vmem:[#allocation3 + $0x10] sm:$0xff] }
 0x47d   : > { %v667_v63 = vpop.permute.xlu1 %666 }
 0x47e   : > { %v674_v39 = vsub.f32 %v1550_v9, %v667_v63  ;;  %v502_v63 = vld [vmem:[#allocation3 + $0x18] sm:$0xf] }
 0x480   : > { %v676_v2 = vmul.f32 1.442695, %v674_v39 }
 0x481   : > { %v672_v52 = vpop.permute.xlu1 %671 }
 0x482   : > { %1278 = vpow2.f32 %v676_v2  ;;  %v675_v4 = vsub.f32 %v1554_v12, %v672_v52 }
 0x484   : > { %v1275_v51 = vpop.eup %1274  ;;  %v678_v5 = vmul.f32 1.442695, %v675_v4 }
 0x485   : > { %v847_v7 = vpop.permute.xlu1 %846  ;;  %v505_v3 = vsel %vm286_vm3, %v1275_v51, 0.0 }
 0x486   : > { %v1277_v8 = vpop.eup %1276  ;;  %1280 = vpow2.f32 %v678_v5  ;;  %v854_v6 = vsub.f32 %v1558_v15, %v847_v7  ;;  %506 = vadd.xlane.f32.xlu1 %v505_v3  ;;  %v298_v15 = vmul.f32 1.442695, %v296_v26  ;;  %v681_v7 = vld [vmem:[#allocation3 + $0x20] sm:$0xff] }
 0x487   : > { %v508_v10 = vsel %vm290_vm4, %v1277_v8, 0.0  ;;  %v530_v11 = vpack.c.bf16 %v1277_v8, %v1275_v51 }
 0x488   : > { %v856_v13 = vmul.f32 1.442695, %v854_v6  ;;  %509 = vadd.xlane.f32.xlu0 %v508_v10  ;;  %v334_v6 = vld [vmem:[#allocation4] sm:$0xff]  ;;  %v682_v10 = vld [vmem:[#allocation3 + $0x28] sm:$0xf] }
 0x489   : > { %v852_v9 = vpop.permute.xlu1 %851 }
 0x48a   : > { %1282 = vpow2.f32 %v856_v13  ;;  %v855_v14 = vsub.f32 %v1562_v18, %v852_v9 }
 0x48c   : > { %v1279_v12 = vpop.eup %1278  ;;  %v858_v16 = vmul.f32 1.442695, %v855_v14 }
 0x48d   : > { %v532_v17 = vpop.permute.xlu1 %531  ;;  %v685_v19 = vsel %vm286_vm3, %v1279_v12, 0.0 }
 0x48e   : > { %1284 = vpow2.f32 %v858_v16  ;;  %v537_v22 = vsel %vm354_vm6, %v532_v17, 0  ;;  %686 = vadd.xlane.f32.xlu1 %v685_v19  ;;  %v861_v17 = vld [vmem:[#allocation3 + $0x30] sm:$0xff] }
 0x48f   : > { %1197 = vmatpush3.bf16.msra.mxu0 %v537_v22  ;;  %1286 = vpow2.f32 %v298_v15 }
 0x490   : > { %v1281_v29 = vpop.eup %1280  ;;  %1208 = vmatprep.subr.bf16.mxu0 %v1342_v0  ;;  %1288 = vpow2.f32 %v300_v42 }
 0x491   : > { %v688_v33 = vsel %vm290_vm4, %v1281_v29, 0.0  ;;  %v712_v18 = vpop.permute.xlu1 %711  ;;  %v710_v38 = vpack.c.bf16 %v1281_v29, %v1279_v12  ;;  %1290 = vpow2.f32 %v480_v21 }
 0x492   : > { %689 = vadd.xlane.f32.xlu1 %v688_v33  ;;  %1199 = vmatmul.mubr.msk.bf16.vlgmr.msra.gmra.mrb[4].mxu0 %vm286_vm3, %v530_v11  ;;  %v717_v47 = vsel %vm354_vm6, %v712_v18, 0  ;;  %1292 = vpow2.f32 %v660_v27  ;;  %v862_v18 = vld [vmem:[#allocation3 + $0x38] sm:$0xf] }
 0x493   : > { %1209 = vmatpush3.bf16.msra.mxu0 %v717_v47  ;;  %1210 = vmatprep.mubr.msk.bf16.mxu0 %vm1343_vm1, %v1342_v0  ;;  %1294 = vpow2.f32 %v662_v50 }
 0x494   : > { %v1283_v24 = vpop.eup %1282  ;;  %1220 = vmatprep.subr.bf16.mxu0 %v1342_v0  ;;  %1296 = vpow2.f32 %v840_v41 }
 0x495   : > { %v865_v23 = vsel %vm286_vm3, %v1283_v24, 0.0  ;;  %v892_v26 = vpop.permute.xlu1 %891  ;;  %1298 = vpow2.f32 %v482_v56 }
 0x496   : > { %866 = vadd.xlane.f32.xlu1 %v865_v23  ;;  %v897_v25 = vsel %vm354_vm6, %v892_v26, 0  ;;  %1300 = vpow2.f32 %v842_v30 }
 0x498   : > { %v1285_v28 = vpop.eup %1284 }
 0x499   : > { %v868_v32 = vsel %vm290_vm4, %v1285_v28, 0.0  ;;  %v890_v34 = vpack.c.bf16 %v1285_v28, %v1283_v24  ;;  %v1287_v37 = vpop.eup %1286 }
 0x49a   : > { %869 = vadd.xlane.f32.xlu1 %v868_v32  ;;  %1211 = vmatmul.mubr.msk.bf16.vlgmr.msra.gmra.mrb[8].mxu0 %vm286_vm3, %v710_v38  ;;  %v1289_v43 = vpop.eup %1288  ;;  %v320_v55 = vmul.f32 %v1287_v37, %v318_v54  ;;  %v696_v54 = vld [vmem:[#allocation4 + $0x20] sm:$0xff] }
 0x49b   : > { %1221 = vmatpush3.bf16.msra.mxu0 %v897_v25  ;;  %1222 = vmatprep.mubr.msk.bf16.mxu0 %vm1343_vm1, %v1342_v0  ;;  %v1291_v58 = vpop.eup %1290  ;;  %v321_v35 = vmul.f32 %v1289_v43, %v319_v57 }
 0x49c   : > { %v1293_v40 = vpop.eup %1292  ;;  %v503_v39 = vmul.f32 %v1291_v58, %v501_v20 }
 0x49d   : > { %v1295_v45 = vpop.eup %1294  ;;  %v683_v3 = vmul.f32 %v1293_v40, %v681_v7 }
 0x49e   : > { %338 = vperm.xlu0 %1269, %v1287_v37   ;;  %v1297_v46 = vpop.eup %1296  ;;  %v684_v12 = vmul.f32 %v1295_v45, %v682_v10 }
 0x49f   : > { %v1299_v49 = vpop.eup %1298  ;;  %v863_v29 = vmul.f32 %v1297_v46, %v861_v17 }
 0x4a0   : > { %v1301_v48 = vpop.eup %1300  ;;  %v504_v4 = vmul.f32 %v1299_v49, %v502_v63 }
 0x4a1   : > { %v864_v47 = vmul.f32 %v1301_v48, %v862_v18 }
 0x4a2   : > { %520 = vperm.xlu0 %1269, %v1291_v58   ;;  %1223 = vmatmul.mubr.msk.bf16.vlgmr.msra.gmra.mrb[12].mxu0 %vm286_vm3, %v890_v34  ;;  %v516_v58 = vld [vmem:[#allocation4 + $0x10] sm:$0xff] }
 0x4a4   : > { %v327_v36 = vpop.xlane.xlu0 %326 }
 0x4a5   : > { %v329_v44 = vadd.f32 %v327_v36, %v321_v35  ;;  %v517_v35 = vld [vmem:[#allocation4 + $0x18] sm:$0xf] }
 0x4a6   : > { %700 = vperm.xlu0 %1269, %v1293_v40  }
 0x4a7   : > { %333 = vst.msk [vmem:[#allocation3 + $0x8] sm:$0xf] %vm199_vm5, %v329_v44 }
 0x4aa   : > { %705 = vperm.xlu0 %1269, %v1295_v45  }
 0x4ab   : > { %343 = vperm.xlu1 %1268, %v1289_v43  }
 0x4ae   : > { %880 = vperm.xlu0 %1269, %v1297_v46   ;;  %v952_v0 = vld [vmem:[#allocation3 + $0x8] sm:$0xf] }
 0x4af   : > { %525 = vperm.xlu1 %1268, %v1299_v49   ;;  %1302 = vrcp.f32 %v952_v0 }
 0x4b2   : > { %885 = vperm.xlu0 %1269, %v1301_v48  }
 0x4b9   : > { %v1303_v53 = vpop.eup %1302 }
 0x4ba   : > { %962 = vperm.xlu0 %1269, %v1303_v53  }
 0x4c7   : > { %v324_v59 = vpop.xlane.xlu1 %323 }
 0x4c8   : > { %v328_v60 = vadd.f32 %v324_v59, %v320_v55  ;;  %v697_v55 = vld [vmem:[#allocation4 + $0x28] sm:$0xf] }
 0x4ca   : > { %331 = vst.msk [vmem:[#allocation3] sm:$0xff] %vm197_vm2, %v328_v60 }
 0x4d1   : > { %v951_v61 = vld [vmem:[#allocation3] sm:$0xff] }
 0x4d2   : > { %1304 = vrcp.f32 %v951_v61 }
 0x4dc   : > { %v1305_v31 = vpop.eup %1304 }
 0x4dd   : > { %957 = vperm.xlu1 %1268, %v1305_v31  }
 0x513   : > { %v507_v2 = vpop.xlane.xlu1 %506 }
 0x514   : > { %v511_v52 = vadd.f32 %v507_v2, %v503_v39 }
 0x515   : > { %v510_v51 = vpop.xlane.xlu0 %509 }
 0x516   : > { %513 = vst.msk [vmem:[#allocation3 + $0x10] sm:$0xff] %vm197_vm2, %v511_v52  ;;  %v512_v5 = vadd.f32 %v510_v51, %v504_v4  ;;  %v876_v4 = vld [vmem:[#allocation4 + $0x30] sm:$0xff]  ;;  %v877_v51 = vld [vmem:[#allocation4 + $0x38] sm:$0xf] }
 0x518   : > { %514 = vst.msk [vmem:[#allocation3 + $0x18] sm:$0xf] %vm199_vm5, %v512_v5 }
 0x51b   : > { %v687_v8 = vpop.xlane.xlu1 %686 }
 0x51c   : > { %v691_v11 = vadd.f32 %v687_v8, %v683_v3 }
 0x51d   : > { %v339_v13 = vpop.permute.xlu0 %338  ;;  %v969_v9 = vld [vmem:[#allocation3 + $0x10] sm:$0xff] }
 0x51e   : > { %693 = vst.msk [vmem:[#allocation3 + $0x20] sm:$0xff] %vm197_vm2, %v691_v11  ;;  %v346_v14 = vmul.f32 %v339_v13, %v334_v6  ;;  %1306 = vrcp.f32 %v969_v9 }
 0x51f   : > { %v690_v16 = vpop.xlane.xlu1 %689  ;;  %v970_v19 = vld [vmem:[#allocation3 + $0x18] sm:$0xf] }
 0x520   : > { %v399_v22 = vadd.f32 %v1538_v62, %v346_v14  ;;  %v692_v15 = vadd.f32 %v690_v16, %v684_v12  ;;  %1308 = vrcp.f32 %v970_v19  ;;  %v335_v62 = vld [vmem:[#allocation4 + $0x8] sm:$0xf] }
 0x521   : > { %v521_v57 = vpop.permute.xlu0 %520 }
 0x522   : > { %401 = vst.msk [vmem:[#allocation4] sm:$0xff] %vm215_vm0, %v399_v22  ;;  %v528_v40 = vmul.f32 %v521_v57, %v516_v58 }
 0x523   : > { %694 = vst.msk [vmem:[#allocation3 + $0x28] sm:$0xf] %vm199_vm5, %v692_v15  ;;  %v867_v33 = vpop.xlane.xlu1 %866 }
 0x524   : > { %v871_v38 = vadd.f32 %v867_v33, %v863_v29 }
 0x525   : > { %v987_v42 = vld [vmem:[#allocation3 + $0x20] sm:$0xff]  ;;  %v701_v30 = vpop.permute.xlu0 %700 }
 0x526   : > { %873 = vst.msk [vmem:[#allocation3 + $0x30] sm:$0xff] %vm197_vm2, %v871_v38  ;;  %1310 = vrcp.f32 %v987_v42  ;;  %v708_v59 = vmul.f32 %v701_v30, %v696_v54 }
 0x527   : > { %v870_v21 = vpop.xlane.xlu1 %869 }
 0x528   : > { %v1307_v24 = vpop.eup %1306  ;;  %v872_v23 = vadd.f32 %v870_v21, %v864_v47 }
 0x529   : > { %975 = vperm.xlu1 %1268, %v1307_v24   ;;  %v706_v49 = vpop.permute.xlu0 %705 }
 0x52a   : > { %v988_v26 = vld [vmem:[#allocation3 + $0x28] sm:$0xf]  ;;  %v1309_v27 = vpop.eup %1308  ;;  %874 = vst.msk [vmem:[#allocation3 + $0x38] sm:$0xf] %vm199_vm5, %v872_v23  ;;  %v709_v31 = vmul.f32 %v706_v49, %v697_v55 }
 0x52b   : > { %1312 = vrcp.f32 %v988_v26  ;;  %980 = vperm.xlu0 %1269, %v1309_v27   ;;  %v344_v28 = vpop.permute.xlu1 %343 }
 0x52c   : > { %v347_v25 = vmul.f32 %v344_v28, %v335_v62 }
 0x52d   : > { %v1005_v32 = vld [vmem:[#allocation3 + $0x30] sm:$0xff]  ;;  %v881_v60 = vpop.permute.xlu0 %880 }
 0x52e   : > { %v400_v34 = vadd.f32 %v1540_v1, %v347_v25  ;;  %1314 = vrcp.f32 %v1005_v32  ;;  %v888_v7 = vmul.f32 %v881_v60, %v876_v4  ;;  %v949_v32 = vld [vmem:[#allocation4] sm:$0xff] }
 0x52f   : > { %v526_v36 = vpop.permute.xlu1 %525 }
 0x530   : > { %v1311_v50 = vpop.eup %1310  ;;  %403 = vst.msk [vmem:[#allocation4 + $0x8] sm:$0xf] %vm217_vm7, %v400_v34  ;;  %v529_v44 = vmul.f32 %v526_v36, %v517_v35 }
 0x531   : > { %993 = vperm.xlu1 %1268, %v1311_v50   ;;  %v1006_v37 = vld [vmem:[#allocation3 + $0x38] sm:$0xf]  ;;  %v886_v5 = vpop.permute.xlu0 %885 }
 0x532   : > { %1316 = vrcp.f32 %v1006_v37  ;;  %v889_v8 = vmul.f32 %v886_v5, %v877_v51 }
 0x535   : > { %v1313_v41 = vpop.eup %1312 }
 0x536   : > { %998 = vperm.xlu0 %1269, %v1313_v41  }
 0x538   : > { %v1315_v43 = vpop.eup %1314 }
 0x539   : > { %1011 = vperm.xlu1 %1268, %v1315_v43   ;;  %v963_v12 = vpop.permute.xlu0 %962  ;;  %v950_v43 = vld [vmem:[#allocation4 + $0x8] sm:$0xf] }
 0x53a   : > { %v966_v30 = vmul.f32 %v963_v12, %v950_v43 }
 0x53c   : > { %v1317_v56 = vpop.eup %1316 }
 0x53d   : > { %1016 = vperm.xlu0 %1269, %v1317_v56  }
 0x55c   : > { %v958_v14 = vpop.permute.xlu1 %957 }
 0x55d   : > { %v965_v37 = vmul.f32 %v958_v14, %v949_v32 }
 0x565   : > { %v573_v1 = vpop.f32.mrb[4].mxu0 }
 0x566   : > { %v580_v45 = vadd.f32 %v573_v1, %v528_v40  ;;  %v1200_v46 = vpop.f32.mrb[5].mxu0 }
 0x567   : > { %v576_v0 = vpop.f32.mrb[6].mxu0 }
 0x568   : > { %582 = vst.msk [vmem:[#allocation4 + $0x10] sm:$0xff] %vm215_vm0, %v580_v45  ;;  %v581_v48 = vadd.f32 %v576_v0, %v529_v44  ;;  %v1201_v53 = vpop.f32.mrb[7].mxu0 }
 0x56a   : > { %583 = vst.msk [vmem:[#allocation4 + $0x18] sm:$0xf] %vm217_vm7, %v581_v48 }
 0x56d   : > { %v753_v61 = vpop.f32.mrb[8].mxu0 }
 0x56e   : > { %v760_v20 = vadd.f32 %v753_v61, %v708_v59  ;;  %v1212_v63 = vpop.f32.mrb[9].mxu0 }
 0x56f   : > { %v756_v39 = vpop.f32.mrb[10].mxu0  ;;  %v967_v17 = vld [vmem:[#allocation4 + $0x10] sm:$0xff] }
 0x570   : > { %762 = vst.msk [vmem:[#allocation4 + $0x20] sm:$0xff] %vm215_vm0, %v760_v20  ;;  %v761_v2 = vadd.f32 %v756_v39, %v709_v31  ;;  %v1213_v52 = vpop.f32.mrb[11].mxu0 }
 0x571   : > { %v968_v15 = vld [vmem:[#allocation4 + $0x18] sm:$0xf] }
 0x572   : > { %763 = vst.msk [vmem:[#allocation4 + $0x28] sm:$0xf] %vm217_vm7, %v761_v2 }
 0x575   : > { %v933_v3 = vpop.f32.mrb[12].mxu0 }
 0x576   : > { %v940_v6 = vadd.f32 %v933_v3, %v888_v7  ;;  %v1224_v10 = vpop.f32.mrb[13].mxu0 }
 0x577   : > { %v936_v11 = vpop.f32.mrb[14].mxu0  ;;  %v985_v18 = vld [vmem:[#allocation4 + $0x20] sm:$0xff] }
 0x578   : > { %942 = vst.msk [vmem:[#allocation4 + $0x30] sm:$0xff] %vm215_vm0, %v940_v6  ;;  %v941_v13 = vadd.f32 %v936_v11, %v889_v8  ;;  %v1225_v9 = vpop.f32.mrb[15].mxu0 }
 0x579   : > { %v986_v47 = vld [vmem:[#allocation4 + $0x28] sm:$0xf] }
 0x57a   : > { %943 = vst.msk [vmem:[#allocation4 + $0x38] sm:$0xf] %vm217_vm7, %v941_v13 }
 0x57f   : > { %v1003_v23 = vld [vmem:[#allocation4 + $0x30] sm:$0xff] }
 0x581   : > { %v1004_v27 = vld [vmem:[#allocation4 + $0x38] sm:$0xf] }
 0x5a8   : > { %v976_v16 = vpop.permute.xlu1 %975 }
 0x5a9   : > { %v983_v19 = vmul.f32 %v976_v16, %v967_v17 }
 0x5aa   : > { %v981_v22 = vpop.permute.xlu0 %980 }
 0x5ab   : > { %v984_v29 = vmul.f32 %v981_v22, %v968_v15  ;;  %1023 = vrot.lane.b32.xlu1 %v983_v19, %s1357_s3 }
 0x5ad   : > { %1025 = vrot.lane.b32.xlu0 %v984_v29, %s1357_s3 }
 0x5b0   : > { %v994_v33 = vpop.permute.xlu1 %993 }
 0x5b1   : > { %v1001_v38 = vmul.f32 %v994_v33, %v985_v18 }
 0x5b3   : > { %1031 = vrot.lane.b32.xlu1 %v1001_v38, %s1358_s4 }
 0x5b5   : > { %v999_v42 = vpop.permute.xlu0 %998 }
 0x5b6   : > { %v1002_v21 = vmul.f32 %v999_v42, %v986_v47 }
 0x5b8   : > { %1033 = vrot.lane.b32.xlu0 %v1002_v21, %s1358_s4  ;;  %v1012_v24 = vpop.permute.xlu1 %1011 }
 0x5b9   : > { %v1019_v62 = vmul.f32 %v1012_v24, %v1003_v23 }
 0x5bb   : > { %1039 = vrot.lane.b32.xlu1 %v1019_v62, %s1359_s5 }
 0x5bc   : > { %v1017_v26 = vpop.permute.xlu0 %1016 }
 0x5bd   : > { %v1020_v28 = vmul.f32 %v1017_v26, %v1004_v27 }
 0x5bf   : > { %1041 = vrot.lane.b32.xlu0 %v1020_v28, %s1359_s5 }
 0x61d   : > { %v1024_v25 = vpop.permute.xlu1 %1023 }
 0x61e   : > { %v1045_v41 = vsel %vm215_vm0, %v965_v37, %v1024_v25 }
 0x61f   : > { %v1026_v34 = vpop.permute.xlu0 %1025 }
 0x620   : > { %v1046_v36 = vsel %vm215_vm0, %v966_v30, %v1026_v34 }
 0x625   : > { %v1032_v50 = vpop.permute.xlu1 %1031 }
 0x626   : > { %v1048_v56 = vsel %vm1047_vm8, %v1045_v41, %v1032_v50 }
 0x62a   : > { %v1034_v57 = vpop.permute.xlu0 %1033 }
 0x62b   : > { %v1049_v40 = vsel %vm1047_vm8, %v1046_v36, %v1034_v57 }
 0x62d   : > { %v1040_v58 = vpop.permute.xlu1 %1039 }
 0x62e   : > { %v1051_v35 = vsel %vm1050_vm9, %v1048_v56, %v1040_v58 }
 0x62f   : > { %1054 = vst.msk [vmem:[%s191_s8] sm:$0xff] %vm1053_vm10, %v1051_v35 }
 0x631   : > { %v1042_v1 = vpop.permute.xlu0 %1041 }
 0x632   : > { %v1052_v44 = vsel %vm1050_vm9, %v1049_v40, %v1042_v1 }
 0x633   : > { %1056 = vst.msk [vmem:[%s191_s8 + $0x8] sm:$0xf] %vm1055_vm11, %v1052_v44 }
 0x634 PF: > { %s12_s11 = sadd.s32 1, %s1340_s11   ;;  %s1725_s9 = smov %s1336_s10 }
 0x635   : > { %p9_p5 = scmp.ge.s32.totalorder %s12_s11, 4   ;;  %s1726_s10 = smov %s1728_s12 }
 0x637   :  { %11 = sbr.rel (!%p9_p5) target bundleno = 2 (0x2), region = 78 }

// kernel: social_mae_forward.44
= control target key start
LH: loop header
LB: loop body
LE: loop exit
PB: predicated region body
PF: predicated region fallthrough
CT: control target
= control target key end

     0   :  { %vm32_vm0 = vcmask 261120   ;;  %s618_s0 = inlined_call_operand.vmem [shape: f32[24,32], index: 0, kind: input, shape index: {}]   ;;  %s619_s3 = inlined_call_operand.vmem [shape: bf16[32,128], index: 3, kind: input, shape index: {}]   ;;  %s620_s1 = inlined_call_operand.vmem [shape: f32[1,32], index: 1, kind: input, shape index: {}]   ;;  %s621_s2 = inlined_call_operand.vmem [shape: f32[1,32], index: 2, kind: input, shape index: {}]   ;;  %s622_s5 = inlined_call_operand.vmem [shape: bf16[128,32], index: 5, kind: input, shape index: {}]   ;;  %s623_s4 = inlined_call_operand.vmem [shape: f32[1,128], index: 4, kind: input, shape index: {}]   ;;  %s624_s6 = inlined_call_operand.vmem [shape: f32[1,32], index: 6, kind: input, shape index: {}]   ;;  %s625_s7 = inlined_call_operand.vmem [shape: f32[24,32], index: 7, kind: output, shape index: {}]  }
   0x1   :  { %v511_v0 = vld [vmem:[%s618_s0] sm:$0xff]  ;;  %v516_v1 = vld [vmem:[%s618_s0 + $0x10] sm:$0xff]  ;;  %v521_v2 = vld [vmem:[%s618_s0 + $0x8] sm:$0xff] }
   0x2   :  { %v33_v3 = vsel %vm32_vm0, %v511_v0, 0.0  ;;  %v39_v4 = vsel %vm32_vm0, %v516_v1, 0.0  ;;  %v36_v5 = vsel %vm32_vm0, %v521_v2, 0.0  ;;  %v440_v21 = vld [vmem:[%s619_s3] sm:$0xff]   ;;  %v441_v22 = vld [vmem:[%s619_s3 + $0x8] sm:$0xff]   ;;  %v444_v50 = vld [vmem:[%s622_s5 + $0x10] sm:$0xff]  }
   0x3   :  { %34 = vadd.xlane.f32.xlu0 %v33_v3  ;;  %40 = vadd.xlane.f32.xlu1 %v39_v4  ;;  %v382_v34 = vld [vmem:[%s620_s1] ss:$0 sm:$0xff]  ;;  %v443_v49 = vld [vmem:[%s622_s5 + $0x8] sm:$0xff]   ;;  %v445_v51 = vld [vmem:[%s622_s5 + $0x18] sm:$0xff]  }
   0x4   :  { %412 = vmatprep.subr.bf16.mxu0 %v440_v21  ;;  %v383_v40 = vld [vmem:[%s621_s2] ss:$0 sm:$0xff]  ;;  %v447_v53 = vld [vmem:[%s622_s5 + $0x28] sm:$0xff]   ;;  %v448_v54 = vld [vmem:[%s622_s5 + $0x30] sm:$0xff]  }
   0x5   :  { %413 = vmatpush3.bf16.msra.mxu0 %v440_v21  ;;  %v442_v48 = vld [vmem:[%s622_s5] sm:$0xff]   ;;  %v449_v55 = vld [vmem:[%s622_s5 + $0x38] sm:$0xff]  }
   0x6   :  { %414 = vmatprep.subr.bf16.mxu0 %v441_v22  ;;  %420 = vmatprep.subr.bf16.mxu1 %v442_v48  ;;  %v446_v52 = vld [vmem:[%s622_s5 + $0x20] sm:$0xff]  }
   0x7   :  { %37 = vadd.xlane.f32.xlu0 %v36_v5  ;;  %421 = vmatpush3.bf16.msra.mxu1 %v442_v48  ;;  %v384_v56 = vld [vmem:[%s623_s4] ss:$0 sm:$0xff] }
   0x8   :  { %422 = vmatprep.subr.bf16.mxu1 %v443_v49 }
   0x9   :  { %415 = vmatpush3.bf16.msra.mxu0 %v441_v22 }
   0xb   :  { %423 = vmatpush3.bf16.msra.mxu1 %v443_v49 }
   0xc   :  { %424 = vmatprep.subr.bf16.mxu1 %v444_v50 }
   0xf   :  { %425 = vmatpush3.bf16.msra.mxu1 %v444_v50 }
  0x10   :  { %426 = vmatprep.subr.bf16.mxu1 %v445_v51 }
  0x13   :  { %427 = vmatpush3.bf16.msra.mxu1 %v445_v51 }
  0x14   :  { %428 = vmatprep.subr.bf16.mxu1 %v446_v52 }
  0x17   :  { %429 = vmatpush3.bf16.msra.mxu1 %v446_v52 }
  0x18   :  { %430 = vmatprep.subr.bf16.mxu1 %v447_v53 }
  0x1b   :  { %431 = vmatpush3.bf16.msra.mxu1 %v447_v53 }
  0x1c   :  { %432 = vmatprep.subr.bf16.mxu1 %v448_v54 }
  0x1f   :  { %433 = vmatpush3.bf16.msra.mxu1 %v448_v54 }
  0x20   :  { %434 = vmatprep.subr.bf16.mxu1 %v449_v55 }
  0x23   :  { %435 = vmatpush3.bf16.msra.mxu1 %v449_v55 }
  0x90   :  { %v35_v6 = vpop.xlane.xlu0 %34  ;;  %v41_v7 = vpop.xlane.xlu1 %40 }
  0x91   :  { %v43_v8 = vmul.f32 0.03125, %v35_v6  ;;  %v45_v9 = vmul.f32 0.03125, %v41_v7 }
  0x93   :  { %v46_v10 = vsub.f32 %v511_v0, %v43_v8  ;;  %v48_v11 = vsub.f32 %v516_v1, %v45_v9 }
  0x94   :  { %v38_v12 = vpop.xlane.xlu0 %37 }
  0x95   :  { %v44_v13 = vmul.f32 0.03125, %v38_v12  ;;  %v49_v14 = vmul.f32 %v46_v10, %v46_v10  ;;  %v51_v15 = vmul.f32 %v48_v11, %v48_v11 }
  0x97   :  { %v47_v16 = vsub.f32 %v521_v2, %v44_v13  ;;  %v52_v17 = vsel %vm32_vm0, %v49_v14, 0.0  ;;  %v58_v18 = vsel %vm32_vm0, %v51_v15, 0.0 }
  0x98   :  { %53 = vadd.xlane.f32.xlu1 %v52_v17 }
  0x99   :  { %v50_v19 = vmul.f32 %v47_v16, %v47_v16 }
  0x9b   :  { %v55_v20 = vsel %vm32_vm0, %v50_v19, 0.0 }
  0x9c   :  { %59 = vadd.xlane.f32.xlu1 %v58_v18  ;;  %56 = vadd.xlane.f32.xlu0 %v55_v20 }
 0x125   :  { %v54_v23 = vpop.xlane.xlu1 %53 }
 0x126   :  { %v61_v24 = vmul.f32 0.03125, %v54_v23 }
 0x128   :  { %v64_v25 = vadd.f32 1e-05, %v61_v24 }
 0x129   :  { %v60_v26 = vpop.xlane.xlu1 %59  ;;  %v57_v27 = vpop.xlane.xlu0 %56 }
 0x12a   :  { %450 = vrsqrt.f32 %v64_v25  ;;  %v63_v28 = vmul.f32 0.03125, %v60_v26  ;;  %v62_v29 = vmul.f32 0.03125, %v57_v27 }
 0x12c   :  { %v66_v30 = vadd.f32 1e-05, %v63_v28  ;;  %v65_v31 = vadd.f32 1e-05, %v62_v29 }
 0x12e   :  { %452 = vrsqrt.f32 %v66_v30 }
 0x12f   :  { %454 = vrsqrt.f32 %v65_v31 }
 0x134   :  { %v451_v32 = vpop.eup %450 }
 0x135   :  { %v70_v33 = vmul.f32 %v451_v32, %v46_v10 }
 0x137   :  { %v79_v39 = vmul.f32 %v382_v34, %v70_v33 }
 0x138   :  { %v453_v35 = vpop.eup %452 }
 0x139   :  { %v455_v36 = vpop.eup %454  ;;  %v72_v37 = vmul.f32 %v453_v35, %v48_v11  ;;  %v88_v44 = vadd.f32 %v383_v40, %v79_v39 }
 0x13a   :  { %v71_v38 = vmul.f32 %v455_v36, %v47_v16 }
 0x13b   :  { %v81_v41 = vmul.f32 %v382_v34, %v72_v37 }
 0x13c   :  { %v80_v42 = vmul.f32 %v382_v34, %v71_v38 }
 0x13d   :  { %v90_v43 = vadd.f32 %v383_v40, %v81_v41 }
 0x13e   :  { %v89_v45 = vadd.f32 %v383_v40, %v80_v42 }
 0x13f   :  { %v92_v46 = vpack.c.bf16 %v90_v43, %v90_v43 }
 0x140   :  { %v91_v47 = vpack.c.bf16 %v89_v45, %v88_v44 }
 0x142   :  { %416 = vmatprep.mubr.msk.bf16.mxu0 %vm32_vm0, %v91_v47 }
 0x143   :  { %417 = vmatmul.mubr.msk.bf16.vlgmr.msra.gmra.mrb[0].mxu0 %vm32_vm0, %v92_v46 }
 0x216   :  { %v418_v57 = vpop.f32.mrb[0].mxu0 }
 0x217   :  { %v576_v58 = vadd.f32 %v418_v57, %v384_v56  ;;  %v156_v59 = vpop.f32.mrb[1].mxu0 }
 0x218   :  { %v578_v60 = vadd.f32 %v384_v56, %v156_v59  ;;  %v419_v61 = vpop.f32.mrb[2].mxu0 }
 0x219   :  { %v581_v62 = vmul.f32 0.70710677, %v576_v58  ;;  %v159_v63 = vpop.f32.mrb[3].mxu0 }
 0x21a   :  { %v584_v3 = vmul.f32 0.70710677, %v578_v60  ;;  %v586_v4 = vadd.f32 %v384_v56, %v159_v63 }
 0x21b   :  { %v178_v5 = vand.u32 2147483647, %v581_v62  ;;  %vm238_vm1 = vcmp.ge.f32.partialorder %v581_v62, 0.0 }
 0x21c   :  { %v176_v6 = vand.u32 2147483647, %v584_v3  ;;  %v591_v7 = vmul.f32 0.70710677, %v586_v4  ;;  %vm236_vm2 = vcmp.ge.f32.partialorder %v584_v3, 0.0 }
 0x21d   :  { %v181_v8 = vmul.f32 0.3275911, %v178_v5  ;;  %v220_v15 = vsub.f32 0.0, %v178_v5 }
 0x21e   :  { %v179_v9 = vmul.f32 0.3275911, %v176_v6  ;;  %v177_v10 = vand.u32 2147483647, %v591_v7  ;;  %v218_v16 = vsub.f32 0.0, %v176_v6  ;;  %vm237_vm3 = vcmp.ge.f32.partialorder %v591_v7, 0.0 }
 0x21f   :  { %v184_v11 = vadd.f32 1.0, %v181_v8  ;;  %v223_v18 = vmul.f32 %v220_v15, %v178_v5  ;;  %v172_v15 = vmul.f32 0.5, %v576_v58  ;;  %v389_v7 = vld [vmem:[%s624_s6] ss:$0 sm:$0xff] }
 0x220   :  { %v182_v12 = vadd.f32 1.0, %v179_v9  ;;  %v180_v13 = vmul.f32 0.3275911, %v177_v10  ;;  %v219_v19 = vsub.f32 0.0, %v177_v10  ;;  %v221_v21 = vmul.f32 %v218_v16, %v176_v6 }
 0x221   :  { %456 = vrcp.f32 %v184_v11  ;;  %v228_v26 = vmul.f32 1.442695, %v223_v18  ;;  %v171_v18 = vmul.f32 0.5, %v586_v4 }
 0x222   :  { %458 = vrcp.f32 %v182_v12  ;;  %v183_v14 = vadd.f32 1.0, %v180_v13  ;;  %v222_v27 = vmul.f32 %v219_v19, %v177_v10  ;;  %v224_v29 = vmul.f32 1.442695, %v221_v21 }
 0x224   :  { %460 = vrcp.f32 %v183_v14  ;;  %v226_v35 = vmul.f32 1.442695, %v222_v27 }
 0x225   :  { %462 = vpow2.f32 %v228_v26 }
 0x226   :  { %464 = vpow2.f32 %v224_v29 }
 0x227   :  { %466 = vpow2.f32 %v226_v35 }
 0x22b   :  { %v457_v17 = vpop.eup %456 }
 0x22c   :  { %v459_v20 = vpop.eup %458  ;;  %v193_v22 = vmul.f32 1.0614054, %v457_v17 }
 0x22d   :  { %v191_v23 = vmul.f32 1.0614054, %v459_v20 }
 0x22e   :  { %v196_v24 = vadd.f32 -1.4531521, %v193_v22  ;;  %v461_v25 = vpop.eup %460 }
 0x22f   :  { %v194_v28 = vadd.f32 -1.4531521, %v191_v23  ;;  %v192_v30 = vmul.f32 1.0614054, %v461_v25  ;;  %v463_v51 = vpop.eup %462 }
 0x230   :  { %v199_v31 = vmul.f32 %v457_v17, %v196_v24  ;;  %v465_v53 = vpop.eup %464 }
 0x231   :  { %v197_v32 = vmul.f32 %v459_v20, %v194_v28  ;;  %v195_v33 = vadd.f32 -1.4531521, %v192_v30  ;;  %v467_v61 = vpop.eup %466 }
 0x232   :  { %v202_v34 = vadd.f32 1.4214138, %v199_v31 }
 0x233   :  { %v200_v36 = vadd.f32 1.4214138, %v197_v32  ;;  %v198_v37 = vmul.f32 %v461_v25, %v195_v33 }
 0x234   :  { %v205_v38 = vmul.f32 %v457_v17, %v202_v34 }
 0x235   :  { %v203_v39 = vmul.f32 %v459_v20, %v200_v36  ;;  %v201_v40 = vadd.f32 1.4214138, %v198_v37 }
 0x236   :  { %v208_v41 = vadd.f32 -0.28449672, %v205_v38 }
 0x237   :  { %v206_v42 = vadd.f32 -0.28449672, %v203_v39  ;;  %v204_v43 = vmul.f32 %v461_v25, %v201_v40 }
 0x238   :  { %v211_v44 = vmul.f32 %v457_v17, %v208_v41 }
 0x239   :  { %v209_v45 = vmul.f32 %v459_v20, %v206_v42  ;;  %v207_v46 = vadd.f32 -0.28449672, %v204_v43 }
 0x23a   :  { %v214_v47 = vadd.f32 0.2548296, %v211_v44 }
 0x23b   :  { %v212_v48 = vadd.f32 0.2548296, %v209_v45  ;;  %v210_v49 = vmul.f32 %v461_v25, %v207_v46 }
 0x23c   :  { %v217_v50 = vmul.f32 %v457_v17, %v214_v47  ;;  %v170_v17 = vmul.f32 0.5, %v578_v60 }
 0x23d   :  { %v215_v52 = vmul.f32 %v459_v20, %v212_v48  ;;  %v213_v54 = vadd.f32 0.2548296, %v210_v49 }
 0x23e   :  { %v232_v55 = vmul.f32 %v463_v51, %v217_v50 }
 0x23f   :  { %v230_v56 = vmul.f32 %v465_v53, %v215_v52  ;;  %v216_v57 = vmul.f32 %v461_v25, %v213_v54 }
 0x240   :  { %v235_v59 = vsub.f32 1.0, %v232_v55 }
 0x241   :  { %v233_v63 = vsub.f32 1.0, %v230_v56  ;;  %v231_v5 = vmul.f32 %v467_v61, %v216_v57 }
 0x242   :  { %v241_v6 = vsub.f32 0.0, %v235_v59 }
 0x243   :  { %v239_v8 = vsub.f32 0.0, %v233_v63  ;;  %v234_v9 = vsub.f32 1.0, %v231_v5 }
 0x244   :  { %v244_v10 = vsel %vm238_vm1, %v235_v59, %v241_v6 }
 0x245   :  { %v242_v11 = vsel %vm236_vm2, %v233_v63, %v239_v8  ;;  %v240_v12 = vsub.f32 0.0, %v234_v9  ;;  %v247_v13 = vadd.f32 1.0, %v244_v10 }
 0x246   :  { %v245_v14 = vadd.f32 1.0, %v242_v11 }
 0x247   :  { %v243_v16 = vsel %vm237_vm3, %v234_v9, %v240_v12  ;;  %v250_v62 = vmul.f32 %v247_v13, %v172_v15 }
 0x248   :  { %v246_v19 = vadd.f32 1.0, %v243_v16  ;;  %v248_v20 = vmul.f32 %v245_v14, %v170_v17 }
 0x249   :  { %v252_v22 = vpack.c.bf16 %v250_v62, %v250_v62 }
 0x24a   :  { %v249_v21 = vmul.f32 %v246_v19, %v171_v18 }
 0x24c   :  { %v251_v3 = vpack.c.bf16 %v249_v21, %v248_v20 }
 0x24e   :  { %436 = vmatprep.mubr.bf16.mxu1 %v251_v3 }
 0x24f   :  { %437 = vmatmul.mubr.bf16.vlgmr.msra.gmra.mrb[0].mxu1 %v252_v22 }
 0x322   :  { %v438_v23 = vpop.f32.mrb[0].mxu1 }
 0x323   :  { %v367_v24 = vadd.f32 %v438_v23, %v389_v7  ;;  %v358_v58 = vpop.f32.mrb[1].mxu1 }
 0x324   :  { %v359_v25 = vadd.f32 %v389_v7, %v358_v58  ;;  %v439_v26 = vpop.f32.mrb[2].mxu1 }
 0x325   :  { %v374_v60 = vadd.f32 %v367_v24, %v516_v1  ;;  %v361_v4 = vpop.f32.mrb[3].mxu1 }
 0x326   :  { %v372_v27 = vadd.f32 %v359_v25, %v511_v0  ;;  %v362_v28 = vadd.f32 %v389_v7, %v361_v4 }
 0x327   :  { %377 = vst.msk [vmem:[%s625_s7 + $0x10] sm:$0xff] %vm32_vm0, %v374_v60 }
 0x328   :  { %375 = vst.msk [vmem:[%s625_s7] sm:$0xff] %vm32_vm0, %v372_v27  ;;  %v373_v29 = vadd.f32 %v362_v28, %v521_v2 }
 0x32a   :  { %376 = vst.msk [vmem:[%s625_s7 + $0x8] sm:$0xff] %vm32_vm0, %v373_v29 }

// kernel: social_mae_forward.45
= control target key start
LH: loop header
LB: loop body
LE: loop exit
PB: predicated region body
PF: predicated region fallthrough
CT: control target
= control target key end

     0   :  { %12 = vsyncpa [#allocation3], 0  ;;  %s797_s0 = inlined_call_operand.vmem [shape: f32[2,12,32], index: 0, kind: input, shape index: {}]   ;;  %s798_s1 = inlined_call_operand.vmem [shape: f32[1,32], index: 1, kind: input, shape index: {}]   ;;  %s799_s2 = inlined_call_operand.vmem [shape: f32[1,32], index: 2, kind: input, shape index: {}]   ;;  %s800_s3 = inlined_call_operand.vmem [shape: f32[1,32], index: 3, kind: input, shape index: {}]   ;;  %s801_s4 = inlined_call_operand.vmem [shape: f32[1,32], index: 4, kind: input, shape index: {}]   ;;  %s802_s5 = inlined_call_operand.vmem [shape: bf16[32,5], index: 5, kind: input, shape index: {}]   ;;  %s803_s6 = inlined_call_operand.vmem [shape: f32[1,5], index: 6, kind: input, shape index: {}]   ;;  %s804_s7 = inlined_call_operand.hbm [shape: f32[2,1,5], index: 7, kind: output, shape index: {}]  }
   0x1   :  { %14 = vsyncpa [#allocation3 + $0x1], 0  ;;  %s667_s24 = smov 0   ;;  %s669_s25 = smov 0  }
   0x2   :  { %s671_s26 = smov 0   ;;  %s673_s27 = smov 0  }
   0x3 LB: > { %s688_s28 = sadd.s32 4294967295, %s622_s27   ;;  %s485_s29 = sadd.s32 4294967294, %s622_s27   ;;  %s622_s27 = sphi %s673_s27, %s810_s27   ;;  %s618_s26 = sphi %s671_s26, %s809_s26   ;;  %s614_s25 = sphi %s669_s25, %s808_s25   ;;  %s610_s24 = sphi %s667_s24, %s807_s24  }
   0x4   : > { %s692_s30 = sadd.s32 1, %s622_s27   ;;  %s179_s8 = sadd.s32 1, %s618_s26 }
   0x5   : > { %s176_s9 = ssub.s32 %s622_s27, %s692_s30  ;;  %p189_p0 = scmp.ne.s32.totalorder %s618_s26, %s614_s25 }
   0x6   : > { %p177_p1 = scmp.eq.s32.totalorder %s176_s9, 0  ;;  %p190_p2 = scmp.eq.s32.totalorder %s688_s28, 1 }
   0x7   : > { %p195_p3 = scmp.ne.s32.totalorder %s614_s25, %s610_s24  ;;  %p196_p4 = scmp.eq.s32.totalorder %s485_s29, 1 }
   0x8   : > { %s703_s10 = scalar_select %p177_p1, %s618_s26, %s179_s8  }
   0x9   : > { %p705_p5 = por %p190_p2, %p189_p0  ;;  %p709_p6 = por %p196_p4, %p195_p3 }
   0xa   : > { %p488_p7 = scmp.ge.s32.totalorder %s622_s27, 1  ;;  %p240_p8 = scmp.lt.s32.totalorder %s622_s27, 3 }
   0xc   : > { %p241_p9 = pnand %p488_p7, %p240_p8 }
   0xd   : > { %p271_p10 = scmp.lt.s32.totalorder (!%p241_p9), %s688_s28, 1  ;;  %vm281_vm0 = vcmask (!%p241_p9), 261120   ;;  %vm285_vm1 = vcmask (!%p241_p9), 257024   ;;  %v491_v21 = vld [vmem:[%s798_s1] ss:$0 sm:$0xff] (!%p241_p9)  ;;  %v624_v47 = vmov (!%p241_p9), 0.0  }
   0xe   : > { %244 = sbr.rel (%p241_p9) target bundleno = 903 (0x387), region = 48  ;;  %v492_v25 = vld [vmem:[%s799_s2] ss:$0 sm:$0xff] (!%p241_p9)  ;;  %503 = vmatprep.subr.bf16.mxu0 (!%p241_p9), %v624_v47  ;;  %v553_v48 = vld [vmem:[%s802_s5 + $0x8] sm:$0xff] (!%p241_p9)   ;;  %vm625_vm2 = vmmov (!%p241_p9), 0   ;;  %s269_s16 = sand.u32 (!%p241_p9), 1, %s614_s25  }
   0xf   : > { %v552_v46 = vld [vmem:[%s802_s5] sm:$0xff] (!%p241_p9)   ;;  %507 = vmatprep.mubr.msk.bf16.mxu0 (!%p241_p9), %vm625_vm2, %v624_v47  ;;  %s496_s19 = sshll.u32 (!%p241_p9), %s688_s28, 4  ;;  %s270_s20 = scalar_lea.vmem (!%p241_p9), [#allocation2], %s269_s16  ;;  %vm415_vm3 = vcmask (!%p241_p9), 32768  }
  0x10   : > { %504 = vmatpush3.bf16.msra.mxu0 (!%p241_p9), %v552_v46  ;;  %v337_v53 = vld [vmem:[%s800_s3] sm:$0x1] (!%p241_p9)  ;;  %s430_s21 = sshll.u32 (!%p241_p9), %s270_s20, 4  ;;  %s755_s29 = scalar_lea.hbm (!%p241_p9), %s804_s7, %s496_s19  ;;  %s757_s21 = int_to_ptr.vmem [resolvable:$true] %s430_s21 }
  0x11   : > { %505 = vmatprep.subr.bf16.mxu0 (!%p241_p9), %v624_v47  ;;  %v338_v55 = vld [vmem:[%s801_s4] sm:$0x1] (!%p241_p9)  ;;  %s560_s8 = scalar_lea.vmem (!%p241_p9), %s757_s21, 16  ;;  %s626_s9 = smov (!%p241_p9), [#allocation2]  }
  0x12   : > { %v359_v59 = vld [vmem:[%s803_s6] sm:$0x1] (!%p241_p9)  ;;  %p561_p11 = scmp.ne.s32.totalorder (!%p241_p9), %s757_s21, %s560_s8 }
  0x14   : > { %506 = vmatpush3.bf16.msra.mxu0 (!%p241_p9), %v553_v48  ;;  %p562_p12 = pnand (!%p241_p9), %p561_p11, %p705_p5 }
  0x15   : > { %s272_s13 = scalar_select %p271_p10, %s688_s28, 1 }
  0x16   : > { %s418_s28 = scalar_lea.sflag [#allocation3], %s269_s16  ;;  %p563_p13 = pneg %p562_p12 }
  0x17   : > { %s499_s14 = sshll.u32 %s272_s13, 4  ;;  %s564_s13 = sshll.u32 %s626_s9, 4  ;;  %s565_s13 = int_to_ptr.vmem [resolvable:$false] %s564_s13 }
  0x18   : > { %s275_s17 = scalar_lea.vmem %s797_s0, %s499_s14  ;;  %s566_s14 = scalar_lea.vmem %s565_s13, 32 }
  0x19   : > { %v277_v0 = vld [vmem:[%s275_s17] sm:$0xff]  ;;  %v278_v1 = vld [vmem:[%s275_s17 + $0x8] sm:$0xf]  ;;  %p567_p0 = scmp.lt.s32.totalorder %s757_s21, %s565_s13  ;;  %p568_p1 = scmp.lt.s32.totalorder %s566_s14, %s560_s8 }
  0x1a   : > { %v282_v2 = vsel %vm281_vm0, %v277_v0, 0.0  ;;  %v286_v3 = vsel %vm285_vm1, %v278_v1, 0.0 }
  0x1b   : > { %283 = vadd.xlane.f32.xlu0 %v282_v2  ;;  %p569_p2 = por %p568_p1, %p567_p0 }
  0x1d   : > { %p570_p3 = pnand %p569_p2, %p563_p13 }
  0x1f   : > { %287 = vadd.xlane.f32.xlu0 %v286_v3 }
  0xa8   : > { %v284_v4 = vpop.xlane.xlu0 %283 }
  0xa9   : > { %v290_v5 = vmul.f32 0.03125, %v284_v4 }
  0xab   : > { %v292_v6 = vsub.f32 %v277_v0, %v290_v5 }
  0xac   : > { %v288_v7 = vpop.xlane.xlu0 %287 }
  0xad   : > { %v291_v8 = vmul.f32 0.03125, %v288_v7  ;;  %v294_v9 = vmul.f32 %v292_v6, %v292_v6 }
  0xaf   : > { %v293_v10 = vsub.f32 %v278_v1, %v291_v8  ;;  %v296_v11 = vsel %vm281_vm0, %v294_v9, 0.0 }
  0xb0   : > { %297 = vadd.xlane.f32.xlu1 %v296_v11 }
  0xb1   : > { %v295_v12 = vmul.f32 %v293_v10, %v293_v10 }
  0xb3   : > { %v299_v13 = vsel %vm285_vm1, %v295_v12, 0.0 }
  0xb4   : > { %300 = vadd.xlane.f32.xlu1 %v299_v13 }
 0x13d   : > { %v298_v14 = vpop.xlane.xlu1 %297 }
 0x13e   : > { %v302_v15 = vmul.f32 0.03125, %v298_v14 }
 0x140   : > { %v304_v16 = vadd.f32 1e-05, %v302_v15 }
 0x141   : > { %v301_v17 = vpop.xlane.xlu1 %300 }
 0x142   : > { %554 = vrsqrt.f32 %v304_v16  ;;  %v303_v18 = vmul.f32 0.03125, %v301_v17 }
 0x144   : > { %v305_v19 = vadd.f32 1e-05, %v303_v18 }
 0x146   : > { %556 = vrsqrt.f32 %v305_v19 }
 0x14c   : > { %v555_v20 = vpop.eup %554 }
 0x14d   : > { %v308_v22 = vmul.f32 %v555_v20, %v292_v6 }
 0x14f   : > { %v316_v23 = vmul.f32 %v491_v21, %v308_v22 }
 0x150   : > { %v557_v24 = vpop.eup %556 }
 0x151   : > { %v309_v26 = vmul.f32 %v557_v24, %v293_v10  ;;  %v324_v28 = vadd.f32 %v492_v25, %v316_v23 }
 0x153   : > { %v317_v27 = vmul.f32 %v491_v21, %v309_v26  ;;  %v326_v30 = vsel %vm281_vm0, %v324_v28, 0.0 }
 0x155   : > { %v325_v29 = vadd.f32 %v492_v25, %v317_v27 }
 0x157   : > { %v327_v31 = vsel %vm285_vm1, %v325_v29, 0.0 }
 0x158   : > { %v328_v32 = vadd.f32 %v327_v31, %v326_v30 }
 0x15a   : > { %v329_v33 = vrot.slane %v328_v32, 4 }
 0x15c   : > { %v330_v34 = vadd.f32 %v329_v33, %v328_v32 }
 0x15e   : > { %v331_v35 = vrot.slane %v330_v34, 2 }
 0x160   : > { %v332_v36 = vadd.f32 %v331_v35, %v330_v34 }
 0x162   : > { %v333_v37 = vrot.slane %v332_v36, 1 }
 0x164   : > { %v334_v38 = vadd.f32 %v333_v37, %v332_v36 }
 0x166   : > { %v336_v39 = vmul.f32 0.083333336, %v334_v38 }
 0x168   : > { %v339_v40 = vsel %vm281_vm0, %v336_v39, 0.0 }
 0x169   : > { %340 = vadd.xlane.f32.xlu0 %v339_v40 }
 0x1f6   : > { %v341_v41 = vpop.xlane.xlu0 %340 }
 0x1f7   : > { %v342_v42 = vmul.f32 0.03125, %v341_v41 }
 0x1f9   : > { %v343_v43 = vsub.f32 %v336_v39, %v342_v42 }
 0x1fb   : > { %v344_v44 = vmul.f32 %v343_v43, %v343_v43 }
 0x1fd   : > { %v345_v45 = vsel %vm281_vm0, %v344_v44, 0.0 }
 0x1fe   : > { %346 = vadd.xlane.f32.xlu1 %v345_v45 }
 0x28b   : > { %v347_v49 = vpop.xlane.xlu1 %346 }
 0x28c   : > { %v348_v50 = vmul.f32 0.03125, %v347_v49 }
 0x28e   : > { %v349_v51 = vadd.f32 1e-05, %v348_v50 }
 0x290   : > { %558 = vrsqrt.f32 %v349_v51 }
 0x29a   : > { %v559_v52 = vpop.eup %558 }
 0x29b   : > { %v351_v54 = vmul.f32 %v559_v52, %v343_v43 }
 0x29d   : > { %v352_v56 = vmul.f32 %v351_v54, %v337_v53 }
 0x29f   : > { %v353_v57 = vadd.f32 %v352_v56, %v338_v55 }
 0x2a1   : > { %v354_v58 = vpack.c.bf16 %v353_v57, %v353_v57 }
 0x2a3   : > { %508 = vmatmul.mubr.msk.bf16.vlgmr.msra.gmra.mrb[0].mxu0 %vm281_vm0, %v354_v58 }
 0x376   : > { %v409_v60 = vpop.f32.mrb[0].mxu0 }
 0x377   : > { %v410_v61 = vadd.f32 %v409_v60, %v359_v59  ;;  %v509_v62 = vpop.f32.mrb[1].mxu0 }
 0x378   : > { %v412_v63 = vpop.f32.mrb[2].mxu0 }
 0x379   : > { %v510_v0 = vpop.f32.mrb[3].mxu0  ;;  %416 = vst.msk [vmem:[%s270_s20] sm:$0x1] %vm415_vm3, %v410_v61 }
 0x37a   : > { %573 = shalt.err (!%p570_p3)
}
 0x37b   : > { %s574_s15 = scalar_lea.hbm %s755_s29, 16  ;;  %s578_s18 = scalar_lea.hbm %s804_s7, 32 }
 0x37c   : > { %p575_p4 = scmp.ne.s32.totalorder %s755_s29, %s574_s15  ;;  %p579_p9 = scmp.lt.u32.totalorder %s755_s29, %s804_s7 }
 0x37d   : > { %p580_p10 = scmp.lt.u32.totalorder %s578_s18, %s574_s15  ;;  %p582_p12 = scmp.lt.u32.totalorder %s574_s15, %s755_s29 }
 0x37e   : > { %p576_p7 = pnand %p575_p4, %p705_p5 }
 0x37f   : > { %p581_p11 = por %p580_p10, %p579_p9 }
 0x380   : > { %p577_p8 = pneg %p576_p7 }
 0x381   : > { %p583_p13 = por %p582_p12, %p581_p11 }
 0x383   : > { %p584_p0 = pnand %p583_p13, %p577_p8 }
 0x385   : > { %587 = shalt.err (!%p584_p0)
}
 0x386   : > { %511 = dma.vmem_to_hbm [thread:$0]  (%p705_p5), %s757_s21, 16, %s755_s29, %s418_s28  }
 0x387 PF: > { %p517_p1 = scmp.ge.s32.totalorder %s622_s27, 2  ;;  %s442_s22 = sand.u32 1, %s610_s24  }
 0x388   : > { %s443_s23 = scalar_lea.sflag [#allocation3], %s442_s22 }
 0x389   : > { %p514_p2 = pnand %p517_p1, %p709_p6 }
 0x38b   : > { %605 = dma.done.wait (!%p514_p2), %s443_s23, 16  }
 0x38c   : > { %607 = vsyncadd (!%p514_p2), %s443_s23, 4294967280  ;;  %p17_p3 = scmp.ge.s32.totalorder %s692_s30, 4   ;;  %s807_s24 = smov %s614_s25 }
 0x38d   : > { %s808_s25 = smov %s618_s26  ;;  %s809_s26 = smov %s703_s10 }
 0x38e   : > { %s810_s27 = smov %s692_s30  ;;  %19 = sbr.rel (!%p17_p3) target bundleno = 3 (0x3), region = 83 }
 0x395   :  { %447 = vsyncpa [#allocation3], 1 }
 0x396   :  { %449 = vsyncpa [#allocation3 + $0x1], 1 }

</bundles_post_ra>
